<compile_context>
chip_gen: v6e
topology: v6e:2x2x1
jax: 0.10.0
libtpu: 0.0.40
codegen_flags: <defaults>
</compile_context>

<pallas_src>
import functools

import numpy as np

import jax
import jax.numpy as jnp
from jax import lax
from jax.experimental import pallas as pl
from jax.experimental.pallas import tpu as pltpu


def _zero_checks(num_tta: int, filter_views: float, eps: float) -> None:
    if filter_views <= 0.0 or filter_views > 1.0:
        raise ValueError(f"`filter_views` must be in ]0, 1]. Got {filter_views}.")
    if num_tta < 1 / filter_views:
        raise ValueError(f"`num_tta` should be >= 1/filter_views. Got {num_tta}.")
    if eps <= 0:
        raise ValueError(f"`eps` should be strictly positive. Got {eps}.")


def _round_up(x: int, m: int) -> int:
    return ((x + m - 1) // m) * m


def zero_kernel(x_ref, w_ref, b_ref, out_ref, *, num_tta, kept_views, eps):
    # x_ref: (V, F, TB)  -- views leading, features on sublanes, batch on lanes
    # w_ref: (C, F), b_ref: (C, 1), out_ref: (C, TB)
    V, F, TB = x_ref.shape
    C = w_ref.shape[0]

    w = w_ref[...]                      # (C, F)   hoisted out of the view loop
    b = b_ref[...]                      # (C, 1)
    # class index along the sublane axis, broadcast over the batch lanes
    c_iota = lax.broadcasted_iota(jnp.int32, (C, TB), 0).astype(jnp.float32)

    # ---- inner core model per view: Linear(F->C) (+ implicit softmax) ----
    # All per-view tensors are (C, TB) or (1, TB): batch on the 128-lane axis,
    # so there is no lane padding anywhere after the matmul.
    ent_rows, vote_rows = [], []
    for v in range(V):
        logits = jnp.dot(w, x_ref[v],
                         preferred_element_type=jnp.float32) + b     # (C, TB)
        m = jnp.max(logits, axis=0, keepdims=True)                   # (1, TB)
        z = logits - m
        ex = jnp.exp(z)
        s = jnp.sum(ex, axis=0, keepdims=True)                       # (1, TB)
        pz = jnp.sum(ex * z, axis=0, keepdims=True)                  # (1, TB)
        # Entropy via logsumexp form (probs never materialized, no 0*log0):
        #   H = -sum p log p = log(s) - (sum ex*z)/s
        inv_s = pl.reciprocal(s, approx=True)          # EUP vrcp fast path
        inv_s = inv_s * (2.0 - s * inv_s)              # 1 NR step: ranking-stable
        ent_rows.append(jnp.log(s) - pz * inv_s)                     # (1, TB)
        # argmax vote: first maximal class index (same tie rule as torch.argmax)
        vote_rows.append(jnp.min(jnp.where(logits == m, c_iota, float(C)),
                                 axis=0, keepdims=True))             # (1, TB)

    # ---- rank of each view under a stable ascending-entropy argsort ----
    # (per-row formulation: only elementwise compares/adds on (1,TB) slabs)
    rank_rows = []
    for i in range(V):
        e_i = ent_rows[i]
        r = jnp.zeros((1, TB), jnp.float32)
        for j in range(V):
            if j == i:
                continue
            if j < i:   # stable sort: earlier index wins exact ties
                r = r + (ent_rows[j] <= e_i).astype(jnp.float32)
            else:
                r = r + (ent_rows[j] < e_i).astype(jnp.float32)
        rank_rows.append(r)                                          # (1, TB)

    # ---- bincount of votes over the kept (most confident) views ----
    counts = jnp.zeros((C, TB), jnp.float32)
    for v in range(V):
        kept_v = rank_rows[v] < float(kept_views)                    # (1, TB)
        onehot_v = vote_rows[v] == c_iota                            # (C, TB)
        counts = counts + (kept_v & onehot_v).astype(jnp.float32)

    # ---- votes of the views at confidence ranks kept..num_tta-1, hoisted out
    #      of the tie-break loop (one pass instead of per-iteration work) ----
    extra = num_tta - kept_views
    vote_by_rank = []
    for i in range(extra):
        r = float(kept_views + i)
        sel = jnp.zeros((1, TB), jnp.float32)
        for v in range(V):
            sel = sel + jnp.where(rank_rows[v] == r, vote_rows[v], 0.0)
        vote_by_rank.append(sel)                                     # (1, TB)

    # ---- sequential tie-breaking, fully unrolled & predicated (equivalent to
    #      the reference early-exit while loop: once the max is unique nothing
    #      more is ever added) ----
    for i in range(extra):
        maximum = jnp.max(counts, axis=0, keepdims=True)                     # (1, TB)
        ties = jnp.sum((counts == maximum).astype(jnp.float32),
                       axis=0, keepdims=True)                                # (1, TB)
        do_add = ties > 1.0                                                  # (1, TB)
        add = (do_add & (c_iota == vote_by_rank[i])).astype(jnp.float32)     # (C, TB)
        counts = counts + add

    # lane-dense (C, TB) store: TB is a multiple of 128 -> unmasked vst
    out_ref[...] = jnp.log(counts * (1.0 / num_tta) + eps)


def zero_forward(x, w, b, *, num_tta, filter_views=0.1, eps=1e-8, tile_b=None):
    """x: (B*num_tta, F) f32, rows ordered (b v). w: (C, F). b: (C,).

    Returns (B, C) f32 = Zero.eval_forward(x) with a Linear+softmax core model.
    """
    _zero_checks(num_tta, filter_views, eps)
    # NOTE: truncation (not rounding) matches the PyTorch module exactly.
    kept_views = int(filter_views * num_tta)

    BV, F = x.shape
    assert BV % num_tta == 0, "leading dim must be batch * num_tta"
    B = BV // num_tta
    C, Fw = w.shape
    assert Fw == F

    if tile_b is None:
        # Lane-dense batch tile (multiple of 128).  Aim for >= 2 grid steps
        # when B allows so ("parallel",) can use both v7x TensorCores; cap at
        # 512 so the double-buffered x block stays <= ~2 MiB (comfortable even
        # under v5e's 16 MiB default scoped VMEM).
        tile_b = min(512, max(128, _round_up((B + 1) // 2, 128)))
    tile_b = max(128, _round_up(tile_b, 128))
    Bp = _round_up(B, tile_b)

    # (B*V, F) -> (V, F, B): views leading, features on sublanes, batch on
    # lanes.  Cheap XLA-side relayout done once outside the kernel; keeps every
    # post-matmul tensor in the kernel lane-dense (batch == lane axis).
    x_t = x.reshape(B, num_tta, F).transpose(1, 2, 0)
    if Bp != B:
        # Zero padding: padded images produce finite garbage that is sliced off.
        x_t = jnp.pad(x_t, ((0, 0), (0, 0), (0, Bp - B)))

    b2 = b.reshape(C, 1)

    kernel = functools.partial(zero_kernel, num_tta=num_tta,
                               kept_views=kept_views, eps=eps)

    out = pl.pallas_call(
        kernel,
        out_shape=jax.ShapeDtypeStruct((C, Bp), jnp.float32),
        grid_spec=pltpu.PrefetchScalarGridSpec(
            num_scalar_prefetch=0,
            grid=(Bp // tile_b,),
            in_specs=[
                pl.BlockSpec((num_tta, F, tile_b), lambda i: (0, 0, i)),
                pl.BlockSpec((C, F), lambda i: (0, 0)),
                pl.BlockSpec((C, 1), lambda i: (0, 0)),
            ],
            out_specs=pl.BlockSpec((C, tile_b), lambda i: (0, i)),
        ),
        compiler_params=pltpu.CompilerParams(
            dimension_semantics=("parallel",)),   # lets v7x shard batch on 2 TCs
    )(x_t, w, b2)

    # tiny (C, B) -> (B, C) transpose in plain XLA
    return out[:, :B].T


def reference(x, w, b, num_tta, kept_views, eps):
    """Pure numpy (f64) re-implementation of Zero.eval_forward for validation."""
    x64 = np.asarray(x, np.float64)
    w64 = np.asarray(w, np.float64)
    b64 = np.asarray(b, np.float64)
    logits = x64 @ w64.T + b64
    logits = logits - logits.max(axis=-1, keepdims=True)
    ex = np.exp(logits)
    probs = ex / ex.sum(axis=-1, keepdims=True)
    C = probs.shape[-1]
    B = probs.shape[0] // num_tta
    probs = probs.reshape(B, num_tta, C)
    ent = -np.sum(probs * np.log(probs), axis=-1)
    conf_idx = np.argsort(ent, axis=-1, kind="stable")
    votes = np.argmax(probs, axis=-1)
    preds = np.zeros((B, C), dtype=np.float64)
    for img in range(B):
        preds[img] += np.bincount(votes[img, conf_idx[img, :kept_views]],
                                  minlength=C)
        maximum = preds[img].max()
        i = 0
        while kept_views + i < num_tta and (preds[img] == maximum).sum() > 1:
            preds[img, votes[img, conf_idx[img, kept_views + i]]] += 1
            maximum = preds[img].max()
            i += 1
    preds /= num_tta
    return np.log(preds + eps)


if __name__ == "__main__":
    num_tta = 16
    filter_views = 0.25
    eps = 1e-8
    kept_views = int(filter_views * num_tta)

    # 150 images x 16 TTA views: default tile_b -> 128, Bp=256 -> grid=(2,),
    # exercising the tiled path, batch padding and the lane-dense out spec.
    B, F, C = 150, 32, 10

    key = jax.random.PRNGKey(0)
    kx, kw, kb = jax.random.split(key, 3)
    x = jax.random.normal(kx, (B * num_tta, F), dtype=jnp.float32)
    w = jax.random.normal(kw, (C, F), dtype=jnp.float32) * 0.3
    b = jax.random.normal(kb, (C,), dtype=jnp.float32) * 0.1

    out = zero_forward(x, w, b, num_tta=num_tta, filter_views=filter_views,
                       eps=eps)
    out = jax.block_until_ready(out)

    ref = reference(x, w, b, num_tta, kept_views, eps)
    assert out.shape == (B, C)
    np.testing.assert_allclose(np.asarray(out), ref, rtol=1e-4, atol=1e-4)
    print("KERNEL_OK")
</pallas_src>

<mosaic_0001>
module attributes {stable_mosaic.version = 11 : i64} {
  func.func @zero_kernel(%arg0: i32, %arg1: memref<16x32x128xf32, #tpu.memory_space<vmem>>, %arg2: memref<10x32xf32, #tpu.memory_space<vmem>>, %arg3: memref<10x1xf32, #tpu.memory_space<vmem>>, %arg4: memref<10x128xf32, #tpu.memory_space<vmem>>) attributes {dimension_semantics = [#tpu.dimension_semantics<parallel>], iteration_bounds = array<i64: 2>, scalar_prefetch = 0 : i64, scratch_operands = 0 : i64, tpu.core_type = #tpu.core_type<tc>, window_params = [{transform_indices = @transform_0, window_bounds = array<i64: 16, 32, 128>}, {pipeline_mode = #tpu.pipeline_mode<synchronous>, transform_indices = @transform_1, window_bounds = array<i64: 10, 32>}, {pipeline_mode = #tpu.pipeline_mode<synchronous>, transform_indices = @transform_2, window_bounds = array<i64: 10, 1>}, {transform_indices = @transform_3, window_bounds = array<i64: 10, 128>}]} {
    %c0 = arith.constant 0 : index
    %c0_0 = arith.constant 0 : index
    %0 = vector.load %arg2[%c0, %c0_0] : memref<10x32xf32, #tpu.memory_space<vmem>>, vector<10x32xf32>
    %c0_1 = arith.constant 0 : index
    %c0_2 = arith.constant 0 : index
    %1 = vector.load %arg3[%c0_1, %c0_2] : memref<10x1xf32, #tpu.memory_space<vmem>>, vector<10x1xf32>
    %2 = tpu.iota {dimensions = array<i32: 0>} : vector<10x128xi32>
    %3 = arith.sitofp %2 : vector<10x128xi32> to vector<10x128xf32>
    %c0_3 = arith.constant 0 : index
    %c0_4 = arith.constant 0 : index
    %c0_5 = arith.constant 0 : index
    %4 = vector.load %arg1[%c0_3, %c0_4, %c0_5] : memref<16x32x128xf32, #tpu.memory_space<vmem>>, vector<1x32x128xf32>
    %5 = vector.shape_cast %4 : vector<1x32x128xf32> to vector<32x128xf32>
    %cst = arith.constant dense<0.000000e+00> : vector<10x128xf32>
    %6 = tpu.matmul %0, %5, %cst {dimension_numbers = #tpu.dot_dimension_numbers<[1], [0], [0], [1], [0, 0, 1, 1], [], []>} : vector<10x32xf32>, vector<32x128xf32>, vector<10x128xf32> -> vector<10x128xf32>
    %7 = vector.broadcast %1 : vector<10x1xf32> to vector<10x128xf32>
    %8 = arith.addf %6, %7 : vector<10x128xf32>
    %cst_6 = arith.constant dense<0xFF800000> : vector<128xf32>
    %9 = vector.multi_reduction <maximumf>, %8, %cst_6 [0] : vector<10x128xf32> to vector<128xf32>
    %10 = vector.shape_cast %9 : vector<128xf32> to vector<1x128xf32>
    %11 = vector.broadcast %10 : vector<1x128xf32> to vector<10x128xf32>
    %12 = arith.subf %8, %11 : vector<10x128xf32>
    %13 = math.exp %12 : vector<10x128xf32>
    %cst_7 = arith.constant dense<0.000000e+00> : vector<128xf32>
    %14 = vector.multi_reduction <add>, %13, %cst_7 [0] : vector<10x128xf32> to vector<128xf32>
    %15 = vector.shape_cast %14 : vector<128xf32> to vector<1x128xf32>
    %16 = arith.mulf %13, %12 : vector<10x128xf32>
    %cst_8 = arith.constant dense<0.000000e+00> : vector<128xf32>
    %17 = vector.multi_reduction <add>, %16, %cst_8 [0] : vector<10x128xf32> to vector<128xf32>
    %18 = vector.shape_cast %17 : vector<128xf32> to vector<1x128xf32>
    %19 = tpu.reciprocal %15 {approx = true} : vector<1x128xf32> -> vector<1x128xf32>
    %20 = arith.mulf %15, %19 : vector<1x128xf32>
    %cst_9 = arith.constant 2.000000e+00 : f32
    %21 = vector.broadcast %cst_9 : f32 to vector<1x128xf32>
    %22 = arith.subf %21, %20 : vector<1x128xf32>
    %23 = arith.mulf %19, %22 : vector<1x128xf32>
    %24 = math.log %15 : vector<1x128xf32>
    %25 = arith.mulf %18, %23 : vector<1x128xf32>
    %26 = arith.subf %24, %25 : vector<1x128xf32>
    %27 = vector.broadcast %10 : vector<1x128xf32> to vector<10x128xf32>
    %28 = arith.cmpf oeq, %8, %27 : vector<10x128xf32>
    %cst_10 = arith.constant 1.000000e+01 : f32
    %29 = vector.broadcast %cst_10 : f32 to vector<10x128xf32>
    %30 = arith.select %28, %3, %29 : vector<10x128xi1>, vector<10x128xf32>
    %cst_11 = arith.constant dense<0x7F800000> : vector<128xf32>
    %31 = vector.multi_reduction <minimumf>, %30, %cst_11 [0] : vector<10x128xf32> to vector<128xf32>
    %32 = vector.shape_cast %31 : vector<128xf32> to vector<1x128xf32>
    %c1 = arith.constant 1 : index
    %c0_12 = arith.constant 0 : index
    %c0_13 = arith.constant 0 : index
    %33 = vector.load %arg1[%c1, %c0_12, %c0_13] : memref<16x32x128xf32, #tpu.memory_space<vmem>>, vector<1x32x128xf32>
    %34 = vector.shape_cast %33 : vector<1x32x128xf32> to vector<32x128xf32>
    %cst_14 = arith.constant dense<0.000000e+00> : vector<10x128xf32>
    %35 = tpu.matmul %0, %34, %cst_14 {dimension_numbers = #tpu.dot_dimension_numbers<[1], [0], [0], [1], [0, 0, 1, 1], [], []>} : vector<10x32xf32>, vector<32x128xf32>, vector<10x128xf32> -> vector<10x128xf32>
    %36 = vector.broadcast %1 : vector<10x1xf32> to vector<10x128xf32>
    %37 = arith.addf %35, %36 : vector<10x128xf32>
    %cst_15 = arith.constant dense<0xFF800000> : vector<128xf32>
    %38 = vector.multi_reduction <maximumf>, %37, %cst_15 [0] : vector<10x128xf32> to vector<128xf32>
    %39 = vector.shape_cast %38 : vector<128xf32> to vector<1x128xf32>
    %40 = vector.broadcast %39 : vector<1x128xf32> to vector<10x128xf32>
    %41 = arith.subf %37, %40 : vector<10x128xf32>
    %42 = math.exp %41 : vector<10x128xf32>
    %cst_16 = arith.constant dense<0.000000e+00> : vector<128xf32>
    %43 = vector.multi_reduction <add>, %42, %cst_16 [0] : vector<10x128xf32> to vector<128xf32>
    %44 = vector.shape_cast %43 : vector<128xf32> to vector<1x128xf32>
    %45 = arith.mulf %42, %41 : vector<10x128xf32>
    %cst_17 = arith.constant dense<0.000000e+00> : vector<128xf32>
    %46 = vector.multi_reduction <add>, %45, %cst_17 [0] : vector<10x128xf32> to vector<128xf32>
    %47 = vector.shape_cast %46 : vector<128xf32> to vector<1x128xf32>
    %48 = tpu.reciprocal %44 {approx = true} : vector<1x128xf32> -> vector<1x128xf32>
    %49 = arith.mulf %44, %48 : vector<1x128xf32>
    %cst_18 = arith.constant 2.000000e+00 : f32
    %50 = vector.broadcast %cst_18 : f32 to vector<1x128xf32>
    %51 = arith.subf %50, %49 : vector<1x128xf32>
    %52 = arith.mulf %48, %51 : vector<1x128xf32>
    %53 = math.log %44 : vector<1x128xf32>
    %54 = arith.mulf %47, %52 : vector<1x128xf32>
    %55 = arith.subf %53, %54 : vector<1x128xf32>
    %56 = vector.broadcast %39 : vector<1x128xf32> to vector<10x128xf32>
    %57 = arith.cmpf oeq, %37, %56 : vector<10x128xf32>
    %cst_19 = arith.constant 1.000000e+01 : f32
    %58 = vector.broadcast %cst_19 : f32 to vector<10x128xf32>
    %59 = arith.select %57, %3, %58 : vector<10x128xi1>, vector<10x128xf32>
    %cst_20 = arith.constant dense<0x7F800000> : vector<128xf32>
    %60 = vector.multi_reduction <minimumf>, %59, %cst_20 [0] : vector<10x128xf32> to vector<128xf32>
    %61 = vector.shape_cast %60 : vector<128xf32> to vector<1x128xf32>
    %c2 = arith.constant 2 : index
    %c0_21 = arith.constant 0 : index
    %c0_22 = arith.constant 0 : index
    %62 = vector.load %arg1[%c2, %c0_21, %c0_22] : memref<16x32x128xf32, #tpu.memory_space<vmem>>, vector<1x32x128xf32>
    %63 = vector.shape_cast %62 : vector<1x32x128xf32> to vector<32x128xf32>
    %cst_23 = arith.constant dense<0.000000e+00> : vector<10x128xf32>
    %64 = tpu.matmul %0, %63, %cst_23 {dimension_numbers = #tpu.dot_dimension_numbers<[1], [0], [0], [1], [0, 0, 1, 1], [], []>} : vector<10x32xf32>, vector<32x128xf32>, vector<10x128xf32> -> vector<10x128xf32>
    %65 = vector.broadcast %1 : vector<10x1xf32> to vector<10x128xf32>
    %66 = arith.addf %64, %65 : vector<10x128xf32>
    %cst_24 = arith.constant dense<0xFF800000> : vector<128xf32>
    %67 = vector.multi_reduction <maximumf>, %66, %cst_24 [0] : vector<10x128xf32> to vector<128xf32>
    %68 = vector.shape_cast %67 : vector<128xf32> to vector<1x128xf32>
    %69 = vector.broadcast %68 : vector<1x128xf32> to vector<10x128xf32>
    %70 = arith.subf %66, %69 : vector<10x128xf32>
    %71 = math.exp %70 : vector<10x128xf32>
    %cst_25 = arith.constant dense<0.000000e+00> : vector<128xf32>
    %72 = vector.multi_reduction <add>, %71, %cst_25 [0] : vector<10x128xf32> to vector<128xf32>
    %73 = vector.shape_cast %72 : vector<128xf32> to vector<1x128xf32>
    %74 = arith.mulf %71, %70 : vector<10x128xf32>
    %cst_26 = arith.constant dense<0.000000e+00> : vector<128xf32>
    %75 = vector.multi_reduction <add>, %74, %cst_26 [0] : vector<10x128xf32> to vector<128xf32>
    %76 = vector.shape_cast %75 : vector<128xf32> to vector<1x128xf32>
    %77 = tpu.reciprocal %73 {approx = true} : vector<1x128xf32> -> vector<1x128xf32>
    %78 = arith.mulf %73, %77 : vector<1x128xf32>
    %cst_27 = arith.constant 2.000000e+00 : f32
    %79 = vector.broadcast %cst_27 : f32 to vector<1x128xf32>
    %80 = arith.subf %79, %78 : vector<1x128xf32>
    %81 = arith.mulf %77, %80 : vector<1x128xf32>
    %82 = math.log %73 : vector<1x128xf32>
    %83 = arith.mulf %76, %81 : vector<1x128xf32>
    %84 = arith.subf %82, %83 : vector<1x128xf32>
    %85 = vector.broadcast %68 : vector<1x128xf32> to vector<10x128xf32>
    %86 = arith.cmpf oeq, %66, %85 : vector<10x128xf32>
    %cst_28 = arith.constant 1.000000e+01 : f32
    %87 = vector.broadcast %cst_28 : f32 to vector<10x128xf32>
    %88 = arith.select %86, %3, %87 : vector<10x128xi1>, vector<10x128xf32>
    %cst_29 = arith.constant dense<0x7F800000> : vector<128xf32>
    %89 = vector.multi_reduction <minimumf>, %88, %cst_29 [0] : vector<10x128xf32> to vector<128xf32>
    %90 = vector.shape_cast %89 : vector<128xf32> to vector<1x128xf32>
    %c3 = arith.constant 3 : index
    %c0_30 = arith.constant 0 : index
    %c0_31 = arith.constant 0 : index
    %91 = vector.load %arg1[%c3, %c0_30, %c0_31] : memref<16x32x128xf32, #tpu.memory_space<vmem>>, vector<1x32x128xf32>
    %92 = vector.shape_cast %91 : vector<1x32x128xf32> to vector<32x128xf32>
    %cst_32 = arith.constant dense<0.000000e+00> : vector<10x128xf32>
    %93 = tpu.matmul %0, %92, %cst_32 {dimension_numbers = #tpu.dot_dimension_numbers<[1], [0], [0], [1], [0, 0, 1, 1], [], []>} : vector<10x32xf32>, vector<32x128xf32>, vector<10x128xf32> -> vector<10x128xf32>
    %94 = vector.broadcast %1 : vector<10x1xf32> to vector<10x128xf32>
    %95 = arith.addf %93, %94 : vector<10x128xf32>
    %cst_33 = arith.constant dense<0xFF800000> : vector<128xf32>
    %96 = vector.multi_reduction <maximumf>, %95, %cst_33 [0] : vector<10x128xf32> to vector<128xf32>
    %97 = vector.shape_cast %96 : vector<128xf32> to vector<1x128xf32>
    %98 = vector.broadcast %97 : vector<1x128xf32> to vector<10x128xf32>
    %99 = arith.subf %95, %98 : vector<10x128xf32>
    %100 = math.exp %99 : vector<10x128xf32>
    %cst_34 = arith.constant dense<0.000000e+00> : vector<128xf32>
    %101 = vector.multi_reduction <add>, %100, %cst_34 [0] : vector<10x128xf32> to vector<128xf32>
    %102 = vector.shape_cast %101 : vector<128xf32> to vector<1x128xf32>
    %103 = arith.mulf %100, %99 : vector<10x128xf32>
    %cst_35 = arith.constant dense<0.000000e+00> : vector<128xf32>
    %104 = vector.multi_reduction <add>, %103, %cst_35 [0] : vector<10x128xf32> to vector<128xf32>
    %105 = vector.shape_cast %104 : vector<128xf32> to vector<1x128xf32>
    %106 = tpu.reciprocal %102 {approx = true} : vector<1x128xf32> -> vector<1x128xf32>
    %107 = arith.mulf %102, %106 : vector<1x128xf32>
    %cst_36 = arith.constant 2.000000e+00 : f32
    %108 = vector.broadcast %cst_36 : f32 to vector<1x128xf32>
    %109 = arith.subf %108, %107 : vector<1x128xf32>
    %110 = arith.mulf %106, %109 : vector<1x128xf32>
    %111 = math.log %102 : vector<1x128xf32>
    %112 = arith.mulf %105, %110 : vector<1x128xf32>
    %113 = arith.subf %111, %112 : vector<1x128xf32>
    %114 = vector.broadcast %97 : vector<1x128xf32> to vector<10x128xf32>
    %115 = arith.cmpf oeq, %95, %114 : vector<10x128xf32>
    %cst_37 = arith.constant 1.000000e+01 : f32
    %116 = vector.broadcast %cst_37 : f32 to vector<10x128xf32>
    %117 = arith.select %115, %3, %116 : vector<10x128xi1>, vector<10x128xf32>
    %cst_38 = arith.constant dense<0x7F800000> : vector<128xf32>
    %118 = vector.multi_reduction <minimumf>, %117, %cst_38 [0] : vector<10x128xf32> to vector<128xf32>
    %119 = vector.shape_cast %118 : vector<128xf32> to vector<1x128xf32>
    %c4 = arith.constant 4 : index
    %c0_39 = arith.constant 0 : index
    %c0_40 = arith.constant 0 : index
    %120 = vector.load %arg1[%c4, %c0_39, %c0_40] : memref<16x32x128xf32, #tpu.memory_space<vmem>>, vector<1x32x128xf32>
    %121 = vector.shape_cast %120 : vector<1x32x128xf32> to vector<32x128xf32>
    %cst_41 = arith.constant dense<0.000000e+00> : vector<10x128xf32>
    %122 = tpu.matmul %0, %121, %cst_41 {dimension_numbers = #tpu.dot_dimension_numbers<[1], [0], [0], [1], [0, 0, 1, 1], [], []>} : vector<10x32xf32>, vector<32x128xf32>, vector<10x128xf32> -> vector<10x128xf32>
    %123 = vector.broadcast %1 : vector<10x1xf32> to vector<10x128xf32>
    %124 = arith.addf %122, %123 : vector<10x128xf32>
    %cst_42 = arith.constant dense<0xFF800000> : vector<128xf32>
    %125 = vector.multi_reduction <maximumf>, %124, %cst_42 [0] : vector<10x128xf32> to vector<128xf32>
    %126 = vector.shape_cast %125 : vector<128xf32> to vector<1x128xf32>
    %127 = vector.broadcast %126 : vector<1x128xf32> to vector<10x128xf32>
    %128 = arith.subf %124, %127 : vector<10x128xf32>
    %129 = math.exp %128 : vector<10x128xf32>
    %cst_43 = arith.constant dense<0.000000e+00> : vector<128xf32>
    %130 = vector.multi_reduction <add>, %129, %cst_43 [0] : vector<10x128xf32> to vector<128xf32>
    %131 = vector.shape_cast %130 : vector<128xf32> to vector<1x128xf32>
    %132 = arith.mulf %129, %128 : vector<10x128xf32>
    %cst_44 = arith.constant dense<0.000000e+00> : vector<128xf32>
    %133 = vector.multi_reduction <add>, %132, %cst_44 [0] : vector<10x128xf32> to vector<128xf32>
    %134 = vector.shape_cast %133 : vector<128xf32> to vector<1x128xf32>
    %135 = tpu.reciprocal %131 {approx = true} : vector<1x128xf32> -> vector<1x128xf32>
    %136 = arith.mulf %131, %135 : vector<1x128xf32>
    %cst_45 = arith.constant 2.000000e+00 : f32
    %137 = vector.broadcast %cst_45 : f32 to vector<1x128xf32>
    %138 = arith.subf %137, %136 : vector<1x128xf32>
    %139 = arith.mulf %135, %138 : vector<1x128xf32>
    %140 = math.log %131 : vector<1x128xf32>
    %141 = arith.mulf %134, %139 : vector<1x128xf32>
    %142 = arith.subf %140, %141 : vector<1x128xf32>
    %143 = vector.broadcast %126 : vector<1x128xf32> to vector<10x128xf32>
    %144 = arith.cmpf oeq, %124, %143 : vector<10x128xf32>
    %cst_46 = arith.constant 1.000000e+01 : f32
    %145 = vector.broadcast %cst_46 : f32 to vector<10x128xf32>
    %146 = arith.select %144, %3, %145 : vector<10x128xi1>, vector<10x128xf32>
    %cst_47 = arith.constant dense<0x7F800000> : vector<128xf32>
    %147 = vector.multi_reduction <minimumf>, %146, %cst_47 [0] : vector<10x128xf32> to vector<128xf32>
    %148 = vector.shape_cast %147 : vector<128xf32> to vector<1x128xf32>
    %c5 = arith.constant 5 : index
    %c0_48 = arith.constant 0 : index
    %c0_49 = arith.constant 0 : index
    %149 = vector.load %arg1[%c5, %c0_48, %c0_49] : memref<16x32x128xf32, #tpu.memory_space<vmem>>, vector<1x32x128xf32>
    %150 = vector.shape_cast %149 : vector<1x32x128xf32> to vector<32x128xf32>
    %cst_50 = arith.constant dense<0.000000e+00> : vector<10x128xf32>
    %151 = tpu.matmul %0, %150, %cst_50 {dimension_numbers = #tpu.dot_dimension_numbers<[1], [0], [0], [1], [0, 0, 1, 1], [], []>} : vector<10x32xf32>, vector<32x128xf32>, vector<10x128xf32> -> vector<10x128xf32>
    %152 = vector.broadcast %1 : vector<10x1xf32> to vector<10x128xf32>
    %153 = arith.addf %151, %152 : vector<10x128xf32>
    %cst_51 = arith.constant dense<0xFF800000> : vector<128xf32>
    %154 = vector.multi_reduction <maximumf>, %153, %cst_51 [0] : vector<10x128xf32> to vector<128xf32>
    %155 = vector.shape_cast %154 : vector<128xf32> to vector<1x128xf32>
    %156 = vector.broadcast %155 : vector<1x128xf32> to vector<10x128xf32>
    %157 = arith.subf %153, %156 : vector<10x128xf32>
    %158 = math.exp %157 : vector<10x128xf32>
    %cst_52 = arith.constant dense<0.000000e+00> : vector<128xf32>
    %159 = vector.multi_reduction <add>, %158, %cst_52 [0] : vector<10x128xf32> to vector<128xf32>
    %160 = vector.shape_cast %159 : vector<128xf32> to vector<1x128xf32>
    %161 = arith.mulf %158, %157 : vector<10x128xf32>
    %cst_53 = arith.constant dense<0.000000e+00> : vector<128xf32>
    %162 = vector.multi_reduction <add>, %161, %cst_53 [0] : vector<10x128xf32> to vector<128xf32>
    %163 = vector.shape_cast %162 : vector<128xf32> to vector<1x128xf32>
    %164 = tpu.reciprocal %160 {approx = true} : vector<1x128xf32> -> vector<1x128xf32>
    %165 = arith.mulf %160, %164 : vector<1x128xf32>
    %cst_54 = arith.constant 2.000000e+00 : f32
    %166 = vector.broadcast %cst_54 : f32 to vector<1x128xf32>
    %167 = arith.subf %166, %165 : vector<1x128xf32>
    %168 = arith.mulf %164, %167 : vector<1x128xf32>
    %169 = math.log %160 : vector<1x128xf32>
    %170 = arith.mulf %163, %168 : vector<1x128xf32>
    %171 = arith.subf %169, %170 : vector<1x128xf32>
    %172 = vector.broadcast %155 : vector<1x128xf32> to vector<10x128xf32>
    %173 = arith.cmpf oeq, %153, %172 : vector<10x128xf32>
    %cst_55 = arith.constant 1.000000e+01 : f32
    %174 = vector.broadcast %cst_55 : f32 to vector<10x128xf32>
    %175 = arith.select %173, %3, %174 : vector<10x128xi1>, vector<10x128xf32>
    %cst_56 = arith.constant dense<0x7F800000> : vector<128xf32>
    %176 = vector.multi_reduction <minimumf>, %175, %cst_56 [0] : vector<10x128xf32> to vector<128xf32>
    %177 = vector.shape_cast %176 : vector<128xf32> to vector<1x128xf32>
    %c6 = arith.constant 6 : index
    %c0_57 = arith.constant 0 : index
    %c0_58 = arith.constant 0 : index
    %178 = vector.load %arg1[%c6, %c0_57, %c0_58] : memref<16x32x128xf32, #tpu.memory_space<vmem>>, vector<1x32x128xf32>
    %179 = vector.shape_cast %178 : vector<1x32x128xf32> to vector<32x128xf32>
    %cst_59 = arith.constant dense<0.000000e+00> : vector<10x128xf32>
    %180 = tpu.matmul %0, %179, %cst_59 {dimension_numbers = #tpu.dot_dimension_numbers<[1], [0], [0], [1], [0, 0, 1, 1], [], []>} : vector<10x32xf32>, vector<32x128xf32>, vector<10x128xf32> -> vector<10x128xf32>
    %181 = vector.broadcast %1 : vector<10x1xf32> to vector<10x128xf32>
    %182 = arith.addf %180, %181 : vector<10x128xf32>
    %cst_60 = arith.constant dense<0xFF800000> : vector<128xf32>
    %183 = vector.multi_reduction <maximumf>, %182, %cst_60 [0] : vector<10x128xf32> to vector<128xf32>
    %184 = vector.shape_cast %183 : vector<128xf32> to vector<1x128xf32>
    %185 = vector.broadcast %184 : vector<1x128xf32> to vector<10x128xf32>
    %186 = arith.subf %182, %185 : vector<10x128xf32>
    %187 = math.exp %186 : vector<10x128xf32>
    %cst_61 = arith.constant dense<0.000000e+00> : vector<128xf32>
    %188 = vector.multi_reduction <add>, %187, %cst_61 [0] : vector<10x128xf32> to vector<128xf32>
    %189 = vector.shape_cast %188 : vector<128xf32> to vector<1x128xf32>
    %190 = arith.mulf %187, %186 : vector<10x128xf32>
    %cst_62 = arith.constant dense<0.000000e+00> : vector<128xf32>
    %191 = vector.multi_reduction <add>, %190, %cst_62 [0] : vector<10x128xf32> to vector<128xf32>
    %192 = vector.shape_cast %191 : vector<128xf32> to vector<1x128xf32>
    %193 = tpu.reciprocal %189 {approx = true} : vector<1x128xf32> -> vector<1x128xf32>
    %194 = arith.mulf %189, %193 : vector<1x128xf32>
    %cst_63 = arith.constant 2.000000e+00 : f32
    %195 = vector.broadcast %cst_63 : f32 to vector<1x128xf32>
    %196 = arith.subf %195, %194 : vector<1x128xf32>
    %197 = arith.mulf %193, %196 : vector<1x128xf32>
    %198 = math.log %189 : vector<1x128xf32>
    %199 = arith.mulf %192, %197 : vector<1x128xf32>
    %200 = arith.subf %198, %199 : vector<1x128xf32>
    %201 = vector.broadcast %184 : vector<1x128xf32> to vector<10x128xf32>
    %202 = arith.cmpf oeq, %182, %201 : vector<10x128xf32>
    %cst_64 = arith.constant 1.000000e+01 : f32
    %203 = vector.broadcast %cst_64 : f32 to vector<10x128xf32>
    %204 = arith.select %202, %3, %203 : vector<10x128xi1>, vector<10x128xf32>
    %cst_65 = arith.constant dense<0x7F800000> : vector<128xf32>
    %205 = vector.multi_reduction <minimumf>, %204, %cst_65 [0] : vector<10x128xf32> to vector<128xf32>
    %206 = vector.shape_cast %205 : vector<128xf32> to vector<1x128xf32>
    %c7 = arith.constant 7 : index
    %c0_66 = arith.constant 0 : index
    %c0_67 = arith.constant 0 : index
    %207 = vector.load %arg1[%c7, %c0_66, %c0_67] : memref<16x32x128xf32, #tpu.memory_space<vmem>>, vector<1x32x128xf32>
    %208 = vector.shape_cast %207 : vector<1x32x128xf32> to vector<32x128xf32>
    %cst_68 = arith.constant dense<0.000000e+00> : vector<10x128xf32>
    %209 = tpu.matmul %0, %208, %cst_68 {dimension_numbers = #tpu.dot_dimension_numbers<[1], [0], [0], [1], [0, 0, 1, 1], [], []>} : vector<10x32xf32>, vector<32x128xf32>, vector<10x128xf32> -> vector<10x128xf32>
    %210 = vector.broadcast %1 : vector<10x1xf32> to vector<10x128xf32>
    %211 = arith.addf %209, %210 : vector<10x128xf32>
    %cst_69 = arith.constant dense<0xFF800000> : vector<128xf32>
    %212 = vector.multi_reduction <maximumf>, %211, %cst_69 [0] : vector<10x128xf32> to vector<128xf32>
    %213 = vector.shape_cast %212 : vector<128xf32> to vector<1x128xf32>
    %214 = vector.broadcast %213 : vector<1x128xf32> to vector<10x128xf32>
    %215 = arith.subf %211, %214 : vector<10x128xf32>
    %216 = math.exp %215 : vector<10x128xf32>
    %cst_70 = arith.constant dense<0.000000e+00> : vector<128xf32>
    %217 = vector.multi_reduction <add>, %216, %cst_70 [0] : vector<10x128xf32> to vector<128xf32>
    %218 = vector.shape_cast %217 : vector<128xf32> to vector<1x128xf32>
    %219 = arith.mulf %216, %215 : vector<10x128xf32>
    %cst_71 = arith.constant dense<0.000000e+00> : vector<128xf32>
    %220 = vector.multi_reduction <add>, %219, %cst_71 [0] : vector<10x128xf32> to vector<128xf32>
    %221 = vector.shape_cast %220 : vector<128xf32> to vector<1x128xf32>
    %222 = tpu.reciprocal %218 {approx = true} : vector<1x128xf32> -> vector<1x128xf32>
    %223 = arith.mulf %218, %222 : vector<1x128xf32>
    %cst_72 = arith.constant 2.000000e+00 : f32
    %224 = vector.broadcast %cst_72 : f32 to vector<1x128xf32>
    %225 = arith.subf %224, %223 : vector<1x128xf32>
    %226 = arith.mulf %222, %225 : vector<1x128xf32>
    %227 = math.log %218 : vector<1x128xf32>
    %228 = arith.mulf %221, %226 : vector<1x128xf32>
    %229 = arith.subf %227, %228 : vector<1x128xf32>
    %230 = vector.broadcast %213 : vector<1x128xf32> to vector<10x128xf32>
    %231 = arith.cmpf oeq, %211, %230 : vector<10x128xf32>
    %cst_73 = arith.constant 1.000000e+01 : f32
    %232 = vector.broadcast %cst_73 : f32 to vector<10x128xf32>
    %233 = arith.select %231, %3, %232 : vector<10x128xi1>, vector<10x128xf32>
    %cst_74 = arith.constant dense<0x7F800000> : vector<128xf32>
    %234 = vector.multi_reduction <minimumf>, %233, %cst_74 [0] : vector<10x128xf32> to vector<128xf32>
    %235 = vector.shape_cast %234 : vector<128xf32> to vector<1x128xf32>
    %c8 = arith.constant 8 : index
    %c0_75 = arith.constant 0 : index
    %c0_76 = arith.constant 0 : index
    %236 = vector.load %arg1[%c8, %c0_75, %c0_76] : memref<16x32x128xf32, #tpu.memory_space<vmem>>, vector<1x32x128xf32>
    %237 = vector.shape_cast %236 : vector<1x32x128xf32> to vector<32x128xf32>
    %cst_77 = arith.constant dense<0.000000e+00> : vector<10x128xf32>
    %238 = tpu.matmul %0, %237, %cst_77 {dimension_numbers = #tpu.dot_dimension_numbers<[1], [0], [0], [1], [0, 0, 1, 1], [], []>} : vector<10x32xf32>, vector<32x128xf32>, vector<10x128xf32> -> vector<10x128xf32>
    %239 = vector.broadcast %1 : vector<10x1xf32> to vector<10x128xf32>
    %240 = arith.addf %238, %239 : vector<10x128xf32>
    %cst_78 = arith.constant dense<0xFF800000> : vector<128xf32>
    %241 = vector.multi_reduction <maximumf>, %240, %cst_78 [0] : vector<10x128xf32> to vector<128xf32>
    %242 = vector.shape_cast %241 : vector<128xf32> to vector<1x128xf32>
    %243 = vector.broadcast %242 : vector<1x128xf32> to vector<10x128xf32>
    %244 = arith.subf %240, %243 : vector<10x128xf32>
    %245 = math.exp %244 : vector<10x128xf32>
    %cst_79 = arith.constant dense<0.000000e+00> : vector<128xf32>
    %246 = vector.multi_reduction <add>, %245, %cst_79 [0] : vector<10x128xf32> to vector<128xf32>
    %247 = vector.shape_cast %246 : vector<128xf32> to vector<1x128xf32>
    %248 = arith.mulf %245, %244 : vector<10x128xf32>
    %cst_80 = arith.constant dense<0.000000e+00> : vector<128xf32>
    %249 = vector.multi_reduction <add>, %248, %cst_80 [0] : vector<10x128xf32> to vector<128xf32>
    %250 = vector.shape_cast %249 : vector<128xf32> to vector<1x128xf32>
    %251 = tpu.reciprocal %247 {approx = true} : vector<1x128xf32> -> vector<1x128xf32>
    %252 = arith.mulf %247, %251 : vector<1x128xf32>
    %cst_81 = arith.constant 2.000000e+00 : f32
    %253 = vector.broadcast %cst_81 : f32 to vector<1x128xf32>
    %254 = arith.subf %253, %252 : vector<1x128xf32>
    %255 = arith.mulf %251, %254 : vector<1x128xf32>
    %256 = math.log %247 : vector<1x128xf32>
    %257 = arith.mulf %250, %255 : vector<1x128xf32>
    %258 = arith.subf %256, %257 : vector<1x128xf32>
    %259 = vector.broadcast %242 : vector<1x128xf32> to vector<10x128xf32>
    %260 = arith.cmpf oeq, %240, %259 : vector<10x128xf32>
    %cst_82 = arith.constant 1.000000e+01 : f32
    %261 = vector.broadcast %cst_82 : f32 to vector<10x128xf32>
    %262 = arith.select %260, %3, %261 : vector<10x128xi1>, vector<10x128xf32>
    %cst_83 = arith.constant dense<0x7F800000> : vector<128xf32>
    %263 = vector.multi_reduction <minimumf>, %262, %cst_83 [0] : vector<10x128xf32> to vector<128xf32>
    %264 = vector.shape_cast %263 : vector<128xf32> to vector<1x128xf32>
    %c9 = arith.constant 9 : index
    %c0_84 = arith.constant 0 : index
    %c0_85 = arith.constant 0 : index
    %265 = vector.load %arg1[%c9, %c0_84, %c0_85] : memref<16x32x128xf32, #tpu.memory_space<vmem>>, vector<1x32x128xf32>
    %266 = vector.shape_cast %265 : vector<1x32x128xf32> to vector<32x128xf32>
    %cst_86 = arith.constant dense<0.000000e+00> : vector<10x128xf32>
    %267 = tpu.matmul %0, %266, %cst_86 {dimension_numbers = #tpu.dot_dimension_numbers<[1], [0], [0], [1], [0, 0, 1, 1], [], []>} : vector<10x32xf32>, vector<32x128xf32>, vector<10x128xf32> -> vector<10x128xf32>
    %268 = vector.broadcast %1 : vector<10x1xf32> to vector<10x128xf32>
    %269 = arith.addf %267, %268 : vector<10x128xf32>
    %cst_87 = arith.constant dense<0xFF800000> : vector<128xf32>
    %270 = vector.multi_reduction <maximumf>, %269, %cst_87 [0] : vector<10x128xf32> to vector<128xf32>
    %271 = vector.shape_cast %270 : vector<128xf32> to vector<1x128xf32>
    %272 = vector.broadcast %271 : vector<1x128xf32> to vector<10x128xf32>
    %273 = arith.subf %269, %272 : vector<10x128xf32>
    %274 = math.exp %273 : vector<10x128xf32>
    %cst_88 = arith.constant dense<0.000000e+00> : vector<128xf32>
    %275 = vector.multi_reduction <add>, %274, %cst_88 [0] : vector<10x128xf32> to vector<128xf32>
    %276 = vector.shape_cast %275 : vector<128xf32> to vector<1x128xf32>
    %277 = arith.mulf %274, %273 : vector<10x128xf32>
    %cst_89 = arith.constant dense<0.000000e+00> : vector<128xf32>
    %278 = vector.multi_reduction <add>, %277, %cst_89 [0] : vector<10x128xf32> to vector<128xf32>
    %279 = vector.shape_cast %278 : vector<128xf32> to vector<1x128xf32>
    %280 = tpu.reciprocal %276 {approx = true} : vector<1x128xf32> -> vector<1x128xf32>
    %281 = arith.mulf %276, %280 : vector<1x128xf32>
    %cst_90 = arith.constant 2.000000e+00 : f32
    %282 = vector.broadcast %cst_90 : f32 to vector<1x128xf32>
    %283 = arith.subf %282, %281 : vector<1x128xf32>
    %284 = arith.mulf %280, %283 : vector<1x128xf32>
    %285 = math.log %276 : vector<1x128xf32>
    %286 = arith.mulf %279, %284 : vector<1x128xf32>
    %287 = arith.subf %285, %286 : vector<1x128xf32>
    %288 = vector.broadcast %271 : vector<1x128xf32> to vector<10x128xf32>
    %289 = arith.cmpf oeq, %269, %288 : vector<10x128xf32>
    %cst_91 = arith.constant 1.000000e+01 : f32
    %290 = vector.broadcast %cst_91 : f32 to vector<10x128xf32>
    %291 = arith.select %289, %3, %290 : vector<10x128xi1>, vector<10x128xf32>
    %cst_92 = arith.constant dense<0x7F800000> : vector<128xf32>
    %292 = vector.multi_reduction <minimumf>, %291, %cst_92 [0] : vector<10x128xf32> to vector<128xf32>
    %293 = vector.shape_cast %292 : vector<128xf32> to vector<1x128xf32>
    %c10 = arith.constant 10 : index
    %c0_93 = arith.constant 0 : index
    %c0_94 = arith.constant 0 : index
    %294 = vector.load %arg1[%c10, %c0_93, %c0_94] : memref<16x32x128xf32, #tpu.memory_space<vmem>>, vector<1x32x128xf32>
    %295 = vector.shape_cast %294 : vector<1x32x128xf32> to vector<32x128xf32>
    %cst_95 = arith.constant dense<0.000000e+00> : vector<10x128xf32>
    %296 = tpu.matmul %0, %295, %cst_95 {dimension_numbers = #tpu.dot_dimension_numbers<[1], [0], [0], [1], [0, 0, 1, 1], [], []>} : vector<10x32xf32>, vector<32x128xf32>, vector<10x128xf32> -> vector<10x128xf32>
    %297 = vector.broadcast %1 : vector<10x1xf32> to vector<10x128xf32>
    %298 = arith.addf %296, %297 : vector<10x128xf32>
    %cst_96 = arith.constant dense<0xFF800000> : vector<128xf32>
    %299 = vector.multi_reduction <maximumf>, %298, %cst_96 [0] : vector<10x128xf32> to vector<128xf32>
    %300 = vector.shape_cast %299 : vector<128xf32> to vector<1x128xf32>
    %301 = vector.broadcast %300 : vector<1x128xf32> to vector<10x128xf32>
    %302 = arith.subf %298, %301 : vector<10x128xf32>
    %303 = math.exp %302 : vector<10x128xf32>
    %cst_97 = arith.constant dense<0.000000e+00> : vector<128xf32>
    %304 = vector.multi_reduction <add>, %303, %cst_97 [0] : vector<10x128xf32> to vector<128xf32>
    %305 = vector.shape_cast %304 : vector<128xf32> to vector<1x128xf32>
    %306 = arith.mulf %303, %302 : vector<10x128xf32>
    %cst_98 = arith.constant dense<0.000000e+00> : vector<128xf32>
    %307 = vector.multi_reduction <add>, %306, %cst_98 [0] : vector<10x128xf32> to vector<128xf32>
    %308 = vector.shape_cast %307 : vector<128xf32> to vector<1x128xf32>
    %309 = tpu.reciprocal %305 {approx = true} : vector<1x128xf32> -> vector<1x128xf32>
    %310 = arith.mulf %305, %309 : vector<1x128xf32>
    %cst_99 = arith.constant 2.000000e+00 : f32
    %311 = vector.broadcast %cst_99 : f32 to vector<1x128xf32>
    %312 = arith.subf %311, %310 : vector<1x128xf32>
    %313 = arith.mulf %309, %312 : vector<1x128xf32>
    %314 = math.log %305 : vector<1x128xf32>
    %315 = arith.mulf %308, %313 : vector<1x128xf32>
    %316 = arith.subf %314, %315 : vector<1x128xf32>
    %317 = vector.broadcast %300 : vector<1x128xf32> to vector<10x128xf32>
    %318 = arith.cmpf oeq, %298, %317 : vector<10x128xf32>
    %cst_100 = arith.constant 1.000000e+01 : f32
    %319 = vector.broadcast %cst_100 : f32 to vector<10x128xf32>
    %320 = arith.select %318, %3, %319 : vector<10x128xi1>, vector<10x128xf32>
    %cst_101 = arith.constant dense<0x7F800000> : vector<128xf32>
    %321 = vector.multi_reduction <minimumf>, %320, %cst_101 [0] : vector<10x128xf32> to vector<128xf32>
    %322 = vector.shape_cast %321 : vector<128xf32> to vector<1x128xf32>
    %c11 = arith.constant 11 : index
    %c0_102 = arith.constant 0 : index
    %c0_103 = arith.constant 0 : index
    %323 = vector.load %arg1[%c11, %c0_102, %c0_103] : memref<16x32x128xf32, #tpu.memory_space<vmem>>, vector<1x32x128xf32>
    %324 = vector.shape_cast %323 : vector<1x32x128xf32> to vector<32x128xf32>
    %cst_104 = arith.constant dense<0.000000e+00> : vector<10x128xf32>
    %325 = tpu.matmul %0, %324, %cst_104 {dimension_numbers = #tpu.dot_dimension_numbers<[1], [0], [0], [1], [0, 0, 1, 1], [], []>} : vector<10x32xf32>, vector<32x128xf32>, vector<10x128xf32> -> vector<10x128xf32>
    %326 = vector.broadcast %1 : vector<10x1xf32> to vector<10x128xf32>
    %327 = arith.addf %325, %326 : vector<10x128xf32>
    %cst_105 = arith.constant dense<0xFF800000> : vector<128xf32>
    %328 = vector.multi_reduction <maximumf>, %327, %cst_105 [0] : vector<10x128xf32> to vector<128xf32>
    %329 = vector.shape_cast %328 : vector<128xf32> to vector<1x128xf32>
    %330 = vector.broadcast %329 : vector<1x128xf32> to vector<10x128xf32>
    %331 = arith.subf %327, %330 : vector<10x128xf32>
    %332 = math.exp %331 : vector<10x128xf32>
    %cst_106 = arith.constant dense<0.000000e+00> : vector<128xf32>
    %333 = vector.multi_reduction <add>, %332, %cst_106 [0] : vector<10x128xf32> to vector<128xf32>
    %334 = vector.shape_cast %333 : vector<128xf32> to vector<1x128xf32>
    %335 = arith.mulf %332, %331 : vector<10x128xf32>
    %cst_107 = arith.constant dense<0.000000e+00> : vector<128xf32>
    %336 = vector.multi_reduction <add>, %335, %cst_107 [0] : vector<10x128xf32> to vector<128xf32>
    %337 = vector.shape_cast %336 : vector<128xf32> to vector<1x128xf32>
    %338 = tpu.reciprocal %334 {approx = true} : vector<1x128xf32> -> vector<1x128xf32>
    %339 = arith.mulf %334, %338 : vector<1x128xf32>
    %cst_108 = arith.constant 2.000000e+00 : f32
    %340 = vector.broadcast %cst_108 : f32 to vector<1x128xf32>
    %341 = arith.subf %340, %339 : vector<1x128xf32>
    %342 = arith.mulf %338, %341 : vector<1x128xf32>
    %343 = math.log %334 : vector<1x128xf32>
    %344 = arith.mulf %337, %342 : vector<1x128xf32>
    %345 = arith.subf %343, %344 : vector<1x128xf32>
    %346 = vector.broadcast %329 : vector<1x128xf32> to vector<10x128xf32>
    %347 = arith.cmpf oeq, %327, %346 : vector<10x128xf32>
    %cst_109 = arith.constant 1.000000e+01 : f32
    %348 = vector.broadcast %cst_109 : f32 to vector<10x128xf32>
    %349 = arith.select %347, %3, %348 : vector<10x128xi1>, vector<10x128xf32>
    %cst_110 = arith.constant dense<0x7F800000> : vector<128xf32>
    %350 = vector.multi_reduction <minimumf>, %349, %cst_110 [0] : vector<10x128xf32> to vector<128xf32>
    %351 = vector.shape_cast %350 : vector<128xf32> to vector<1x128xf32>
    %c12 = arith.constant 12 : index
    %c0_111 = arith.constant 0 : index
    %c0_112 = arith.constant 0 : index
    %352 = vector.load %arg1[%c12, %c0_111, %c0_112] : memref<16x32x128xf32, #tpu.memory_space<vmem>>, vector<1x32x128xf32>
    %353 = vector.shape_cast %352 : vector<1x32x128xf32> to vector<32x128xf32>
    %cst_113 = arith.constant dense<0.000000e+00> : vector<10x128xf32>
    %354 = tpu.matmul %0, %353, %cst_113 {dimension_numbers = #tpu.dot_dimension_numbers<[1], [0], [0], [1], [0, 0, 1, 1], [], []>} : vector<10x32xf32>, vector<32x128xf32>, vector<10x128xf32> -> vector<10x128xf32>
    %355 = vector.broadcast %1 : vector<10x1xf32> to vector<10x128xf32>
    %356 = arith.addf %354, %355 : vector<10x128xf32>
    %cst_114 = arith.constant dense<0xFF800000> : vector<128xf32>
    %357 = vector.multi_reduction <maximumf>, %356, %cst_114 [0] : vector<10x128xf32> to vector<128xf32>
    %358 = vector.shape_cast %357 : vector<128xf32> to vector<1x128xf32>
    %359 = vector.broadcast %358 : vector<1x128xf32> to vector<10x128xf32>
    %360 = arith.subf %356, %359 : vector<10x128xf32>
    %361 = math.exp %360 : vector<10x128xf32>
    %cst_115 = arith.constant dense<0.000000e+00> : vector<128xf32>
    %362 = vector.multi_reduction <add>, %361, %cst_115 [0] : vector<10x128xf32> to vector<128xf32>
    %363 = vector.shape_cast %362 : vector<128xf32> to vector<1x128xf32>
    %364 = arith.mulf %361, %360 : vector<10x128xf32>
    %cst_116 = arith.constant dense<0.000000e+00> : vector<128xf32>
    %365 = vector.multi_reduction <add>, %364, %cst_116 [0] : vector<10x128xf32> to vector<128xf32>
    %366 = vector.shape_cast %365 : vector<128xf32> to vector<1x128xf32>
    %367 = tpu.reciprocal %363 {approx = true} : vector<1x128xf32> -> vector<1x128xf32>
    %368 = arith.mulf %363, %367 : vector<1x128xf32>
    %cst_117 = arith.constant 2.000000e+00 : f32
    %369 = vector.broadcast %cst_117 : f32 to vector<1x128xf32>
    %370 = arith.subf %369, %368 : vector<1x128xf32>
    %371 = arith.mulf %367, %370 : vector<1x128xf32>
    %372 = math.log %363 : vector<1x128xf32>
    %373 = arith.mulf %366, %371 : vector<1x128xf32>
    %374 = arith.subf %372, %373 : vector<1x128xf32>
    %375 = vector.broadcast %358 : vector<1x128xf32> to vector<10x128xf32>
    %376 = arith.cmpf oeq, %356, %375 : vector<10x128xf32>
    %cst_118 = arith.constant 1.000000e+01 : f32
    %377 = vector.broadcast %cst_118 : f32 to vector<10x128xf32>
    %378 = arith.select %376, %3, %377 : vector<10x128xi1>, vector<10x128xf32>
    %cst_119 = arith.constant dense<0x7F800000> : vector<128xf32>
    %379 = vector.multi_reduction <minimumf>, %378, %cst_119 [0] : vector<10x128xf32> to vector<128xf32>
    %380 = vector.shape_cast %379 : vector<128xf32> to vector<1x128xf32>
    %c13 = arith.constant 13 : index
    %c0_120 = arith.constant 0 : index
    %c0_121 = arith.constant 0 : index
    %381 = vector.load %arg1[%c13, %c0_120, %c0_121] : memref<16x32x128xf32, #tpu.memory_space<vmem>>, vector<1x32x128xf32>
    %382 = vector.shape_cast %381 : vector<1x32x128xf32> to vector<32x128xf32>
    %cst_122 = arith.constant dense<0.000000e+00> : vector<10x128xf32>
    %383 = tpu.matmul %0, %382, %cst_122 {dimension_numbers = #tpu.dot_dimension_numbers<[1], [0], [0], [1], [0, 0, 1, 1], [], []>} : vector<10x32xf32>, vector<32x128xf32>, vector<10x128xf32> -> vector<10x128xf32>
    %384 = vector.broadcast %1 : vector<10x1xf32> to vector<10x128xf32>
    %385 = arith.addf %383, %384 : vector<10x128xf32>
    %cst_123 = arith.constant dense<0xFF800000> : vector<128xf32>
    %386 = vector.multi_reduction <maximumf>, %385, %cst_123 [0] : vector<10x128xf32> to vector<128xf32>
    %387 = vector.shape_cast %386 : vector<128xf32> to vector<1x128xf32>
    %388 = vector.broadcast %387 : vector<1x128xf32> to vector<10x128xf32>
    %389 = arith.subf %385, %388 : vector<10x128xf32>
    %390 = math.exp %389 : vector<10x128xf32>
    %cst_124 = arith.constant dense<0.000000e+00> : vector<128xf32>
    %391 = vector.multi_reduction <add>, %390, %cst_124 [0] : vector<10x128xf32> to vector<128xf32>
    %392 = vector.shape_cast %391 : vector<128xf32> to vector<1x128xf32>
    %393 = arith.mulf %390, %389 : vector<10x128xf32>
    %cst_125 = arith.constant dense<0.000000e+00> : vector<128xf32>
    %394 = vector.multi_reduction <add>, %393, %cst_125 [0] : vector<10x128xf32> to vector<128xf32>
    %395 = vector.shape_cast %394 : vector<128xf32> to vector<1x128xf32>
    %396 = tpu.reciprocal %392 {approx = true} : vector<1x128xf32> -> vector<1x128xf32>
    %397 = arith.mulf %392, %396 : vector<1x128xf32>
    %cst_126 = arith.constant 2.000000e+00 : f32
    %398 = vector.broadcast %cst_126 : f32 to vector<1x128xf32>
    %399 = arith.subf %398, %397 : vector<1x128xf32>
    %400 = arith.mulf %396, %399 : vector<1x128xf32>
    %401 = math.log %392 : vector<1x128xf32>
    %402 = arith.mulf %395, %400 : vector<1x128xf32>
    %403 = arith.subf %401, %402 : vector<1x128xf32>
    %404 = vector.broadcast %387 : vector<1x128xf32> to vector<10x128xf32>
    %405 = arith.cmpf oeq, %385, %404 : vector<10x128xf32>
    %cst_127 = arith.constant 1.000000e+01 : f32
    %406 = vector.broadcast %cst_127 : f32 to vector<10x128xf32>
    %407 = arith.select %405, %3, %406 : vector<10x128xi1>, vector<10x128xf32>
    %cst_128 = arith.constant dense<0x7F800000> : vector<128xf32>
    %408 = vector.multi_reduction <minimumf>, %407, %cst_128 [0] : vector<10x128xf32> to vector<128xf32>
    %409 = vector.shape_cast %408 : vector<128xf32> to vector<1x128xf32>
    %c14 = arith.constant 14 : index
    %c0_129 = arith.constant 0 : index
    %c0_130 = arith.constant 0 : index
    %410 = vector.load %arg1[%c14, %c0_129, %c0_130] : memref<16x32x128xf32, #tpu.memory_space<vmem>>, vector<1x32x128xf32>
    %411 = vector.shape_cast %410 : vector<1x32x128xf32> to vector<32x128xf32>
    %cst_131 = arith.constant dense<0.000000e+00> : vector<10x128xf32>
    %412 = tpu.matmul %0, %411, %cst_131 {dimension_numbers = #tpu.dot_dimension_numbers<[1], [0], [0], [1], [0, 0, 1, 1], [], []>} : vector<10x32xf32>, vector<32x128xf32>, vector<10x128xf32> -> vector<10x128xf32>
    %413 = vector.broadcast %1 : vector<10x1xf32> to vector<10x128xf32>
    %414 = arith.addf %412, %413 : vector<10x128xf32>
    %cst_132 = arith.constant dense<0xFF800000> : vector<128xf32>
    %415 = vector.multi_reduction <maximumf>, %414, %cst_132 [0] : vector<10x128xf32> to vector<128xf32>
    %416 = vector.shape_cast %415 : vector<128xf32> to vector<1x128xf32>
    %417 = vector.broadcast %416 : vector<1x128xf32> to vector<10x128xf32>
    %418 = arith.subf %414, %417 : vector<10x128xf32>
    %419 = math.exp %418 : vector<10x128xf32>
    %cst_133 = arith.constant dense<0.000000e+00> : vector<128xf32>
    %420 = vector.multi_reduction <add>, %419, %cst_133 [0] : vector<10x128xf32> to vector<128xf32>
    %421 = vector.shape_cast %420 : vector<128xf32> to vector<1x128xf32>
    %422 = arith.mulf %419, %418 : vector<10x128xf32>
    %cst_134 = arith.constant dense<0.000000e+00> : vector<128xf32>
    %423 = vector.multi_reduction <add>, %422, %cst_134 [0] : vector<10x128xf32> to vector<128xf32>
    %424 = vector.shape_cast %423 : vector<128xf32> to vector<1x128xf32>
    %425 = tpu.reciprocal %421 {approx = true} : vector<1x128xf32> -> vector<1x128xf32>
    %426 = arith.mulf %421, %425 : vector<1x128xf32>
    %cst_135 = arith.constant 2.000000e+00 : f32
    %427 = vector.broadcast %cst_135 : f32 to vector<1x128xf32>
    %428 = arith.subf %427, %426 : vector<1x128xf32>
    %429 = arith.mulf %425, %428 : vector<1x128xf32>
    %430 = math.log %421 : vector<1x128xf32>
    %431 = arith.mulf %424, %429 : vector<1x128xf32>
    %432 = arith.subf %430, %431 : vector<1x128xf32>
    %433 = vector.broadcast %416 : vector<1x128xf32> to vector<10x128xf32>
    %434 = arith.cmpf oeq, %414, %433 : vector<10x128xf32>
    %cst_136 = arith.constant 1.000000e+01 : f32
    %435 = vector.broadcast %cst_136 : f32 to vector<10x128xf32>
    %436 = arith.select %434, %3, %435 : vector<10x128xi1>, vector<10x128xf32>
    %cst_137 = arith.constant dense<0x7F800000> : vector<128xf32>
    %437 = vector.multi_reduction <minimumf>, %436, %cst_137 [0] : vector<10x128xf32> to vector<128xf32>
    %438 = vector.shape_cast %437 : vector<128xf32> to vector<1x128xf32>
    %c15 = arith.constant 15 : index
    %c0_138 = arith.constant 0 : index
    %c0_139 = arith.constant 0 : index
    %439 = vector.load %arg1[%c15, %c0_138, %c0_139] : memref<16x32x128xf32, #tpu.memory_space<vmem>>, vector<1x32x128xf32>
    %440 = vector.shape_cast %439 : vector<1x32x128xf32> to vector<32x128xf32>
    %cst_140 = arith.constant dense<0.000000e+00> : vector<10x128xf32>
    %441 = tpu.matmul %0, %440, %cst_140 {dimension_numbers = #tpu.dot_dimension_numbers<[1], [0], [0], [1], [0, 0, 1, 1], [], []>} : vector<10x32xf32>, vector<32x128xf32>, vector<10x128xf32> -> vector<10x128xf32>
    %442 = vector.broadcast %1 : vector<10x1xf32> to vector<10x128xf32>
    %443 = arith.addf %441, %442 : vector<10x128xf32>
    %cst_141 = arith.constant dense<0xFF800000> : vector<128xf32>
    %444 = vector.multi_reduction <maximumf>, %443, %cst_141 [0] : vector<10x128xf32> to vector<128xf32>
    %445 = vector.shape_cast %444 : vector<128xf32> to vector<1x128xf32>
    %446 = vector.broadcast %445 : vector<1x128xf32> to vector<10x128xf32>
    %447 = arith.subf %443, %446 : vector<10x128xf32>
    %448 = math.exp %447 : vector<10x128xf32>
    %cst_142 = arith.constant dense<0.000000e+00> : vector<128xf32>
    %449 = vector.multi_reduction <add>, %448, %cst_142 [0] : vector<10x128xf32> to vector<128xf32>
    %450 = vector.shape_cast %449 : vector<128xf32> to vector<1x128xf32>
    %451 = arith.mulf %448, %447 : vector<10x128xf32>
    %cst_143 = arith.constant dense<0.000000e+00> : vector<128xf32>
    %452 = vector.multi_reduction <add>, %451, %cst_143 [0] : vector<10x128xf32> to vector<128xf32>
    %453 = vector.shape_cast %452 : vector<128xf32> to vector<1x128xf32>
    %454 = tpu.reciprocal %450 {approx = true} : vector<1x128xf32> -> vector<1x128xf32>
    %455 = arith.mulf %450, %454 : vector<1x128xf32>
    %cst_144 = arith.constant 2.000000e+00 : f32
    %456 = vector.broadcast %cst_144 : f32 to vector<1x128xf32>
    %457 = arith.subf %456, %455 : vector<1x128xf32>
    %458 = arith.mulf %454, %457 : vector<1x128xf32>
    %459 = math.log %450 : vector<1x128xf32>
    %460 = arith.mulf %453, %458 : vector<1x128xf32>
    %461 = arith.subf %459, %460 : vector<1x128xf32>
    %462 = vector.broadcast %445 : vector<1x128xf32> to vector<10x128xf32>
    %463 = arith.cmpf oeq, %443, %462 : vector<10x128xf32>
    %cst_145 = arith.constant 1.000000e+01 : f32
    %464 = vector.broadcast %cst_145 : f32 to vector<10x128xf32>
    %465 = arith.select %463, %3, %464 : vector<10x128xi1>, vector<10x128xf32>
    %cst_146 = arith.constant dense<0x7F800000> : vector<128xf32>
    %466 = vector.multi_reduction <minimumf>, %465, %cst_146 [0] : vector<10x128xf32> to vector<128xf32>
    %467 = vector.shape_cast %466 : vector<128xf32> to vector<1x128xf32>
    %cst_147 = arith.constant 0.000000e+00 : f32
    %468 = vector.broadcast %cst_147 : f32 to vector<1x128xf32>
    %469 = arith.cmpf olt, %55, %26 : vector<1x128xf32>
    %470 = arith.extui %469 : vector<1x128xi1> to vector<1x128xi32>
    %471 = arith.sitofp %470 : vector<1x128xi32> to vector<1x128xf32>
    %472 = arith.addf %468, %471 : vector<1x128xf32>
    %473 = arith.cmpf olt, %84, %26 : vector<1x128xf32>
    %474 = arith.extui %473 : vector<1x128xi1> to vector<1x128xi32>
    %475 = arith.sitofp %474 : vector<1x128xi32> to vector<1x128xf32>
    %476 = arith.addf %472, %475 : vector<1x128xf32>
    %477 = arith.cmpf olt, %113, %26 : vector<1x128xf32>
    %478 = arith.extui %477 : vector<1x128xi1> to vector<1x128xi32>
    %479 = arith.sitofp %478 : vector<1x128xi32> to vector<1x128xf32>
    %480 = arith.addf %476, %479 : vector<1x128xf32>
    %481 = arith.cmpf olt, %142, %26 : vector<1x128xf32>
    %482 = arith.extui %481 : vector<1x128xi1> to vector<1x128xi32>
    %483 = arith.sitofp %482 : vector<1x128xi32> to vector<1x128xf32>
    %484 = arith.addf %480, %483 : vector<1x128xf32>
    %485 = arith.cmpf olt, %171, %26 : vector<1x128xf32>
    %486 = arith.extui %485 : vector<1x128xi1> to vector<1x128xi32>
    %487 = arith.sitofp %486 : vector<1x128xi32> to vector<1x128xf32>
    %488 = arith.addf %484, %487 : vector<1x128xf32>
    %489 = arith.cmpf olt, %200, %26 : vector<1x128xf32>
    %490 = arith.extui %489 : vector<1x128xi1> to vector<1x128xi32>
    %491 = arith.sitofp %490 : vector<1x128xi32> to vector<1x128xf32>
    %492 = arith.addf %488, %491 : vector<1x128xf32>
    %493 = arith.cmpf olt, %229, %26 : vector<1x128xf32>
    %494 = arith.extui %493 : vector<1x128xi1> to vector<1x128xi32>
    %495 = arith.sitofp %494 : vector<1x128xi32> to vector<1x128xf32>
    %496 = arith.addf %492, %495 : vector<1x128xf32>
    %497 = arith.cmpf olt, %258, %26 : vector<1x128xf32>
    %498 = arith.extui %497 : vector<1x128xi1> to vector<1x128xi32>
    %499 = arith.sitofp %498 : vector<1x128xi32> to vector<1x128xf32>
    %500 = arith.addf %496, %499 : vector<1x128xf32>
    %501 = arith.cmpf olt, %287, %26 : vector<1x128xf32>
    %502 = arith.extui %501 : vector<1x128xi1> to vector<1x128xi32>
    %503 = arith.sitofp %502 : vector<1x128xi32> to vector<1x128xf32>
    %504 = arith.addf %500, %503 : vector<1x128xf32>
    %505 = arith.cmpf olt, %316, %26 : vector<1x128xf32>
    %506 = arith.extui %505 : vector<1x128xi1> to vector<1x128xi32>
    %507 = arith.sitofp %506 : vector<1x128xi32> to vector<1x128xf32>
    %508 = arith.addf %504, %507 : vector<1x128xf32>
    %509 = arith.cmpf olt, %345, %26 : vector<1x128xf32>
    %510 = arith.extui %509 : vector<1x128xi1> to vector<1x128xi32>
    %511 = arith.sitofp %510 : vector<1x128xi32> to vector<1x128xf32>
    %512 = arith.addf %508, %511 : vector<1x128xf32>
    %513 = arith.cmpf olt, %374, %26 : vector<1x128xf32>
    %514 = arith.extui %513 : vector<1x128xi1> to vector<1x128xi32>
    %515 = arith.sitofp %514 : vector<1x128xi32> to vector<1x128xf32>
    %516 = arith.addf %512, %515 : vector<1x128xf32>
    %517 = arith.cmpf olt, %403, %26 : vector<1x128xf32>
    %518 = arith.extui %517 : vector<1x128xi1> to vector<1x128xi32>
    %519 = arith.sitofp %518 : vector<1x128xi32> to vector<1x128xf32>
    %520 = arith.addf %516, %519 : vector<1x128xf32>
    %521 = arith.cmpf olt, %432, %26 : vector<1x128xf32>
    %522 = arith.extui %521 : vector<1x128xi1> to vector<1x128xi32>
    %523 = arith.sitofp %522 : vector<1x128xi32> to vector<1x128xf32>
    %524 = arith.addf %520, %523 : vector<1x128xf32>
    %525 = arith.cmpf olt, %461, %26 : vector<1x128xf32>
    %526 = arith.extui %525 : vector<1x128xi1> to vector<1x128xi32>
    %527 = arith.sitofp %526 : vector<1x128xi32> to vector<1x128xf32>
    %528 = arith.addf %524, %527 : vector<1x128xf32>
    %cst_148 = arith.constant 0.000000e+00 : f32
    %529 = vector.broadcast %cst_148 : f32 to vector<1x128xf32>
    %530 = arith.cmpf ole, %26, %55 : vector<1x128xf32>
    %531 = arith.extui %530 : vector<1x128xi1> to vector<1x128xi32>
    %532 = arith.sitofp %531 : vector<1x128xi32> to vector<1x128xf32>
    %533 = arith.addf %529, %532 : vector<1x128xf32>
    %534 = arith.cmpf olt, %84, %55 : vector<1x128xf32>
    %535 = arith.extui %534 : vector<1x128xi1> to vector<1x128xi32>
    %536 = arith.sitofp %535 : vector<1x128xi32> to vector<1x128xf32>
    %537 = arith.addf %533, %536 : vector<1x128xf32>
    %538 = arith.cmpf olt, %113, %55 : vector<1x128xf32>
    %539 = arith.extui %538 : vector<1x128xi1> to vector<1x128xi32>
    %540 = arith.sitofp %539 : vector<1x128xi32> to vector<1x128xf32>
    %541 = arith.addf %537, %540 : vector<1x128xf32>
    %542 = arith.cmpf olt, %142, %55 : vector<1x128xf32>
    %543 = arith.extui %542 : vector<1x128xi1> to vector<1x128xi32>
    %544 = arith.sitofp %543 : vector<1x128xi32> to vector<1x128xf32>
    %545 = arith.addf %541, %544 : vector<1x128xf32>
    %546 = arith.cmpf olt, %171, %55 : vector<1x128xf32>
    %547 = arith.extui %546 : vector<1x128xi1> to vector<1x128xi32>
    %548 = arith.sitofp %547 : vector<1x128xi32> to vector<1x128xf32>
    %549 = arith.addf %545, %548 : vector<1x128xf32>
    %550 = arith.cmpf olt, %200, %55 : vector<1x128xf32>
    %551 = arith.extui %550 : vector<1x128xi1> to vector<1x128xi32>
    %552 = arith.sitofp %551 : vector<1x128xi32> to vector<1x128xf32>
    %553 = arith.addf %549, %552 : vector<1x128xf32>
    %554 = arith.cmpf olt, %229, %55 : vector<1x128xf32>
    %555 = arith.extui %554 : vector<1x128xi1> to vector<1x128xi32>
    %556 = arith.sitofp %555 : vector<1x128xi32> to vector<1x128xf32>
    %557 = arith.addf %553, %556 : vector<1x128xf32>
    %558 = arith.cmpf olt, %258, %55 : vector<1x128xf32>
    %559 = arith.extui %558 : vector<1x128xi1> to vector<1x128xi32>
    %560 = arith.sitofp %559 : vector<1x128xi32> to vector<1x128xf32>
    %561 = arith.addf %557, %560 : vector<1x128xf32>
    %562 = arith.cmpf olt, %287, %55 : vector<1x128xf32>
    %563 = arith.extui %562 : vector<1x128xi1> to vector<1x128xi32>
    %564 = arith.sitofp %563 : vector<1x128xi32> to vector<1x128xf32>
    %565 = arith.addf %561, %564 : vector<1x128xf32>
    %566 = arith.cmpf olt, %316, %55 : vector<1x128xf32>
    %567 = arith.extui %566 : vector<1x128xi1> to vector<1x128xi32>
    %568 = arith.sitofp %567 : vector<1x128xi32> to vector<1x128xf32>
    %569 = arith.addf %565, %568 : vector<1x128xf32>
    %570 = arith.cmpf olt, %345, %55 : vector<1x128xf32>
    %571 = arith.extui %570 : vector<1x128xi1> to vector<1x128xi32>
    %572 = arith.sitofp %571 : vector<1x128xi32> to vector<1x128xf32>
    %573 = arith.addf %569, %572 : vector<1x128xf32>
    %574 = arith.cmpf olt, %374, %55 : vector<1x128xf32>
    %575 = arith.extui %574 : vector<1x128xi1> to vector<1x128xi32>
    %576 = arith.sitofp %575 : vector<1x128xi32> to vector<1x128xf32>
    %577 = arith.addf %573, %576 : vector<1x128xf32>
    %578 = arith.cmpf olt, %403, %55 : vector<1x128xf32>
    %579 = arith.extui %578 : vector<1x128xi1> to vector<1x128xi32>
    %580 = arith.sitofp %579 : vector<1x128xi32> to vector<1x128xf32>
    %581 = arith.addf %577, %580 : vector<1x128xf32>
    %582 = arith.cmpf olt, %432, %55 : vector<1x128xf32>
    %583 = arith.extui %582 : vector<1x128xi1> to vector<1x128xi32>
    %584 = arith.sitofp %583 : vector<1x128xi32> to vector<1x128xf32>
    %585 = arith.addf %581, %584 : vector<1x128xf32>
    %586 = arith.cmpf olt, %461, %55 : vector<1x128xf32>
    %587 = arith.extui %586 : vector<1x128xi1> to vector<1x128xi32>
    %588 = arith.sitofp %587 : vector<1x128xi32> to vector<1x128xf32>
    %589 = arith.addf %585, %588 : vector<1x128xf32>
    %cst_149 = arith.constant 0.000000e+00 : f32
    %590 = vector.broadcast %cst_149 : f32 to vector<1x128xf32>
    %591 = arith.cmpf ole, %26, %84 : vector<1x128xf32>
    %592 = arith.extui %591 : vector<1x128xi1> to vector<1x128xi32>
    %593 = arith.sitofp %592 : vector<1x128xi32> to vector<1x128xf32>
    %594 = arith.addf %590, %593 : vector<1x128xf32>
    %595 = arith.cmpf ole, %55, %84 : vector<1x128xf32>
    %596 = arith.extui %595 : vector<1x128xi1> to vector<1x128xi32>
    %597 = arith.sitofp %596 : vector<1x128xi32> to vector<1x128xf32>
    %598 = arith.addf %594, %597 : vector<1x128xf32>
    %599 = arith.cmpf olt, %113, %84 : vector<1x128xf32>
    %600 = arith.extui %599 : vector<1x128xi1> to vector<1x128xi32>
    %601 = arith.sitofp %600 : vector<1x128xi32> to vector<1x128xf32>
    %602 = arith.addf %598, %601 : vector<1x128xf32>
    %603 = arith.cmpf olt, %142, %84 : vector<1x128xf32>
    %604 = arith.extui %603 : vector<1x128xi1> to vector<1x128xi32>
    %605 = arith.sitofp %604 : vector<1x128xi32> to vector<1x128xf32>
    %606 = arith.addf %602, %605 : vector<1x128xf32>
    %607 = arith.cmpf olt, %171, %84 : vector<1x128xf32>
    %608 = arith.extui %607 : vector<1x128xi1> to vector<1x128xi32>
    %609 = arith.sitofp %608 : vector<1x128xi32> to vector<1x128xf32>
    %610 = arith.addf %606, %609 : vector<1x128xf32>
    %611 = arith.cmpf olt, %200, %84 : vector<1x128xf32>
    %612 = arith.extui %611 : vector<1x128xi1> to vector<1x128xi32>
    %613 = arith.sitofp %612 : vector<1x128xi32> to vector<1x128xf32>
    %614 = arith.addf %610, %613 : vector<1x128xf32>
    %615 = arith.cmpf olt, %229, %84 : vector<1x128xf32>
    %616 = arith.extui %615 : vector<1x128xi1> to vector<1x128xi32>
    %617 = arith.sitofp %616 : vector<1x128xi32> to vector<1x128xf32>
    %618 = arith.addf %614, %617 : vector<1x128xf32>
    %619 = arith.cmpf olt, %258, %84 : vector<1x128xf32>
    %620 = arith.extui %619 : vector<1x128xi1> to vector<1x128xi32>
    %621 = arith.sitofp %620 : vector<1x128xi32> to vector<1x128xf32>
    %622 = arith.addf %618, %621 : vector<1x128xf32>
    %623 = arith.cmpf olt, %287, %84 : vector<1x128xf32>
    %624 = arith.extui %623 : vector<1x128xi1> to vector<1x128xi32>
    %625 = arith.sitofp %624 : vector<1x128xi32> to vector<1x128xf32>
    %626 = arith.addf %622, %625 : vector<1x128xf32>
    %627 = arith.cmpf olt, %316, %84 : vector<1x128xf32>
    %628 = arith.extui %627 : vector<1x128xi1> to vector<1x128xi32>
    %629 = arith.sitofp %628 : vector<1x128xi32> to vector<1x128xf32>
    %630 = arith.addf %626, %629 : vector<1x128xf32>
    %631 = arith.cmpf olt, %345, %84 : vector<1x128xf32>
    %632 = arith.extui %631 : vector<1x128xi1> to vector<1x128xi32>
    %633 = arith.sitofp %632 : vector<1x128xi32> to vector<1x128xf32>
    %634 = arith.addf %630, %633 : vector<1x128xf32>
    %635 = arith.cmpf olt, %374, %84 : vector<1x128xf32>
    %636 = arith.extui %635 : vector<1x128xi1> to vector<1x128xi32>
    %637 = arith.sitofp %636 : vector<1x128xi32> to vector<1x128xf32>
    %638 = arith.addf %634, %637 : vector<1x128xf32>
    %639 = arith.cmpf olt, %403, %84 : vector<1x128xf32>
    %640 = arith.extui %639 : vector<1x128xi1> to vector<1x128xi32>
    %641 = arith.sitofp %640 : vector<1x128xi32> to vector<1x128xf32>
    %642 = arith.addf %638, %641 : vector<1x128xf32>
    %643 = arith.cmpf olt, %432, %84 : vector<1x128xf32>
    %644 = arith.extui %643 : vector<1x128xi1> to vector<1x128xi32>
    %645 = arith.sitofp %644 : vector<1x128xi32> to vector<1x128xf32>
    %646 = arith.addf %642, %645 : vector<1x128xf32>
    %647 = arith.cmpf olt, %461, %84 : vector<1x128xf32>
    %648 = arith.extui %647 : vector<1x128xi1> to vector<1x128xi32>
    %649 = arith.sitofp %648 : vector<1x128xi32> to vector<1x128xf32>
    %650 = arith.addf %646, %649 : vector<1x128xf32>
    %cst_150 = arith.constant 0.000000e+00 : f32
    %651 = vector.broadcast %cst_150 : f32 to vector<1x128xf32>
    %652 = arith.cmpf ole, %26, %113 : vector<1x128xf32>
    %653 = arith.extui %652 : vector<1x128xi1> to vector<1x128xi32>
    %654 = arith.sitofp %653 : vector<1x128xi32> to vector<1x128xf32>
    %655 = arith.addf %651, %654 : vector<1x128xf32>
    %656 = arith.cmpf ole, %55, %113 : vector<1x128xf32>
    %657 = arith.extui %656 : vector<1x128xi1> to vector<1x128xi32>
    %658 = arith.sitofp %657 : vector<1x128xi32> to vector<1x128xf32>
    %659 = arith.addf %655, %658 : vector<1x128xf32>
    %660 = arith.cmpf ole, %84, %113 : vector<1x128xf32>
    %661 = arith.extui %660 : vector<1x128xi1> to vector<1x128xi32>
    %662 = arith.sitofp %661 : vector<1x128xi32> to vector<1x128xf32>
    %663 = arith.addf %659, %662 : vector<1x128xf32>
    %664 = arith.cmpf olt, %142, %113 : vector<1x128xf32>
    %665 = arith.extui %664 : vector<1x128xi1> to vector<1x128xi32>
    %666 = arith.sitofp %665 : vector<1x128xi32> to vector<1x128xf32>
    %667 = arith.addf %663, %666 : vector<1x128xf32>
    %668 = arith.cmpf olt, %171, %113 : vector<1x128xf32>
    %669 = arith.extui %668 : vector<1x128xi1> to vector<1x128xi32>
    %670 = arith.sitofp %669 : vector<1x128xi32> to vector<1x128xf32>
    %671 = arith.addf %667, %670 : vector<1x128xf32>
    %672 = arith.cmpf olt, %200, %113 : vector<1x128xf32>
    %673 = arith.extui %672 : vector<1x128xi1> to vector<1x128xi32>
    %674 = arith.sitofp %673 : vector<1x128xi32> to vector<1x128xf32>
    %675 = arith.addf %671, %674 : vector<1x128xf32>
    %676 = arith.cmpf olt, %229, %113 : vector<1x128xf32>
    %677 = arith.extui %676 : vector<1x128xi1> to vector<1x128xi32>
    %678 = arith.sitofp %677 : vector<1x128xi32> to vector<1x128xf32>
    %679 = arith.addf %675, %678 : vector<1x128xf32>
    %680 = arith.cmpf olt, %258, %113 : vector<1x128xf32>
    %681 = arith.extui %680 : vector<1x128xi1> to vector<1x128xi32>
    %682 = arith.sitofp %681 : vector<1x128xi32> to vector<1x128xf32>
    %683 = arith.addf %679, %682 : vector<1x128xf32>
    %684 = arith.cmpf olt, %287, %113 : vector<1x128xf32>
    %685 = arith.extui %684 : vector<1x128xi1> to vector<1x128xi32>
    %686 = arith.sitofp %685 : vector<1x128xi32> to vector<1x128xf32>
    %687 = arith.addf %683, %686 : vector<1x128xf32>
    %688 = arith.cmpf olt, %316, %113 : vector<1x128xf32>
    %689 = arith.extui %688 : vector<1x128xi1> to vector<1x128xi32>
    %690 = arith.sitofp %689 : vector<1x128xi32> to vector<1x128xf32>
    %691 = arith.addf %687, %690 : vector<1x128xf32>
    %692 = arith.cmpf olt, %345, %113 : vector<1x128xf32>
    %693 = arith.extui %692 : vector<1x128xi1> to vector<1x128xi32>
    %694 = arith.sitofp %693 : vector<1x128xi32> to vector<1x128xf32>
    %695 = arith.addf %691, %694 : vector<1x128xf32>
    %696 = arith.cmpf olt, %374, %113 : vector<1x128xf32>
    %697 = arith.extui %696 : vector<1x128xi1> to vector<1x128xi32>
    %698 = arith.sitofp %697 : vector<1x128xi32> to vector<1x128xf32>
    %699 = arith.addf %695, %698 : vector<1x128xf32>
    %700 = arith.cmpf olt, %403, %113 : vector<1x128xf32>
    %701 = arith.extui %700 : vector<1x128xi1> to vector<1x128xi32>
    %702 = arith.sitofp %701 : vector<1x128xi32> to vector<1x128xf32>
    %703 = arith.addf %699, %702 : vector<1x128xf32>
    %704 = arith.cmpf olt, %432, %113 : vector<1x128xf32>
    %705 = arith.extui %704 : vector<1x128xi1> to vector<1x128xi32>
    %706 = arith.sitofp %705 : vector<1x128xi32> to vector<1x128xf32>
    %707 = arith.addf %703, %706 : vector<1x128xf32>
    %708 = arith.cmpf olt, %461, %113 : vector<1x128xf32>
    %709 = arith.extui %708 : vector<1x128xi1> to vector<1x128xi32>
    %710 = arith.sitofp %709 : vector<1x128xi32> to vector<1x128xf32>
    %711 = arith.addf %707, %710 : vector<1x128xf32>
    %cst_151 = arith.constant 0.000000e+00 : f32
    %712 = vector.broadcast %cst_151 : f32 to vector<1x128xf32>
    %713 = arith.cmpf ole, %26, %142 : vector<1x128xf32>
    %714 = arith.extui %713 : vector<1x128xi1> to vector<1x128xi32>
    %715 = arith.sitofp %714 : vector<1x128xi32> to vector<1x128xf32>
    %716 = arith.addf %712, %715 : vector<1x128xf32>
    %717 = arith.cmpf ole, %55, %142 : vector<1x128xf32>
    %718 = arith.extui %717 : vector<1x128xi1> to vector<1x128xi32>
    %719 = arith.sitofp %718 : vector<1x128xi32> to vector<1x128xf32>
    %720 = arith.addf %716, %719 : vector<1x128xf32>
    %721 = arith.cmpf ole, %84, %142 : vector<1x128xf32>
    %722 = arith.extui %721 : vector<1x128xi1> to vector<1x128xi32>
    %723 = arith.sitofp %722 : vector<1x128xi32> to vector<1x128xf32>
    %724 = arith.addf %720, %723 : vector<1x128xf32>
    %725 = arith.cmpf ole, %113, %142 : vector<1x128xf32>
    %726 = arith.extui %725 : vector<1x128xi1> to vector<1x128xi32>
    %727 = arith.sitofp %726 : vector<1x128xi32> to vector<1x128xf32>
    %728 = arith.addf %724, %727 : vector<1x128xf32>
    %729 = arith.cmpf olt, %171, %142 : vector<1x128xf32>
    %730 = arith.extui %729 : vector<1x128xi1> to vector<1x128xi32>
    %731 = arith.sitofp %730 : vector<1x128xi32> to vector<1x128xf32>
    %732 = arith.addf %728, %731 : vector<1x128xf32>
    %733 = arith.cmpf olt, %200, %142 : vector<1x128xf32>
    %734 = arith.extui %733 : vector<1x128xi1> to vector<1x128xi32>
    %735 = arith.sitofp %734 : vector<1x128xi32> to vector<1x128xf32>
    %736 = arith.addf %732, %735 : vector<1x128xf32>
    %737 = arith.cmpf olt, %229, %142 : vector<1x128xf32>
    %738 = arith.extui %737 : vector<1x128xi1> to vector<1x128xi32>
    %739 = arith.sitofp %738 : vector<1x128xi32> to vector<1x128xf32>
    %740 = arith.addf %736, %739 : vector<1x128xf32>
    %741 = arith.cmpf olt, %258, %142 : vector<1x128xf32>
    %742 = arith.extui %741 : vector<1x128xi1> to vector<1x128xi32>
    %743 = arith.sitofp %742 : vector<1x128xi32> to vector<1x128xf32>
    %744 = arith.addf %740, %743 : vector<1x128xf32>
    %745 = arith.cmpf olt, %287, %142 : vector<1x128xf32>
    %746 = arith.extui %745 : vector<1x128xi1> to vector<1x128xi32>
    %747 = arith.sitofp %746 : vector<1x128xi32> to vector<1x128xf32>
    %748 = arith.addf %744, %747 : vector<1x128xf32>
    %749 = arith.cmpf olt, %316, %142 : vector<1x128xf32>
    %750 = arith.extui %749 : vector<1x128xi1> to vector<1x128xi32>
    %751 = arith.sitofp %750 : vector<1x128xi32> to vector<1x128xf32>
    %752 = arith.addf %748, %751 : vector<1x128xf32>
    %753 = arith.cmpf olt, %345, %142 : vector<1x128xf32>
    %754 = arith.extui %753 : vector<1x128xi1> to vector<1x128xi32>
    %755 = arith.sitofp %754 : vector<1x128xi32> to vector<1x128xf32>
    %756 = arith.addf %752, %755 : vector<1x128xf32>
    %757 = arith.cmpf olt, %374, %142 : vector<1x128xf32>
    %758 = arith.extui %757 : vector<1x128xi1> to vector<1x128xi32>
    %759 = arith.sitofp %758 : vector<1x128xi32> to vector<1x128xf32>
    %760 = arith.addf %756, %759 : vector<1x128xf32>
    %761 = arith.cmpf olt, %403, %142 : vector<1x128xf32>
    %762 = arith.extui %761 : vector<1x128xi1> to vector<1x128xi32>
    %763 = arith.sitofp %762 : vector<1x128xi32> to vector<1x128xf32>
    %764 = arith.addf %760, %763 : vector<1x128xf32>
    %765 = arith.cmpf olt, %432, %142 : vector<1x128xf32>
    %766 = arith.extui %765 : vector<1x128xi1> to vector<1x128xi32>
    %767 = arith.sitofp %766 : vector<1x128xi32> to vector<1x128xf32>
    %768 = arith.addf %764, %767 : vector<1x128xf32>
    %769 = arith.cmpf olt, %461, %142 : vector<1x128xf32>
    %770 = arith.extui %769 : vector<1x128xi1> to vector<1x128xi32>
    %771 = arith.sitofp %770 : vector<1x128xi32> to vector<1x128xf32>
    %772 = arith.addf %768, %771 : vector<1x128xf32>
    %cst_152 = arith.constant 0.000000e+00 : f32
    %773 = vector.broadcast %cst_152 : f32 to vector<1x128xf32>
    %774 = arith.cmpf ole, %26, %171 : vector<1x128xf32>
    %775 = arith.extui %774 : vector<1x128xi1> to vector<1x128xi32>
    %776 = arith.sitofp %775 : vector<1x128xi32> to vector<1x128xf32>
    %777 = arith.addf %773, %776 : vector<1x128xf32>
    %778 = arith.cmpf ole, %55, %171 : vector<1x128xf32>
    %779 = arith.extui %778 : vector<1x128xi1> to vector<1x128xi32>
    %780 = arith.sitofp %779 : vector<1x128xi32> to vector<1x128xf32>
    %781 = arith.addf %777, %780 : vector<1x128xf32>
    %782 = arith.cmpf ole, %84, %171 : vector<1x128xf32>
    %783 = arith.extui %782 : vector<1x128xi1> to vector<1x128xi32>
    %784 = arith.sitofp %783 : vector<1x128xi32> to vector<1x128xf32>
    %785 = arith.addf %781, %784 : vector<1x128xf32>
    %786 = arith.cmpf ole, %113, %171 : vector<1x128xf32>
    %787 = arith.extui %786 : vector<1x128xi1> to vector<1x128xi32>
    %788 = arith.sitofp %787 : vector<1x128xi32> to vector<1x128xf32>
    %789 = arith.addf %785, %788 : vector<1x128xf32>
    %790 = arith.cmpf ole, %142, %171 : vector<1x128xf32>
    %791 = arith.extui %790 : vector<1x128xi1> to vector<1x128xi32>
    %792 = arith.sitofp %791 : vector<1x128xi32> to vector<1x128xf32>
    %793 = arith.addf %789, %792 : vector<1x128xf32>
    %794 = arith.cmpf olt, %200, %171 : vector<1x128xf32>
    %795 = arith.extui %794 : vector<1x128xi1> to vector<1x128xi32>
    %796 = arith.sitofp %795 : vector<1x128xi32> to vector<1x128xf32>
    %797 = arith.addf %793, %796 : vector<1x128xf32>
    %798 = arith.cmpf olt, %229, %171 : vector<1x128xf32>
    %799 = arith.extui %798 : vector<1x128xi1> to vector<1x128xi32>
    %800 = arith.sitofp %799 : vector<1x128xi32> to vector<1x128xf32>
    %801 = arith.addf %797, %800 : vector<1x128xf32>
    %802 = arith.cmpf olt, %258, %171 : vector<1x128xf32>
    %803 = arith.extui %802 : vector<1x128xi1> to vector<1x128xi32>
    %804 = arith.sitofp %803 : vector<1x128xi32> to vector<1x128xf32>
    %805 = arith.addf %801, %804 : vector<1x128xf32>
    %806 = arith.cmpf olt, %287, %171 : vector<1x128xf32>
    %807 = arith.extui %806 : vector<1x128xi1> to vector<1x128xi32>
    %808 = arith.sitofp %807 : vector<1x128xi32> to vector<1x128xf32>
    %809 = arith.addf %805, %808 : vector<1x128xf32>
    %810 = arith.cmpf olt, %316, %171 : vector<1x128xf32>
    %811 = arith.extui %810 : vector<1x128xi1> to vector<1x128xi32>
    %812 = arith.sitofp %811 : vector<1x128xi32> to vector<1x128xf32>
    %813 = arith.addf %809, %812 : vector<1x128xf32>
    %814 = arith.cmpf olt, %345, %171 : vector<1x128xf32>
    %815 = arith.extui %814 : vector<1x128xi1> to vector<1x128xi32>
    %816 = arith.sitofp %815 : vector<1x128xi32> to vector<1x128xf32>
    %817 = arith.addf %813, %816 : vector<1x128xf32>
    %818 = arith.cmpf olt, %374, %171 : vector<1x128xf32>
    %819 = arith.extui %818 : vector<1x128xi1> to vector<1x128xi32>
    %820 = arith.sitofp %819 : vector<1x128xi32> to vector<1x128xf32>
    %821 = arith.addf %817, %820 : vector<1x128xf32>
    %822 = arith.cmpf olt, %403, %171 : vector<1x128xf32>
    %823 = arith.extui %822 : vector<1x128xi1> to vector<1x128xi32>
    %824 = arith.sitofp %823 : vector<1x128xi32> to vector<1x128xf32>
    %825 = arith.addf %821, %824 : vector<1x128xf32>
    %826 = arith.cmpf olt, %432, %171 : vector<1x128xf32>
    %827 = arith.extui %826 : vector<1x128xi1> to vector<1x128xi32>
    %828 = arith.sitofp %827 : vector<1x128xi32> to vector<1x128xf32>
    %829 = arith.addf %825, %828 : vector<1x128xf32>
    %830 = arith.cmpf olt, %461, %171 : vector<1x128xf32>
    %831 = arith.extui %830 : vector<1x128xi1> to vector<1x128xi32>
    %832 = arith.sitofp %831 : vector<1x128xi32> to vector<1x128xf32>
    %833 = arith.addf %829, %832 : vector<1x128xf32>
    %cst_153 = arith.constant 0.000000e+00 : f32
    %834 = vector.broadcast %cst_153 : f32 to vector<1x128xf32>
    %835 = arith.cmpf ole, %26, %200 : vector<1x128xf32>
    %836 = arith.extui %835 : vector<1x128xi1> to vector<1x128xi32>
    %837 = arith.sitofp %836 : vector<1x128xi32> to vector<1x128xf32>
    %838 = arith.addf %834, %837 : vector<1x128xf32>
    %839 = arith.cmpf ole, %55, %200 : vector<1x128xf32>
    %840 = arith.extui %839 : vector<1x128xi1> to vector<1x128xi32>
    %841 = arith.sitofp %840 : vector<1x128xi32> to vector<1x128xf32>
    %842 = arith.addf %838, %841 : vector<1x128xf32>
    %843 = arith.cmpf ole, %84, %200 : vector<1x128xf32>
    %844 = arith.extui %843 : vector<1x128xi1> to vector<1x128xi32>
    %845 = arith.sitofp %844 : vector<1x128xi32> to vector<1x128xf32>
    %846 = arith.addf %842, %845 : vector<1x128xf32>
    %847 = arith.cmpf ole, %113, %200 : vector<1x128xf32>
    %848 = arith.extui %847 : vector<1x128xi1> to vector<1x128xi32>
    %849 = arith.sitofp %848 : vector<1x128xi32> to vector<1x128xf32>
    %850 = arith.addf %846, %849 : vector<1x128xf32>
    %851 = arith.cmpf ole, %142, %200 : vector<1x128xf32>
    %852 = arith.extui %851 : vector<1x128xi1> to vector<1x128xi32>
    %853 = arith.sitofp %852 : vector<1x128xi32> to vector<1x128xf32>
    %854 = arith.addf %850, %853 : vector<1x128xf32>
    %855 = arith.cmpf ole, %171, %200 : vector<1x128xf32>
    %856 = arith.extui %855 : vector<1x128xi1> to vector<1x128xi32>
    %857 = arith.sitofp %856 : vector<1x128xi32> to vector<1x128xf32>
    %858 = arith.addf %854, %857 : vector<1x128xf32>
    %859 = arith.cmpf olt, %229, %200 : vector<1x128xf32>
    %860 = arith.extui %859 : vector<1x128xi1> to vector<1x128xi32>
    %861 = arith.sitofp %860 : vector<1x128xi32> to vector<1x128xf32>
    %862 = arith.addf %858, %861 : vector<1x128xf32>
    %863 = arith.cmpf olt, %258, %200 : vector<1x128xf32>
    %864 = arith.extui %863 : vector<1x128xi1> to vector<1x128xi32>
    %865 = arith.sitofp %864 : vector<1x128xi32> to vector<1x128xf32>
    %866 = arith.addf %862, %865 : vector<1x128xf32>
    %867 = arith.cmpf olt, %287, %200 : vector<1x128xf32>
    %868 = arith.extui %867 : vector<1x128xi1> to vector<1x128xi32>
    %869 = arith.sitofp %868 : vector<1x128xi32> to vector<1x128xf32>
    %870 = arith.addf %866, %869 : vector<1x128xf32>
    %871 = arith.cmpf olt, %316, %200 : vector<1x128xf32>
    %872 = arith.extui %871 : vector<1x128xi1> to vector<1x128xi32>
    %873 = arith.sitofp %872 : vector<1x128xi32> to vector<1x128xf32>
    %874 = arith.addf %870, %873 : vector<1x128xf32>
    %875 = arith.cmpf olt, %345, %200 : vector<1x128xf32>
    %876 = arith.extui %875 : vector<1x128xi1> to vector<1x128xi32>
    %877 = arith.sitofp %876 : vector<1x128xi32> to vector<1x128xf32>
    %878 = arith.addf %874, %877 : vector<1x128xf32>
    %879 = arith.cmpf olt, %374, %200 : vector<1x128xf32>
    %880 = arith.extui %879 : vector<1x128xi1> to vector<1x128xi32>
    %881 = arith.sitofp %880 : vector<1x128xi32> to vector<1x128xf32>
    %882 = arith.addf %878, %881 : vector<1x128xf32>
    %883 = arith.cmpf olt, %403, %200 : vector<1x128xf32>
    %884 = arith.extui %883 : vector<1x128xi1> to vector<1x128xi32>
    %885 = arith.sitofp %884 : vector<1x128xi32> to vector<1x128xf32>
    %886 = arith.addf %882, %885 : vector<1x128xf32>
    %887 = arith.cmpf olt, %432, %200 : vector<1x128xf32>
    %888 = arith.extui %887 : vector<1x128xi1> to vector<1x128xi32>
    %889 = arith.sitofp %888 : vector<1x128xi32> to vector<1x128xf32>
    %890 = arith.addf %886, %889 : vector<1x128xf32>
    %891 = arith.cmpf olt, %461, %200 : vector<1x128xf32>
    %892 = arith.extui %891 : vector<1x128xi1> to vector<1x128xi32>
    %893 = arith.sitofp %892 : vector<1x128xi32> to vector<1x128xf32>
    %894 = arith.addf %890, %893 : vector<1x128xf32>
    %cst_154 = arith.constant 0.000000e+00 : f32
    %895 = vector.broadcast %cst_154 : f32 to vector<1x128xf32>
    %896 = arith.cmpf ole, %26, %229 : vector<1x128xf32>
    %897 = arith.extui %896 : vector<1x128xi1> to vector<1x128xi32>
    %898 = arith.sitofp %897 : vector<1x128xi32> to vector<1x128xf32>
    %899 = arith.addf %895, %898 : vector<1x128xf32>
    %900 = arith.cmpf ole, %55, %229 : vector<1x128xf32>
    %901 = arith.extui %900 : vector<1x128xi1> to vector<1x128xi32>
    %902 = arith.sitofp %901 : vector<1x128xi32> to vector<1x128xf32>
    %903 = arith.addf %899, %902 : vector<1x128xf32>
    %904 = arith.cmpf ole, %84, %229 : vector<1x128xf32>
    %905 = arith.extui %904 : vector<1x128xi1> to vector<1x128xi32>
    %906 = arith.sitofp %905 : vector<1x128xi32> to vector<1x128xf32>
    %907 = arith.addf %903, %906 : vector<1x128xf32>
    %908 = arith.cmpf ole, %113, %229 : vector<1x128xf32>
    %909 = arith.extui %908 : vector<1x128xi1> to vector<1x128xi32>
    %910 = arith.sitofp %909 : vector<1x128xi32> to vector<1x128xf32>
    %911 = arith.addf %907, %910 : vector<1x128xf32>
    %912 = arith.cmpf ole, %142, %229 : vector<1x128xf32>
    %913 = arith.extui %912 : vector<1x128xi1> to vector<1x128xi32>
    %914 = arith.sitofp %913 : vector<1x128xi32> to vector<1x128xf32>
    %915 = arith.addf %911, %914 : vector<1x128xf32>
    %916 = arith.cmpf ole, %171, %229 : vector<1x128xf32>
    %917 = arith.extui %916 : vector<1x128xi1> to vector<1x128xi32>
    %918 = arith.sitofp %917 : vector<1x128xi32> to vector<1x128xf32>
    %919 = arith.addf %915, %918 : vector<1x128xf32>
    %920 = arith.cmpf ole, %200, %229 : vector<1x128xf32>
    %921 = arith.extui %920 : vector<1x128xi1> to vector<1x128xi32>
    %922 = arith.sitofp %921 : vector<1x128xi32> to vector<1x128xf32>
    %923 = arith.addf %919, %922 : vector<1x128xf32>
    %924 = arith.cmpf olt, %258, %229 : vector<1x128xf32>
    %925 = arith.extui %924 : vector<1x128xi1> to vector<1x128xi32>
    %926 = arith.sitofp %925 : vector<1x128xi32> to vector<1x128xf32>
    %927 = arith.addf %923, %926 : vector<1x128xf32>
    %928 = arith.cmpf olt, %287, %229 : vector<1x128xf32>
    %929 = arith.extui %928 : vector<1x128xi1> to vector<1x128xi32>
    %930 = arith.sitofp %929 : vector<1x128xi32> to vector<1x128xf32>
    %931 = arith.addf %927, %930 : vector<1x128xf32>
    %932 = arith.cmpf olt, %316, %229 : vector<1x128xf32>
    %933 = arith.extui %932 : vector<1x128xi1> to vector<1x128xi32>
    %934 = arith.sitofp %933 : vector<1x128xi32> to vector<1x128xf32>
    %935 = arith.addf %931, %934 : vector<1x128xf32>
    %936 = arith.cmpf olt, %345, %229 : vector<1x128xf32>
    %937 = arith.extui %936 : vector<1x128xi1> to vector<1x128xi32>
    %938 = arith.sitofp %937 : vector<1x128xi32> to vector<1x128xf32>
    %939 = arith.addf %935, %938 : vector<1x128xf32>
    %940 = arith.cmpf olt, %374, %229 : vector<1x128xf32>
    %941 = arith.extui %940 : vector<1x128xi1> to vector<1x128xi32>
    %942 = arith.sitofp %941 : vector<1x128xi32> to vector<1x128xf32>
    %943 = arith.addf %939, %942 : vector<1x128xf32>
    %944 = arith.cmpf olt, %403, %229 : vector<1x128xf32>
    %945 = arith.extui %944 : vector<1x128xi1> to vector<1x128xi32>
    %946 = arith.sitofp %945 : vector<1x128xi32> to vector<1x128xf32>
    %947 = arith.addf %943, %946 : vector<1x128xf32>
    %948 = arith.cmpf olt, %432, %229 : vector<1x128xf32>
    %949 = arith.extui %948 : vector<1x128xi1> to vector<1x128xi32>
    %950 = arith.sitofp %949 : vector<1x128xi32> to vector<1x128xf32>
    %951 = arith.addf %947, %950 : vector<1x128xf32>
    %952 = arith.cmpf olt, %461, %229 : vector<1x128xf32>
    %953 = arith.extui %952 : vector<1x128xi1> to vector<1x128xi32>
    %954 = arith.sitofp %953 : vector<1x128xi32> to vector<1x128xf32>
    %955 = arith.addf %951, %954 : vector<1x128xf32>
    %cst_155 = arith.constant 0.000000e+00 : f32
    %956 = vector.broadcast %cst_155 : f32 to vector<1x128xf32>
    %957 = arith.cmpf ole, %26, %258 : vector<1x128xf32>
    %958 = arith.extui %957 : vector<1x128xi1> to vector<1x128xi32>
    %959 = arith.sitofp %958 : vector<1x128xi32> to vector<1x128xf32>
    %960 = arith.addf %956, %959 : vector<1x128xf32>
    %961 = arith.cmpf ole, %55, %258 : vector<1x128xf32>
    %962 = arith.extui %961 : vector<1x128xi1> to vector<1x128xi32>
    %963 = arith.sitofp %962 : vector<1x128xi32> to vector<1x128xf32>
    %964 = arith.addf %960, %963 : vector<1x128xf32>
    %965 = arith.cmpf ole, %84, %258 : vector<1x128xf32>
    %966 = arith.extui %965 : vector<1x128xi1> to vector<1x128xi32>
    %967 = arith.sitofp %966 : vector<1x128xi32> to vector<1x128xf32>
    %968 = arith.addf %964, %967 : vector<1x128xf32>
    %969 = arith.cmpf ole, %113, %258 : vector<1x128xf32>
    %970 = arith.extui %969 : vector<1x128xi1> to vector<1x128xi32>
    %971 = arith.sitofp %970 : vector<1x128xi32> to vector<1x128xf32>
    %972 = arith.addf %968, %971 : vector<1x128xf32>
    %973 = arith.cmpf ole, %142, %258 : vector<1x128xf32>
    %974 = arith.extui %973 : vector<1x128xi1> to vector<1x128xi32>
    %975 = arith.sitofp %974 : vector<1x128xi32> to vector<1x128xf32>
    %976 = arith.addf %972, %975 : vector<1x128xf32>
    %977 = arith.cmpf ole, %171, %258 : vector<1x128xf32>
    %978 = arith.extui %977 : vector<1x128xi1> to vector<1x128xi32>
    %979 = arith.sitofp %978 : vector<1x128xi32> to vector<1x128xf32>
    %980 = arith.addf %976, %979 : vector<1x128xf32>
    %981 = arith.cmpf ole, %200, %258 : vector<1x128xf32>
    %982 = arith.extui %981 : vector<1x128xi1> to vector<1x128xi32>
    %983 = arith.sitofp %982 : vector<1x128xi32> to vector<1x128xf32>
    %984 = arith.addf %980, %983 : vector<1x128xf32>
    %985 = arith.cmpf ole, %229, %258 : vector<1x128xf32>
    %986 = arith.extui %985 : vector<1x128xi1> to vector<1x128xi32>
    %987 = arith.sitofp %986 : vector<1x128xi32> to vector<1x128xf32>
    %988 = arith.addf %984, %987 : vector<1x128xf32>
    %989 = arith.cmpf olt, %287, %258 : vector<1x128xf32>
    %990 = arith.extui %989 : vector<1x128xi1> to vector<1x128xi32>
    %991 = arith.sitofp %990 : vector<1x128xi32> to vector<1x128xf32>
    %992 = arith.addf %988, %991 : vector<1x128xf32>
    %993 = arith.cmpf olt, %316, %258 : vector<1x128xf32>
    %994 = arith.extui %993 : vector<1x128xi1> to vector<1x128xi32>
    %995 = arith.sitofp %994 : vector<1x128xi32> to vector<1x128xf32>
    %996 = arith.addf %992, %995 : vector<1x128xf32>
    %997 = arith.cmpf olt, %345, %258 : vector<1x128xf32>
    %998 = arith.extui %997 : vector<1x128xi1> to vector<1x128xi32>
    %999 = arith.sitofp %998 : vector<1x128xi32> to vector<1x128xf32>
    %1000 = arith.addf %996, %999 : vector<1x128xf32>
    %1001 = arith.cmpf olt, %374, %258 : vector<1x128xf32>
    %1002 = arith.extui %1001 : vector<1x128xi1> to vector<1x128xi32>
    %1003 = arith.sitofp %1002 : vector<1x128xi32> to vector<1x128xf32>
    %1004 = arith.addf %1000, %1003 : vector<1x128xf32>
    %1005 = arith.cmpf olt, %403, %258 : vector<1x128xf32>
    %1006 = arith.extui %1005 : vector<1x128xi1> to vector<1x128xi32>
    %1007 = arith.sitofp %1006 : vector<1x128xi32> to vector<1x128xf32>
    %1008 = arith.addf %1004, %1007 : vector<1x128xf32>
    %1009 = arith.cmpf olt, %432, %258 : vector<1x128xf32>
    %1010 = arith.extui %1009 : vector<1x128xi1> to vector<1x128xi32>
    %1011 = arith.sitofp %1010 : vector<1x128xi32> to vector<1x128xf32>
    %1012 = arith.addf %1008, %1011 : vector<1x128xf32>
    %1013 = arith.cmpf olt, %461, %258 : vector<1x128xf32>
    %1014 = arith.extui %1013 : vector<1x128xi1> to vector<1x128xi32>
    %1015 = arith.sitofp %1014 : vector<1x128xi32> to vector<1x128xf32>
    %1016 = arith.addf %1012, %1015 : vector<1x128xf32>
    %cst_156 = arith.constant 0.000000e+00 : f32
    %1017 = vector.broadcast %cst_156 : f32 to vector<1x128xf32>
    %1018 = arith.cmpf ole, %26, %287 : vector<1x128xf32>
    %1019 = arith.extui %1018 : vector<1x128xi1> to vector<1x128xi32>
    %1020 = arith.sitofp %1019 : vector<1x128xi32> to vector<1x128xf32>
    %1021 = arith.addf %1017, %1020 : vector<1x128xf32>
    %1022 = arith.cmpf ole, %55, %287 : vector<1x128xf32>
    %1023 = arith.extui %1022 : vector<1x128xi1> to vector<1x128xi32>
    %1024 = arith.sitofp %1023 : vector<1x128xi32> to vector<1x128xf32>
    %1025 = arith.addf %1021, %1024 : vector<1x128xf32>
    %1026 = arith.cmpf ole, %84, %287 : vector<1x128xf32>
    %1027 = arith.extui %1026 : vector<1x128xi1> to vector<1x128xi32>
    %1028 = arith.sitofp %1027 : vector<1x128xi32> to vector<1x128xf32>
    %1029 = arith.addf %1025, %1028 : vector<1x128xf32>
    %1030 = arith.cmpf ole, %113, %287 : vector<1x128xf32>
    %1031 = arith.extui %1030 : vector<1x128xi1> to vector<1x128xi32>
    %1032 = arith.sitofp %1031 : vector<1x128xi32> to vector<1x128xf32>
    %1033 = arith.addf %1029, %1032 : vector<1x128xf32>
    %1034 = arith.cmpf ole, %142, %287 : vector<1x128xf32>
    %1035 = arith.extui %1034 : vector<1x128xi1> to vector<1x128xi32>
    %1036 = arith.sitofp %1035 : vector<1x128xi32> to vector<1x128xf32>
    %1037 = arith.addf %1033, %1036 : vector<1x128xf32>
    %1038 = arith.cmpf ole, %171, %287 : vector<1x128xf32>
    %1039 = arith.extui %1038 : vector<1x128xi1> to vector<1x128xi32>
    %1040 = arith.sitofp %1039 : vector<1x128xi32> to vector<1x128xf32>
    %1041 = arith.addf %1037, %1040 : vector<1x128xf32>
    %1042 = arith.cmpf ole, %200, %287 : vector<1x128xf32>
    %1043 = arith.extui %1042 : vector<1x128xi1> to vector<1x128xi32>
    %1044 = arith.sitofp %1043 : vector<1x128xi32> to vector<1x128xf32>
    %1045 = arith.addf %1041, %1044 : vector<1x128xf32>
    %1046 = arith.cmpf ole, %229, %287 : vector<1x128xf32>
    %1047 = arith.extui %1046 : vector<1x128xi1> to vector<1x128xi32>
    %1048 = arith.sitofp %1047 : vector<1x128xi32> to vector<1x128xf32>
    %1049 = arith.addf %1045, %1048 : vector<1x128xf32>
    %1050 = arith.cmpf ole, %258, %287 : vector<1x128xf32>
    %1051 = arith.extui %1050 : vector<1x128xi1> to vector<1x128xi32>
    %1052 = arith.sitofp %1051 : vector<1x128xi32> to vector<1x128xf32>
    %1053 = arith.addf %1049, %1052 : vector<1x128xf32>
    %1054 = arith.cmpf olt, %316, %287 : vector<1x128xf32>
    %1055 = arith.extui %1054 : vector<1x128xi1> to vector<1x128xi32>
    %1056 = arith.sitofp %1055 : vector<1x128xi32> to vector<1x128xf32>
    %1057 = arith.addf %1053, %1056 : vector<1x128xf32>
    %1058 = arith.cmpf olt, %345, %287 : vector<1x128xf32>
    %1059 = arith.extui %1058 : vector<1x128xi1> to vector<1x128xi32>
    %1060 = arith.sitofp %1059 : vector<1x128xi32> to vector<1x128xf32>
    %1061 = arith.addf %1057, %1060 : vector<1x128xf32>
    %1062 = arith.cmpf olt, %374, %287 : vector<1x128xf32>
    %1063 = arith.extui %1062 : vector<1x128xi1> to vector<1x128xi32>
    %1064 = arith.sitofp %1063 : vector<1x128xi32> to vector<1x128xf32>
    %1065 = arith.addf %1061, %1064 : vector<1x128xf32>
    %1066 = arith.cmpf olt, %403, %287 : vector<1x128xf32>
    %1067 = arith.extui %1066 : vector<1x128xi1> to vector<1x128xi32>
    %1068 = arith.sitofp %1067 : vector<1x128xi32> to vector<1x128xf32>
    %1069 = arith.addf %1065, %1068 : vector<1x128xf32>
    %1070 = arith.cmpf olt, %432, %287 : vector<1x128xf32>
    %1071 = arith.extui %1070 : vector<1x128xi1> to vector<1x128xi32>
    %1072 = arith.sitofp %1071 : vector<1x128xi32> to vector<1x128xf32>
    %1073 = arith.addf %1069, %1072 : vector<1x128xf32>
    %1074 = arith.cmpf olt, %461, %287 : vector<1x128xf32>
    %1075 = arith.extui %1074 : vector<1x128xi1> to vector<1x128xi32>
    %1076 = arith.sitofp %1075 : vector<1x128xi32> to vector<1x128xf32>
    %1077 = arith.addf %1073, %1076 : vector<1x128xf32>
    %cst_157 = arith.constant 0.000000e+00 : f32
    %1078 = vector.broadcast %cst_157 : f32 to vector<1x128xf32>
    %1079 = arith.cmpf ole, %26, %316 : vector<1x128xf32>
    %1080 = arith.extui %1079 : vector<1x128xi1> to vector<1x128xi32>
    %1081 = arith.sitofp %1080 : vector<1x128xi32> to vector<1x128xf32>
    %1082 = arith.addf %1078, %1081 : vector<1x128xf32>
    %1083 = arith.cmpf ole, %55, %316 : vector<1x128xf32>
    %1084 = arith.extui %1083 : vector<1x128xi1> to vector<1x128xi32>
    %1085 = arith.sitofp %1084 : vector<1x128xi32> to vector<1x128xf32>
    %1086 = arith.addf %1082, %1085 : vector<1x128xf32>
    %1087 = arith.cmpf ole, %84, %316 : vector<1x128xf32>
    %1088 = arith.extui %1087 : vector<1x128xi1> to vector<1x128xi32>
    %1089 = arith.sitofp %1088 : vector<1x128xi32> to vector<1x128xf32>
    %1090 = arith.addf %1086, %1089 : vector<1x128xf32>
    %1091 = arith.cmpf ole, %113, %316 : vector<1x128xf32>
    %1092 = arith.extui %1091 : vector<1x128xi1> to vector<1x128xi32>
    %1093 = arith.sitofp %1092 : vector<1x128xi32> to vector<1x128xf32>
    %1094 = arith.addf %1090, %1093 : vector<1x128xf32>
    %1095 = arith.cmpf ole, %142, %316 : vector<1x128xf32>
    %1096 = arith.extui %1095 : vector<1x128xi1> to vector<1x128xi32>
    %1097 = arith.sitofp %1096 : vector<1x128xi32> to vector<1x128xf32>
    %1098 = arith.addf %1094, %1097 : vector<1x128xf32>
    %1099 = arith.cmpf ole, %171, %316 : vector<1x128xf32>
    %1100 = arith.extui %1099 : vector<1x128xi1> to vector<1x128xi32>
    %1101 = arith.sitofp %1100 : vector<1x128xi32> to vector<1x128xf32>
    %1102 = arith.addf %1098, %1101 : vector<1x128xf32>
    %1103 = arith.cmpf ole, %200, %316 : vector<1x128xf32>
    %1104 = arith.extui %1103 : vector<1x128xi1> to vector<1x128xi32>
    %1105 = arith.sitofp %1104 : vector<1x128xi32> to vector<1x128xf32>
    %1106 = arith.addf %1102, %1105 : vector<1x128xf32>
    %1107 = arith.cmpf ole, %229, %316 : vector<1x128xf32>
    %1108 = arith.extui %1107 : vector<1x128xi1> to vector<1x128xi32>
    %1109 = arith.sitofp %1108 : vector<1x128xi32> to vector<1x128xf32>
    %1110 = arith.addf %1106, %1109 : vector<1x128xf32>
    %1111 = arith.cmpf ole, %258, %316 : vector<1x128xf32>
    %1112 = arith.extui %1111 : vector<1x128xi1> to vector<1x128xi32>
    %1113 = arith.sitofp %1112 : vector<1x128xi32> to vector<1x128xf32>
    %1114 = arith.addf %1110, %1113 : vector<1x128xf32>
    %1115 = arith.cmpf ole, %287, %316 : vector<1x128xf32>
    %1116 = arith.extui %1115 : vector<1x128xi1> to vector<1x128xi32>
    %1117 = arith.sitofp %1116 : vector<1x128xi32> to vector<1x128xf32>
    %1118 = arith.addf %1114, %1117 : vector<1x128xf32>
    %1119 = arith.cmpf olt, %345, %316 : vector<1x128xf32>
    %1120 = arith.extui %1119 : vector<1x128xi1> to vector<1x128xi32>
    %1121 = arith.sitofp %1120 : vector<1x128xi32> to vector<1x128xf32>
    %1122 = arith.addf %1118, %1121 : vector<1x128xf32>
    %1123 = arith.cmpf olt, %374, %316 : vector<1x128xf32>
    %1124 = arith.extui %1123 : vector<1x128xi1> to vector<1x128xi32>
    %1125 = arith.sitofp %1124 : vector<1x128xi32> to vector<1x128xf32>
    %1126 = arith.addf %1122, %1125 : vector<1x128xf32>
    %1127 = arith.cmpf olt, %403, %316 : vector<1x128xf32>
    %1128 = arith.extui %1127 : vector<1x128xi1> to vector<1x128xi32>
    %1129 = arith.sitofp %1128 : vector<1x128xi32> to vector<1x128xf32>
    %1130 = arith.addf %1126, %1129 : vector<1x128xf32>
    %1131 = arith.cmpf olt, %432, %316 : vector<1x128xf32>
    %1132 = arith.extui %1131 : vector<1x128xi1> to vector<1x128xi32>
    %1133 = arith.sitofp %1132 : vector<1x128xi32> to vector<1x128xf32>
    %1134 = arith.addf %1130, %1133 : vector<1x128xf32>
    %1135 = arith.cmpf olt, %461, %316 : vector<1x128xf32>
    %1136 = arith.extui %1135 : vector<1x128xi1> to vector<1x128xi32>
    %1137 = arith.sitofp %1136 : vector<1x128xi32> to vector<1x128xf32>
    %1138 = arith.addf %1134, %1137 : vector<1x128xf32>
    %cst_158 = arith.constant 0.000000e+00 : f32
    %1139 = vector.broadcast %cst_158 : f32 to vector<1x128xf32>
    %1140 = arith.cmpf ole, %26, %345 : vector<1x128xf32>
    %1141 = arith.extui %1140 : vector<1x128xi1> to vector<1x128xi32>
    %1142 = arith.sitofp %1141 : vector<1x128xi32> to vector<1x128xf32>
    %1143 = arith.addf %1139, %1142 : vector<1x128xf32>
    %1144 = arith.cmpf ole, %55, %345 : vector<1x128xf32>
    %1145 = arith.extui %1144 : vector<1x128xi1> to vector<1x128xi32>
    %1146 = arith.sitofp %1145 : vector<1x128xi32> to vector<1x128xf32>
    %1147 = arith.addf %1143, %1146 : vector<1x128xf32>
    %1148 = arith.cmpf ole, %84, %345 : vector<1x128xf32>
    %1149 = arith.extui %1148 : vector<1x128xi1> to vector<1x128xi32>
    %1150 = arith.sitofp %1149 : vector<1x128xi32> to vector<1x128xf32>
    %1151 = arith.addf %1147, %1150 : vector<1x128xf32>
    %1152 = arith.cmpf ole, %113, %345 : vector<1x128xf32>
    %1153 = arith.extui %1152 : vector<1x128xi1> to vector<1x128xi32>
    %1154 = arith.sitofp %1153 : vector<1x128xi32> to vector<1x128xf32>
    %1155 = arith.addf %1151, %1154 : vector<1x128xf32>
    %1156 = arith.cmpf ole, %142, %345 : vector<1x128xf32>
    %1157 = arith.extui %1156 : vector<1x128xi1> to vector<1x128xi32>
    %1158 = arith.sitofp %1157 : vector<1x128xi32> to vector<1x128xf32>
    %1159 = arith.addf %1155, %1158 : vector<1x128xf32>
    %1160 = arith.cmpf ole, %171, %345 : vector<1x128xf32>
    %1161 = arith.extui %1160 : vector<1x128xi1> to vector<1x128xi32>
    %1162 = arith.sitofp %1161 : vector<1x128xi32> to vector<1x128xf32>
    %1163 = arith.addf %1159, %1162 : vector<1x128xf32>
    %1164 = arith.cmpf ole, %200, %345 : vector<1x128xf32>
    %1165 = arith.extui %1164 : vector<1x128xi1> to vector<1x128xi32>
    %1166 = arith.sitofp %1165 : vector<1x128xi32> to vector<1x128xf32>
    %1167 = arith.addf %1163, %1166 : vector<1x128xf32>
    %1168 = arith.cmpf ole, %229, %345 : vector<1x128xf32>
    %1169 = arith.extui %1168 : vector<1x128xi1> to vector<1x128xi32>
    %1170 = arith.sitofp %1169 : vector<1x128xi32> to vector<1x128xf32>
    %1171 = arith.addf %1167, %1170 : vector<1x128xf32>
    %1172 = arith.cmpf ole, %258, %345 : vector<1x128xf32>
    %1173 = arith.extui %1172 : vector<1x128xi1> to vector<1x128xi32>
    %1174 = arith.sitofp %1173 : vector<1x128xi32> to vector<1x128xf32>
    %1175 = arith.addf %1171, %1174 : vector<1x128xf32>
    %1176 = arith.cmpf ole, %287, %345 : vector<1x128xf32>
    %1177 = arith.extui %1176 : vector<1x128xi1> to vector<1x128xi32>
    %1178 = arith.sitofp %1177 : vector<1x128xi32> to vector<1x128xf32>
    %1179 = arith.addf %1175, %1178 : vector<1x128xf32>
    %1180 = arith.cmpf ole, %316, %345 : vector<1x128xf32>
    %1181 = arith.extui %1180 : vector<1x128xi1> to vector<1x128xi32>
    %1182 = arith.sitofp %1181 : vector<1x128xi32> to vector<1x128xf32>
    %1183 = arith.addf %1179, %1182 : vector<1x128xf32>
    %1184 = arith.cmpf olt, %374, %345 : vector<1x128xf32>
    %1185 = arith.extui %1184 : vector<1x128xi1> to vector<1x128xi32>
    %1186 = arith.sitofp %1185 : vector<1x128xi32> to vector<1x128xf32>
    %1187 = arith.addf %1183, %1186 : vector<1x128xf32>
    %1188 = arith.cmpf olt, %403, %345 : vector<1x128xf32>
    %1189 = arith.extui %1188 : vector<1x128xi1> to vector<1x128xi32>
    %1190 = arith.sitofp %1189 : vector<1x128xi32> to vector<1x128xf32>
    %1191 = arith.addf %1187, %1190 : vector<1x128xf32>
    %1192 = arith.cmpf olt, %432, %345 : vector<1x128xf32>
    %1193 = arith.extui %1192 : vector<1x128xi1> to vector<1x128xi32>
    %1194 = arith.sitofp %1193 : vector<1x128xi32> to vector<1x128xf32>
    %1195 = arith.addf %1191, %1194 : vector<1x128xf32>
    %1196 = arith.cmpf olt, %461, %345 : vector<1x128xf32>
    %1197 = arith.extui %1196 : vector<1x128xi1> to vector<1x128xi32>
    %1198 = arith.sitofp %1197 : vector<1x128xi32> to vector<1x128xf32>
    %1199 = arith.addf %1195, %1198 : vector<1x128xf32>
    %cst_159 = arith.constant 0.000000e+00 : f32
    %1200 = vector.broadcast %cst_159 : f32 to vector<1x128xf32>
    %1201 = arith.cmpf ole, %26, %374 : vector<1x128xf32>
    %1202 = arith.extui %1201 : vector<1x128xi1> to vector<1x128xi32>
    %1203 = arith.sitofp %1202 : vector<1x128xi32> to vector<1x128xf32>
    %1204 = arith.addf %1200, %1203 : vector<1x128xf32>
    %1205 = arith.cmpf ole, %55, %374 : vector<1x128xf32>
    %1206 = arith.extui %1205 : vector<1x128xi1> to vector<1x128xi32>
    %1207 = arith.sitofp %1206 : vector<1x128xi32> to vector<1x128xf32>
    %1208 = arith.addf %1204, %1207 : vector<1x128xf32>
    %1209 = arith.cmpf ole, %84, %374 : vector<1x128xf32>
    %1210 = arith.extui %1209 : vector<1x128xi1> to vector<1x128xi32>
    %1211 = arith.sitofp %1210 : vector<1x128xi32> to vector<1x128xf32>
    %1212 = arith.addf %1208, %1211 : vector<1x128xf32>
    %1213 = arith.cmpf ole, %113, %374 : vector<1x128xf32>
    %1214 = arith.extui %1213 : vector<1x128xi1> to vector<1x128xi32>
    %1215 = arith.sitofp %1214 : vector<1x128xi32> to vector<1x128xf32>
    %1216 = arith.addf %1212, %1215 : vector<1x128xf32>
    %1217 = arith.cmpf ole, %142, %374 : vector<1x128xf32>
    %1218 = arith.extui %1217 : vector<1x128xi1> to vector<1x128xi32>
    %1219 = arith.sitofp %1218 : vector<1x128xi32> to vector<1x128xf32>
    %1220 = arith.addf %1216, %1219 : vector<1x128xf32>
    %1221 = arith.cmpf ole, %171, %374 : vector<1x128xf32>
    %1222 = arith.extui %1221 : vector<1x128xi1> to vector<1x128xi32>
    %1223 = arith.sitofp %1222 : vector<1x128xi32> to vector<1x128xf32>
    %1224 = arith.addf %1220, %1223 : vector<1x128xf32>
    %1225 = arith.cmpf ole, %200, %374 : vector<1x128xf32>
    %1226 = arith.extui %1225 : vector<1x128xi1> to vector<1x128xi32>
    %1227 = arith.sitofp %1226 : vector<1x128xi32> to vector<1x128xf32>
    %1228 = arith.addf %1224, %1227 : vector<1x128xf32>
    %1229 = arith.cmpf ole, %229, %374 : vector<1x128xf32>
    %1230 = arith.extui %1229 : vector<1x128xi1> to vector<1x128xi32>
    %1231 = arith.sitofp %1230 : vector<1x128xi32> to vector<1x128xf32>
    %1232 = arith.addf %1228, %1231 : vector<1x128xf32>
    %1233 = arith.cmpf ole, %258, %374 : vector<1x128xf32>
    %1234 = arith.extui %1233 : vector<1x128xi1> to vector<1x128xi32>
    %1235 = arith.sitofp %1234 : vector<1x128xi32> to vector<1x128xf32>
    %1236 = arith.addf %1232, %1235 : vector<1x128xf32>
    %1237 = arith.cmpf ole, %287, %374 : vector<1x128xf32>
    %1238 = arith.extui %1237 : vector<1x128xi1> to vector<1x128xi32>
    %1239 = arith.sitofp %1238 : vector<1x128xi32> to vector<1x128xf32>
    %1240 = arith.addf %1236, %1239 : vector<1x128xf32>
    %1241 = arith.cmpf ole, %316, %374 : vector<1x128xf32>
    %1242 = arith.extui %1241 : vector<1x128xi1> to vector<1x128xi32>
    %1243 = arith.sitofp %1242 : vector<1x128xi32> to vector<1x128xf32>
    %1244 = arith.addf %1240, %1243 : vector<1x128xf32>
    %1245 = arith.cmpf ole, %345, %374 : vector<1x128xf32>
    %1246 = arith.extui %1245 : vector<1x128xi1> to vector<1x128xi32>
    %1247 = arith.sitofp %1246 : vector<1x128xi32> to vector<1x128xf32>
    %1248 = arith.addf %1244, %1247 : vector<1x128xf32>
    %1249 = arith.cmpf olt, %403, %374 : vector<1x128xf32>
    %1250 = arith.extui %1249 : vector<1x128xi1> to vector<1x128xi32>
    %1251 = arith.sitofp %1250 : vector<1x128xi32> to vector<1x128xf32>
    %1252 = arith.addf %1248, %1251 : vector<1x128xf32>
    %1253 = arith.cmpf olt, %432, %374 : vector<1x128xf32>
    %1254 = arith.extui %1253 : vector<1x128xi1> to vector<1x128xi32>
    %1255 = arith.sitofp %1254 : vector<1x128xi32> to vector<1x128xf32>
    %1256 = arith.addf %1252, %1255 : vector<1x128xf32>
    %1257 = arith.cmpf olt, %461, %374 : vector<1x128xf32>
    %1258 = arith.extui %1257 : vector<1x128xi1> to vector<1x128xi32>
    %1259 = arith.sitofp %1258 : vector<1x128xi32> to vector<1x128xf32>
    %1260 = arith.addf %1256, %1259 : vector<1x128xf32>
    %cst_160 = arith.constant 0.000000e+00 : f32
    %1261 = vector.broadcast %cst_160 : f32 to vector<1x128xf32>
    %1262 = arith.cmpf ole, %26, %403 : vector<1x128xf32>
    %1263 = arith.extui %1262 : vector<1x128xi1> to vector<1x128xi32>
    %1264 = arith.sitofp %1263 : vector<1x128xi32> to vector<1x128xf32>
    %1265 = arith.addf %1261, %1264 : vector<1x128xf32>
    %1266 = arith.cmpf ole, %55, %403 : vector<1x128xf32>
    %1267 = arith.extui %1266 : vector<1x128xi1> to vector<1x128xi32>
    %1268 = arith.sitofp %1267 : vector<1x128xi32> to vector<1x128xf32>
    %1269 = arith.addf %1265, %1268 : vector<1x128xf32>
    %1270 = arith.cmpf ole, %84, %403 : vector<1x128xf32>
    %1271 = arith.extui %1270 : vector<1x128xi1> to vector<1x128xi32>
    %1272 = arith.sitofp %1271 : vector<1x128xi32> to vector<1x128xf32>
    %1273 = arith.addf %1269, %1272 : vector<1x128xf32>
    %1274 = arith.cmpf ole, %113, %403 : vector<1x128xf32>
    %1275 = arith.extui %1274 : vector<1x128xi1> to vector<1x128xi32>
    %1276 = arith.sitofp %1275 : vector<1x128xi32> to vector<1x128xf32>
    %1277 = arith.addf %1273, %1276 : vector<1x128xf32>
    %1278 = arith.cmpf ole, %142, %403 : vector<1x128xf32>
    %1279 = arith.extui %1278 : vector<1x128xi1> to vector<1x128xi32>
    %1280 = arith.sitofp %1279 : vector<1x128xi32> to vector<1x128xf32>
    %1281 = arith.addf %1277, %1280 : vector<1x128xf32>
    %1282 = arith.cmpf ole, %171, %403 : vector<1x128xf32>
    %1283 = arith.extui %1282 : vector<1x128xi1> to vector<1x128xi32>
    %1284 = arith.sitofp %1283 : vector<1x128xi32> to vector<1x128xf32>
    %1285 = arith.addf %1281, %1284 : vector<1x128xf32>
    %1286 = arith.cmpf ole, %200, %403 : vector<1x128xf32>
    %1287 = arith.extui %1286 : vector<1x128xi1> to vector<1x128xi32>
    %1288 = arith.sitofp %1287 : vector<1x128xi32> to vector<1x128xf32>
    %1289 = arith.addf %1285, %1288 : vector<1x128xf32>
    %1290 = arith.cmpf ole, %229, %403 : vector<1x128xf32>
    %1291 = arith.extui %1290 : vector<1x128xi1> to vector<1x128xi32>
    %1292 = arith.sitofp %1291 : vector<1x128xi32> to vector<1x128xf32>
    %1293 = arith.addf %1289, %1292 : vector<1x128xf32>
    %1294 = arith.cmpf ole, %258, %403 : vector<1x128xf32>
    %1295 = arith.extui %1294 : vector<1x128xi1> to vector<1x128xi32>
    %1296 = arith.sitofp %1295 : vector<1x128xi32> to vector<1x128xf32>
    %1297 = arith.addf %1293, %1296 : vector<1x128xf32>
    %1298 = arith.cmpf ole, %287, %403 : vector<1x128xf32>
    %1299 = arith.extui %1298 : vector<1x128xi1> to vector<1x128xi32>
    %1300 = arith.sitofp %1299 : vector<1x128xi32> to vector<1x128xf32>
    %1301 = arith.addf %1297, %1300 : vector<1x128xf32>
    %1302 = arith.cmpf ole, %316, %403 : vector<1x128xf32>
    %1303 = arith.extui %1302 : vector<1x128xi1> to vector<1x128xi32>
    %1304 = arith.sitofp %1303 : vector<1x128xi32> to vector<1x128xf32>
    %1305 = arith.addf %1301, %1304 : vector<1x128xf32>
    %1306 = arith.cmpf ole, %345, %403 : vector<1x128xf32>
    %1307 = arith.extui %1306 : vector<1x128xi1> to vector<1x128xi32>
    %1308 = arith.sitofp %1307 : vector<1x128xi32> to vector<1x128xf32>
    %1309 = arith.addf %1305, %1308 : vector<1x128xf32>
    %1310 = arith.cmpf ole, %374, %403 : vector<1x128xf32>
    %1311 = arith.extui %1310 : vector<1x128xi1> to vector<1x128xi32>
    %1312 = arith.sitofp %1311 : vector<1x128xi32> to vector<1x128xf32>
    %1313 = arith.addf %1309, %1312 : vector<1x128xf32>
    %1314 = arith.cmpf olt, %432, %403 : vector<1x128xf32>
    %1315 = arith.extui %1314 : vector<1x128xi1> to vector<1x128xi32>
    %1316 = arith.sitofp %1315 : vector<1x128xi32> to vector<1x128xf32>
    %1317 = arith.addf %1313, %1316 : vector<1x128xf32>
    %1318 = arith.cmpf olt, %461, %403 : vector<1x128xf32>
    %1319 = arith.extui %1318 : vector<1x128xi1> to vector<1x128xi32>
    %1320 = arith.sitofp %1319 : vector<1x128xi32> to vector<1x128xf32>
    %1321 = arith.addf %1317, %1320 : vector<1x128xf32>
    %cst_161 = arith.constant 0.000000e+00 : f32
    %1322 = vector.broadcast %cst_161 : f32 to vector<1x128xf32>
    %1323 = arith.cmpf ole, %26, %432 : vector<1x128xf32>
    %1324 = arith.extui %1323 : vector<1x128xi1> to vector<1x128xi32>
    %1325 = arith.sitofp %1324 : vector<1x128xi32> to vector<1x128xf32>
    %1326 = arith.addf %1322, %1325 : vector<1x128xf32>
    %1327 = arith.cmpf ole, %55, %432 : vector<1x128xf32>
    %1328 = arith.extui %1327 : vector<1x128xi1> to vector<1x128xi32>
    %1329 = arith.sitofp %1328 : vector<1x128xi32> to vector<1x128xf32>
    %1330 = arith.addf %1326, %1329 : vector<1x128xf32>
    %1331 = arith.cmpf ole, %84, %432 : vector<1x128xf32>
    %1332 = arith.extui %1331 : vector<1x128xi1> to vector<1x128xi32>
    %1333 = arith.sitofp %1332 : vector<1x128xi32> to vector<1x128xf32>
    %1334 = arith.addf %1330, %1333 : vector<1x128xf32>
    %1335 = arith.cmpf ole, %113, %432 : vector<1x128xf32>
    %1336 = arith.extui %1335 : vector<1x128xi1> to vector<1x128xi32>
    %1337 = arith.sitofp %1336 : vector<1x128xi32> to vector<1x128xf32>
    %1338 = arith.addf %1334, %1337 : vector<1x128xf32>
    %1339 = arith.cmpf ole, %142, %432 : vector<1x128xf32>
    %1340 = arith.extui %1339 : vector<1x128xi1> to vector<1x128xi32>
    %1341 = arith.sitofp %1340 : vector<1x128xi32> to vector<1x128xf32>
    %1342 = arith.addf %1338, %1341 : vector<1x128xf32>
    %1343 = arith.cmpf ole, %171, %432 : vector<1x128xf32>
    %1344 = arith.extui %1343 : vector<1x128xi1> to vector<1x128xi32>
    %1345 = arith.sitofp %1344 : vector<1x128xi32> to vector<1x128xf32>
    %1346 = arith.addf %1342, %1345 : vector<1x128xf32>
    %1347 = arith.cmpf ole, %200, %432 : vector<1x128xf32>
    %1348 = arith.extui %1347 : vector<1x128xi1> to vector<1x128xi32>
    %1349 = arith.sitofp %1348 : vector<1x128xi32> to vector<1x128xf32>
    %1350 = arith.addf %1346, %1349 : vector<1x128xf32>
    %1351 = arith.cmpf ole, %229, %432 : vector<1x128xf32>
    %1352 = arith.extui %1351 : vector<1x128xi1> to vector<1x128xi32>
    %1353 = arith.sitofp %1352 : vector<1x128xi32> to vector<1x128xf32>
    %1354 = arith.addf %1350, %1353 : vector<1x128xf32>
    %1355 = arith.cmpf ole, %258, %432 : vector<1x128xf32>
    %1356 = arith.extui %1355 : vector<1x128xi1> to vector<1x128xi32>
    %1357 = arith.sitofp %1356 : vector<1x128xi32> to vector<1x128xf32>
    %1358 = arith.addf %1354, %1357 : vector<1x128xf32>
    %1359 = arith.cmpf ole, %287, %432 : vector<1x128xf32>
    %1360 = arith.extui %1359 : vector<1x128xi1> to vector<1x128xi32>
    %1361 = arith.sitofp %1360 : vector<1x128xi32> to vector<1x128xf32>
    %1362 = arith.addf %1358, %1361 : vector<1x128xf32>
    %1363 = arith.cmpf ole, %316, %432 : vector<1x128xf32>
    %1364 = arith.extui %1363 : vector<1x128xi1> to vector<1x128xi32>
    %1365 = arith.sitofp %1364 : vector<1x128xi32> to vector<1x128xf32>
    %1366 = arith.addf %1362, %1365 : vector<1x128xf32>
    %1367 = arith.cmpf ole, %345, %432 : vector<1x128xf32>
    %1368 = arith.extui %1367 : vector<1x128xi1> to vector<1x128xi32>
    %1369 = arith.sitofp %1368 : vector<1x128xi32> to vector<1x128xf32>
    %1370 = arith.addf %1366, %1369 : vector<1x128xf32>
    %1371 = arith.cmpf ole, %374, %432 : vector<1x128xf32>
    %1372 = arith.extui %1371 : vector<1x128xi1> to vector<1x128xi32>
    %1373 = arith.sitofp %1372 : vector<1x128xi32> to vector<1x128xf32>
    %1374 = arith.addf %1370, %1373 : vector<1x128xf32>
    %1375 = arith.cmpf ole, %403, %432 : vector<1x128xf32>
    %1376 = arith.extui %1375 : vector<1x128xi1> to vector<1x128xi32>
    %1377 = arith.sitofp %1376 : vector<1x128xi32> to vector<1x128xf32>
    %1378 = arith.addf %1374, %1377 : vector<1x128xf32>
    %1379 = arith.cmpf olt, %461, %432 : vector<1x128xf32>
    %1380 = arith.extui %1379 : vector<1x128xi1> to vector<1x128xi32>
    %1381 = arith.sitofp %1380 : vector<1x128xi32> to vector<1x128xf32>
    %1382 = arith.addf %1378, %1381 : vector<1x128xf32>
    %cst_162 = arith.constant 0.000000e+00 : f32
    %1383 = vector.broadcast %cst_162 : f32 to vector<1x128xf32>
    %1384 = arith.cmpf ole, %26, %461 : vector<1x128xf32>
    %1385 = arith.extui %1384 : vector<1x128xi1> to vector<1x128xi32>
    %1386 = arith.sitofp %1385 : vector<1x128xi32> to vector<1x128xf32>
    %1387 = arith.addf %1383, %1386 : vector<1x128xf32>
    %1388 = arith.cmpf ole, %55, %461 : vector<1x128xf32>
    %1389 = arith.extui %1388 : vector<1x128xi1> to vector<1x128xi32>
    %1390 = arith.sitofp %1389 : vector<1x128xi32> to vector<1x128xf32>
    %1391 = arith.addf %1387, %1390 : vector<1x128xf32>
    %1392 = arith.cmpf ole, %84, %461 : vector<1x128xf32>
    %1393 = arith.extui %1392 : vector<1x128xi1> to vector<1x128xi32>
    %1394 = arith.sitofp %1393 : vector<1x128xi32> to vector<1x128xf32>
    %1395 = arith.addf %1391, %1394 : vector<1x128xf32>
    %1396 = arith.cmpf ole, %113, %461 : vector<1x128xf32>
    %1397 = arith.extui %1396 : vector<1x128xi1> to vector<1x128xi32>
    %1398 = arith.sitofp %1397 : vector<1x128xi32> to vector<1x128xf32>
    %1399 = arith.addf %1395, %1398 : vector<1x128xf32>
    %1400 = arith.cmpf ole, %142, %461 : vector<1x128xf32>
    %1401 = arith.extui %1400 : vector<1x128xi1> to vector<1x128xi32>
    %1402 = arith.sitofp %1401 : vector<1x128xi32> to vector<1x128xf32>
    %1403 = arith.addf %1399, %1402 : vector<1x128xf32>
    %1404 = arith.cmpf ole, %171, %461 : vector<1x128xf32>
    %1405 = arith.extui %1404 : vector<1x128xi1> to vector<1x128xi32>
    %1406 = arith.sitofp %1405 : vector<1x128xi32> to vector<1x128xf32>
    %1407 = arith.addf %1403, %1406 : vector<1x128xf32>
    %1408 = arith.cmpf ole, %200, %461 : vector<1x128xf32>
    %1409 = arith.extui %1408 : vector<1x128xi1> to vector<1x128xi32>
    %1410 = arith.sitofp %1409 : vector<1x128xi32> to vector<1x128xf32>
    %1411 = arith.addf %1407, %1410 : vector<1x128xf32>
    %1412 = arith.cmpf ole, %229, %461 : vector<1x128xf32>
    %1413 = arith.extui %1412 : vector<1x128xi1> to vector<1x128xi32>
    %1414 = arith.sitofp %1413 : vector<1x128xi32> to vector<1x128xf32>
    %1415 = arith.addf %1411, %1414 : vector<1x128xf32>
    %1416 = arith.cmpf ole, %258, %461 : vector<1x128xf32>
    %1417 = arith.extui %1416 : vector<1x128xi1> to vector<1x128xi32>
    %1418 = arith.sitofp %1417 : vector<1x128xi32> to vector<1x128xf32>
    %1419 = arith.addf %1415, %1418 : vector<1x128xf32>
    %1420 = arith.cmpf ole, %287, %461 : vector<1x128xf32>
    %1421 = arith.extui %1420 : vector<1x128xi1> to vector<1x128xi32>
    %1422 = arith.sitofp %1421 : vector<1x128xi32> to vector<1x128xf32>
    %1423 = arith.addf %1419, %1422 : vector<1x128xf32>
    %1424 = arith.cmpf ole, %316, %461 : vector<1x128xf32>
    %1425 = arith.extui %1424 : vector<1x128xi1> to vector<1x128xi32>
    %1426 = arith.sitofp %1425 : vector<1x128xi32> to vector<1x128xf32>
    %1427 = arith.addf %1423, %1426 : vector<1x128xf32>
    %1428 = arith.cmpf ole, %345, %461 : vector<1x128xf32>
    %1429 = arith.extui %1428 : vector<1x128xi1> to vector<1x128xi32>
    %1430 = arith.sitofp %1429 : vector<1x128xi32> to vector<1x128xf32>
    %1431 = arith.addf %1427, %1430 : vector<1x128xf32>
    %1432 = arith.cmpf ole, %374, %461 : vector<1x128xf32>
    %1433 = arith.extui %1432 : vector<1x128xi1> to vector<1x128xi32>
    %1434 = arith.sitofp %1433 : vector<1x128xi32> to vector<1x128xf32>
    %1435 = arith.addf %1431, %1434 : vector<1x128xf32>
    %1436 = arith.cmpf ole, %403, %461 : vector<1x128xf32>
    %1437 = arith.extui %1436 : vector<1x128xi1> to vector<1x128xi32>
    %1438 = arith.sitofp %1437 : vector<1x128xi32> to vector<1x128xf32>
    %1439 = arith.addf %1435, %1438 : vector<1x128xf32>
    %1440 = arith.cmpf ole, %432, %461 : vector<1x128xf32>
    %1441 = arith.extui %1440 : vector<1x128xi1> to vector<1x128xi32>
    %1442 = arith.sitofp %1441 : vector<1x128xi32> to vector<1x128xf32>
    %1443 = arith.addf %1439, %1442 : vector<1x128xf32>
    %cst_163 = arith.constant 0.000000e+00 : f32
    %1444 = vector.broadcast %cst_163 : f32 to vector<10x128xf32>
    %cst_164 = arith.constant 4.000000e+00 : f32
    %1445 = vector.broadcast %cst_164 : f32 to vector<1x128xf32>
    %1446 = arith.cmpf olt, %528, %1445 : vector<1x128xf32>
    %1447 = vector.broadcast %32 : vector<1x128xf32> to vector<10x128xf32>
    %1448 = arith.cmpf oeq, %1447, %3 : vector<10x128xf32>
    %1449 = vector.broadcast %1446 : vector<1x128xi1> to vector<10x128xi1>
    %1450 = arith.andi %1449, %1448 : vector<10x128xi1>
    %1451 = arith.extui %1450 : vector<10x128xi1> to vector<10x128xi32>
    %1452 = arith.sitofp %1451 : vector<10x128xi32> to vector<10x128xf32>
    %1453 = arith.addf %1444, %1452 : vector<10x128xf32>
    %cst_165 = arith.constant 4.000000e+00 : f32
    %1454 = vector.broadcast %cst_165 : f32 to vector<1x128xf32>
    %1455 = arith.cmpf olt, %589, %1454 : vector<1x128xf32>
    %1456 = vector.broadcast %61 : vector<1x128xf32> to vector<10x128xf32>
    %1457 = arith.cmpf oeq, %1456, %3 : vector<10x128xf32>
    %1458 = vector.broadcast %1455 : vector<1x128xi1> to vector<10x128xi1>
    %1459 = arith.andi %1458, %1457 : vector<10x128xi1>
    %1460 = arith.extui %1459 : vector<10x128xi1> to vector<10x128xi32>
    %1461 = arith.sitofp %1460 : vector<10x128xi32> to vector<10x128xf32>
    %1462 = arith.addf %1453, %1461 : vector<10x128xf32>
    %cst_166 = arith.constant 4.000000e+00 : f32
    %1463 = vector.broadcast %cst_166 : f32 to vector<1x128xf32>
    %1464 = arith.cmpf olt, %650, %1463 : vector<1x128xf32>
    %1465 = vector.broadcast %90 : vector<1x128xf32> to vector<10x128xf32>
    %1466 = arith.cmpf oeq, %1465, %3 : vector<10x128xf32>
    %1467 = vector.broadcast %1464 : vector<1x128xi1> to vector<10x128xi1>
    %1468 = arith.andi %1467, %1466 : vector<10x128xi1>
    %1469 = arith.extui %1468 : vector<10x128xi1> to vector<10x128xi32>
    %1470 = arith.sitofp %1469 : vector<10x128xi32> to vector<10x128xf32>
    %1471 = arith.addf %1462, %1470 : vector<10x128xf32>
    %cst_167 = arith.constant 4.000000e+00 : f32
    %1472 = vector.broadcast %cst_167 : f32 to vector<1x128xf32>
    %1473 = arith.cmpf olt, %711, %1472 : vector<1x128xf32>
    %1474 = vector.broadcast %119 : vector<1x128xf32> to vector<10x128xf32>
    %1475 = arith.cmpf oeq, %1474, %3 : vector<10x128xf32>
    %1476 = vector.broadcast %1473 : vector<1x128xi1> to vector<10x128xi1>
    %1477 = arith.andi %1476, %1475 : vector<10x128xi1>
    %1478 = arith.extui %1477 : vector<10x128xi1> to vector<10x128xi32>
    %1479 = arith.sitofp %1478 : vector<10x128xi32> to vector<10x128xf32>
    %1480 = arith.addf %1471, %1479 : vector<10x128xf32>
    %cst_168 = arith.constant 4.000000e+00 : f32
    %1481 = vector.broadcast %cst_168 : f32 to vector<1x128xf32>
    %1482 = arith.cmpf olt, %772, %1481 : vector<1x128xf32>
    %1483 = vector.broadcast %148 : vector<1x128xf32> to vector<10x128xf32>
    %1484 = arith.cmpf oeq, %1483, %3 : vector<10x128xf32>
    %1485 = vector.broadcast %1482 : vector<1x128xi1> to vector<10x128xi1>
    %1486 = arith.andi %1485, %1484 : vector<10x128xi1>
    %1487 = arith.extui %1486 : vector<10x128xi1> to vector<10x128xi32>
    %1488 = arith.sitofp %1487 : vector<10x128xi32> to vector<10x128xf32>
    %1489 = arith.addf %1480, %1488 : vector<10x128xf32>
    %cst_169 = arith.constant 4.000000e+00 : f32
    %1490 = vector.broadcast %cst_169 : f32 to vector<1x128xf32>
    %1491 = arith.cmpf olt, %833, %1490 : vector<1x128xf32>
    %1492 = vector.broadcast %177 : vector<1x128xf32> to vector<10x128xf32>
    %1493 = arith.cmpf oeq, %1492, %3 : vector<10x128xf32>
    %1494 = vector.broadcast %1491 : vector<1x128xi1> to vector<10x128xi1>
    %1495 = arith.andi %1494, %1493 : vector<10x128xi1>
    %1496 = arith.extui %1495 : vector<10x128xi1> to vector<10x128xi32>
    %1497 = arith.sitofp %1496 : vector<10x128xi32> to vector<10x128xf32>
    %1498 = arith.addf %1489, %1497 : vector<10x128xf32>
    %cst_170 = arith.constant 4.000000e+00 : f32
    %1499 = vector.broadcast %cst_170 : f32 to vector<1x128xf32>
    %1500 = arith.cmpf olt, %894, %1499 : vector<1x128xf32>
    %1501 = vector.broadcast %206 : vector<1x128xf32> to vector<10x128xf32>
    %1502 = arith.cmpf oeq, %1501, %3 : vector<10x128xf32>
    %1503 = vector.broadcast %1500 : vector<1x128xi1> to vector<10x128xi1>
    %1504 = arith.andi %1503, %1502 : vector<10x128xi1>
    %1505 = arith.extui %1504 : vector<10x128xi1> to vector<10x128xi32>
    %1506 = arith.sitofp %1505 : vector<10x128xi32> to vector<10x128xf32>
    %1507 = arith.addf %1498, %1506 : vector<10x128xf32>
    %cst_171 = arith.constant 4.000000e+00 : f32
    %1508 = vector.broadcast %cst_171 : f32 to vector<1x128xf32>
    %1509 = arith.cmpf olt, %955, %1508 : vector<1x128xf32>
    %1510 = vector.broadcast %235 : vector<1x128xf32> to vector<10x128xf32>
    %1511 = arith.cmpf oeq, %1510, %3 : vector<10x128xf32>
    %1512 = vector.broadcast %1509 : vector<1x128xi1> to vector<10x128xi1>
    %1513 = arith.andi %1512, %1511 : vector<10x128xi1>
    %1514 = arith.extui %1513 : vector<10x128xi1> to vector<10x128xi32>
    %1515 = arith.sitofp %1514 : vector<10x128xi32> to vector<10x128xf32>
    %1516 = arith.addf %1507, %1515 : vector<10x128xf32>
    %cst_172 = arith.constant 4.000000e+00 : f32
    %1517 = vector.broadcast %cst_172 : f32 to vector<1x128xf32>
    %1518 = arith.cmpf olt, %1016, %1517 : vector<1x128xf32>
    %1519 = vector.broadcast %264 : vector<1x128xf32> to vector<10x128xf32>
    %1520 = arith.cmpf oeq, %1519, %3 : vector<10x128xf32>
    %1521 = vector.broadcast %1518 : vector<1x128xi1> to vector<10x128xi1>
    %1522 = arith.andi %1521, %1520 : vector<10x128xi1>
    %1523 = arith.extui %1522 : vector<10x128xi1> to vector<10x128xi32>
    %1524 = arith.sitofp %1523 : vector<10x128xi32> to vector<10x128xf32>
    %1525 = arith.addf %1516, %1524 : vector<10x128xf32>
    %cst_173 = arith.constant 4.000000e+00 : f32
    %1526 = vector.broadcast %cst_173 : f32 to vector<1x128xf32>
    %1527 = arith.cmpf olt, %1077, %1526 : vector<1x128xf32>
    %1528 = vector.broadcast %293 : vector<1x128xf32> to vector<10x128xf32>
    %1529 = arith.cmpf oeq, %1528, %3 : vector<10x128xf32>
    %1530 = vector.broadcast %1527 : vector<1x128xi1> to vector<10x128xi1>
    %1531 = arith.andi %1530, %1529 : vector<10x128xi1>
    %1532 = arith.extui %1531 : vector<10x128xi1> to vector<10x128xi32>
    %1533 = arith.sitofp %1532 : vector<10x128xi32> to vector<10x128xf32>
    %1534 = arith.addf %1525, %1533 : vector<10x128xf32>
    %cst_174 = arith.constant 4.000000e+00 : f32
    %1535 = vector.broadcast %cst_174 : f32 to vector<1x128xf32>
    %1536 = arith.cmpf olt, %1138, %1535 : vector<1x128xf32>
    %1537 = vector.broadcast %322 : vector<1x128xf32> to vector<10x128xf32>
    %1538 = arith.cmpf oeq, %1537, %3 : vector<10x128xf32>
    %1539 = vector.broadcast %1536 : vector<1x128xi1> to vector<10x128xi1>
    %1540 = arith.andi %1539, %1538 : vector<10x128xi1>
    %1541 = arith.extui %1540 : vector<10x128xi1> to vector<10x128xi32>
    %1542 = arith.sitofp %1541 : vector<10x128xi32> to vector<10x128xf32>
    %1543 = arith.addf %1534, %1542 : vector<10x128xf32>
    %cst_175 = arith.constant 4.000000e+00 : f32
    %1544 = vector.broadcast %cst_175 : f32 to vector<1x128xf32>
    %1545 = arith.cmpf olt, %1199, %1544 : vector<1x128xf32>
    %1546 = vector.broadcast %351 : vector<1x128xf32> to vector<10x128xf32>
    %1547 = arith.cmpf oeq, %1546, %3 : vector<10x128xf32>
    %1548 = vector.broadcast %1545 : vector<1x128xi1> to vector<10x128xi1>
    %1549 = arith.andi %1548, %1547 : vector<10x128xi1>
    %1550 = arith.extui %1549 : vector<10x128xi1> to vector<10x128xi32>
    %1551 = arith.sitofp %1550 : vector<10x128xi32> to vector<10x128xf32>
    %1552 = arith.addf %1543, %1551 : vector<10x128xf32>
    %cst_176 = arith.constant 4.000000e+00 : f32
    %1553 = vector.broadcast %cst_176 : f32 to vector<1x128xf32>
    %1554 = arith.cmpf olt, %1260, %1553 : vector<1x128xf32>
    %1555 = vector.broadcast %380 : vector<1x128xf32> to vector<10x128xf32>
    %1556 = arith.cmpf oeq, %1555, %3 : vector<10x128xf32>
    %1557 = vector.broadcast %1554 : vector<1x128xi1> to vector<10x128xi1>
    %1558 = arith.andi %1557, %1556 : vector<10x128xi1>
    %1559 = arith.extui %1558 : vector<10x128xi1> to vector<10x128xi32>
    %1560 = arith.sitofp %1559 : vector<10x128xi32> to vector<10x128xf32>
    %1561 = arith.addf %1552, %1560 : vector<10x128xf32>
    %cst_177 = arith.constant 4.000000e+00 : f32
    %1562 = vector.broadcast %cst_177 : f32 to vector<1x128xf32>
    %1563 = arith.cmpf olt, %1321, %1562 : vector<1x128xf32>
    %1564 = vector.broadcast %409 : vector<1x128xf32> to vector<10x128xf32>
    %1565 = arith.cmpf oeq, %1564, %3 : vector<10x128xf32>
    %1566 = vector.broadcast %1563 : vector<1x128xi1> to vector<10x128xi1>
    %1567 = arith.andi %1566, %1565 : vector<10x128xi1>
    %1568 = arith.extui %1567 : vector<10x128xi1> to vector<10x128xi32>
    %1569 = arith.sitofp %1568 : vector<10x128xi32> to vector<10x128xf32>
    %1570 = arith.addf %1561, %1569 : vector<10x128xf32>
    %cst_178 = arith.constant 4.000000e+00 : f32
    %1571 = vector.broadcast %cst_178 : f32 to vector<1x128xf32>
    %1572 = arith.cmpf olt, %1382, %1571 : vector<1x128xf32>
    %1573 = vector.broadcast %438 : vector<1x128xf32> to vector<10x128xf32>
    %1574 = arith.cmpf oeq, %1573, %3 : vector<10x128xf32>
    %1575 = vector.broadcast %1572 : vector<1x128xi1> to vector<10x128xi1>
    %1576 = arith.andi %1575, %1574 : vector<10x128xi1>
    %1577 = arith.extui %1576 : vector<10x128xi1> to vector<10x128xi32>
    %1578 = arith.sitofp %1577 : vector<10x128xi32> to vector<10x128xf32>
    %1579 = arith.addf %1570, %1578 : vector<10x128xf32>
    %cst_179 = arith.constant 4.000000e+00 : f32
    %1580 = vector.broadcast %cst_179 : f32 to vector<1x128xf32>
    %1581 = arith.cmpf olt, %1443, %1580 : vector<1x128xf32>
    %1582 = vector.broadcast %467 : vector<1x128xf32> to vector<10x128xf32>
    %1583 = arith.cmpf oeq, %1582, %3 : vector<10x128xf32>
    %1584 = vector.broadcast %1581 : vector<1x128xi1> to vector<10x128xi1>
    %1585 = arith.andi %1584, %1583 : vector<10x128xi1>
    %1586 = arith.extui %1585 : vector<10x128xi1> to vector<10x128xi32>
    %1587 = arith.sitofp %1586 : vector<10x128xi32> to vector<10x128xf32>
    %1588 = arith.addf %1579, %1587 : vector<10x128xf32>
    %cst_180 = arith.constant 0.000000e+00 : f32
    %1589 = vector.broadcast %cst_180 : f32 to vector<1x128xf32>
    %cst_181 = arith.constant 4.000000e+00 : f32
    %1590 = vector.broadcast %cst_181 : f32 to vector<1x128xf32>
    %1591 = arith.cmpf oeq, %528, %1590 : vector<1x128xf32>
    %cst_182 = arith.constant 0.000000e+00 : f32
    %1592 = vector.broadcast %cst_182 : f32 to vector<1x128xf32>
    %1593 = arith.select %1591, %32, %1592 : vector<1x128xi1>, vector<1x128xf32>
    %1594 = arith.addf %1589, %1593 : vector<1x128xf32>
    %cst_183 = arith.constant 4.000000e+00 : f32
    %1595 = vector.broadcast %cst_183 : f32 to vector<1x128xf32>
    %1596 = arith.cmpf oeq, %589, %1595 : vector<1x128xf32>
    %cst_184 = arith.constant 0.000000e+00 : f32
    %1597 = vector.broadcast %cst_184 : f32 to vector<1x128xf32>
    %1598 = arith.select %1596, %61, %1597 : vector<1x128xi1>, vector<1x128xf32>
    %1599 = arith.addf %1594, %1598 : vector<1x128xf32>
    %cst_185 = arith.constant 4.000000e+00 : f32
    %1600 = vector.broadcast %cst_185 : f32 to vector<1x128xf32>
    %1601 = arith.cmpf oeq, %650, %1600 : vector<1x128xf32>
    %cst_186 = arith.constant 0.000000e+00 : f32
    %1602 = vector.broadcast %cst_186 : f32 to vector<1x128xf32>
    %1603 = arith.select %1601, %90, %1602 : vector<1x128xi1>, vector<1x128xf32>
    %1604 = arith.addf %1599, %1603 : vector<1x128xf32>
    %cst_187 = arith.constant 4.000000e+00 : f32
    %1605 = vector.broadcast %cst_187 : f32 to vector<1x128xf32>
    %1606 = arith.cmpf oeq, %711, %1605 : vector<1x128xf32>
    %cst_188 = arith.constant 0.000000e+00 : f32
    %1607 = vector.broadcast %cst_188 : f32 to vector<1x128xf32>
    %1608 = arith.select %1606, %119, %1607 : vector<1x128xi1>, vector<1x128xf32>
    %1609 = arith.addf %1604, %1608 : vector<1x128xf32>
    %cst_189 = arith.constant 4.000000e+00 : f32
    %1610 = vector.broadcast %cst_189 : f32 to vector<1x128xf32>
    %1611 = arith.cmpf oeq, %772, %1610 : vector<1x128xf32>
    %cst_190 = arith.constant 0.000000e+00 : f32
    %1612 = vector.broadcast %cst_190 : f32 to vector<1x128xf32>
    %1613 = arith.select %1611, %148, %1612 : vector<1x128xi1>, vector<1x128xf32>
    %1614 = arith.addf %1609, %1613 : vector<1x128xf32>
    %cst_191 = arith.constant 4.000000e+00 : f32
    %1615 = vector.broadcast %cst_191 : f32 to vector<1x128xf32>
    %1616 = arith.cmpf oeq, %833, %1615 : vector<1x128xf32>
    %cst_192 = arith.constant 0.000000e+00 : f32
    %1617 = vector.broadcast %cst_192 : f32 to vector<1x128xf32>
    %1618 = arith.select %1616, %177, %1617 : vector<1x128xi1>, vector<1x128xf32>
    %1619 = arith.addf %1614, %1618 : vector<1x128xf32>
    %cst_193 = arith.constant 4.000000e+00 : f32
    %1620 = vector.broadcast %cst_193 : f32 to vector<1x128xf32>
    %1621 = arith.cmpf oeq, %894, %1620 : vector<1x128xf32>
    %cst_194 = arith.constant 0.000000e+00 : f32
    %1622 = vector.broadcast %cst_194 : f32 to vector<1x128xf32>
    %1623 = arith.select %1621, %206, %1622 : vector<1x128xi1>, vector<1x128xf32>
    %1624 = arith.addf %1619, %1623 : vector<1x128xf32>
    %cst_195 = arith.constant 4.000000e+00 : f32
    %1625 = vector.broadcast %cst_195 : f32 to vector<1x128xf32>
    %1626 = arith.cmpf oeq, %955, %1625 : vector<1x128xf32>
    %cst_196 = arith.constant 0.000000e+00 : f32
    %1627 = vector.broadcast %cst_196 : f32 to vector<1x128xf32>
    %1628 = arith.select %1626, %235, %1627 : vector<1x128xi1>, vector<1x128xf32>
    %1629 = arith.addf %1624, %1628 : vector<1x128xf32>
    %cst_197 = arith.constant 4.000000e+00 : f32
    %1630 = vector.broadcast %cst_197 : f32 to vector<1x128xf32>
    %1631 = arith.cmpf oeq, %1016, %1630 : vector<1x128xf32>
    %cst_198 = arith.constant 0.000000e+00 : f32
    %1632 = vector.broadcast %cst_198 : f32 to vector<1x128xf32>
    %1633 = arith.select %1631, %264, %1632 : vector<1x128xi1>, vector<1x128xf32>
    %1634 = arith.addf %1629, %1633 : vector<1x128xf32>
    %cst_199 = arith.constant 4.000000e+00 : f32
    %1635 = vector.broadcast %cst_199 : f32 to vector<1x128xf32>
    %1636 = arith.cmpf oeq, %1077, %1635 : vector<1x128xf32>
    %cst_200 = arith.constant 0.000000e+00 : f32
    %1637 = vector.broadcast %cst_200 : f32 to vector<1x128xf32>
    %1638 = arith.select %1636, %293, %1637 : vector<1x128xi1>, vector<1x128xf32>
    %1639 = arith.addf %1634, %1638 : vector<1x128xf32>
    %cst_201 = arith.constant 4.000000e+00 : f32
    %1640 = vector.broadcast %cst_201 : f32 to vector<1x128xf32>
    %1641 = arith.cmpf oeq, %1138, %1640 : vector<1x128xf32>
    %cst_202 = arith.constant 0.000000e+00 : f32
    %1642 = vector.broadcast %cst_202 : f32 to vector<1x128xf32>
    %1643 = arith.select %1641, %322, %1642 : vector<1x128xi1>, vector<1x128xf32>
    %1644 = arith.addf %1639, %1643 : vector<1x128xf32>
    %cst_203 = arith.constant 4.000000e+00 : f32
    %1645 = vector.broadcast %cst_203 : f32 to vector<1x128xf32>
    %1646 = arith.cmpf oeq, %1199, %1645 : vector<1x128xf32>
    %cst_204 = arith.constant 0.000000e+00 : f32
    %1647 = vector.broadcast %cst_204 : f32 to vector<1x128xf32>
    %1648 = arith.select %1646, %351, %1647 : vector<1x128xi1>, vector<1x128xf32>
    %1649 = arith.addf %1644, %1648 : vector<1x128xf32>
    %cst_205 = arith.constant 4.000000e+00 : f32
    %1650 = vector.broadcast %cst_205 : f32 to vector<1x128xf32>
    %1651 = arith.cmpf oeq, %1260, %1650 : vector<1x128xf32>
    %cst_206 = arith.constant 0.000000e+00 : f32
    %1652 = vector.broadcast %cst_206 : f32 to vector<1x128xf32>
    %1653 = arith.select %1651, %380, %1652 : vector<1x128xi1>, vector<1x128xf32>
    %1654 = arith.addf %1649, %1653 : vector<1x128xf32>
    %cst_207 = arith.constant 4.000000e+00 : f32
    %1655 = vector.broadcast %cst_207 : f32 to vector<1x128xf32>
    %1656 = arith.cmpf oeq, %1321, %1655 : vector<1x128xf32>
    %cst_208 = arith.constant 0.000000e+00 : f32
    %1657 = vector.broadcast %cst_208 : f32 to vector<1x128xf32>
    %1658 = arith.select %1656, %409, %1657 : vector<1x128xi1>, vector<1x128xf32>
    %1659 = arith.addf %1654, %1658 : vector<1x128xf32>
    %cst_209 = arith.constant 4.000000e+00 : f32
    %1660 = vector.broadcast %cst_209 : f32 to vector<1x128xf32>
    %1661 = arith.cmpf oeq, %1382, %1660 : vector<1x128xf32>
    %cst_210 = arith.constant 0.000000e+00 : f32
    %1662 = vector.broadcast %cst_210 : f32 to vector<1x128xf32>
    %1663 = arith.select %1661, %438, %1662 : vector<1x128xi1>, vector<1x128xf32>
    %1664 = arith.addf %1659, %1663 : vector<1x128xf32>
    %cst_211 = arith.constant 4.000000e+00 : f32
    %1665 = vector.broadcast %cst_211 : f32 to vector<1x128xf32>
    %1666 = arith.cmpf oeq, %1443, %1665 : vector<1x128xf32>
    %cst_212 = arith.constant 0.000000e+00 : f32
    %1667 = vector.broadcast %cst_212 : f32 to vector<1x128xf32>
    %1668 = arith.select %1666, %467, %1667 : vector<1x128xi1>, vector<1x128xf32>
    %1669 = arith.addf %1664, %1668 : vector<1x128xf32>
    %cst_213 = arith.constant 0.000000e+00 : f32
    %1670 = vector.broadcast %cst_213 : f32 to vector<1x128xf32>
    %cst_214 = arith.constant 5.000000e+00 : f32
    %1671 = vector.broadcast %cst_214 : f32 to vector<1x128xf32>
    %1672 = arith.cmpf oeq, %528, %1671 : vector<1x128xf32>
    %cst_215 = arith.constant 0.000000e+00 : f32
    %1673 = vector.broadcast %cst_215 : f32 to vector<1x128xf32>
    %1674 = arith.select %1672, %32, %1673 : vector<1x128xi1>, vector<1x128xf32>
    %1675 = arith.addf %1670, %1674 : vector<1x128xf32>
    %cst_216 = arith.constant 5.000000e+00 : f32
    %1676 = vector.broadcast %cst_216 : f32 to vector<1x128xf32>
    %1677 = arith.cmpf oeq, %589, %1676 : vector<1x128xf32>
    %cst_217 = arith.constant 0.000000e+00 : f32
    %1678 = vector.broadcast %cst_217 : f32 to vector<1x128xf32>
    %1679 = arith.select %1677, %61, %1678 : vector<1x128xi1>, vector<1x128xf32>
    %1680 = arith.addf %1675, %1679 : vector<1x128xf32>
    %cst_218 = arith.constant 5.000000e+00 : f32
    %1681 = vector.broadcast %cst_218 : f32 to vector<1x128xf32>
    %1682 = arith.cmpf oeq, %650, %1681 : vector<1x128xf32>
    %cst_219 = arith.constant 0.000000e+00 : f32
    %1683 = vector.broadcast %cst_219 : f32 to vector<1x128xf32>
    %1684 = arith.select %1682, %90, %1683 : vector<1x128xi1>, vector<1x128xf32>
    %1685 = arith.addf %1680, %1684 : vector<1x128xf32>
    %cst_220 = arith.constant 5.000000e+00 : f32
    %1686 = vector.broadcast %cst_220 : f32 to vector<1x128xf32>
    %1687 = arith.cmpf oeq, %711, %1686 : vector<1x128xf32>
    %cst_221 = arith.constant 0.000000e+00 : f32
    %1688 = vector.broadcast %cst_221 : f32 to vector<1x128xf32>
    %1689 = arith.select %1687, %119, %1688 : vector<1x128xi1>, vector<1x128xf32>
    %1690 = arith.addf %1685, %1689 : vector<1x128xf32>
    %cst_222 = arith.constant 5.000000e+00 : f32
    %1691 = vector.broadcast %cst_222 : f32 to vector<1x128xf32>
    %1692 = arith.cmpf oeq, %772, %1691 : vector<1x128xf32>
    %cst_223 = arith.constant 0.000000e+00 : f32
    %1693 = vector.broadcast %cst_223 : f32 to vector<1x128xf32>
    %1694 = arith.select %1692, %148, %1693 : vector<1x128xi1>, vector<1x128xf32>
    %1695 = arith.addf %1690, %1694 : vector<1x128xf32>
    %cst_224 = arith.constant 5.000000e+00 : f32
    %1696 = vector.broadcast %cst_224 : f32 to vector<1x128xf32>
    %1697 = arith.cmpf oeq, %833, %1696 : vector<1x128xf32>
    %cst_225 = arith.constant 0.000000e+00 : f32
    %1698 = vector.broadcast %cst_225 : f32 to vector<1x128xf32>
    %1699 = arith.select %1697, %177, %1698 : vector<1x128xi1>, vector<1x128xf32>
    %1700 = arith.addf %1695, %1699 : vector<1x128xf32>
    %cst_226 = arith.constant 5.000000e+00 : f32
    %1701 = vector.broadcast %cst_226 : f32 to vector<1x128xf32>
    %1702 = arith.cmpf oeq, %894, %1701 : vector<1x128xf32>
    %cst_227 = arith.constant 0.000000e+00 : f32
    %1703 = vector.broadcast %cst_227 : f32 to vector<1x128xf32>
    %1704 = arith.select %1702, %206, %1703 : vector<1x128xi1>, vector<1x128xf32>
    %1705 = arith.addf %1700, %1704 : vector<1x128xf32>
    %cst_228 = arith.constant 5.000000e+00 : f32
    %1706 = vector.broadcast %cst_228 : f32 to vector<1x128xf32>
    %1707 = arith.cmpf oeq, %955, %1706 : vector<1x128xf32>
    %cst_229 = arith.constant 0.000000e+00 : f32
    %1708 = vector.broadcast %cst_229 : f32 to vector<1x128xf32>
    %1709 = arith.select %1707, %235, %1708 : vector<1x128xi1>, vector<1x128xf32>
    %1710 = arith.addf %1705, %1709 : vector<1x128xf32>
    %cst_230 = arith.constant 5.000000e+00 : f32
    %1711 = vector.broadcast %cst_230 : f32 to vector<1x128xf32>
    %1712 = arith.cmpf oeq, %1016, %1711 : vector<1x128xf32>
    %cst_231 = arith.constant 0.000000e+00 : f32
    %1713 = vector.broadcast %cst_231 : f32 to vector<1x128xf32>
    %1714 = arith.select %1712, %264, %1713 : vector<1x128xi1>, vector<1x128xf32>
    %1715 = arith.addf %1710, %1714 : vector<1x128xf32>
    %cst_232 = arith.constant 5.000000e+00 : f32
    %1716 = vector.broadcast %cst_232 : f32 to vector<1x128xf32>
    %1717 = arith.cmpf oeq, %1077, %1716 : vector<1x128xf32>
    %cst_233 = arith.constant 0.000000e+00 : f32
    %1718 = vector.broadcast %cst_233 : f32 to vector<1x128xf32>
    %1719 = arith.select %1717, %293, %1718 : vector<1x128xi1>, vector<1x128xf32>
    %1720 = arith.addf %1715, %1719 : vector<1x128xf32>
    %cst_234 = arith.constant 5.000000e+00 : f32
    %1721 = vector.broadcast %cst_234 : f32 to vector<1x128xf32>
    %1722 = arith.cmpf oeq, %1138, %1721 : vector<1x128xf32>
    %cst_235 = arith.constant 0.000000e+00 : f32
    %1723 = vector.broadcast %cst_235 : f32 to vector<1x128xf32>
    %1724 = arith.select %1722, %322, %1723 : vector<1x128xi1>, vector<1x128xf32>
    %1725 = arith.addf %1720, %1724 : vector<1x128xf32>
    %cst_236 = arith.constant 5.000000e+00 : f32
    %1726 = vector.broadcast %cst_236 : f32 to vector<1x128xf32>
    %1727 = arith.cmpf oeq, %1199, %1726 : vector<1x128xf32>
    %cst_237 = arith.constant 0.000000e+00 : f32
    %1728 = vector.broadcast %cst_237 : f32 to vector<1x128xf32>
    %1729 = arith.select %1727, %351, %1728 : vector<1x128xi1>, vector<1x128xf32>
    %1730 = arith.addf %1725, %1729 : vector<1x128xf32>
    %cst_238 = arith.constant 5.000000e+00 : f32
    %1731 = vector.broadcast %cst_238 : f32 to vector<1x128xf32>
    %1732 = arith.cmpf oeq, %1260, %1731 : vector<1x128xf32>
    %cst_239 = arith.constant 0.000000e+00 : f32
    %1733 = vector.broadcast %cst_239 : f32 to vector<1x128xf32>
    %1734 = arith.select %1732, %380, %1733 : vector<1x128xi1>, vector<1x128xf32>
    %1735 = arith.addf %1730, %1734 : vector<1x128xf32>
    %cst_240 = arith.constant 5.000000e+00 : f32
    %1736 = vector.broadcast %cst_240 : f32 to vector<1x128xf32>
    %1737 = arith.cmpf oeq, %1321, %1736 : vector<1x128xf32>
    %cst_241 = arith.constant 0.000000e+00 : f32
    %1738 = vector.broadcast %cst_241 : f32 to vector<1x128xf32>
    %1739 = arith.select %1737, %409, %1738 : vector<1x128xi1>, vector<1x128xf32>
    %1740 = arith.addf %1735, %1739 : vector<1x128xf32>
    %cst_242 = arith.constant 5.000000e+00 : f32
    %1741 = vector.broadcast %cst_242 : f32 to vector<1x128xf32>
    %1742 = arith.cmpf oeq, %1382, %1741 : vector<1x128xf32>
    %cst_243 = arith.constant 0.000000e+00 : f32
    %1743 = vector.broadcast %cst_243 : f32 to vector<1x128xf32>
    %1744 = arith.select %1742, %438, %1743 : vector<1x128xi1>, vector<1x128xf32>
    %1745 = arith.addf %1740, %1744 : vector<1x128xf32>
    %cst_244 = arith.constant 5.000000e+00 : f32
    %1746 = vector.broadcast %cst_244 : f32 to vector<1x128xf32>
    %1747 = arith.cmpf oeq, %1443, %1746 : vector<1x128xf32>
    %cst_245 = arith.constant 0.000000e+00 : f32
    %1748 = vector.broadcast %cst_245 : f32 to vector<1x128xf32>
    %1749 = arith.select %1747, %467, %1748 : vector<1x128xi1>, vector<1x128xf32>
    %1750 = arith.addf %1745, %1749 : vector<1x128xf32>
    %cst_246 = arith.constant 0.000000e+00 : f32
    %1751 = vector.broadcast %cst_246 : f32 to vector<1x128xf32>
    %cst_247 = arith.constant 6.000000e+00 : f32
    %1752 = vector.broadcast %cst_247 : f32 to vector<1x128xf32>
    %1753 = arith.cmpf oeq, %528, %1752 : vector<1x128xf32>
    %cst_248 = arith.constant 0.000000e+00 : f32
    %1754 = vector.broadcast %cst_248 : f32 to vector<1x128xf32>
    %1755 = arith.select %1753, %32, %1754 : vector<1x128xi1>, vector<1x128xf32>
    %1756 = arith.addf %1751, %1755 : vector<1x128xf32>
    %cst_249 = arith.constant 6.000000e+00 : f32
    %1757 = vector.broadcast %cst_249 : f32 to vector<1x128xf32>
    %1758 = arith.cmpf oeq, %589, %1757 : vector<1x128xf32>
    %cst_250 = arith.constant 0.000000e+00 : f32
    %1759 = vector.broadcast %cst_250 : f32 to vector<1x128xf32>
    %1760 = arith.select %1758, %61, %1759 : vector<1x128xi1>, vector<1x128xf32>
    %1761 = arith.addf %1756, %1760 : vector<1x128xf32>
    %cst_251 = arith.constant 6.000000e+00 : f32
    %1762 = vector.broadcast %cst_251 : f32 to vector<1x128xf32>
    %1763 = arith.cmpf oeq, %650, %1762 : vector<1x128xf32>
    %cst_252 = arith.constant 0.000000e+00 : f32
    %1764 = vector.broadcast %cst_252 : f32 to vector<1x128xf32>
    %1765 = arith.select %1763, %90, %1764 : vector<1x128xi1>, vector<1x128xf32>
    %1766 = arith.addf %1761, %1765 : vector<1x128xf32>
    %cst_253 = arith.constant 6.000000e+00 : f32
    %1767 = vector.broadcast %cst_253 : f32 to vector<1x128xf32>
    %1768 = arith.cmpf oeq, %711, %1767 : vector<1x128xf32>
    %cst_254 = arith.constant 0.000000e+00 : f32
    %1769 = vector.broadcast %cst_254 : f32 to vector<1x128xf32>
    %1770 = arith.select %1768, %119, %1769 : vector<1x128xi1>, vector<1x128xf32>
    %1771 = arith.addf %1766, %1770 : vector<1x128xf32>
    %cst_255 = arith.constant 6.000000e+00 : f32
    %1772 = vector.broadcast %cst_255 : f32 to vector<1x128xf32>
    %1773 = arith.cmpf oeq, %772, %1772 : vector<1x128xf32>
    %cst_256 = arith.constant 0.000000e+00 : f32
    %1774 = vector.broadcast %cst_256 : f32 to vector<1x128xf32>
    %1775 = arith.select %1773, %148, %1774 : vector<1x128xi1>, vector<1x128xf32>
    %1776 = arith.addf %1771, %1775 : vector<1x128xf32>
    %cst_257 = arith.constant 6.000000e+00 : f32
    %1777 = vector.broadcast %cst_257 : f32 to vector<1x128xf32>
    %1778 = arith.cmpf oeq, %833, %1777 : vector<1x128xf32>
    %cst_258 = arith.constant 0.000000e+00 : f32
    %1779 = vector.broadcast %cst_258 : f32 to vector<1x128xf32>
    %1780 = arith.select %1778, %177, %1779 : vector<1x128xi1>, vector<1x128xf32>
    %1781 = arith.addf %1776, %1780 : vector<1x128xf32>
    %cst_259 = arith.constant 6.000000e+00 : f32
    %1782 = vector.broadcast %cst_259 : f32 to vector<1x128xf32>
    %1783 = arith.cmpf oeq, %894, %1782 : vector<1x128xf32>
    %cst_260 = arith.constant 0.000000e+00 : f32
    %1784 = vector.broadcast %cst_260 : f32 to vector<1x128xf32>
    %1785 = arith.select %1783, %206, %1784 : vector<1x128xi1>, vector<1x128xf32>
    %1786 = arith.addf %1781, %1785 : vector<1x128xf32>
    %cst_261 = arith.constant 6.000000e+00 : f32
    %1787 = vector.broadcast %cst_261 : f32 to vector<1x128xf32>
    %1788 = arith.cmpf oeq, %955, %1787 : vector<1x128xf32>
    %cst_262 = arith.constant 0.000000e+00 : f32
    %1789 = vector.broadcast %cst_262 : f32 to vector<1x128xf32>
    %1790 = arith.select %1788, %235, %1789 : vector<1x128xi1>, vector<1x128xf32>
    %1791 = arith.addf %1786, %1790 : vector<1x128xf32>
    %cst_263 = arith.constant 6.000000e+00 : f32
    %1792 = vector.broadcast %cst_263 : f32 to vector<1x128xf32>
    %1793 = arith.cmpf oeq, %1016, %1792 : vector<1x128xf32>
    %cst_264 = arith.constant 0.000000e+00 : f32
    %1794 = vector.broadcast %cst_264 : f32 to vector<1x128xf32>
    %1795 = arith.select %1793, %264, %1794 : vector<1x128xi1>, vector<1x128xf32>
    %1796 = arith.addf %1791, %1795 : vector<1x128xf32>
    %cst_265 = arith.constant 6.000000e+00 : f32
    %1797 = vector.broadcast %cst_265 : f32 to vector<1x128xf32>
    %1798 = arith.cmpf oeq, %1077, %1797 : vector<1x128xf32>
    %cst_266 = arith.constant 0.000000e+00 : f32
    %1799 = vector.broadcast %cst_266 : f32 to vector<1x128xf32>
    %1800 = arith.select %1798, %293, %1799 : vector<1x128xi1>, vector<1x128xf32>
    %1801 = arith.addf %1796, %1800 : vector<1x128xf32>
    %cst_267 = arith.constant 6.000000e+00 : f32
    %1802 = vector.broadcast %cst_267 : f32 to vector<1x128xf32>
    %1803 = arith.cmpf oeq, %1138, %1802 : vector<1x128xf32>
    %cst_268 = arith.constant 0.000000e+00 : f32
    %1804 = vector.broadcast %cst_268 : f32 to vector<1x128xf32>
    %1805 = arith.select %1803, %322, %1804 : vector<1x128xi1>, vector<1x128xf32>
    %1806 = arith.addf %1801, %1805 : vector<1x128xf32>
    %cst_269 = arith.constant 6.000000e+00 : f32
    %1807 = vector.broadcast %cst_269 : f32 to vector<1x128xf32>
    %1808 = arith.cmpf oeq, %1199, %1807 : vector<1x128xf32>
    %cst_270 = arith.constant 0.000000e+00 : f32
    %1809 = vector.broadcast %cst_270 : f32 to vector<1x128xf32>
    %1810 = arith.select %1808, %351, %1809 : vector<1x128xi1>, vector<1x128xf32>
    %1811 = arith.addf %1806, %1810 : vector<1x128xf32>
    %cst_271 = arith.constant 6.000000e+00 : f32
    %1812 = vector.broadcast %cst_271 : f32 to vector<1x128xf32>
    %1813 = arith.cmpf oeq, %1260, %1812 : vector<1x128xf32>
    %cst_272 = arith.constant 0.000000e+00 : f32
    %1814 = vector.broadcast %cst_272 : f32 to vector<1x128xf32>
    %1815 = arith.select %1813, %380, %1814 : vector<1x128xi1>, vector<1x128xf32>
    %1816 = arith.addf %1811, %1815 : vector<1x128xf32>
    %cst_273 = arith.constant 6.000000e+00 : f32
    %1817 = vector.broadcast %cst_273 : f32 to vector<1x128xf32>
    %1818 = arith.cmpf oeq, %1321, %1817 : vector<1x128xf32>
    %cst_274 = arith.constant 0.000000e+00 : f32
    %1819 = vector.broadcast %cst_274 : f32 to vector<1x128xf32>
    %1820 = arith.select %1818, %409, %1819 : vector<1x128xi1>, vector<1x128xf32>
    %1821 = arith.addf %1816, %1820 : vector<1x128xf32>
    %cst_275 = arith.constant 6.000000e+00 : f32
    %1822 = vector.broadcast %cst_275 : f32 to vector<1x128xf32>
    %1823 = arith.cmpf oeq, %1382, %1822 : vector<1x128xf32>
    %cst_276 = arith.constant 0.000000e+00 : f32
    %1824 = vector.broadcast %cst_276 : f32 to vector<1x128xf32>
    %1825 = arith.select %1823, %438, %1824 : vector<1x128xi1>, vector<1x128xf32>
    %1826 = arith.addf %1821, %1825 : vector<1x128xf32>
    %cst_277 = arith.constant 6.000000e+00 : f32
    %1827 = vector.broadcast %cst_277 : f32 to vector<1x128xf32>
    %1828 = arith.cmpf oeq, %1443, %1827 : vector<1x128xf32>
    %cst_278 = arith.constant 0.000000e+00 : f32
    %1829 = vector.broadcast %cst_278 : f32 to vector<1x128xf32>
    %1830 = arith.select %1828, %467, %1829 : vector<1x128xi1>, vector<1x128xf32>
    %1831 = arith.addf %1826, %1830 : vector<1x128xf32>
    %cst_279 = arith.constant 0.000000e+00 : f32
    %1832 = vector.broadcast %cst_279 : f32 to vector<1x128xf32>
    %cst_280 = arith.constant 7.000000e+00 : f32
    %1833 = vector.broadcast %cst_280 : f32 to vector<1x128xf32>
    %1834 = arith.cmpf oeq, %528, %1833 : vector<1x128xf32>
    %cst_281 = arith.constant 0.000000e+00 : f32
    %1835 = vector.broadcast %cst_281 : f32 to vector<1x128xf32>
    %1836 = arith.select %1834, %32, %1835 : vector<1x128xi1>, vector<1x128xf32>
    %1837 = arith.addf %1832, %1836 : vector<1x128xf32>
    %cst_282 = arith.constant 7.000000e+00 : f32
    %1838 = vector.broadcast %cst_282 : f32 to vector<1x128xf32>
    %1839 = arith.cmpf oeq, %589, %1838 : vector<1x128xf32>
    %cst_283 = arith.constant 0.000000e+00 : f32
    %1840 = vector.broadcast %cst_283 : f32 to vector<1x128xf32>
    %1841 = arith.select %1839, %61, %1840 : vector<1x128xi1>, vector<1x128xf32>
    %1842 = arith.addf %1837, %1841 : vector<1x128xf32>
    %cst_284 = arith.constant 7.000000e+00 : f32
    %1843 = vector.broadcast %cst_284 : f32 to vector<1x128xf32>
    %1844 = arith.cmpf oeq, %650, %1843 : vector<1x128xf32>
    %cst_285 = arith.constant 0.000000e+00 : f32
    %1845 = vector.broadcast %cst_285 : f32 to vector<1x128xf32>
    %1846 = arith.select %1844, %90, %1845 : vector<1x128xi1>, vector<1x128xf32>
    %1847 = arith.addf %1842, %1846 : vector<1x128xf32>
    %cst_286 = arith.constant 7.000000e+00 : f32
    %1848 = vector.broadcast %cst_286 : f32 to vector<1x128xf32>
    %1849 = arith.cmpf oeq, %711, %1848 : vector<1x128xf32>
    %cst_287 = arith.constant 0.000000e+00 : f32
    %1850 = vector.broadcast %cst_287 : f32 to vector<1x128xf32>
    %1851 = arith.select %1849, %119, %1850 : vector<1x128xi1>, vector<1x128xf32>
    %1852 = arith.addf %1847, %1851 : vector<1x128xf32>
    %cst_288 = arith.constant 7.000000e+00 : f32
    %1853 = vector.broadcast %cst_288 : f32 to vector<1x128xf32>
    %1854 = arith.cmpf oeq, %772, %1853 : vector<1x128xf32>
    %cst_289 = arith.constant 0.000000e+00 : f32
    %1855 = vector.broadcast %cst_289 : f32 to vector<1x128xf32>
    %1856 = arith.select %1854, %148, %1855 : vector<1x128xi1>, vector<1x128xf32>
    %1857 = arith.addf %1852, %1856 : vector<1x128xf32>
    %cst_290 = arith.constant 7.000000e+00 : f32
    %1858 = vector.broadcast %cst_290 : f32 to vector<1x128xf32>
    %1859 = arith.cmpf oeq, %833, %1858 : vector<1x128xf32>
    %cst_291 = arith.constant 0.000000e+00 : f32
    %1860 = vector.broadcast %cst_291 : f32 to vector<1x128xf32>
    %1861 = arith.select %1859, %177, %1860 : vector<1x128xi1>, vector<1x128xf32>
    %1862 = arith.addf %1857, %1861 : vector<1x128xf32>
    %cst_292 = arith.constant 7.000000e+00 : f32
    %1863 = vector.broadcast %cst_292 : f32 to vector<1x128xf32>
    %1864 = arith.cmpf oeq, %894, %1863 : vector<1x128xf32>
    %cst_293 = arith.constant 0.000000e+00 : f32
    %1865 = vector.broadcast %cst_293 : f32 to vector<1x128xf32>
    %1866 = arith.select %1864, %206, %1865 : vector<1x128xi1>, vector<1x128xf32>
    %1867 = arith.addf %1862, %1866 : vector<1x128xf32>
    %cst_294 = arith.constant 7.000000e+00 : f32
    %1868 = vector.broadcast %cst_294 : f32 to vector<1x128xf32>
    %1869 = arith.cmpf oeq, %955, %1868 : vector<1x128xf32>
    %cst_295 = arith.constant 0.000000e+00 : f32
    %1870 = vector.broadcast %cst_295 : f32 to vector<1x128xf32>
    %1871 = arith.select %1869, %235, %1870 : vector<1x128xi1>, vector<1x128xf32>
    %1872 = arith.addf %1867, %1871 : vector<1x128xf32>
    %cst_296 = arith.constant 7.000000e+00 : f32
    %1873 = vector.broadcast %cst_296 : f32 to vector<1x128xf32>
    %1874 = arith.cmpf oeq, %1016, %1873 : vector<1x128xf32>
    %cst_297 = arith.constant 0.000000e+00 : f32
    %1875 = vector.broadcast %cst_297 : f32 to vector<1x128xf32>
    %1876 = arith.select %1874, %264, %1875 : vector<1x128xi1>, vector<1x128xf32>
    %1877 = arith.addf %1872, %1876 : vector<1x128xf32>
    %cst_298 = arith.constant 7.000000e+00 : f32
    %1878 = vector.broadcast %cst_298 : f32 to vector<1x128xf32>
    %1879 = arith.cmpf oeq, %1077, %1878 : vector<1x128xf32>
    %cst_299 = arith.constant 0.000000e+00 : f32
    %1880 = vector.broadcast %cst_299 : f32 to vector<1x128xf32>
    %1881 = arith.select %1879, %293, %1880 : vector<1x128xi1>, vector<1x128xf32>
    %1882 = arith.addf %1877, %1881 : vector<1x128xf32>
    %cst_300 = arith.constant 7.000000e+00 : f32
    %1883 = vector.broadcast %cst_300 : f32 to vector<1x128xf32>
    %1884 = arith.cmpf oeq, %1138, %1883 : vector<1x128xf32>
    %cst_301 = arith.constant 0.000000e+00 : f32
    %1885 = vector.broadcast %cst_301 : f32 to vector<1x128xf32>
    %1886 = arith.select %1884, %322, %1885 : vector<1x128xi1>, vector<1x128xf32>
    %1887 = arith.addf %1882, %1886 : vector<1x128xf32>
    %cst_302 = arith.constant 7.000000e+00 : f32
    %1888 = vector.broadcast %cst_302 : f32 to vector<1x128xf32>
    %1889 = arith.cmpf oeq, %1199, %1888 : vector<1x128xf32>
    %cst_303 = arith.constant 0.000000e+00 : f32
    %1890 = vector.broadcast %cst_303 : f32 to vector<1x128xf32>
    %1891 = arith.select %1889, %351, %1890 : vector<1x128xi1>, vector<1x128xf32>
    %1892 = arith.addf %1887, %1891 : vector<1x128xf32>
    %cst_304 = arith.constant 7.000000e+00 : f32
    %1893 = vector.broadcast %cst_304 : f32 to vector<1x128xf32>
    %1894 = arith.cmpf oeq, %1260, %1893 : vector<1x128xf32>
    %cst_305 = arith.constant 0.000000e+00 : f32
    %1895 = vector.broadcast %cst_305 : f32 to vector<1x128xf32>
    %1896 = arith.select %1894, %380, %1895 : vector<1x128xi1>, vector<1x128xf32>
    %1897 = arith.addf %1892, %1896 : vector<1x128xf32>
    %cst_306 = arith.constant 7.000000e+00 : f32
    %1898 = vector.broadcast %cst_306 : f32 to vector<1x128xf32>
    %1899 = arith.cmpf oeq, %1321, %1898 : vector<1x128xf32>
    %cst_307 = arith.constant 0.000000e+00 : f32
    %1900 = vector.broadcast %cst_307 : f32 to vector<1x128xf32>
    %1901 = arith.select %1899, %409, %1900 : vector<1x128xi1>, vector<1x128xf32>
    %1902 = arith.addf %1897, %1901 : vector<1x128xf32>
    %cst_308 = arith.constant 7.000000e+00 : f32
    %1903 = vector.broadcast %cst_308 : f32 to vector<1x128xf32>
    %1904 = arith.cmpf oeq, %1382, %1903 : vector<1x128xf32>
    %cst_309 = arith.constant 0.000000e+00 : f32
    %1905 = vector.broadcast %cst_309 : f32 to vector<1x128xf32>
    %1906 = arith.select %1904, %438, %1905 : vector<1x128xi1>, vector<1x128xf32>
    %1907 = arith.addf %1902, %1906 : vector<1x128xf32>
    %cst_310 = arith.constant 7.000000e+00 : f32
    %1908 = vector.broadcast %cst_310 : f32 to vector<1x128xf32>
    %1909 = arith.cmpf oeq, %1443, %1908 : vector<1x128xf32>
    %cst_311 = arith.constant 0.000000e+00 : f32
    %1910 = vector.broadcast %cst_311 : f32 to vector<1x128xf32>
    %1911 = arith.select %1909, %467, %1910 : vector<1x128xi1>, vector<1x128xf32>
    %1912 = arith.addf %1907, %1911 : vector<1x128xf32>
    %cst_312 = arith.constant 0.000000e+00 : f32
    %1913 = vector.broadcast %cst_312 : f32 to vector<1x128xf32>
    %cst_313 = arith.constant 8.000000e+00 : f32
    %1914 = vector.broadcast %cst_313 : f32 to vector<1x128xf32>
    %1915 = arith.cmpf oeq, %528, %1914 : vector<1x128xf32>
    %cst_314 = arith.constant 0.000000e+00 : f32
    %1916 = vector.broadcast %cst_314 : f32 to vector<1x128xf32>
    %1917 = arith.select %1915, %32, %1916 : vector<1x128xi1>, vector<1x128xf32>
    %1918 = arith.addf %1913, %1917 : vector<1x128xf32>
    %cst_315 = arith.constant 8.000000e+00 : f32
    %1919 = vector.broadcast %cst_315 : f32 to vector<1x128xf32>
    %1920 = arith.cmpf oeq, %589, %1919 : vector<1x128xf32>
    %cst_316 = arith.constant 0.000000e+00 : f32
    %1921 = vector.broadcast %cst_316 : f32 to vector<1x128xf32>
    %1922 = arith.select %1920, %61, %1921 : vector<1x128xi1>, vector<1x128xf32>
    %1923 = arith.addf %1918, %1922 : vector<1x128xf32>
    %cst_317 = arith.constant 8.000000e+00 : f32
    %1924 = vector.broadcast %cst_317 : f32 to vector<1x128xf32>
    %1925 = arith.cmpf oeq, %650, %1924 : vector<1x128xf32>
    %cst_318 = arith.constant 0.000000e+00 : f32
    %1926 = vector.broadcast %cst_318 : f32 to vector<1x128xf32>
    %1927 = arith.select %1925, %90, %1926 : vector<1x128xi1>, vector<1x128xf32>
    %1928 = arith.addf %1923, %1927 : vector<1x128xf32>
    %cst_319 = arith.constant 8.000000e+00 : f32
    %1929 = vector.broadcast %cst_319 : f32 to vector<1x128xf32>
    %1930 = arith.cmpf oeq, %711, %1929 : vector<1x128xf32>
    %cst_320 = arith.constant 0.000000e+00 : f32
    %1931 = vector.broadcast %cst_320 : f32 to vector<1x128xf32>
    %1932 = arith.select %1930, %119, %1931 : vector<1x128xi1>, vector<1x128xf32>
    %1933 = arith.addf %1928, %1932 : vector<1x128xf32>
    %cst_321 = arith.constant 8.000000e+00 : f32
    %1934 = vector.broadcast %cst_321 : f32 to vector<1x128xf32>
    %1935 = arith.cmpf oeq, %772, %1934 : vector<1x128xf32>
    %cst_322 = arith.constant 0.000000e+00 : f32
    %1936 = vector.broadcast %cst_322 : f32 to vector<1x128xf32>
    %1937 = arith.select %1935, %148, %1936 : vector<1x128xi1>, vector<1x128xf32>
    %1938 = arith.addf %1933, %1937 : vector<1x128xf32>
    %cst_323 = arith.constant 8.000000e+00 : f32
    %1939 = vector.broadcast %cst_323 : f32 to vector<1x128xf32>
    %1940 = arith.cmpf oeq, %833, %1939 : vector<1x128xf32>
    %cst_324 = arith.constant 0.000000e+00 : f32
    %1941 = vector.broadcast %cst_324 : f32 to vector<1x128xf32>
    %1942 = arith.select %1940, %177, %1941 : vector<1x128xi1>, vector<1x128xf32>
    %1943 = arith.addf %1938, %1942 : vector<1x128xf32>
    %cst_325 = arith.constant 8.000000e+00 : f32
    %1944 = vector.broadcast %cst_325 : f32 to vector<1x128xf32>
    %1945 = arith.cmpf oeq, %894, %1944 : vector<1x128xf32>
    %cst_326 = arith.constant 0.000000e+00 : f32
    %1946 = vector.broadcast %cst_326 : f32 to vector<1x128xf32>
    %1947 = arith.select %1945, %206, %1946 : vector<1x128xi1>, vector<1x128xf32>
    %1948 = arith.addf %1943, %1947 : vector<1x128xf32>
    %cst_327 = arith.constant 8.000000e+00 : f32
    %1949 = vector.broadcast %cst_327 : f32 to vector<1x128xf32>
    %1950 = arith.cmpf oeq, %955, %1949 : vector<1x128xf32>
    %cst_328 = arith.constant 0.000000e+00 : f32
    %1951 = vector.broadcast %cst_328 : f32 to vector<1x128xf32>
    %1952 = arith.select %1950, %235, %1951 : vector<1x128xi1>, vector<1x128xf32>
    %1953 = arith.addf %1948, %1952 : vector<1x128xf32>
    %cst_329 = arith.constant 8.000000e+00 : f32
    %1954 = vector.broadcast %cst_329 : f32 to vector<1x128xf32>
    %1955 = arith.cmpf oeq, %1016, %1954 : vector<1x128xf32>
    %cst_330 = arith.constant 0.000000e+00 : f32
    %1956 = vector.broadcast %cst_330 : f32 to vector<1x128xf32>
    %1957 = arith.select %1955, %264, %1956 : vector<1x128xi1>, vector<1x128xf32>
    %1958 = arith.addf %1953, %1957 : vector<1x128xf32>
    %cst_331 = arith.constant 8.000000e+00 : f32
    %1959 = vector.broadcast %cst_331 : f32 to vector<1x128xf32>
    %1960 = arith.cmpf oeq, %1077, %1959 : vector<1x128xf32>
    %cst_332 = arith.constant 0.000000e+00 : f32
    %1961 = vector.broadcast %cst_332 : f32 to vector<1x128xf32>
    %1962 = arith.select %1960, %293, %1961 : vector<1x128xi1>, vector<1x128xf32>
    %1963 = arith.addf %1958, %1962 : vector<1x128xf32>
    %cst_333 = arith.constant 8.000000e+00 : f32
    %1964 = vector.broadcast %cst_333 : f32 to vector<1x128xf32>
    %1965 = arith.cmpf oeq, %1138, %1964 : vector<1x128xf32>
    %cst_334 = arith.constant 0.000000e+00 : f32
    %1966 = vector.broadcast %cst_334 : f32 to vector<1x128xf32>
    %1967 = arith.select %1965, %322, %1966 : vector<1x128xi1>, vector<1x128xf32>
    %1968 = arith.addf %1963, %1967 : vector<1x128xf32>
    %cst_335 = arith.constant 8.000000e+00 : f32
    %1969 = vector.broadcast %cst_335 : f32 to vector<1x128xf32>
    %1970 = arith.cmpf oeq, %1199, %1969 : vector<1x128xf32>
    %cst_336 = arith.constant 0.000000e+00 : f32
    %1971 = vector.broadcast %cst_336 : f32 to vector<1x128xf32>
    %1972 = arith.select %1970, %351, %1971 : vector<1x128xi1>, vector<1x128xf32>
    %1973 = arith.addf %1968, %1972 : vector<1x128xf32>
    %cst_337 = arith.constant 8.000000e+00 : f32
    %1974 = vector.broadcast %cst_337 : f32 to vector<1x128xf32>
    %1975 = arith.cmpf oeq, %1260, %1974 : vector<1x128xf32>
    %cst_338 = arith.constant 0.000000e+00 : f32
    %1976 = vector.broadcast %cst_338 : f32 to vector<1x128xf32>
    %1977 = arith.select %1975, %380, %1976 : vector<1x128xi1>, vector<1x128xf32>
    %1978 = arith.addf %1973, %1977 : vector<1x128xf32>
    %cst_339 = arith.constant 8.000000e+00 : f32
    %1979 = vector.broadcast %cst_339 : f32 to vector<1x128xf32>
    %1980 = arith.cmpf oeq, %1321, %1979 : vector<1x128xf32>
    %cst_340 = arith.constant 0.000000e+00 : f32
    %1981 = vector.broadcast %cst_340 : f32 to vector<1x128xf32>
    %1982 = arith.select %1980, %409, %1981 : vector<1x128xi1>, vector<1x128xf32>
    %1983 = arith.addf %1978, %1982 : vector<1x128xf32>
    %cst_341 = arith.constant 8.000000e+00 : f32
    %1984 = vector.broadcast %cst_341 : f32 to vector<1x128xf32>
    %1985 = arith.cmpf oeq, %1382, %1984 : vector<1x128xf32>
    %cst_342 = arith.constant 0.000000e+00 : f32
    %1986 = vector.broadcast %cst_342 : f32 to vector<1x128xf32>
    %1987 = arith.select %1985, %438, %1986 : vector<1x128xi1>, vector<1x128xf32>
    %1988 = arith.addf %1983, %1987 : vector<1x128xf32>
    %cst_343 = arith.constant 8.000000e+00 : f32
    %1989 = vector.broadcast %cst_343 : f32 to vector<1x128xf32>
    %1990 = arith.cmpf oeq, %1443, %1989 : vector<1x128xf32>
    %cst_344 = arith.constant 0.000000e+00 : f32
    %1991 = vector.broadcast %cst_344 : f32 to vector<1x128xf32>
    %1992 = arith.select %1990, %467, %1991 : vector<1x128xi1>, vector<1x128xf32>
    %1993 = arith.addf %1988, %1992 : vector<1x128xf32>
    %cst_345 = arith.constant 0.000000e+00 : f32
    %1994 = vector.broadcast %cst_345 : f32 to vector<1x128xf32>
    %cst_346 = arith.constant 9.000000e+00 : f32
    %1995 = vector.broadcast %cst_346 : f32 to vector<1x128xf32>
    %1996 = arith.cmpf oeq, %528, %1995 : vector<1x128xf32>
    %cst_347 = arith.constant 0.000000e+00 : f32
    %1997 = vector.broadcast %cst_347 : f32 to vector<1x128xf32>
    %1998 = arith.select %1996, %32, %1997 : vector<1x128xi1>, vector<1x128xf32>
    %1999 = arith.addf %1994, %1998 : vector<1x128xf32>
    %cst_348 = arith.constant 9.000000e+00 : f32
    %2000 = vector.broadcast %cst_348 : f32 to vector<1x128xf32>
    %2001 = arith.cmpf oeq, %589, %2000 : vector<1x128xf32>
    %cst_349 = arith.constant 0.000000e+00 : f32
    %2002 = vector.broadcast %cst_349 : f32 to vector<1x128xf32>
    %2003 = arith.select %2001, %61, %2002 : vector<1x128xi1>, vector<1x128xf32>
    %2004 = arith.addf %1999, %2003 : vector<1x128xf32>
    %cst_350 = arith.constant 9.000000e+00 : f32
    %2005 = vector.broadcast %cst_350 : f32 to vector<1x128xf32>
    %2006 = arith.cmpf oeq, %650, %2005 : vector<1x128xf32>
    %cst_351 = arith.constant 0.000000e+00 : f32
    %2007 = vector.broadcast %cst_351 : f32 to vector<1x128xf32>
    %2008 = arith.select %2006, %90, %2007 : vector<1x128xi1>, vector<1x128xf32>
    %2009 = arith.addf %2004, %2008 : vector<1x128xf32>
    %cst_352 = arith.constant 9.000000e+00 : f32
    %2010 = vector.broadcast %cst_352 : f32 to vector<1x128xf32>
    %2011 = arith.cmpf oeq, %711, %2010 : vector<1x128xf32>
    %cst_353 = arith.constant 0.000000e+00 : f32
    %2012 = vector.broadcast %cst_353 : f32 to vector<1x128xf32>
    %2013 = arith.select %2011, %119, %2012 : vector<1x128xi1>, vector<1x128xf32>
    %2014 = arith.addf %2009, %2013 : vector<1x128xf32>
    %cst_354 = arith.constant 9.000000e+00 : f32
    %2015 = vector.broadcast %cst_354 : f32 to vector<1x128xf32>
    %2016 = arith.cmpf oeq, %772, %2015 : vector<1x128xf32>
    %cst_355 = arith.constant 0.000000e+00 : f32
    %2017 = vector.broadcast %cst_355 : f32 to vector<1x128xf32>
    %2018 = arith.select %2016, %148, %2017 : vector<1x128xi1>, vector<1x128xf32>
    %2019 = arith.addf %2014, %2018 : vector<1x128xf32>
    %cst_356 = arith.constant 9.000000e+00 : f32
    %2020 = vector.broadcast %cst_356 : f32 to vector<1x128xf32>
    %2021 = arith.cmpf oeq, %833, %2020 : vector<1x128xf32>
    %cst_357 = arith.constant 0.000000e+00 : f32
    %2022 = vector.broadcast %cst_357 : f32 to vector<1x128xf32>
    %2023 = arith.select %2021, %177, %2022 : vector<1x128xi1>, vector<1x128xf32>
    %2024 = arith.addf %2019, %2023 : vector<1x128xf32>
    %cst_358 = arith.constant 9.000000e+00 : f32
    %2025 = vector.broadcast %cst_358 : f32 to vector<1x128xf32>
    %2026 = arith.cmpf oeq, %894, %2025 : vector<1x128xf32>
    %cst_359 = arith.constant 0.000000e+00 : f32
    %2027 = vector.broadcast %cst_359 : f32 to vector<1x128xf32>
    %2028 = arith.select %2026, %206, %2027 : vector<1x128xi1>, vector<1x128xf32>
    %2029 = arith.addf %2024, %2028 : vector<1x128xf32>
    %cst_360 = arith.constant 9.000000e+00 : f32
    %2030 = vector.broadcast %cst_360 : f32 to vector<1x128xf32>
    %2031 = arith.cmpf oeq, %955, %2030 : vector<1x128xf32>
    %cst_361 = arith.constant 0.000000e+00 : f32
    %2032 = vector.broadcast %cst_361 : f32 to vector<1x128xf32>
    %2033 = arith.select %2031, %235, %2032 : vector<1x128xi1>, vector<1x128xf32>
    %2034 = arith.addf %2029, %2033 : vector<1x128xf32>
    %cst_362 = arith.constant 9.000000e+00 : f32
    %2035 = vector.broadcast %cst_362 : f32 to vector<1x128xf32>
    %2036 = arith.cmpf oeq, %1016, %2035 : vector<1x128xf32>
    %cst_363 = arith.constant 0.000000e+00 : f32
    %2037 = vector.broadcast %cst_363 : f32 to vector<1x128xf32>
    %2038 = arith.select %2036, %264, %2037 : vector<1x128xi1>, vector<1x128xf32>
    %2039 = arith.addf %2034, %2038 : vector<1x128xf32>
    %cst_364 = arith.constant 9.000000e+00 : f32
    %2040 = vector.broadcast %cst_364 : f32 to vector<1x128xf32>
    %2041 = arith.cmpf oeq, %1077, %2040 : vector<1x128xf32>
    %cst_365 = arith.constant 0.000000e+00 : f32
    %2042 = vector.broadcast %cst_365 : f32 to vector<1x128xf32>
    %2043 = arith.select %2041, %293, %2042 : vector<1x128xi1>, vector<1x128xf32>
    %2044 = arith.addf %2039, %2043 : vector<1x128xf32>
    %cst_366 = arith.constant 9.000000e+00 : f32
    %2045 = vector.broadcast %cst_366 : f32 to vector<1x128xf32>
    %2046 = arith.cmpf oeq, %1138, %2045 : vector<1x128xf32>
    %cst_367 = arith.constant 0.000000e+00 : f32
    %2047 = vector.broadcast %cst_367 : f32 to vector<1x128xf32>
    %2048 = arith.select %2046, %322, %2047 : vector<1x128xi1>, vector<1x128xf32>
    %2049 = arith.addf %2044, %2048 : vector<1x128xf32>
    %cst_368 = arith.constant 9.000000e+00 : f32
    %2050 = vector.broadcast %cst_368 : f32 to vector<1x128xf32>
    %2051 = arith.cmpf oeq, %1199, %2050 : vector<1x128xf32>
    %cst_369 = arith.constant 0.000000e+00 : f32
    %2052 = vector.broadcast %cst_369 : f32 to vector<1x128xf32>
    %2053 = arith.select %2051, %351, %2052 : vector<1x128xi1>, vector<1x128xf32>
    %2054 = arith.addf %2049, %2053 : vector<1x128xf32>
    %cst_370 = arith.constant 9.000000e+00 : f32
    %2055 = vector.broadcast %cst_370 : f32 to vector<1x128xf32>
    %2056 = arith.cmpf oeq, %1260, %2055 : vector<1x128xf32>
    %cst_371 = arith.constant 0.000000e+00 : f32
    %2057 = vector.broadcast %cst_371 : f32 to vector<1x128xf32>
    %2058 = arith.select %2056, %380, %2057 : vector<1x128xi1>, vector<1x128xf32>
    %2059 = arith.addf %2054, %2058 : vector<1x128xf32>
    %cst_372 = arith.constant 9.000000e+00 : f32
    %2060 = vector.broadcast %cst_372 : f32 to vector<1x128xf32>
    %2061 = arith.cmpf oeq, %1321, %2060 : vector<1x128xf32>
    %cst_373 = arith.constant 0.000000e+00 : f32
    %2062 = vector.broadcast %cst_373 : f32 to vector<1x128xf32>
    %2063 = arith.select %2061, %409, %2062 : vector<1x128xi1>, vector<1x128xf32>
    %2064 = arith.addf %2059, %2063 : vector<1x128xf32>
    %cst_374 = arith.constant 9.000000e+00 : f32
    %2065 = vector.broadcast %cst_374 : f32 to vector<1x128xf32>
    %2066 = arith.cmpf oeq, %1382, %2065 : vector<1x128xf32>
    %cst_375 = arith.constant 0.000000e+00 : f32
    %2067 = vector.broadcast %cst_375 : f32 to vector<1x128xf32>
    %2068 = arith.select %2066, %438, %2067 : vector<1x128xi1>, vector<1x128xf32>
    %2069 = arith.addf %2064, %2068 : vector<1x128xf32>
    %cst_376 = arith.constant 9.000000e+00 : f32
    %2070 = vector.broadcast %cst_376 : f32 to vector<1x128xf32>
    %2071 = arith.cmpf oeq, %1443, %2070 : vector<1x128xf32>
    %cst_377 = arith.constant 0.000000e+00 : f32
    %2072 = vector.broadcast %cst_377 : f32 to vector<1x128xf32>
    %2073 = arith.select %2071, %467, %2072 : vector<1x128xi1>, vector<1x128xf32>
    %2074 = arith.addf %2069, %2073 : vector<1x128xf32>
    %cst_378 = arith.constant 0.000000e+00 : f32
    %2075 = vector.broadcast %cst_378 : f32 to vector<1x128xf32>
    %cst_379 = arith.constant 1.000000e+01 : f32
    %2076 = vector.broadcast %cst_379 : f32 to vector<1x128xf32>
    %2077 = arith.cmpf oeq, %528, %2076 : vector<1x128xf32>
    %cst_380 = arith.constant 0.000000e+00 : f32
    %2078 = vector.broadcast %cst_380 : f32 to vector<1x128xf32>
    %2079 = arith.select %2077, %32, %2078 : vector<1x128xi1>, vector<1x128xf32>
    %2080 = arith.addf %2075, %2079 : vector<1x128xf32>
    %cst_381 = arith.constant 1.000000e+01 : f32
    %2081 = vector.broadcast %cst_381 : f32 to vector<1x128xf32>
    %2082 = arith.cmpf oeq, %589, %2081 : vector<1x128xf32>
    %cst_382 = arith.constant 0.000000e+00 : f32
    %2083 = vector.broadcast %cst_382 : f32 to vector<1x128xf32>
    %2084 = arith.select %2082, %61, %2083 : vector<1x128xi1>, vector<1x128xf32>
    %2085 = arith.addf %2080, %2084 : vector<1x128xf32>
    %cst_383 = arith.constant 1.000000e+01 : f32
    %2086 = vector.broadcast %cst_383 : f32 to vector<1x128xf32>
    %2087 = arith.cmpf oeq, %650, %2086 : vector<1x128xf32>
    %cst_384 = arith.constant 0.000000e+00 : f32
    %2088 = vector.broadcast %cst_384 : f32 to vector<1x128xf32>
    %2089 = arith.select %2087, %90, %2088 : vector<1x128xi1>, vector<1x128xf32>
    %2090 = arith.addf %2085, %2089 : vector<1x128xf32>
    %cst_385 = arith.constant 1.000000e+01 : f32
    %2091 = vector.broadcast %cst_385 : f32 to vector<1x128xf32>
    %2092 = arith.cmpf oeq, %711, %2091 : vector<1x128xf32>
    %cst_386 = arith.constant 0.000000e+00 : f32
    %2093 = vector.broadcast %cst_386 : f32 to vector<1x128xf32>
    %2094 = arith.select %2092, %119, %2093 : vector<1x128xi1>, vector<1x128xf32>
    %2095 = arith.addf %2090, %2094 : vector<1x128xf32>
    %cst_387 = arith.constant 1.000000e+01 : f32
    %2096 = vector.broadcast %cst_387 : f32 to vector<1x128xf32>
    %2097 = arith.cmpf oeq, %772, %2096 : vector<1x128xf32>
    %cst_388 = arith.constant 0.000000e+00 : f32
    %2098 = vector.broadcast %cst_388 : f32 to vector<1x128xf32>
    %2099 = arith.select %2097, %148, %2098 : vector<1x128xi1>, vector<1x128xf32>
    %2100 = arith.addf %2095, %2099 : vector<1x128xf32>
    %cst_389 = arith.constant 1.000000e+01 : f32
    %2101 = vector.broadcast %cst_389 : f32 to vector<1x128xf32>
    %2102 = arith.cmpf oeq, %833, %2101 : vector<1x128xf32>
    %cst_390 = arith.constant 0.000000e+00 : f32
    %2103 = vector.broadcast %cst_390 : f32 to vector<1x128xf32>
    %2104 = arith.select %2102, %177, %2103 : vector<1x128xi1>, vector<1x128xf32>
    %2105 = arith.addf %2100, %2104 : vector<1x128xf32>
    %cst_391 = arith.constant 1.000000e+01 : f32
    %2106 = vector.broadcast %cst_391 : f32 to vector<1x128xf32>
    %2107 = arith.cmpf oeq, %894, %2106 : vector<1x128xf32>
    %cst_392 = arith.constant 0.000000e+00 : f32
    %2108 = vector.broadcast %cst_392 : f32 to vector<1x128xf32>
    %2109 = arith.select %2107, %206, %2108 : vector<1x128xi1>, vector<1x128xf32>
    %2110 = arith.addf %2105, %2109 : vector<1x128xf32>
    %cst_393 = arith.constant 1.000000e+01 : f32
    %2111 = vector.broadcast %cst_393 : f32 to vector<1x128xf32>
    %2112 = arith.cmpf oeq, %955, %2111 : vector<1x128xf32>
    %cst_394 = arith.constant 0.000000e+00 : f32
    %2113 = vector.broadcast %cst_394 : f32 to vector<1x128xf32>
    %2114 = arith.select %2112, %235, %2113 : vector<1x128xi1>, vector<1x128xf32>
    %2115 = arith.addf %2110, %2114 : vector<1x128xf32>
    %cst_395 = arith.constant 1.000000e+01 : f32
    %2116 = vector.broadcast %cst_395 : f32 to vector<1x128xf32>
    %2117 = arith.cmpf oeq, %1016, %2116 : vector<1x128xf32>
    %cst_396 = arith.constant 0.000000e+00 : f32
    %2118 = vector.broadcast %cst_396 : f32 to vector<1x128xf32>
    %2119 = arith.select %2117, %264, %2118 : vector<1x128xi1>, vector<1x128xf32>
    %2120 = arith.addf %2115, %2119 : vector<1x128xf32>
    %cst_397 = arith.constant 1.000000e+01 : f32
    %2121 = vector.broadcast %cst_397 : f32 to vector<1x128xf32>
    %2122 = arith.cmpf oeq, %1077, %2121 : vector<1x128xf32>
    %cst_398 = arith.constant 0.000000e+00 : f32
    %2123 = vector.broadcast %cst_398 : f32 to vector<1x128xf32>
    %2124 = arith.select %2122, %293, %2123 : vector<1x128xi1>, vector<1x128xf32>
    %2125 = arith.addf %2120, %2124 : vector<1x128xf32>
    %cst_399 = arith.constant 1.000000e+01 : f32
    %2126 = vector.broadcast %cst_399 : f32 to vector<1x128xf32>
    %2127 = arith.cmpf oeq, %1138, %2126 : vector<1x128xf32>
    %cst_400 = arith.constant 0.000000e+00 : f32
    %2128 = vector.broadcast %cst_400 : f32 to vector<1x128xf32>
    %2129 = arith.select %2127, %322, %2128 : vector<1x128xi1>, vector<1x128xf32>
    %2130 = arith.addf %2125, %2129 : vector<1x128xf32>
    %cst_401 = arith.constant 1.000000e+01 : f32
    %2131 = vector.broadcast %cst_401 : f32 to vector<1x128xf32>
    %2132 = arith.cmpf oeq, %1199, %2131 : vector<1x128xf32>
    %cst_402 = arith.constant 0.000000e+00 : f32
    %2133 = vector.broadcast %cst_402 : f32 to vector<1x128xf32>
    %2134 = arith.select %2132, %351, %2133 : vector<1x128xi1>, vector<1x128xf32>
    %2135 = arith.addf %2130, %2134 : vector<1x128xf32>
    %cst_403 = arith.constant 1.000000e+01 : f32
    %2136 = vector.broadcast %cst_403 : f32 to vector<1x128xf32>
    %2137 = arith.cmpf oeq, %1260, %2136 : vector<1x128xf32>
    %cst_404 = arith.constant 0.000000e+00 : f32
    %2138 = vector.broadcast %cst_404 : f32 to vector<1x128xf32>
    %2139 = arith.select %2137, %380, %2138 : vector<1x128xi1>, vector<1x128xf32>
    %2140 = arith.addf %2135, %2139 : vector<1x128xf32>
    %cst_405 = arith.constant 1.000000e+01 : f32
    %2141 = vector.broadcast %cst_405 : f32 to vector<1x128xf32>
    %2142 = arith.cmpf oeq, %1321, %2141 : vector<1x128xf32>
    %cst_406 = arith.constant 0.000000e+00 : f32
    %2143 = vector.broadcast %cst_406 : f32 to vector<1x128xf32>
    %2144 = arith.select %2142, %409, %2143 : vector<1x128xi1>, vector<1x128xf32>
    %2145 = arith.addf %2140, %2144 : vector<1x128xf32>
    %cst_407 = arith.constant 1.000000e+01 : f32
    %2146 = vector.broadcast %cst_407 : f32 to vector<1x128xf32>
    %2147 = arith.cmpf oeq, %1382, %2146 : vector<1x128xf32>
    %cst_408 = arith.constant 0.000000e+00 : f32
    %2148 = vector.broadcast %cst_408 : f32 to vector<1x128xf32>
    %2149 = arith.select %2147, %438, %2148 : vector<1x128xi1>, vector<1x128xf32>
    %2150 = arith.addf %2145, %2149 : vector<1x128xf32>
    %cst_409 = arith.constant 1.000000e+01 : f32
    %2151 = vector.broadcast %cst_409 : f32 to vector<1x128xf32>
    %2152 = arith.cmpf oeq, %1443, %2151 : vector<1x128xf32>
    %cst_410 = arith.constant 0.000000e+00 : f32
    %2153 = vector.broadcast %cst_410 : f32 to vector<1x128xf32>
    %2154 = arith.select %2152, %467, %2153 : vector<1x128xi1>, vector<1x128xf32>
    %2155 = arith.addf %2150, %2154 : vector<1x128xf32>
    %cst_411 = arith.constant 0.000000e+00 : f32
    %2156 = vector.broadcast %cst_411 : f32 to vector<1x128xf32>
    %cst_412 = arith.constant 1.100000e+01 : f32
    %2157 = vector.broadcast %cst_412 : f32 to vector<1x128xf32>
    %2158 = arith.cmpf oeq, %528, %2157 : vector<1x128xf32>
    %cst_413 = arith.constant 0.000000e+00 : f32
    %2159 = vector.broadcast %cst_413 : f32 to vector<1x128xf32>
    %2160 = arith.select %2158, %32, %2159 : vector<1x128xi1>, vector<1x128xf32>
    %2161 = arith.addf %2156, %2160 : vector<1x128xf32>
    %cst_414 = arith.constant 1.100000e+01 : f32
    %2162 = vector.broadcast %cst_414 : f32 to vector<1x128xf32>
    %2163 = arith.cmpf oeq, %589, %2162 : vector<1x128xf32>
    %cst_415 = arith.constant 0.000000e+00 : f32
    %2164 = vector.broadcast %cst_415 : f32 to vector<1x128xf32>
    %2165 = arith.select %2163, %61, %2164 : vector<1x128xi1>, vector<1x128xf32>
    %2166 = arith.addf %2161, %2165 : vector<1x128xf32>
    %cst_416 = arith.constant 1.100000e+01 : f32
    %2167 = vector.broadcast %cst_416 : f32 to vector<1x128xf32>
    %2168 = arith.cmpf oeq, %650, %2167 : vector<1x128xf32>
    %cst_417 = arith.constant 0.000000e+00 : f32
    %2169 = vector.broadcast %cst_417 : f32 to vector<1x128xf32>
    %2170 = arith.select %2168, %90, %2169 : vector<1x128xi1>, vector<1x128xf32>
    %2171 = arith.addf %2166, %2170 : vector<1x128xf32>
    %cst_418 = arith.constant 1.100000e+01 : f32
    %2172 = vector.broadcast %cst_418 : f32 to vector<1x128xf32>
    %2173 = arith.cmpf oeq, %711, %2172 : vector<1x128xf32>
    %cst_419 = arith.constant 0.000000e+00 : f32
    %2174 = vector.broadcast %cst_419 : f32 to vector<1x128xf32>
    %2175 = arith.select %2173, %119, %2174 : vector<1x128xi1>, vector<1x128xf32>
    %2176 = arith.addf %2171, %2175 : vector<1x128xf32>
    %cst_420 = arith.constant 1.100000e+01 : f32
    %2177 = vector.broadcast %cst_420 : f32 to vector<1x128xf32>
    %2178 = arith.cmpf oeq, %772, %2177 : vector<1x128xf32>
    %cst_421 = arith.constant 0.000000e+00 : f32
    %2179 = vector.broadcast %cst_421 : f32 to vector<1x128xf32>
    %2180 = arith.select %2178, %148, %2179 : vector<1x128xi1>, vector<1x128xf32>
    %2181 = arith.addf %2176, %2180 : vector<1x128xf32>
    %cst_422 = arith.constant 1.100000e+01 : f32
    %2182 = vector.broadcast %cst_422 : f32 to vector<1x128xf32>
    %2183 = arith.cmpf oeq, %833, %2182 : vector<1x128xf32>
    %cst_423 = arith.constant 0.000000e+00 : f32
    %2184 = vector.broadcast %cst_423 : f32 to vector<1x128xf32>
    %2185 = arith.select %2183, %177, %2184 : vector<1x128xi1>, vector<1x128xf32>
    %2186 = arith.addf %2181, %2185 : vector<1x128xf32>
    %cst_424 = arith.constant 1.100000e+01 : f32
    %2187 = vector.broadcast %cst_424 : f32 to vector<1x128xf32>
    %2188 = arith.cmpf oeq, %894, %2187 : vector<1x128xf32>
    %cst_425 = arith.constant 0.000000e+00 : f32
    %2189 = vector.broadcast %cst_425 : f32 to vector<1x128xf32>
    %2190 = arith.select %2188, %206, %2189 : vector<1x128xi1>, vector<1x128xf32>
    %2191 = arith.addf %2186, %2190 : vector<1x128xf32>
    %cst_426 = arith.constant 1.100000e+01 : f32
    %2192 = vector.broadcast %cst_426 : f32 to vector<1x128xf32>
    %2193 = arith.cmpf oeq, %955, %2192 : vector<1x128xf32>
    %cst_427 = arith.constant 0.000000e+00 : f32
    %2194 = vector.broadcast %cst_427 : f32 to vector<1x128xf32>
    %2195 = arith.select %2193, %235, %2194 : vector<1x128xi1>, vector<1x128xf32>
    %2196 = arith.addf %2191, %2195 : vector<1x128xf32>
    %cst_428 = arith.constant 1.100000e+01 : f32
    %2197 = vector.broadcast %cst_428 : f32 to vector<1x128xf32>
    %2198 = arith.cmpf oeq, %1016, %2197 : vector<1x128xf32>
    %cst_429 = arith.constant 0.000000e+00 : f32
    %2199 = vector.broadcast %cst_429 : f32 to vector<1x128xf32>
    %2200 = arith.select %2198, %264, %2199 : vector<1x128xi1>, vector<1x128xf32>
    %2201 = arith.addf %2196, %2200 : vector<1x128xf32>
    %cst_430 = arith.constant 1.100000e+01 : f32
    %2202 = vector.broadcast %cst_430 : f32 to vector<1x128xf32>
    %2203 = arith.cmpf oeq, %1077, %2202 : vector<1x128xf32>
    %cst_431 = arith.constant 0.000000e+00 : f32
    %2204 = vector.broadcast %cst_431 : f32 to vector<1x128xf32>
    %2205 = arith.select %2203, %293, %2204 : vector<1x128xi1>, vector<1x128xf32>
    %2206 = arith.addf %2201, %2205 : vector<1x128xf32>
    %cst_432 = arith.constant 1.100000e+01 : f32
    %2207 = vector.broadcast %cst_432 : f32 to vector<1x128xf32>
    %2208 = arith.cmpf oeq, %1138, %2207 : vector<1x128xf32>
    %cst_433 = arith.constant 0.000000e+00 : f32
    %2209 = vector.broadcast %cst_433 : f32 to vector<1x128xf32>
    %2210 = arith.select %2208, %322, %2209 : vector<1x128xi1>, vector<1x128xf32>
    %2211 = arith.addf %2206, %2210 : vector<1x128xf32>
    %cst_434 = arith.constant 1.100000e+01 : f32
    %2212 = vector.broadcast %cst_434 : f32 to vector<1x128xf32>
    %2213 = arith.cmpf oeq, %1199, %2212 : vector<1x128xf32>
    %cst_435 = arith.constant 0.000000e+00 : f32
    %2214 = vector.broadcast %cst_435 : f32 to vector<1x128xf32>
    %2215 = arith.select %2213, %351, %2214 : vector<1x128xi1>, vector<1x128xf32>
    %2216 = arith.addf %2211, %2215 : vector<1x128xf32>
    %cst_436 = arith.constant 1.100000e+01 : f32
    %2217 = vector.broadcast %cst_436 : f32 to vector<1x128xf32>
    %2218 = arith.cmpf oeq, %1260, %2217 : vector<1x128xf32>
    %cst_437 = arith.constant 0.000000e+00 : f32
    %2219 = vector.broadcast %cst_437 : f32 to vector<1x128xf32>
    %2220 = arith.select %2218, %380, %2219 : vector<1x128xi1>, vector<1x128xf32>
    %2221 = arith.addf %2216, %2220 : vector<1x128xf32>
    %cst_438 = arith.constant 1.100000e+01 : f32
    %2222 = vector.broadcast %cst_438 : f32 to vector<1x128xf32>
    %2223 = arith.cmpf oeq, %1321, %2222 : vector<1x128xf32>
    %cst_439 = arith.constant 0.000000e+00 : f32
    %2224 = vector.broadcast %cst_439 : f32 to vector<1x128xf32>
    %2225 = arith.select %2223, %409, %2224 : vector<1x128xi1>, vector<1x128xf32>
    %2226 = arith.addf %2221, %2225 : vector<1x128xf32>
    %cst_440 = arith.constant 1.100000e+01 : f32
    %2227 = vector.broadcast %cst_440 : f32 to vector<1x128xf32>
    %2228 = arith.cmpf oeq, %1382, %2227 : vector<1x128xf32>
    %cst_441 = arith.constant 0.000000e+00 : f32
    %2229 = vector.broadcast %cst_441 : f32 to vector<1x128xf32>
    %2230 = arith.select %2228, %438, %2229 : vector<1x128xi1>, vector<1x128xf32>
    %2231 = arith.addf %2226, %2230 : vector<1x128xf32>
    %cst_442 = arith.constant 1.100000e+01 : f32
    %2232 = vector.broadcast %cst_442 : f32 to vector<1x128xf32>
    %2233 = arith.cmpf oeq, %1443, %2232 : vector<1x128xf32>
    %cst_443 = arith.constant 0.000000e+00 : f32
    %2234 = vector.broadcast %cst_443 : f32 to vector<1x128xf32>
    %2235 = arith.select %2233, %467, %2234 : vector<1x128xi1>, vector<1x128xf32>
    %2236 = arith.addf %2231, %2235 : vector<1x128xf32>
    %cst_444 = arith.constant 0.000000e+00 : f32
    %2237 = vector.broadcast %cst_444 : f32 to vector<1x128xf32>
    %cst_445 = arith.constant 1.200000e+01 : f32
    %2238 = vector.broadcast %cst_445 : f32 to vector<1x128xf32>
    %2239 = arith.cmpf oeq, %528, %2238 : vector<1x128xf32>
    %cst_446 = arith.constant 0.000000e+00 : f32
    %2240 = vector.broadcast %cst_446 : f32 to vector<1x128xf32>
    %2241 = arith.select %2239, %32, %2240 : vector<1x128xi1>, vector<1x128xf32>
    %2242 = arith.addf %2237, %2241 : vector<1x128xf32>
    %cst_447 = arith.constant 1.200000e+01 : f32
    %2243 = vector.broadcast %cst_447 : f32 to vector<1x128xf32>
    %2244 = arith.cmpf oeq, %589, %2243 : vector<1x128xf32>
    %cst_448 = arith.constant 0.000000e+00 : f32
    %2245 = vector.broadcast %cst_448 : f32 to vector<1x128xf32>
    %2246 = arith.select %2244, %61, %2245 : vector<1x128xi1>, vector<1x128xf32>
    %2247 = arith.addf %2242, %2246 : vector<1x128xf32>
    %cst_449 = arith.constant 1.200000e+01 : f32
    %2248 = vector.broadcast %cst_449 : f32 to vector<1x128xf32>
    %2249 = arith.cmpf oeq, %650, %2248 : vector<1x128xf32>
    %cst_450 = arith.constant 0.000000e+00 : f32
    %2250 = vector.broadcast %cst_450 : f32 to vector<1x128xf32>
    %2251 = arith.select %2249, %90, %2250 : vector<1x128xi1>, vector<1x128xf32>
    %2252 = arith.addf %2247, %2251 : vector<1x128xf32>
    %cst_451 = arith.constant 1.200000e+01 : f32
    %2253 = vector.broadcast %cst_451 : f32 to vector<1x128xf32>
    %2254 = arith.cmpf oeq, %711, %2253 : vector<1x128xf32>
    %cst_452 = arith.constant 0.000000e+00 : f32
    %2255 = vector.broadcast %cst_452 : f32 to vector<1x128xf32>
    %2256 = arith.select %2254, %119, %2255 : vector<1x128xi1>, vector<1x128xf32>
    %2257 = arith.addf %2252, %2256 : vector<1x128xf32>
    %cst_453 = arith.constant 1.200000e+01 : f32
    %2258 = vector.broadcast %cst_453 : f32 to vector<1x128xf32>
    %2259 = arith.cmpf oeq, %772, %2258 : vector<1x128xf32>
    %cst_454 = arith.constant 0.000000e+00 : f32
    %2260 = vector.broadcast %cst_454 : f32 to vector<1x128xf32>
    %2261 = arith.select %2259, %148, %2260 : vector<1x128xi1>, vector<1x128xf32>
    %2262 = arith.addf %2257, %2261 : vector<1x128xf32>
    %cst_455 = arith.constant 1.200000e+01 : f32
    %2263 = vector.broadcast %cst_455 : f32 to vector<1x128xf32>
    %2264 = arith.cmpf oeq, %833, %2263 : vector<1x128xf32>
    %cst_456 = arith.constant 0.000000e+00 : f32
    %2265 = vector.broadcast %cst_456 : f32 to vector<1x128xf32>
    %2266 = arith.select %2264, %177, %2265 : vector<1x128xi1>, vector<1x128xf32>
    %2267 = arith.addf %2262, %2266 : vector<1x128xf32>
    %cst_457 = arith.constant 1.200000e+01 : f32
    %2268 = vector.broadcast %cst_457 : f32 to vector<1x128xf32>
    %2269 = arith.cmpf oeq, %894, %2268 : vector<1x128xf32>
    %cst_458 = arith.constant 0.000000e+00 : f32
    %2270 = vector.broadcast %cst_458 : f32 to vector<1x128xf32>
    %2271 = arith.select %2269, %206, %2270 : vector<1x128xi1>, vector<1x128xf32>
    %2272 = arith.addf %2267, %2271 : vector<1x128xf32>
    %cst_459 = arith.constant 1.200000e+01 : f32
    %2273 = vector.broadcast %cst_459 : f32 to vector<1x128xf32>
    %2274 = arith.cmpf oeq, %955, %2273 : vector<1x128xf32>
    %cst_460 = arith.constant 0.000000e+00 : f32
    %2275 = vector.broadcast %cst_460 : f32 to vector<1x128xf32>
    %2276 = arith.select %2274, %235, %2275 : vector<1x128xi1>, vector<1x128xf32>
    %2277 = arith.addf %2272, %2276 : vector<1x128xf32>
    %cst_461 = arith.constant 1.200000e+01 : f32
    %2278 = vector.broadcast %cst_461 : f32 to vector<1x128xf32>
    %2279 = arith.cmpf oeq, %1016, %2278 : vector<1x128xf32>
    %cst_462 = arith.constant 0.000000e+00 : f32
    %2280 = vector.broadcast %cst_462 : f32 to vector<1x128xf32>
    %2281 = arith.select %2279, %264, %2280 : vector<1x128xi1>, vector<1x128xf32>
    %2282 = arith.addf %2277, %2281 : vector<1x128xf32>
    %cst_463 = arith.constant 1.200000e+01 : f32
    %2283 = vector.broadcast %cst_463 : f32 to vector<1x128xf32>
    %2284 = arith.cmpf oeq, %1077, %2283 : vector<1x128xf32>
    %cst_464 = arith.constant 0.000000e+00 : f32
    %2285 = vector.broadcast %cst_464 : f32 to vector<1x128xf32>
    %2286 = arith.select %2284, %293, %2285 : vector<1x128xi1>, vector<1x128xf32>
    %2287 = arith.addf %2282, %2286 : vector<1x128xf32>
    %cst_465 = arith.constant 1.200000e+01 : f32
    %2288 = vector.broadcast %cst_465 : f32 to vector<1x128xf32>
    %2289 = arith.cmpf oeq, %1138, %2288 : vector<1x128xf32>
    %cst_466 = arith.constant 0.000000e+00 : f32
    %2290 = vector.broadcast %cst_466 : f32 to vector<1x128xf32>
    %2291 = arith.select %2289, %322, %2290 : vector<1x128xi1>, vector<1x128xf32>
    %2292 = arith.addf %2287, %2291 : vector<1x128xf32>
    %cst_467 = arith.constant 1.200000e+01 : f32
    %2293 = vector.broadcast %cst_467 : f32 to vector<1x128xf32>
    %2294 = arith.cmpf oeq, %1199, %2293 : vector<1x128xf32>
    %cst_468 = arith.constant 0.000000e+00 : f32
    %2295 = vector.broadcast %cst_468 : f32 to vector<1x128xf32>
    %2296 = arith.select %2294, %351, %2295 : vector<1x128xi1>, vector<1x128xf32>
    %2297 = arith.addf %2292, %2296 : vector<1x128xf32>
    %cst_469 = arith.constant 1.200000e+01 : f32
    %2298 = vector.broadcast %cst_469 : f32 to vector<1x128xf32>
    %2299 = arith.cmpf oeq, %1260, %2298 : vector<1x128xf32>
    %cst_470 = arith.constant 0.000000e+00 : f32
    %2300 = vector.broadcast %cst_470 : f32 to vector<1x128xf32>
    %2301 = arith.select %2299, %380, %2300 : vector<1x128xi1>, vector<1x128xf32>
    %2302 = arith.addf %2297, %2301 : vector<1x128xf32>
    %cst_471 = arith.constant 1.200000e+01 : f32
    %2303 = vector.broadcast %cst_471 : f32 to vector<1x128xf32>
    %2304 = arith.cmpf oeq, %1321, %2303 : vector<1x128xf32>
    %cst_472 = arith.constant 0.000000e+00 : f32
    %2305 = vector.broadcast %cst_472 : f32 to vector<1x128xf32>
    %2306 = arith.select %2304, %409, %2305 : vector<1x128xi1>, vector<1x128xf32>
    %2307 = arith.addf %2302, %2306 : vector<1x128xf32>
    %cst_473 = arith.constant 1.200000e+01 : f32
    %2308 = vector.broadcast %cst_473 : f32 to vector<1x128xf32>
    %2309 = arith.cmpf oeq, %1382, %2308 : vector<1x128xf32>
    %cst_474 = arith.constant 0.000000e+00 : f32
    %2310 = vector.broadcast %cst_474 : f32 to vector<1x128xf32>
    %2311 = arith.select %2309, %438, %2310 : vector<1x128xi1>, vector<1x128xf32>
    %2312 = arith.addf %2307, %2311 : vector<1x128xf32>
    %cst_475 = arith.constant 1.200000e+01 : f32
    %2313 = vector.broadcast %cst_475 : f32 to vector<1x128xf32>
    %2314 = arith.cmpf oeq, %1443, %2313 : vector<1x128xf32>
    %cst_476 = arith.constant 0.000000e+00 : f32
    %2315 = vector.broadcast %cst_476 : f32 to vector<1x128xf32>
    %2316 = arith.select %2314, %467, %2315 : vector<1x128xi1>, vector<1x128xf32>
    %2317 = arith.addf %2312, %2316 : vector<1x128xf32>
    %cst_477 = arith.constant 0.000000e+00 : f32
    %2318 = vector.broadcast %cst_477 : f32 to vector<1x128xf32>
    %cst_478 = arith.constant 1.300000e+01 : f32
    %2319 = vector.broadcast %cst_478 : f32 to vector<1x128xf32>
    %2320 = arith.cmpf oeq, %528, %2319 : vector<1x128xf32>
    %cst_479 = arith.constant 0.000000e+00 : f32
    %2321 = vector.broadcast %cst_479 : f32 to vector<1x128xf32>
    %2322 = arith.select %2320, %32, %2321 : vector<1x128xi1>, vector<1x128xf32>
    %2323 = arith.addf %2318, %2322 : vector<1x128xf32>
    %cst_480 = arith.constant 1.300000e+01 : f32
    %2324 = vector.broadcast %cst_480 : f32 to vector<1x128xf32>
    %2325 = arith.cmpf oeq, %589, %2324 : vector<1x128xf32>
    %cst_481 = arith.constant 0.000000e+00 : f32
    %2326 = vector.broadcast %cst_481 : f32 to vector<1x128xf32>
    %2327 = arith.select %2325, %61, %2326 : vector<1x128xi1>, vector<1x128xf32>
    %2328 = arith.addf %2323, %2327 : vector<1x128xf32>
    %cst_482 = arith.constant 1.300000e+01 : f32
    %2329 = vector.broadcast %cst_482 : f32 to vector<1x128xf32>
    %2330 = arith.cmpf oeq, %650, %2329 : vector<1x128xf32>
    %cst_483 = arith.constant 0.000000e+00 : f32
    %2331 = vector.broadcast %cst_483 : f32 to vector<1x128xf32>
    %2332 = arith.select %2330, %90, %2331 : vector<1x128xi1>, vector<1x128xf32>
    %2333 = arith.addf %2328, %2332 : vector<1x128xf32>
    %cst_484 = arith.constant 1.300000e+01 : f32
    %2334 = vector.broadcast %cst_484 : f32 to vector<1x128xf32>
    %2335 = arith.cmpf oeq, %711, %2334 : vector<1x128xf32>
    %cst_485 = arith.constant 0.000000e+00 : f32
    %2336 = vector.broadcast %cst_485 : f32 to vector<1x128xf32>
    %2337 = arith.select %2335, %119, %2336 : vector<1x128xi1>, vector<1x128xf32>
    %2338 = arith.addf %2333, %2337 : vector<1x128xf32>
    %cst_486 = arith.constant 1.300000e+01 : f32
    %2339 = vector.broadcast %cst_486 : f32 to vector<1x128xf32>
    %2340 = arith.cmpf oeq, %772, %2339 : vector<1x128xf32>
    %cst_487 = arith.constant 0.000000e+00 : f32
    %2341 = vector.broadcast %cst_487 : f32 to vector<1x128xf32>
    %2342 = arith.select %2340, %148, %2341 : vector<1x128xi1>, vector<1x128xf32>
    %2343 = arith.addf %2338, %2342 : vector<1x128xf32>
    %cst_488 = arith.constant 1.300000e+01 : f32
    %2344 = vector.broadcast %cst_488 : f32 to vector<1x128xf32>
    %2345 = arith.cmpf oeq, %833, %2344 : vector<1x128xf32>
    %cst_489 = arith.constant 0.000000e+00 : f32
    %2346 = vector.broadcast %cst_489 : f32 to vector<1x128xf32>
    %2347 = arith.select %2345, %177, %2346 : vector<1x128xi1>, vector<1x128xf32>
    %2348 = arith.addf %2343, %2347 : vector<1x128xf32>
    %cst_490 = arith.constant 1.300000e+01 : f32
    %2349 = vector.broadcast %cst_490 : f32 to vector<1x128xf32>
    %2350 = arith.cmpf oeq, %894, %2349 : vector<1x128xf32>
    %cst_491 = arith.constant 0.000000e+00 : f32
    %2351 = vector.broadcast %cst_491 : f32 to vector<1x128xf32>
    %2352 = arith.select %2350, %206, %2351 : vector<1x128xi1>, vector<1x128xf32>
    %2353 = arith.addf %2348, %2352 : vector<1x128xf32>
    %cst_492 = arith.constant 1.300000e+01 : f32
    %2354 = vector.broadcast %cst_492 : f32 to vector<1x128xf32>
    %2355 = arith.cmpf oeq, %955, %2354 : vector<1x128xf32>
    %cst_493 = arith.constant 0.000000e+00 : f32
    %2356 = vector.broadcast %cst_493 : f32 to vector<1x128xf32>
    %2357 = arith.select %2355, %235, %2356 : vector<1x128xi1>, vector<1x128xf32>
    %2358 = arith.addf %2353, %2357 : vector<1x128xf32>
    %cst_494 = arith.constant 1.300000e+01 : f32
    %2359 = vector.broadcast %cst_494 : f32 to vector<1x128xf32>
    %2360 = arith.cmpf oeq, %1016, %2359 : vector<1x128xf32>
    %cst_495 = arith.constant 0.000000e+00 : f32
    %2361 = vector.broadcast %cst_495 : f32 to vector<1x128xf32>
    %2362 = arith.select %2360, %264, %2361 : vector<1x128xi1>, vector<1x128xf32>
    %2363 = arith.addf %2358, %2362 : vector<1x128xf32>
    %cst_496 = arith.constant 1.300000e+01 : f32
    %2364 = vector.broadcast %cst_496 : f32 to vector<1x128xf32>
    %2365 = arith.cmpf oeq, %1077, %2364 : vector<1x128xf32>
    %cst_497 = arith.constant 0.000000e+00 : f32
    %2366 = vector.broadcast %cst_497 : f32 to vector<1x128xf32>
    %2367 = arith.select %2365, %293, %2366 : vector<1x128xi1>, vector<1x128xf32>
    %2368 = arith.addf %2363, %2367 : vector<1x128xf32>
    %cst_498 = arith.constant 1.300000e+01 : f32
    %2369 = vector.broadcast %cst_498 : f32 to vector<1x128xf32>
    %2370 = arith.cmpf oeq, %1138, %2369 : vector<1x128xf32>
    %cst_499 = arith.constant 0.000000e+00 : f32
    %2371 = vector.broadcast %cst_499 : f32 to vector<1x128xf32>
    %2372 = arith.select %2370, %322, %2371 : vector<1x128xi1>, vector<1x128xf32>
    %2373 = arith.addf %2368, %2372 : vector<1x128xf32>
    %cst_500 = arith.constant 1.300000e+01 : f32
    %2374 = vector.broadcast %cst_500 : f32 to vector<1x128xf32>
    %2375 = arith.cmpf oeq, %1199, %2374 : vector<1x128xf32>
    %cst_501 = arith.constant 0.000000e+00 : f32
    %2376 = vector.broadcast %cst_501 : f32 to vector<1x128xf32>
    %2377 = arith.select %2375, %351, %2376 : vector<1x128xi1>, vector<1x128xf32>
    %2378 = arith.addf %2373, %2377 : vector<1x128xf32>
    %cst_502 = arith.constant 1.300000e+01 : f32
    %2379 = vector.broadcast %cst_502 : f32 to vector<1x128xf32>
    %2380 = arith.cmpf oeq, %1260, %2379 : vector<1x128xf32>
    %cst_503 = arith.constant 0.000000e+00 : f32
    %2381 = vector.broadcast %cst_503 : f32 to vector<1x128xf32>
    %2382 = arith.select %2380, %380, %2381 : vector<1x128xi1>, vector<1x128xf32>
    %2383 = arith.addf %2378, %2382 : vector<1x128xf32>
    %cst_504 = arith.constant 1.300000e+01 : f32
    %2384 = vector.broadcast %cst_504 : f32 to vector<1x128xf32>
    %2385 = arith.cmpf oeq, %1321, %2384 : vector<1x128xf32>
    %cst_505 = arith.constant 0.000000e+00 : f32
    %2386 = vector.broadcast %cst_505 : f32 to vector<1x128xf32>
    %2387 = arith.select %2385, %409, %2386 : vector<1x128xi1>, vector<1x128xf32>
    %2388 = arith.addf %2383, %2387 : vector<1x128xf32>
    %cst_506 = arith.constant 1.300000e+01 : f32
    %2389 = vector.broadcast %cst_506 : f32 to vector<1x128xf32>
    %2390 = arith.cmpf oeq, %1382, %2389 : vector<1x128xf32>
    %cst_507 = arith.constant 0.000000e+00 : f32
    %2391 = vector.broadcast %cst_507 : f32 to vector<1x128xf32>
    %2392 = arith.select %2390, %438, %2391 : vector<1x128xi1>, vector<1x128xf32>
    %2393 = arith.addf %2388, %2392 : vector<1x128xf32>
    %cst_508 = arith.constant 1.300000e+01 : f32
    %2394 = vector.broadcast %cst_508 : f32 to vector<1x128xf32>
    %2395 = arith.cmpf oeq, %1443, %2394 : vector<1x128xf32>
    %cst_509 = arith.constant 0.000000e+00 : f32
    %2396 = vector.broadcast %cst_509 : f32 to vector<1x128xf32>
    %2397 = arith.select %2395, %467, %2396 : vector<1x128xi1>, vector<1x128xf32>
    %2398 = arith.addf %2393, %2397 : vector<1x128xf32>
    %cst_510 = arith.constant 0.000000e+00 : f32
    %2399 = vector.broadcast %cst_510 : f32 to vector<1x128xf32>
    %cst_511 = arith.constant 1.400000e+01 : f32
    %2400 = vector.broadcast %cst_511 : f32 to vector<1x128xf32>
    %2401 = arith.cmpf oeq, %528, %2400 : vector<1x128xf32>
    %cst_512 = arith.constant 0.000000e+00 : f32
    %2402 = vector.broadcast %cst_512 : f32 to vector<1x128xf32>
    %2403 = arith.select %2401, %32, %2402 : vector<1x128xi1>, vector<1x128xf32>
    %2404 = arith.addf %2399, %2403 : vector<1x128xf32>
    %cst_513 = arith.constant 1.400000e+01 : f32
    %2405 = vector.broadcast %cst_513 : f32 to vector<1x128xf32>
    %2406 = arith.cmpf oeq, %589, %2405 : vector<1x128xf32>
    %cst_514 = arith.constant 0.000000e+00 : f32
    %2407 = vector.broadcast %cst_514 : f32 to vector<1x128xf32>
    %2408 = arith.select %2406, %61, %2407 : vector<1x128xi1>, vector<1x128xf32>
    %2409 = arith.addf %2404, %2408 : vector<1x128xf32>
    %cst_515 = arith.constant 1.400000e+01 : f32
    %2410 = vector.broadcast %cst_515 : f32 to vector<1x128xf32>
    %2411 = arith.cmpf oeq, %650, %2410 : vector<1x128xf32>
    %cst_516 = arith.constant 0.000000e+00 : f32
    %2412 = vector.broadcast %cst_516 : f32 to vector<1x128xf32>
    %2413 = arith.select %2411, %90, %2412 : vector<1x128xi1>, vector<1x128xf32>
    %2414 = arith.addf %2409, %2413 : vector<1x128xf32>
    %cst_517 = arith.constant 1.400000e+01 : f32
    %2415 = vector.broadcast %cst_517 : f32 to vector<1x128xf32>
    %2416 = arith.cmpf oeq, %711, %2415 : vector<1x128xf32>
    %cst_518 = arith.constant 0.000000e+00 : f32
    %2417 = vector.broadcast %cst_518 : f32 to vector<1x128xf32>
    %2418 = arith.select %2416, %119, %2417 : vector<1x128xi1>, vector<1x128xf32>
    %2419 = arith.addf %2414, %2418 : vector<1x128xf32>
    %cst_519 = arith.constant 1.400000e+01 : f32
    %2420 = vector.broadcast %cst_519 : f32 to vector<1x128xf32>
    %2421 = arith.cmpf oeq, %772, %2420 : vector<1x128xf32>
    %cst_520 = arith.constant 0.000000e+00 : f32
    %2422 = vector.broadcast %cst_520 : f32 to vector<1x128xf32>
    %2423 = arith.select %2421, %148, %2422 : vector<1x128xi1>, vector<1x128xf32>
    %2424 = arith.addf %2419, %2423 : vector<1x128xf32>
    %cst_521 = arith.constant 1.400000e+01 : f32
    %2425 = vector.broadcast %cst_521 : f32 to vector<1x128xf32>
    %2426 = arith.cmpf oeq, %833, %2425 : vector<1x128xf32>
    %cst_522 = arith.constant 0.000000e+00 : f32
    %2427 = vector.broadcast %cst_522 : f32 to vector<1x128xf32>
    %2428 = arith.select %2426, %177, %2427 : vector<1x128xi1>, vector<1x128xf32>
    %2429 = arith.addf %2424, %2428 : vector<1x128xf32>
    %cst_523 = arith.constant 1.400000e+01 : f32
    %2430 = vector.broadcast %cst_523 : f32 to vector<1x128xf32>
    %2431 = arith.cmpf oeq, %894, %2430 : vector<1x128xf32>
    %cst_524 = arith.constant 0.000000e+00 : f32
    %2432 = vector.broadcast %cst_524 : f32 to vector<1x128xf32>
    %2433 = arith.select %2431, %206, %2432 : vector<1x128xi1>, vector<1x128xf32>
    %2434 = arith.addf %2429, %2433 : vector<1x128xf32>
    %cst_525 = arith.constant 1.400000e+01 : f32
    %2435 = vector.broadcast %cst_525 : f32 to vector<1x128xf32>
    %2436 = arith.cmpf oeq, %955, %2435 : vector<1x128xf32>
    %cst_526 = arith.constant 0.000000e+00 : f32
    %2437 = vector.broadcast %cst_526 : f32 to vector<1x128xf32>
    %2438 = arith.select %2436, %235, %2437 : vector<1x128xi1>, vector<1x128xf32>
    %2439 = arith.addf %2434, %2438 : vector<1x128xf32>
    %cst_527 = arith.constant 1.400000e+01 : f32
    %2440 = vector.broadcast %cst_527 : f32 to vector<1x128xf32>
    %2441 = arith.cmpf oeq, %1016, %2440 : vector<1x128xf32>
    %cst_528 = arith.constant 0.000000e+00 : f32
    %2442 = vector.broadcast %cst_528 : f32 to vector<1x128xf32>
    %2443 = arith.select %2441, %264, %2442 : vector<1x128xi1>, vector<1x128xf32>
    %2444 = arith.addf %2439, %2443 : vector<1x128xf32>
    %cst_529 = arith.constant 1.400000e+01 : f32
    %2445 = vector.broadcast %cst_529 : f32 to vector<1x128xf32>
    %2446 = arith.cmpf oeq, %1077, %2445 : vector<1x128xf32>
    %cst_530 = arith.constant 0.000000e+00 : f32
    %2447 = vector.broadcast %cst_530 : f32 to vector<1x128xf32>
    %2448 = arith.select %2446, %293, %2447 : vector<1x128xi1>, vector<1x128xf32>
    %2449 = arith.addf %2444, %2448 : vector<1x128xf32>
    %cst_531 = arith.constant 1.400000e+01 : f32
    %2450 = vector.broadcast %cst_531 : f32 to vector<1x128xf32>
    %2451 = arith.cmpf oeq, %1138, %2450 : vector<1x128xf32>
    %cst_532 = arith.constant 0.000000e+00 : f32
    %2452 = vector.broadcast %cst_532 : f32 to vector<1x128xf32>
    %2453 = arith.select %2451, %322, %2452 : vector<1x128xi1>, vector<1x128xf32>
    %2454 = arith.addf %2449, %2453 : vector<1x128xf32>
    %cst_533 = arith.constant 1.400000e+01 : f32
    %2455 = vector.broadcast %cst_533 : f32 to vector<1x128xf32>
    %2456 = arith.cmpf oeq, %1199, %2455 : vector<1x128xf32>
    %cst_534 = arith.constant 0.000000e+00 : f32
    %2457 = vector.broadcast %cst_534 : f32 to vector<1x128xf32>
    %2458 = arith.select %2456, %351, %2457 : vector<1x128xi1>, vector<1x128xf32>
    %2459 = arith.addf %2454, %2458 : vector<1x128xf32>
    %cst_535 = arith.constant 1.400000e+01 : f32
    %2460 = vector.broadcast %cst_535 : f32 to vector<1x128xf32>
    %2461 = arith.cmpf oeq, %1260, %2460 : vector<1x128xf32>
    %cst_536 = arith.constant 0.000000e+00 : f32
    %2462 = vector.broadcast %cst_536 : f32 to vector<1x128xf32>
    %2463 = arith.select %2461, %380, %2462 : vector<1x128xi1>, vector<1x128xf32>
    %2464 = arith.addf %2459, %2463 : vector<1x128xf32>
    %cst_537 = arith.constant 1.400000e+01 : f32
    %2465 = vector.broadcast %cst_537 : f32 to vector<1x128xf32>
    %2466 = arith.cmpf oeq, %1321, %2465 : vector<1x128xf32>
    %cst_538 = arith.constant 0.000000e+00 : f32
    %2467 = vector.broadcast %cst_538 : f32 to vector<1x128xf32>
    %2468 = arith.select %2466, %409, %2467 : vector<1x128xi1>, vector<1x128xf32>
    %2469 = arith.addf %2464, %2468 : vector<1x128xf32>
    %cst_539 = arith.constant 1.400000e+01 : f32
    %2470 = vector.broadcast %cst_539 : f32 to vector<1x128xf32>
    %2471 = arith.cmpf oeq, %1382, %2470 : vector<1x128xf32>
    %cst_540 = arith.constant 0.000000e+00 : f32
    %2472 = vector.broadcast %cst_540 : f32 to vector<1x128xf32>
    %2473 = arith.select %2471, %438, %2472 : vector<1x128xi1>, vector<1x128xf32>
    %2474 = arith.addf %2469, %2473 : vector<1x128xf32>
    %cst_541 = arith.constant 1.400000e+01 : f32
    %2475 = vector.broadcast %cst_541 : f32 to vector<1x128xf32>
    %2476 = arith.cmpf oeq, %1443, %2475 : vector<1x128xf32>
    %cst_542 = arith.constant 0.000000e+00 : f32
    %2477 = vector.broadcast %cst_542 : f32 to vector<1x128xf32>
    %2478 = arith.select %2476, %467, %2477 : vector<1x128xi1>, vector<1x128xf32>
    %2479 = arith.addf %2474, %2478 : vector<1x128xf32>
    %cst_543 = arith.constant 0.000000e+00 : f32
    %2480 = vector.broadcast %cst_543 : f32 to vector<1x128xf32>
    %cst_544 = arith.constant 1.500000e+01 : f32
    %2481 = vector.broadcast %cst_544 : f32 to vector<1x128xf32>
    %2482 = arith.cmpf oeq, %528, %2481 : vector<1x128xf32>
    %cst_545 = arith.constant 0.000000e+00 : f32
    %2483 = vector.broadcast %cst_545 : f32 to vector<1x128xf32>
    %2484 = arith.select %2482, %32, %2483 : vector<1x128xi1>, vector<1x128xf32>
    %2485 = arith.addf %2480, %2484 : vector<1x128xf32>
    %cst_546 = arith.constant 1.500000e+01 : f32
    %2486 = vector.broadcast %cst_546 : f32 to vector<1x128xf32>
    %2487 = arith.cmpf oeq, %589, %2486 : vector<1x128xf32>
    %cst_547 = arith.constant 0.000000e+00 : f32
    %2488 = vector.broadcast %cst_547 : f32 to vector<1x128xf32>
    %2489 = arith.select %2487, %61, %2488 : vector<1x128xi1>, vector<1x128xf32>
    %2490 = arith.addf %2485, %2489 : vector<1x128xf32>
    %cst_548 = arith.constant 1.500000e+01 : f32
    %2491 = vector.broadcast %cst_548 : f32 to vector<1x128xf32>
    %2492 = arith.cmpf oeq, %650, %2491 : vector<1x128xf32>
    %cst_549 = arith.constant 0.000000e+00 : f32
    %2493 = vector.broadcast %cst_549 : f32 to vector<1x128xf32>
    %2494 = arith.select %2492, %90, %2493 : vector<1x128xi1>, vector<1x128xf32>
    %2495 = arith.addf %2490, %2494 : vector<1x128xf32>
    %cst_550 = arith.constant 1.500000e+01 : f32
    %2496 = vector.broadcast %cst_550 : f32 to vector<1x128xf32>
    %2497 = arith.cmpf oeq, %711, %2496 : vector<1x128xf32>
    %cst_551 = arith.constant 0.000000e+00 : f32
    %2498 = vector.broadcast %cst_551 : f32 to vector<1x128xf32>
    %2499 = arith.select %2497, %119, %2498 : vector<1x128xi1>, vector<1x128xf32>
    %2500 = arith.addf %2495, %2499 : vector<1x128xf32>
    %cst_552 = arith.constant 1.500000e+01 : f32
    %2501 = vector.broadcast %cst_552 : f32 to vector<1x128xf32>
    %2502 = arith.cmpf oeq, %772, %2501 : vector<1x128xf32>
    %cst_553 = arith.constant 0.000000e+00 : f32
    %2503 = vector.broadcast %cst_553 : f32 to vector<1x128xf32>
    %2504 = arith.select %2502, %148, %2503 : vector<1x128xi1>, vector<1x128xf32>
    %2505 = arith.addf %2500, %2504 : vector<1x128xf32>
    %cst_554 = arith.constant 1.500000e+01 : f32
    %2506 = vector.broadcast %cst_554 : f32 to vector<1x128xf32>
    %2507 = arith.cmpf oeq, %833, %2506 : vector<1x128xf32>
    %cst_555 = arith.constant 0.000000e+00 : f32
    %2508 = vector.broadcast %cst_555 : f32 to vector<1x128xf32>
    %2509 = arith.select %2507, %177, %2508 : vector<1x128xi1>, vector<1x128xf32>
    %2510 = arith.addf %2505, %2509 : vector<1x128xf32>
    %cst_556 = arith.constant 1.500000e+01 : f32
    %2511 = vector.broadcast %cst_556 : f32 to vector<1x128xf32>
    %2512 = arith.cmpf oeq, %894, %2511 : vector<1x128xf32>
    %cst_557 = arith.constant 0.000000e+00 : f32
    %2513 = vector.broadcast %cst_557 : f32 to vector<1x128xf32>
    %2514 = arith.select %2512, %206, %2513 : vector<1x128xi1>, vector<1x128xf32>
    %2515 = arith.addf %2510, %2514 : vector<1x128xf32>
    %cst_558 = arith.constant 1.500000e+01 : f32
    %2516 = vector.broadcast %cst_558 : f32 to vector<1x128xf32>
    %2517 = arith.cmpf oeq, %955, %2516 : vector<1x128xf32>
    %cst_559 = arith.constant 0.000000e+00 : f32
    %2518 = vector.broadcast %cst_559 : f32 to vector<1x128xf32>
    %2519 = arith.select %2517, %235, %2518 : vector<1x128xi1>, vector<1x128xf32>
    %2520 = arith.addf %2515, %2519 : vector<1x128xf32>
    %cst_560 = arith.constant 1.500000e+01 : f32
    %2521 = vector.broadcast %cst_560 : f32 to vector<1x128xf32>
    %2522 = arith.cmpf oeq, %1016, %2521 : vector<1x128xf32>
    %cst_561 = arith.constant 0.000000e+00 : f32
    %2523 = vector.broadcast %cst_561 : f32 to vector<1x128xf32>
    %2524 = arith.select %2522, %264, %2523 : vector<1x128xi1>, vector<1x128xf32>
    %2525 = arith.addf %2520, %2524 : vector<1x128xf32>
    %cst_562 = arith.constant 1.500000e+01 : f32
    %2526 = vector.broadcast %cst_562 : f32 to vector<1x128xf32>
    %2527 = arith.cmpf oeq, %1077, %2526 : vector<1x128xf32>
    %cst_563 = arith.constant 0.000000e+00 : f32
    %2528 = vector.broadcast %cst_563 : f32 to vector<1x128xf32>
    %2529 = arith.select %2527, %293, %2528 : vector<1x128xi1>, vector<1x128xf32>
    %2530 = arith.addf %2525, %2529 : vector<1x128xf32>
    %cst_564 = arith.constant 1.500000e+01 : f32
    %2531 = vector.broadcast %cst_564 : f32 to vector<1x128xf32>
    %2532 = arith.cmpf oeq, %1138, %2531 : vector<1x128xf32>
    %cst_565 = arith.constant 0.000000e+00 : f32
    %2533 = vector.broadcast %cst_565 : f32 to vector<1x128xf32>
    %2534 = arith.select %2532, %322, %2533 : vector<1x128xi1>, vector<1x128xf32>
    %2535 = arith.addf %2530, %2534 : vector<1x128xf32>
    %cst_566 = arith.constant 1.500000e+01 : f32
    %2536 = vector.broadcast %cst_566 : f32 to vector<1x128xf32>
    %2537 = arith.cmpf oeq, %1199, %2536 : vector<1x128xf32>
    %cst_567 = arith.constant 0.000000e+00 : f32
    %2538 = vector.broadcast %cst_567 : f32 to vector<1x128xf32>
    %2539 = arith.select %2537, %351, %2538 : vector<1x128xi1>, vector<1x128xf32>
    %2540 = arith.addf %2535, %2539 : vector<1x128xf32>
    %cst_568 = arith.constant 1.500000e+01 : f32
    %2541 = vector.broadcast %cst_568 : f32 to vector<1x128xf32>
    %2542 = arith.cmpf oeq, %1260, %2541 : vector<1x128xf32>
    %cst_569 = arith.constant 0.000000e+00 : f32
    %2543 = vector.broadcast %cst_569 : f32 to vector<1x128xf32>
    %2544 = arith.select %2542, %380, %2543 : vector<1x128xi1>, vector<1x128xf32>
    %2545 = arith.addf %2540, %2544 : vector<1x128xf32>
    %cst_570 = arith.constant 1.500000e+01 : f32
    %2546 = vector.broadcast %cst_570 : f32 to vector<1x128xf32>
    %2547 = arith.cmpf oeq, %1321, %2546 : vector<1x128xf32>
    %cst_571 = arith.constant 0.000000e+00 : f32
    %2548 = vector.broadcast %cst_571 : f32 to vector<1x128xf32>
    %2549 = arith.select %2547, %409, %2548 : vector<1x128xi1>, vector<1x128xf32>
    %2550 = arith.addf %2545, %2549 : vector<1x128xf32>
    %cst_572 = arith.constant 1.500000e+01 : f32
    %2551 = vector.broadcast %cst_572 : f32 to vector<1x128xf32>
    %2552 = arith.cmpf oeq, %1382, %2551 : vector<1x128xf32>
    %cst_573 = arith.constant 0.000000e+00 : f32
    %2553 = vector.broadcast %cst_573 : f32 to vector<1x128xf32>
    %2554 = arith.select %2552, %438, %2553 : vector<1x128xi1>, vector<1x128xf32>
    %2555 = arith.addf %2550, %2554 : vector<1x128xf32>
    %cst_574 = arith.constant 1.500000e+01 : f32
    %2556 = vector.broadcast %cst_574 : f32 to vector<1x128xf32>
    %2557 = arith.cmpf oeq, %1443, %2556 : vector<1x128xf32>
    %cst_575 = arith.constant 0.000000e+00 : f32
    %2558 = vector.broadcast %cst_575 : f32 to vector<1x128xf32>
    %2559 = arith.select %2557, %467, %2558 : vector<1x128xi1>, vector<1x128xf32>
    %2560 = arith.addf %2555, %2559 : vector<1x128xf32>
    %cst_576 = arith.constant dense<0xFF800000> : vector<128xf32>
    %2561 = vector.multi_reduction <maximumf>, %1588, %cst_576 [0] : vector<10x128xf32> to vector<128xf32>
    %2562 = vector.shape_cast %2561 : vector<128xf32> to vector<1x128xf32>
    %2563 = vector.broadcast %2562 : vector<1x128xf32> to vector<10x128xf32>
    %2564 = arith.cmpf oeq, %1588, %2563 : vector<10x128xf32>
    %2565 = arith.extui %2564 : vector<10x128xi1> to vector<10x128xi32>
    %2566 = arith.sitofp %2565 : vector<10x128xi32> to vector<10x128xf32>
    %cst_577 = arith.constant dense<0.000000e+00> : vector<128xf32>
    %2567 = vector.multi_reduction <add>, %2566, %cst_577 [0] : vector<10x128xf32> to vector<128xf32>
    %2568 = vector.shape_cast %2567 : vector<128xf32> to vector<1x128xf32>
    %cst_578 = arith.constant 1.000000e+00 : f32
    %2569 = vector.broadcast %cst_578 : f32 to vector<1x128xf32>
    %2570 = arith.cmpf ogt, %2568, %2569 : vector<1x128xf32>
    %2571 = vector.broadcast %1669 : vector<1x128xf32> to vector<10x128xf32>
    %2572 = arith.cmpf oeq, %3, %2571 : vector<10x128xf32>
    %2573 = vector.broadcast %2570 : vector<1x128xi1> to vector<10x128xi1>
    %2574 = arith.andi %2573, %2572 : vector<10x128xi1>
    %2575 = arith.extui %2574 : vector<10x128xi1> to vector<10x128xi32>
    %2576 = arith.sitofp %2575 : vector<10x128xi32> to vector<10x128xf32>
    %2577 = arith.addf %1588, %2576 : vector<10x128xf32>
    %cst_579 = arith.constant dense<0xFF800000> : vector<128xf32>
    %2578 = vector.multi_reduction <maximumf>, %2577, %cst_579 [0] : vector<10x128xf32> to vector<128xf32>
    %2579 = vector.shape_cast %2578 : vector<128xf32> to vector<1x128xf32>
    %2580 = vector.broadcast %2579 : vector<1x128xf32> to vector<10x128xf32>
    %2581 = arith.cmpf oeq, %2577, %2580 : vector<10x128xf32>
    %2582 = arith.extui %2581 : vector<10x128xi1> to vector<10x128xi32>
    %2583 = arith.sitofp %2582 : vector<10x128xi32> to vector<10x128xf32>
    %cst_580 = arith.constant dense<0.000000e+00> : vector<128xf32>
    %2584 = vector.multi_reduction <add>, %2583, %cst_580 [0] : vector<10x128xf32> to vector<128xf32>
    %2585 = vector.shape_cast %2584 : vector<128xf32> to vector<1x128xf32>
    %cst_581 = arith.constant 1.000000e+00 : f32
    %2586 = vector.broadcast %cst_581 : f32 to vector<1x128xf32>
    %2587 = arith.cmpf ogt, %2585, %2586 : vector<1x128xf32>
    %2588 = vector.broadcast %1750 : vector<1x128xf32> to vector<10x128xf32>
    %2589 = arith.cmpf oeq, %3, %2588 : vector<10x128xf32>
    %2590 = vector.broadcast %2587 : vector<1x128xi1> to vector<10x128xi1>
    %2591 = arith.andi %2590, %2589 : vector<10x128xi1>
    %2592 = arith.extui %2591 : vector<10x128xi1> to vector<10x128xi32>
    %2593 = arith.sitofp %2592 : vector<10x128xi32> to vector<10x128xf32>
    %2594 = arith.addf %2577, %2593 : vector<10x128xf32>
    %cst_582 = arith.constant dense<0xFF800000> : vector<128xf32>
    %2595 = vector.multi_reduction <maximumf>, %2594, %cst_582 [0] : vector<10x128xf32> to vector<128xf32>
    %2596 = vector.shape_cast %2595 : vector<128xf32> to vector<1x128xf32>
    %2597 = vector.broadcast %2596 : vector<1x128xf32> to vector<10x128xf32>
    %2598 = arith.cmpf oeq, %2594, %2597 : vector<10x128xf32>
    %2599 = arith.extui %2598 : vector<10x128xi1> to vector<10x128xi32>
    %2600 = arith.sitofp %2599 : vector<10x128xi32> to vector<10x128xf32>
    %cst_583 = arith.constant dense<0.000000e+00> : vector<128xf32>
    %2601 = vector.multi_reduction <add>, %2600, %cst_583 [0] : vector<10x128xf32> to vector<128xf32>
    %2602 = vector.shape_cast %2601 : vector<128xf32> to vector<1x128xf32>
    %cst_584 = arith.constant 1.000000e+00 : f32
    %2603 = vector.broadcast %cst_584 : f32 to vector<1x128xf32>
    %2604 = arith.cmpf ogt, %2602, %2603 : vector<1x128xf32>
    %2605 = vector.broadcast %1831 : vector<1x128xf32> to vector<10x128xf32>
    %2606 = arith.cmpf oeq, %3, %2605 : vector<10x128xf32>
    %2607 = vector.broadcast %2604 : vector<1x128xi1> to vector<10x128xi1>
    %2608 = arith.andi %2607, %2606 : vector<10x128xi1>
    %2609 = arith.extui %2608 : vector<10x128xi1> to vector<10x128xi32>
    %2610 = arith.sitofp %2609 : vector<10x128xi32> to vector<10x128xf32>
    %2611 = arith.addf %2594, %2610 : vector<10x128xf32>
    %cst_585 = arith.constant dense<0xFF800000> : vector<128xf32>
    %2612 = vector.multi_reduction <maximumf>, %2611, %cst_585 [0] : vector<10x128xf32> to vector<128xf32>
    %2613 = vector.shape_cast %2612 : vector<128xf32> to vector<1x128xf32>
    %2614 = vector.broadcast %2613 : vector<1x128xf32> to vector<10x128xf32>
    %2615 = arith.cmpf oeq, %2611, %2614 : vector<10x128xf32>
    %2616 = arith.extui %2615 : vector<10x128xi1> to vector<10x128xi32>
    %2617 = arith.sitofp %2616 : vector<10x128xi32> to vector<10x128xf32>
    %cst_586 = arith.constant dense<0.000000e+00> : vector<128xf32>
    %2618 = vector.multi_reduction <add>, %2617, %cst_586 [0] : vector<10x128xf32> to vector<128xf32>
    %2619 = vector.shape_cast %2618 : vector<128xf32> to vector<1x128xf32>
    %cst_587 = arith.constant 1.000000e+00 : f32
    %2620 = vector.broadcast %cst_587 : f32 to vector<1x128xf32>
    %2621 = arith.cmpf ogt, %2619, %2620 : vector<1x128xf32>
    %2622 = vector.broadcast %1912 : vector<1x128xf32> to vector<10x128xf32>
    %2623 = arith.cmpf oeq, %3, %2622 : vector<10x128xf32>
    %2624 = vector.broadcast %2621 : vector<1x128xi1> to vector<10x128xi1>
    %2625 = arith.andi %2624, %2623 : vector<10x128xi1>
    %2626 = arith.extui %2625 : vector<10x128xi1> to vector<10x128xi32>
    %2627 = arith.sitofp %2626 : vector<10x128xi32> to vector<10x128xf32>
    %2628 = arith.addf %2611, %2627 : vector<10x128xf32>
    %cst_588 = arith.constant dense<0xFF800000> : vector<128xf32>
    %2629 = vector.multi_reduction <maximumf>, %2628, %cst_588 [0] : vector<10x128xf32> to vector<128xf32>
    %2630 = vector.shape_cast %2629 : vector<128xf32> to vector<1x128xf32>
    %2631 = vector.broadcast %2630 : vector<1x128xf32> to vector<10x128xf32>
    %2632 = arith.cmpf oeq, %2628, %2631 : vector<10x128xf32>
    %2633 = arith.extui %2632 : vector<10x128xi1> to vector<10x128xi32>
    %2634 = arith.sitofp %2633 : vector<10x128xi32> to vector<10x128xf32>
    %cst_589 = arith.constant dense<0.000000e+00> : vector<128xf32>
    %2635 = vector.multi_reduction <add>, %2634, %cst_589 [0] : vector<10x128xf32> to vector<128xf32>
    %2636 = vector.shape_cast %2635 : vector<128xf32> to vector<1x128xf32>
    %cst_590 = arith.constant 1.000000e+00 : f32
    %2637 = vector.broadcast %cst_590 : f32 to vector<1x128xf32>
    %2638 = arith.cmpf ogt, %2636, %2637 : vector<1x128xf32>
    %2639 = vector.broadcast %1993 : vector<1x128xf32> to vector<10x128xf32>
    %2640 = arith.cmpf oeq, %3, %2639 : vector<10x128xf32>
    %2641 = vector.broadcast %2638 : vector<1x128xi1> to vector<10x128xi1>
    %2642 = arith.andi %2641, %2640 : vector<10x128xi1>
    %2643 = arith.extui %2642 : vector<10x128xi1> to vector<10x128xi32>
    %2644 = arith.sitofp %2643 : vector<10x128xi32> to vector<10x128xf32>
    %2645 = arith.addf %2628, %2644 : vector<10x128xf32>
    %cst_591 = arith.constant dense<0xFF800000> : vector<128xf32>
    %2646 = vector.multi_reduction <maximumf>, %2645, %cst_591 [0] : vector<10x128xf32> to vector<128xf32>
    %2647 = vector.shape_cast %2646 : vector<128xf32> to vector<1x128xf32>
    %2648 = vector.broadcast %2647 : vector<1x128xf32> to vector<10x128xf32>
    %2649 = arith.cmpf oeq, %2645, %2648 : vector<10x128xf32>
    %2650 = arith.extui %2649 : vector<10x128xi1> to vector<10x128xi32>
    %2651 = arith.sitofp %2650 : vector<10x128xi32> to vector<10x128xf32>
    %cst_592 = arith.constant dense<0.000000e+00> : vector<128xf32>
    %2652 = vector.multi_reduction <add>, %2651, %cst_592 [0] : vector<10x128xf32> to vector<128xf32>
    %2653 = vector.shape_cast %2652 : vector<128xf32> to vector<1x128xf32>
    %cst_593 = arith.constant 1.000000e+00 : f32
    %2654 = vector.broadcast %cst_593 : f32 to vector<1x128xf32>
    %2655 = arith.cmpf ogt, %2653, %2654 : vector<1x128xf32>
    %2656 = vector.broadcast %2074 : vector<1x128xf32> to vector<10x128xf32>
    %2657 = arith.cmpf oeq, %3, %2656 : vector<10x128xf32>
    %2658 = vector.broadcast %2655 : vector<1x128xi1> to vector<10x128xi1>
    %2659 = arith.andi %2658, %2657 : vector<10x128xi1>
    %2660 = arith.extui %2659 : vector<10x128xi1> to vector<10x128xi32>
    %2661 = arith.sitofp %2660 : vector<10x128xi32> to vector<10x128xf32>
    %2662 = arith.addf %2645, %2661 : vector<10x128xf32>
    %cst_594 = arith.constant dense<0xFF800000> : vector<128xf32>
    %2663 = vector.multi_reduction <maximumf>, %2662, %cst_594 [0] : vector<10x128xf32> to vector<128xf32>
    %2664 = vector.shape_cast %2663 : vector<128xf32> to vector<1x128xf32>
    %2665 = vector.broadcast %2664 : vector<1x128xf32> to vector<10x128xf32>
    %2666 = arith.cmpf oeq, %2662, %2665 : vector<10x128xf32>
    %2667 = arith.extui %2666 : vector<10x128xi1> to vector<10x128xi32>
    %2668 = arith.sitofp %2667 : vector<10x128xi32> to vector<10x128xf32>
    %cst_595 = arith.constant dense<0.000000e+00> : vector<128xf32>
    %2669 = vector.multi_reduction <add>, %2668, %cst_595 [0] : vector<10x128xf32> to vector<128xf32>
    %2670 = vector.shape_cast %2669 : vector<128xf32> to vector<1x128xf32>
    %cst_596 = arith.constant 1.000000e+00 : f32
    %2671 = vector.broadcast %cst_596 : f32 to vector<1x128xf32>
    %2672 = arith.cmpf ogt, %2670, %2671 : vector<1x128xf32>
    %2673 = vector.broadcast %2155 : vector<1x128xf32> to vector<10x128xf32>
    %2674 = arith.cmpf oeq, %3, %2673 : vector<10x128xf32>
    %2675 = vector.broadcast %2672 : vector<1x128xi1> to vector<10x128xi1>
    %2676 = arith.andi %2675, %2674 : vector<10x128xi1>
    %2677 = arith.extui %2676 : vector<10x128xi1> to vector<10x128xi32>
    %2678 = arith.sitofp %2677 : vector<10x128xi32> to vector<10x128xf32>
    %2679 = arith.addf %2662, %2678 : vector<10x128xf32>
    %cst_597 = arith.constant dense<0xFF800000> : vector<128xf32>
    %2680 = vector.multi_reduction <maximumf>, %2679, %cst_597 [0] : vector<10x128xf32> to vector<128xf32>
    %2681 = vector.shape_cast %2680 : vector<128xf32> to vector<1x128xf32>
    %2682 = vector.broadcast %2681 : vector<1x128xf32> to vector<10x128xf32>
    %2683 = arith.cmpf oeq, %2679, %2682 : vector<10x128xf32>
    %2684 = arith.extui %2683 : vector<10x128xi1> to vector<10x128xi32>
    %2685 = arith.sitofp %2684 : vector<10x128xi32> to vector<10x128xf32>
    %cst_598 = arith.constant dense<0.000000e+00> : vector<128xf32>
    %2686 = vector.multi_reduction <add>, %2685, %cst_598 [0] : vector<10x128xf32> to vector<128xf32>
    %2687 = vector.shape_cast %2686 : vector<128xf32> to vector<1x128xf32>
    %cst_599 = arith.constant 1.000000e+00 : f32
    %2688 = vector.broadcast %cst_599 : f32 to vector<1x128xf32>
    %2689 = arith.cmpf ogt, %2687, %2688 : vector<1x128xf32>
    %2690 = vector.broadcast %2236 : vector<1x128xf32> to vector<10x128xf32>
    %2691 = arith.cmpf oeq, %3, %2690 : vector<10x128xf32>
    %2692 = vector.broadcast %2689 : vector<1x128xi1> to vector<10x128xi1>
    %2693 = arith.andi %2692, %2691 : vector<10x128xi1>
    %2694 = arith.extui %2693 : vector<10x128xi1> to vector<10x128xi32>
    %2695 = arith.sitofp %2694 : vector<10x128xi32> to vector<10x128xf32>
    %2696 = arith.addf %2679, %2695 : vector<10x128xf32>
    %cst_600 = arith.constant dense<0xFF800000> : vector<128xf32>
    %2697 = vector.multi_reduction <maximumf>, %2696, %cst_600 [0] : vector<10x128xf32> to vector<128xf32>
    %2698 = vector.shape_cast %2697 : vector<128xf32> to vector<1x128xf32>
    %2699 = vector.broadcast %2698 : vector<1x128xf32> to vector<10x128xf32>
    %2700 = arith.cmpf oeq, %2696, %2699 : vector<10x128xf32>
    %2701 = arith.extui %2700 : vector<10x128xi1> to vector<10x128xi32>
    %2702 = arith.sitofp %2701 : vector<10x128xi32> to vector<10x128xf32>
    %cst_601 = arith.constant dense<0.000000e+00> : vector<128xf32>
    %2703 = vector.multi_reduction <add>, %2702, %cst_601 [0] : vector<10x128xf32> to vector<128xf32>
    %2704 = vector.shape_cast %2703 : vector<128xf32> to vector<1x128xf32>
    %cst_602 = arith.constant 1.000000e+00 : f32
    %2705 = vector.broadcast %cst_602 : f32 to vector<1x128xf32>
    %2706 = arith.cmpf ogt, %2704, %2705 : vector<1x128xf32>
    %2707 = vector.broadcast %2317 : vector<1x128xf32> to vector<10x128xf32>
    %2708 = arith.cmpf oeq, %3, %2707 : vector<10x128xf32>
    %2709 = vector.broadcast %2706 : vector<1x128xi1> to vector<10x128xi1>
    %2710 = arith.andi %2709, %2708 : vector<10x128xi1>
    %2711 = arith.extui %2710 : vector<10x128xi1> to vector<10x128xi32>
    %2712 = arith.sitofp %2711 : vector<10x128xi32> to vector<10x128xf32>
    %2713 = arith.addf %2696, %2712 : vector<10x128xf32>
    %cst_603 = arith.constant dense<0xFF800000> : vector<128xf32>
    %2714 = vector.multi_reduction <maximumf>, %2713, %cst_603 [0] : vector<10x128xf32> to vector<128xf32>
    %2715 = vector.shape_cast %2714 : vector<128xf32> to vector<1x128xf32>
    %2716 = vector.broadcast %2715 : vector<1x128xf32> to vector<10x128xf32>
    %2717 = arith.cmpf oeq, %2713, %2716 : vector<10x128xf32>
    %2718 = arith.extui %2717 : vector<10x128xi1> to vector<10x128xi32>
    %2719 = arith.sitofp %2718 : vector<10x128xi32> to vector<10x128xf32>
    %cst_604 = arith.constant dense<0.000000e+00> : vector<128xf32>
    %2720 = vector.multi_reduction <add>, %2719, %cst_604 [0] : vector<10x128xf32> to vector<128xf32>
    %2721 = vector.shape_cast %2720 : vector<128xf32> to vector<1x128xf32>
    %cst_605 = arith.constant 1.000000e+00 : f32
    %2722 = vector.broadcast %cst_605 : f32 to vector<1x128xf32>
    %2723 = arith.cmpf ogt, %2721, %2722 : vector<1x128xf32>
    %2724 = vector.broadcast %2398 : vector<1x128xf32> to vector<10x128xf32>
    %2725 = arith.cmpf oeq, %3, %2724 : vector<10x128xf32>
    %2726 = vector.broadcast %2723 : vector<1x128xi1> to vector<10x128xi1>
    %2727 = arith.andi %2726, %2725 : vector<10x128xi1>
    %2728 = arith.extui %2727 : vector<10x128xi1> to vector<10x128xi32>
    %2729 = arith.sitofp %2728 : vector<10x128xi32> to vector<10x128xf32>
    %2730 = arith.addf %2713, %2729 : vector<10x128xf32>
    %cst_606 = arith.constant dense<0xFF800000> : vector<128xf32>
    %2731 = vector.multi_reduction <maximumf>, %2730, %cst_606 [0] : vector<10x128xf32> to vector<128xf32>
    %2732 = vector.shape_cast %2731 : vector<128xf32> to vector<1x128xf32>
    %2733 = vector.broadcast %2732 : vector<1x128xf32> to vector<10x128xf32>
    %2734 = arith.cmpf oeq, %2730, %2733 : vector<10x128xf32>
    %2735 = arith.extui %2734 : vector<10x128xi1> to vector<10x128xi32>
    %2736 = arith.sitofp %2735 : vector<10x128xi32> to vector<10x128xf32>
    %cst_607 = arith.constant dense<0.000000e+00> : vector<128xf32>
    %2737 = vector.multi_reduction <add>, %2736, %cst_607 [0] : vector<10x128xf32> to vector<128xf32>
    %2738 = vector.shape_cast %2737 : vector<128xf32> to vector<1x128xf32>
    %cst_608 = arith.constant 1.000000e+00 : f32
    %2739 = vector.broadcast %cst_608 : f32 to vector<1x128xf32>
    %2740 = arith.cmpf ogt, %2738, %2739 : vector<1x128xf32>
    %2741 = vector.broadcast %2479 : vector<1x128xf32> to vector<10x128xf32>
    %2742 = arith.cmpf oeq, %3, %2741 : vector<10x128xf32>
    %2743 = vector.broadcast %2740 : vector<1x128xi1> to vector<10x128xi1>
    %2744 = arith.andi %2743, %2742 : vector<10x128xi1>
    %2745 = arith.extui %2744 : vector<10x128xi1> to vector<10x128xi32>
    %2746 = arith.sitofp %2745 : vector<10x128xi32> to vector<10x128xf32>
    %2747 = arith.addf %2730, %2746 : vector<10x128xf32>
    %cst_609 = arith.constant dense<0xFF800000> : vector<128xf32>
    %2748 = vector.multi_reduction <maximumf>, %2747, %cst_609 [0] : vector<10x128xf32> to vector<128xf32>
    %2749 = vector.shape_cast %2748 : vector<128xf32> to vector<1x128xf32>
    %2750 = vector.broadcast %2749 : vector<1x128xf32> to vector<10x128xf32>
    %2751 = arith.cmpf oeq, %2747, %2750 : vector<10x128xf32>
    %2752 = arith.extui %2751 : vector<10x128xi1> to vector<10x128xi32>
    %2753 = arith.sitofp %2752 : vector<10x128xi32> to vector<10x128xf32>
    %cst_610 = arith.constant dense<0.000000e+00> : vector<128xf32>
    %2754 = vector.multi_reduction <add>, %2753, %cst_610 [0] : vector<10x128xf32> to vector<128xf32>
    %2755 = vector.shape_cast %2754 : vector<128xf32> to vector<1x128xf32>
    %cst_611 = arith.constant 1.000000e+00 : f32
    %2756 = vector.broadcast %cst_611 : f32 to vector<1x128xf32>
    %2757 = arith.cmpf ogt, %2755, %2756 : vector<1x128xf32>
    %2758 = vector.broadcast %2560 : vector<1x128xf32> to vector<10x128xf32>
    %2759 = arith.cmpf oeq, %3, %2758 : vector<10x128xf32>
    %2760 = vector.broadcast %2757 : vector<1x128xi1> to vector<10x128xi1>
    %2761 = arith.andi %2760, %2759 : vector<10x128xi1>
    %2762 = arith.extui %2761 : vector<10x128xi1> to vector<10x128xi32>
    %2763 = arith.sitofp %2762 : vector<10x128xi32> to vector<10x128xf32>
    %2764 = arith.addf %2747, %2763 : vector<10x128xf32>
    %cst_612 = arith.constant 6.250000e-02 : f32
    %2765 = vector.broadcast %cst_612 : f32 to vector<10x128xf32>
    %2766 = arith.mulf %2764, %2765 : vector<10x128xf32>
    %cst_613 = arith.constant 9.99999993E-9 : f32
    %2767 = vector.broadcast %cst_613 : f32 to vector<10x128xf32>
    %2768 = arith.addf %2766, %2767 : vector<10x128xf32>
    %2769 = math.log %2768 : vector<10x128xf32>
    %c0_614 = arith.constant 0 : index
    %c0_615 = arith.constant 0 : index
    %2770 = vector.load %arg4[%c0_614, %c0_615] : memref<10x128xf32, #tpu.memory_space<vmem>>, vector<10x128xf32>
    tpu.vector_store %arg4[%c0_614, %c0_615], %2769 {strides = array<i32>} : memref<10x128xf32, #tpu.memory_space<vmem>>, vector<10x128xf32>,
    return
  }
  func.func @transform_0(%arg0: i32) -> (i32, i32, i32) {
    %c0_i32 = arith.constant 0 : i32
    %c0_i32_0 = arith.constant 0 : i32
    %c0_i32_1 = arith.constant 0 : i32
    return %c0_i32, %c0_i32_0, %arg0 : i32, i32, i32
  }
  func.func @transform_1(%arg0: i32) -> (i32, i32) {
    %c0_i32 = arith.constant 0 : i32
    %c0_i32_0 = arith.constant 0 : i32
    %c0_i32_1 = arith.constant 0 : i32
    return %c0_i32, %c0_i32_0 : i32, i32
  }
  func.func @transform_2(%arg0: i32) -> (i32, i32) {
    %c0_i32 = arith.constant 0 : i32
    %c0_i32_0 = arith.constant 0 : i32
    %c0_i32_1 = arith.constant 0 : i32
    return %c0_i32, %c0_i32_0 : i32, i32
  }
  func.func @transform_3(%arg0: i32) -> (i32, i32) {
    %c0_i32 = arith.constant 0 : i32
    %c0_i32_0 = arith.constant 0 : i32
    return %c0_i32, %arg0 : i32, i32
  }
}

</mosaic_0001>

<bundles_post_ra>
// kernel: tpu_custom_call.1
= control target key start
LH: loop header
LB: loop body
LE: loop exit
PB: predicated region body
PF: predicated region fallthrough
CT: control target
= control target key end

     0   :  { %8 = vsyncpa [#allocation3], 0  ;;  %s8541_s0 = inlined_call_operand.hbm [shape: f32[16,32,256], index: 0, kind: input, shape index: {}]   ;;  %s8542_s1 = inlined_call_operand.vmem [shape: f32[10,32], index: 1, kind: input, shape index: {}]   ;;  %s8543_s2 = inlined_call_operand.vmem [shape: f32[10,1], index: 2, kind: input, shape index: {}]   ;;  %s8544_s3 = inlined_call_operand.hbm [shape: f32[10,256], index: 3, kind: output, shape index: {}]  }
   0x1   :  { %10 = vsyncpa [#allocation3 + $0x1], 0 }
   0x2   :  { %11 = vsyncpa [#allocation4], 0 }
   0x3   :  { %13 = vsyncpa [#allocation4 + $0x1], 0  ;;  %s5593_s12 = smov 0   ;;  %s5595_s13 = smov 0  }
   0x4   :  { %s5597_s14 = smov 0   ;;  %s5599_s15 = smov 0  }
   0x5 LB: > { %s5614_s16 = sadd.s32 4294967295, %s5561_s15   ;;  %s4586_s17 = sadd.s32 4294967294, %s5561_s15   ;;  %s5561_s15 = sphi %s5599_s15, %s8712_s15   ;;  %s5557_s14 = sphi %s5597_s14, %s8711_s14   ;;  %s5553_s13 = sphi %s5595_s13, %s8710_s13   ;;  %s5549_s12 = sphi %s5593_s12, %s8709_s12  }
   0x6   : > { %s5618_s18 = sadd.s32 1, %s5561_s15   ;;  %s26_s19 = sadd.s32 1, %s5557_s14 }
   0x7   : > { %s23_s20 = ssub.s32 %s5561_s15, %s5618_s18  ;;  %p33_p0 = scmp.ne.s32.totalorder %s5557_s14, %s5553_s13 }
   0x8   : > { %p24_p1 = scmp.eq.s32.totalorder %s23_s20, 0  ;;  %p34_p2 = scmp.eq.s32.totalorder %s5561_s15, 0 }
   0x9   : > { %p39_p3 = scmp.ne.s32.totalorder %s5553_s13, %s5549_s12  ;;  %p40_p4 = scmp.eq.s32.totalorder %s5614_s16, 0 }
   0xa   : > { %s5630_s21 = scalar_select %p24_p1, %s5557_s14, %s26_s19  }
   0xb   : > { %p5632_p5 = por %p34_p2, %p33_p0  ;;  %p5636_p6 = por %p40_p4, %p39_p3 }
   0xc   : > { %p105_p7 = scmp.eq.s32.totalorder %s5614_s16, 1  ;;  %p111_p8 = scmp.eq.s32.totalorder %s4586_s17, 1 }
   0xd   : > { %s8594_s23 = scalar_select %p5636_p6, 1, 0 }
   0xe   : > { %p5294_p10 = scmp.lt.s32.totalorder %s5561_s15, 2  ;;  %p5643_p11 = por %p105_p7, %p33_p0 }
   0xf   : > { %p5647_p12 = por %p111_p8, %p39_p3  ;;  %s137_s26 = sand.u32 1, %s5557_s14  }
  0x10   : > { %s8595_s24 = scalar_select %p5643_p11, 1, 0 }
  0x11   : > { %s8596_s25 = scalar_select %p5647_p12, 1, 0 }
  0x12   : > { %s4590_s27 = sshll.u32 %s5561_s15, 7  ;;  %s4589_s28 = sshll.u32 %s137_s26, 9 }
  0x13   : > { %s5656_s4 = scalar_lea.hbm %s8541_s0, %s4590_s27  ;;  %s141_s5 = scalar_lea.vmem [#allocation2], %s4589_s28 }
  0x14   : > { %s147_s6 = sshll.u32 %s141_s5, 4  ;;  %p5660_p13 = pnand %p5294_p10, %p5632_p5  ;;  %s5664_s6 = int_to_ptr.vmem [resolvable:$true] %s147_s6 }
  0x15   : > { %s5667_s8 = scalar_lea.sflag [#allocation3], %s137_s26  ;;  %s5469_s9 = scalar_lea.hbm %s5656_s4, 8192 }
  0x16   : > { %p5470_p1 = scmp.ne.s32.totalorder %s5656_s4, %s5469_s9  ;;  %p5471_p2 = pneg %p5660_p13 }
  0x17   : > { %s5474_s17 = scalar_lea.hbm %s8541_s0, 16384  ;;  %p5475_p5 = scmp.lt.s32.totalorder %s5656_s4, %s8541_s0 }
  0x18   : > { %p5472_p3 = pnand %p5471_p2, %p5470_p1  ;;  %p5476_p7 = scmp.lt.s32.totalorder %s5474_s17, %s5469_s9 }
  0x1a   : > { %p5473_p4 = pneg %p5472_p3  ;;  %p5477_p8 = por %p5476_p7, %p5475_p5 }
  0x1c   : > { %p5478_p10 = pnand %p5477_p8, %p5473_p4 }
  0x1e   : > { %5481 = shalt.err (!%p5478_p10)
}
  0x1f   : > { %s5482_s22 = scalar_lea.vmem %s5664_s6, 8192  ;;  %s5563_s26 = smov [#allocation2]  }
  0x20   : > { %p5483_p9 = scmp.ne.s32.totalorder %s5664_s6, %s5482_s22  ;;  %s5487_s27 = sshll.u32 %s5563_s26, 4  ;;  %s5488_s27 = int_to_ptr.vmem [resolvable:$false] %s5487_s27 }
  0x21   : > { %s5489_s28 = scalar_lea.vmem %s5488_s27, 16384  ;;  %p5490_p3 = scmp.lt.s32.totalorder %s5664_s6, %s5488_s27 }
  0x22   : > { %p5485_p0 = pnand %p5483_p9, %p5471_p2  ;;  %p5491_p12 = scmp.lt.s32.totalorder %s5489_s28, %s5482_s22 }
  0x24   : > { %p5486_p1 = pneg %p5485_p0  ;;  %p5492_p11 = por %p5491_p12, %p5490_p3 }
  0x26   : > { %p5493_p6 = pnand %p5492_p11, %p5486_p1 }
  0x28   : > { %5496 = shalt.err (!%p5493_p6)
}
  0x29   : > { %s5564_s29 = smov 256   ;;  %s5565_s30 = smov 128  }
  0x2a   : > { %s5566_s5 = smov 8   ;;  %p155_p9 = scmp.lt.s32.totalorder %s5561_s15, 3 }
  0x2b   : > { %5289 = dma.hbm_to_vmem [thread:$0]  (!%p5660_p13), %s5656_s4, 8192, %s5664_s6, %s5667_s8, %s5564_s29, %s5565_s30, %s5566_s5  }
  0x2c   : > { %p8598_p0 = scmp.ge.s32.totalorder %s5561_s15, 1 }
  0x2e   : > { %p156_p2 = pnand %p8598_p0, %p155_p9 }
  0x30   : > { %159 = sbr.rel (%p156_p2) target bundleno = 1213 (0x4bd), region = 32 }
  0x35   : > { %s5692_s9 = sand.u32 1, %s5553_s13   ;;  %p8599_p6 = scmp.ne.s32.totalorder %s8594_s23, 0 }
  0x36   : > { %s4592_s10 = sshll.u32 %s5692_s9, 9  ;;  %s162_s11 = scalar_lea.sflag [#allocation3], %s5692_s9 }
  0x37   : > { %s5696_s17 = scalar_lea.vmem [#allocation2], %s4592_s10 }
  0x38   : > { %5540 = dma.done.wait (%p8599_p6), %s162_s11, 8192  }
  0x39   : > { %5542 = vsyncadd (%p8599_p6), %s162_s11, 4294959104  ;;  %v5567_v0 = vmov 0   ;;  %v200_v1 = vld [vmem:[%s5696_s17 + $0x18] sm:$0xff]  ;;  %v199_v3 = vld [vmem:[%s5696_s17 + $0x10] sm:$0xff]  ;;  %vm211_vm0 = vcmask 261120   ;;  %vm8592_vm1 = vcmask 1041408  }
  0x3a   : > { %5336 = vset.pattern.permute.xlu0 %v5567_v0  ;;  %v4599_v2 = vld [vmem:[%s5696_s17 + $0x38] sm:$0xff]  ;;  %5106 = vmatprep.subr.mxu0 %v200_v1  ;;  %v4598_v4 = vld [vmem:[%s5696_s17 + $0x30] sm:$0xff]  ;;  %v198_v5 = vld [vmem:[%s5696_s17 + $0x8] sm:$0xff]  ;;  %s4593_s26 = sshll.u32 %s5692_s9, 4  ;;  %s5007_s27 = sshll.u32 %s5614_s16, 7 }
  0x3b   : > { %5117 = vmatprep.subr.mxu1 %v4599_v2  ;;  %5107 = vmatpush3.msra.mxu0 %v200_v1  ;;  %v4597_v6 = vld [vmem:[%s5696_s17 + $0x28] sm:$0xff]  ;;  %v197_v7 = vld [vmem:[%s5696_s17] sm:$0xff]  ;;  %v4605_v11 = vld [vmem:[%s5696_s17 + $0x58] sm:$0xff]  ;;  %s187_s28 = scalar_lea.vmem [#allocation5], %s4593_s26  ;;  %s8496_s10 = scalar_lea.hbm %s8544_s3, %s5007_s27 }
  0x3c   : > { %5118 = vmatpush3.msra.mxu1 %v4599_v2  ;;  %5108 = vmatprep.subr.mxu0 %v199_v3  ;;  %v4596_v8 = vld [vmem:[%s5696_s17 + $0x20] sm:$0xff]  ;;  %v5718_v10 = vld [vmem:[%s8542_s1 + $0x8] sm:$0x3]  ;;  %v4611_v12 = vld [vmem:[%s5696_s17 + $0x78] sm:$0xff]  ;;  %s4513_s29 = sshll.u32 %s187_s28, 4  ;;  %s4501_s11 = scalar_lea.sflag [#allocation4], %s5692_s9  ;;  %s8498_s29 = int_to_ptr.vmem [resolvable:$true] %s4513_s29 }
  0x3d   : > { %5119 = vmatprep.subr.mxu1 %v4598_v4  ;;  %5109 = vmatpush3.msra.mxu0 %v199_v3  ;;  %v5713_v9 = vld [vmem:[%s8542_s1] sm:$0xff]  ;;  %v4604_v13 = vld [vmem:[%s5696_s17 + $0x50] sm:$0xff]  ;;  %v4603_v15 = vld [vmem:[%s5696_s17 + $0x48] sm:$0xff]  ;;  %s5497_s16 = scalar_lea.vmem %s8498_s29, 256  ;;  %p8706_p12 = scmp.ne.s32.totalorder %s8595_s24, 0 }
  0x3e   : > { %5120 = vmatpush3.msra.mxu1 %v4598_v4  ;;  %5110 = vmatprep.subr.mxu0 %v198_v5  ;;  %v4610_v14 = vld [vmem:[%s5696_s17 + $0x70] sm:$0xff]  ;;  %v4609_v16 = vld [vmem:[%s5696_s17 + $0x68] sm:$0xff]  ;;  %v4602_v17 = vld [vmem:[%s5696_s17 + $0x40] sm:$0xff]  ;;  %p5498_p11 = scmp.ne.s32.totalorder %s8498_s29, %s5497_s16 }
  0x3f   : > { %5121 = vmatprep.subr.mxu1 %v4597_v6  ;;  %5111 = vmatpush3.msra.mxu0 %v198_v5  ;;  %v4608_v18 = vld [vmem:[%s5696_s17 + $0x60] sm:$0xff]  ;;  %v4617_v19 = vld [vmem:[%s5696_s17 + $0x98] sm:$0xff]  ;;  %v4616_v21 = vld [vmem:[%s5696_s17 + $0x90] sm:$0xff] }
  0x40   : > { %5122 = vmatpush3.msra.mxu1 %v4597_v6  ;;  %5112 = vmatprep.subr.mxu0 %v197_v7  ;;  %v4623_v20 = vld [vmem:[%s5696_s17 + $0xb8] sm:$0xff]  ;;  %v4622_v22 = vld [vmem:[%s5696_s17 + $0xb0] sm:$0xff]  ;;  %v4615_v23 = vld [vmem:[%s5696_s17 + $0x88] sm:$0xff]  ;;  %p5499_p13 = pnand %p5498_p11, %p8706_p12 }
  0x41   : > { %5123 = vmatprep.subr.mxu1 %v4596_v8  ;;  %5113 = vmatpush3.msra.mxu0 %v197_v7  ;;  %v4621_v24 = vld [vmem:[%s5696_s17 + $0xa8] sm:$0xff]  ;;  %v4614_v25 = vld [vmem:[%s5696_s17 + $0x80] sm:$0xff]  ;;  %v4629_v27 = vld [vmem:[%s5696_s17 + $0xd8] sm:$0xff] }
  0x42   : > { %5114 = vmatprep.mubr.msk.f32.mxu0 %vm211_vm0, %v5713_v9  ;;  %5124 = vmatpush3.msra.mxu1 %v4596_v8  ;;  %v4620_v26 = vld [vmem:[%s5696_s17 + $0xa0] sm:$0xff]  ;;  %v4635_v28 = vld [vmem:[%s5696_s17 + $0xf8] sm:$0xff]  ;;  %v4628_v29 = vld [vmem:[%s5696_s17 + $0xd0] sm:$0xff]  ;;  %p5500_p4 = pneg %p5499_p13 }
  0x43   : > { %5125 = vmatprep.mubr.msk.f32.mxu1 %vm211_vm0, %v5713_v9  ;;  %5115 = vmatmul.mubr.msk.f32.vlgmr.msra.gmra.mxu0 %vm211_vm0, %v5718_v10  ;;  %v4634_v30 = vld [vmem:[%s5696_s17 + $0xf0] sm:$0xff]  ;;  %v4627_v31 = vld [vmem:[%s5696_s17 + $0xc8] sm:$0xff]  ;;  %v4626_v33 = vld [vmem:[%s5696_s17 + $0xc0] sm:$0xff] }
  0x44   : > { %5126 = vmatmul.mubr.msk.f32.vlgmr.msra.gmra.mxu1 %vm211_vm0, %v5718_v10  ;;  %5128 = vmatprep.subr.mxu0 %v4605_v11  ;;  %v4633_v32 = vld [vmem:[%s5696_s17 + $0xe8] sm:$0xff]  ;;  %v4632_v34 = vld [vmem:[%s5696_s17 + $0xe0] sm:$0xff]  ;;  %v4641_v35 = vld [vmem:[%s5696_s17 + $0x118] sm:$0xff] }
  0x45   : > { %5139 = vmatprep.subr.mxu1 %v4611_v12  ;;  %5129 = vmatpush3.msra.mxu0 %v4605_v11  ;;  %v4647_v36 = vld [vmem:[%s5696_s17 + $0x138] sm:$0xff]  ;;  %v4640_v37 = vld [vmem:[%s5696_s17 + $0x110] sm:$0xff]  ;;  %v4639_v39 = vld [vmem:[%s5696_s17 + $0x108] sm:$0xff] }
  0x46   : > { %5140 = vmatpush3.msra.mxu1 %v4611_v12  ;;  %5130 = vmatprep.subr.mxu0 %v4604_v13  ;;  %v4646_v38 = vld [vmem:[%s5696_s17 + $0x130] sm:$0xff]  ;;  %v4645_v40 = vld [vmem:[%s5696_s17 + $0x128] sm:$0xff]  ;;  %v4638_v41 = vld [vmem:[%s5696_s17 + $0x100] sm:$0xff] }
  0x47   : > { %5141 = vmatprep.subr.mxu1 %v4610_v14  ;;  %5131 = vmatpush3.msra.mxu0 %v4604_v13  ;;  %v4644_v42 = vld [vmem:[%s5696_s17 + $0x120] sm:$0xff]  ;;  %v4653_v43 = vld [vmem:[%s5696_s17 + $0x158] sm:$0xff]  ;;  %v4652_v45 = vld [vmem:[%s5696_s17 + $0x150] sm:$0xff] }
  0x48   : > { %5142 = vmatpush3.msra.mxu1 %v4610_v14  ;;  %5132 = vmatprep.subr.mxu0 %v4603_v15  ;;  %v4659_v44 = vld [vmem:[%s5696_s17 + $0x178] sm:$0xff]  ;;  %v4658_v46 = vld [vmem:[%s5696_s17 + $0x170] sm:$0xff]  ;;  %v4651_v47 = vld [vmem:[%s5696_s17 + $0x148] sm:$0xff] }
  0x49   : > { %5143 = vmatprep.subr.mxu1 %v4609_v16  ;;  %5133 = vmatpush3.msra.mxu0 %v4603_v15  ;;  %v4657_v48 = vld [vmem:[%s5696_s17 + $0x168] sm:$0xff]  ;;  %v4650_v49 = vld [vmem:[%s5696_s17 + $0x140] sm:$0xff]  ;;  %v4665_v51 = vld [vmem:[%s5696_s17 + $0x198] sm:$0xff] }
  0x4a   : > { %5144 = vmatpush3.msra.mxu1 %v4609_v16  ;;  %5134 = vmatprep.subr.mxu0 %v4602_v17  ;;  %v4656_v50 = vld [vmem:[%s5696_s17 + $0x160] sm:$0xff]  ;;  %v4671_v52 = vld [vmem:[%s5696_s17 + $0x1b8] sm:$0xff]  ;;  %v4664_v53 = vld [vmem:[%s5696_s17 + $0x190] sm:$0xff] }
  0x4b   : > { %5145 = vmatprep.subr.mxu1 %v4608_v18  ;;  %5135 = vmatpush3.msra.mxu0 %v4602_v17  ;;  %v4670_v54 = vld [vmem:[%s5696_s17 + $0x1b0] sm:$0xff]  ;;  %v4663_v55 = vld [vmem:[%s5696_s17 + $0x188] sm:$0xff]  ;;  %v4662_v57 = vld [vmem:[%s5696_s17 + $0x180] sm:$0xff]  ;;  %v192_v17 = vlaneseq }
  0x4c   : > { %5136 = vmatprep.mubr.msk.f32.mxu0 %vm211_vm0, %v5713_v9  ;;  %5146 = vmatpush3.msra.mxu1 %v4608_v18  ;;  %v4669_v56 = vld [vmem:[%s5696_s17 + $0x1a8] sm:$0xff]  ;;  %v4668_v58 = vld [vmem:[%s5696_s17 + $0x1a0] sm:$0xff]  ;;  %v4677_v59 = vld [vmem:[%s5696_s17 + $0x1d8] sm:$0xff] }
  0x4d   : > { %5147 = vmatprep.mubr.msk.f32.mxu1 %vm211_vm0, %v5713_v9  ;;  %5137 = vmatmul.mubr.msk.f32.vlgmr.msra.gmra.mxu0 %vm211_vm0, %v5718_v10  ;;  %v4683_v60 = vld [vmem:[%s5696_s17 + $0x1f8] sm:$0xff]  ;;  %v4676_v61 = vld [vmem:[%s5696_s17 + $0x1d0] sm:$0xff]  ;;  %v4675_v63 = vld [vmem:[%s5696_s17 + $0x1c8] sm:$0xff] }
  0x4e   : > { %5148 = vmatmul.mubr.msk.f32.vlgmr.msra.gmra.mxu1 %vm211_vm0, %v5718_v10  ;;  %5150 = vmatprep.subr.mxu0 %v4617_v19  ;;  %v4682_v62 = vld [vmem:[%s5696_s17 + $0x1f0] sm:$0xff]  ;;  %v4681_v0 = vld [vmem:[%s5696_s17 + $0x1e8] sm:$0xff]  ;;  %v4674_v1 = vld [vmem:[%s5696_s17 + $0x1c0] sm:$0xff] }
  0x4f   : > { %5161 = vmatprep.subr.mxu1 %v4623_v20  ;;  %5151 = vmatpush3.msra.mxu0 %v4617_v19  ;;  %v4680_v2 = vld [vmem:[%s5696_s17 + $0x1e0] sm:$0xff]  ;;  %v191_v3 = vld [vmem:[%s8543_s2 + $0x8] sm:$0x3]  ;;  %s5569_s17 = smov [#allocation5]  }
  0x50   : > { %5162 = vmatpush3.msra.mxu1 %v4623_v20  ;;  %5152 = vmatprep.subr.mxu0 %v4616_v21  ;;  %v190_v4 = vld [vmem:[%s8543_s2] sm:$0xff]  ;;  %s5501_s23 = sshll.u32 %s5569_s17, 4  ;;  %s5502_s23 = int_to_ptr.vmem [resolvable:$false] %s5501_s23 }
  0x51   : > { %5163 = vmatprep.subr.mxu1 %v4622_v22  ;;  %5153 = vmatpush3.msra.mxu0 %v4616_v21  ;;  %s5503_s4 = scalar_lea.vmem %s5502_s23, 512  ;;  %p5504_p5 = scmp.lt.s32.totalorder %s8498_s29, %s5502_s23 }
  0x52   : > { %5164 = vmatpush3.msra.mxu1 %v4622_v22  ;;  %5154 = vmatprep.subr.mxu0 %v4615_v23  ;;  %p5505_p7 = scmp.lt.s32.totalorder %s5503_s4, %s5497_s16 }
  0x53   : > { %5165 = vmatprep.subr.mxu1 %v4621_v24  ;;  %5155 = vmatpush3.msra.mxu0 %v4615_v23 }
  0x54   : > { %5166 = vmatpush3.msra.mxu1 %v4621_v24  ;;  %5156 = vmatprep.subr.mxu0 %v4614_v25  ;;  %p5506_p8 = por %p5505_p7, %p5504_p5 }
  0x55   : > { %5167 = vmatprep.subr.mxu1 %v4620_v26  ;;  %5157 = vmatpush3.msra.mxu0 %v4614_v25 }
  0x56   : > { %5158 = vmatprep.mubr.msk.f32.mxu0 %vm211_vm0, %v5713_v9  ;;  %5168 = vmatpush3.msra.mxu1 %v4620_v26  ;;  %v193_v26 = vshrl.u32 %v192_v17, 7  ;;  %p5507_p10 = pnand %p5506_p8, %p5500_p4 }
  0x57   : > { %5169 = vmatprep.mubr.msk.f32.mxu1 %vm211_vm0, %v5713_v9  ;;  %5159 = vmatmul.mubr.msk.f32.vlgmr.msra.gmra.mxu0 %vm211_vm0, %v5718_v10 }
  0x58   : > { %5170 = vmatmul.mubr.msk.f32.vlgmr.msra.gmra.mxu1 %vm211_vm0, %v5718_v10  ;;  %5172 = vmatprep.subr.mxu0 %v4629_v27 }
  0x59   : > { %5183 = vmatprep.subr.mxu1 %v4635_v28  ;;  %5173 = vmatpush3.msra.mxu0 %v4629_v27 }
  0x5a   : > { %5184 = vmatpush3.msra.mxu1 %v4635_v28  ;;  %5174 = vmatprep.subr.mxu0 %v4628_v29 }
  0x5b   : > { %5185 = vmatprep.subr.mxu1 %v4634_v30  ;;  %5175 = vmatpush3.msra.mxu0 %v4628_v29 }
  0x5c   : > { %5186 = vmatpush3.msra.mxu1 %v4634_v30  ;;  %5176 = vmatprep.subr.mxu0 %v4627_v31 }
  0x5d   : > { %5187 = vmatprep.subr.mxu1 %v4633_v32  ;;  %5177 = vmatpush3.msra.mxu0 %v4627_v31 }
  0x5e   : > { %5188 = vmatpush3.msra.mxu1 %v4633_v32  ;;  %5178 = vmatprep.subr.mxu0 %v4626_v33 }
  0x5f   : > { %5189 = vmatprep.subr.mxu1 %v4632_v34  ;;  %5179 = vmatpush3.msra.mxu0 %v4626_v33 }
  0x60   : > { %5180 = vmatprep.mubr.msk.f32.mxu0 %vm211_vm0, %v5713_v9  ;;  %5190 = vmatpush3.msra.mxu1 %v4632_v34 }
  0x61   : > { %5191 = vmatprep.mubr.msk.f32.mxu1 %vm211_vm0, %v5713_v9  ;;  %5181 = vmatmul.mubr.msk.f32.vlgmr.msra.gmra.mxu0 %vm211_vm0, %v5718_v10 }
  0x62   : > { %5192 = vmatmul.mubr.msk.f32.vlgmr.msra.gmra.mxu1 %vm211_vm0, %v5718_v10  ;;  %5194 = vmatprep.subr.mxu0 %v4641_v35 }
  0x63   : > { %5205 = vmatprep.subr.mxu1 %v4647_v36  ;;  %5195 = vmatpush3.msra.mxu0 %v4641_v35 }
  0x64   : > { %5206 = vmatpush3.msra.mxu1 %v4647_v36  ;;  %5196 = vmatprep.subr.mxu0 %v4640_v37 }
  0x65   : > { %5207 = vmatprep.subr.mxu1 %v4646_v38  ;;  %5197 = vmatpush3.msra.mxu0 %v4640_v37  ;;  %v194_v37 = vadd.s32 8, %v193_v26 }
  0x66   : > { %5208 = vmatpush3.msra.mxu1 %v4646_v38  ;;  %5198 = vmatprep.subr.mxu0 %v4639_v39 }
  0x67   : > { %5209 = vmatprep.subr.mxu1 %v4645_v40  ;;  %5199 = vmatpush3.msra.mxu0 %v4639_v39 }
  0x68   : > { %5210 = vmatpush3.msra.mxu1 %v4645_v40  ;;  %5200 = vmatprep.subr.mxu0 %v4638_v41 }
  0x69   : > { %5211 = vmatprep.subr.mxu1 %v4644_v42  ;;  %5201 = vmatpush3.msra.mxu0 %v4638_v41 }
  0x6a   : > { %5202 = vmatprep.mubr.msk.f32.mxu0 %vm211_vm0, %v5713_v9  ;;  %5212 = vmatpush3.msra.mxu1 %v4644_v42 }
  0x6b   : > { %5213 = vmatprep.mubr.msk.f32.mxu1 %vm211_vm0, %v5713_v9  ;;  %5203 = vmatmul.mubr.msk.f32.vlgmr.msra.gmra.mxu0 %vm211_vm0, %v5718_v10 }
  0x6c   : > { %5214 = vmatmul.mubr.msk.f32.vlgmr.msra.gmra.mxu1 %vm211_vm0, %v5718_v10  ;;  %5216 = vmatprep.subr.mxu0 %v4653_v43 }
  0x6d   : > { %5227 = vmatprep.subr.mxu1 %v4659_v44  ;;  %5217 = vmatpush3.msra.mxu0 %v4653_v43 }
  0x6e   : > { %5228 = vmatpush3.msra.mxu1 %v4659_v44  ;;  %5218 = vmatprep.subr.mxu0 %v4652_v45 }
  0x6f   : > { %5229 = vmatprep.subr.mxu1 %v4658_v46  ;;  %5219 = vmatpush3.msra.mxu0 %v4652_v45 }
  0x70   : > { %5230 = vmatpush3.msra.mxu1 %v4658_v46  ;;  %5220 = vmatprep.subr.mxu0 %v4651_v47  ;;  %v5886_v46 = vcvt.s32.f32 %v193_v26 }
  0x71   : > { %5231 = vmatprep.subr.mxu1 %v4657_v48  ;;  %5221 = vmatpush3.msra.mxu0 %v4651_v47  ;;  %v5888_v47 = vcvt.s32.f32 %v194_v37 }
  0x72   : > { %5232 = vmatpush3.msra.mxu1 %v4657_v48  ;;  %5222 = vmatprep.subr.mxu0 %v4650_v49  ;;  %8600 = vst [vmem:[#allocation8_spill] sm:$0xff] %v5886_v46 }
  0x73   : > { %5233 = vmatprep.subr.mxu1 %v4656_v50  ;;  %5223 = vmatpush3.msra.mxu0 %v4650_v49  ;;  %8601 = vst [vmem:[#allocation9_spill] sm:$0xff] %v5888_v47 }
  0x74   : > { %5224 = vmatprep.mubr.msk.f32.mxu0 %vm211_vm0, %v5713_v9  ;;  %5234 = vmatpush3.msra.mxu1 %v4656_v50 }
  0x75   : > { %5235 = vmatprep.mubr.msk.f32.mxu1 %vm211_vm0, %v5713_v9  ;;  %5225 = vmatmul.mubr.msk.f32.vlgmr.msra.gmra.mxu0 %vm211_vm0, %v5718_v10 }
  0x76   : > { %5236 = vmatmul.mubr.msk.f32.vlgmr.msra.gmra.mxu1 %vm211_vm0, %v5718_v10  ;;  %5238 = vmatprep.subr.mxu0 %v4665_v51 }
  0x77   : > { %5249 = vmatprep.subr.mxu1 %v4671_v52  ;;  %5239 = vmatpush3.msra.mxu0 %v4665_v51 }
  0x78   : > { %5250 = vmatpush3.msra.mxu1 %v4671_v52  ;;  %5240 = vmatprep.subr.mxu0 %v4664_v53 }
  0x79   : > { %5251 = vmatprep.subr.mxu1 %v4670_v54  ;;  %5241 = vmatpush3.msra.mxu0 %v4664_v53 }
  0x7a   : > { %5252 = vmatpush3.msra.mxu1 %v4670_v54  ;;  %5242 = vmatprep.subr.mxu0 %v4663_v55 }
  0x7b   : > { %5253 = vmatprep.subr.mxu1 %v4669_v56  ;;  %5243 = vmatpush3.msra.mxu0 %v4663_v55 }
  0x7c   : > { %5254 = vmatpush3.msra.mxu1 %v4669_v56  ;;  %5244 = vmatprep.subr.mxu0 %v4662_v57 }
  0x7d   : > { %5255 = vmatprep.subr.mxu1 %v4668_v58  ;;  %5245 = vmatpush3.msra.mxu0 %v4662_v57 }
  0x7e   : > { %5246 = vmatprep.mubr.msk.f32.mxu0 %vm211_vm0, %v5713_v9  ;;  %5256 = vmatpush3.msra.mxu1 %v4668_v58 }
  0x7f   : > { %5257 = vmatprep.mubr.msk.f32.mxu1 %vm211_vm0, %v5713_v9  ;;  %5247 = vmatmul.mubr.msk.f32.vlgmr.msra.gmra.mxu0 %vm211_vm0, %v5718_v10 }
  0x80   : > { %5258 = vmatmul.mubr.msk.f32.vlgmr.msra.gmra.mxu1 %vm211_vm0, %v5718_v10  ;;  %5260 = vmatprep.subr.mxu0 %v4677_v59 }
  0x81   : > { %5271 = vmatprep.subr.mxu1 %v4683_v60  ;;  %5261 = vmatpush3.msra.mxu0 %v4677_v59 }
  0x82   : > { %5272 = vmatpush3.msra.mxu1 %v4683_v60  ;;  %5262 = vmatprep.subr.mxu0 %v4676_v61 }
  0x83   : > { %5273 = vmatprep.subr.mxu1 %v4682_v62  ;;  %5263 = vmatpush3.msra.mxu0 %v4676_v61 }
  0x84   : > { %5274 = vmatpush3.msra.mxu1 %v4682_v62  ;;  %5264 = vmatprep.subr.mxu0 %v4675_v63 }
  0x85   : > { %5275 = vmatprep.subr.mxu1 %v4681_v0  ;;  %5265 = vmatpush3.msra.mxu0 %v4675_v63 }
  0x86   : > { %5276 = vmatpush3.msra.mxu1 %v4681_v0  ;;  %5266 = vmatprep.subr.mxu0 %v4674_v1 }
  0x87   : > { %5277 = vmatprep.subr.mxu1 %v4680_v2  ;;  %5267 = vmatpush3.msra.mxu0 %v4674_v1 }
  0x88   : > { %5268 = vmatprep.mubr.msk.f32.mxu0 %vm211_vm0, %v5713_v9  ;;  %5278 = vmatpush3.msra.mxu1 %v4680_v2 }
  0x89   : > { %5279 = vmatprep.mubr.msk.f32.mxu1 %vm211_vm0, %v5713_v9  ;;  %5269 = vmatmul.mubr.msk.f32.vlgmr.msra.gmra.mxu0 %vm211_vm0, %v5718_v10 }
  0x8a   : > { %5280 = vmatmul.mubr.msk.f32.vlgmr.msra.gmra.mxu1 %vm211_vm0, %v5718_v10  ;;  %208 = vperm.xlu0 %5336, %v191_v3  }
  0x8e   : > { %203 = vperm.xlu0 %5336, %v190_v4  }
 0x103   : > { %v5116_v5 = vpop.f32.mrf.mxu0 }
 0x104   : > { %v5127_v6 = vpop.f32.mrf.mxu1 }
 0x105   : > { %v5846_v7 = vpop.permute.xlu0 %208  ;;  %v284_v11 = vpop.f32.mrf.mxu0 }
 0x106   : > { %v5849_v8 = vadd.f32 %v5116_v5, %v5846_v7  ;;  %v5852_v9 = vadd.f32 %v5127_v6, %v5846_v7  ;;  %v417_v12 = vpop.f32.mrf.mxu1 }
 0x108   : > { %v294_v10 = vsel %vm8592_vm1, %v5849_v8, -inf  ;;  %v426_v13 = vsel %vm8592_vm1, %v5852_v9, -inf }
 0x109   : > { %v5858_v14 = vpop.permute.xlu0 %203 }
 0x10a   : > { %v5861_v15 = vadd.f32 %v284_v11, %v5858_v14  ;;  %v5864_v16 = vadd.f32 %v417_v12, %v5858_v14 }
 0x10c   : > { %v295_v18 = vmax.f32 %v5861_v15, %v294_v10  ;;  %v427_v19 = vmax.f32 %v5864_v16, %v426_v13 }
 0x10d   : > { %v5138_v20 = vpop.f32.mrf.mxu0 }
 0x10e   : > { %v5149_v21 = vpop.f32.mrf.mxu1  ;;  %v296_v22 = vrot.slane %v295_v18, 4  ;;  %v428_v23 = vrot.slane %v427_v19, 4  ;;  %v5869_v24 = vadd.f32 %v5138_v20, %v5846_v7 }
 0x10f   : > { %v5872_v25 = vadd.f32 %v5149_v21, %v5846_v7  ;;  %v549_v27 = vpop.f32.mrf.mxu0 }
 0x110   : > { %v681_v28 = vpop.f32.mrf.mxu1  ;;  %v297_v29 = vmax.f32 %v295_v18, %v296_v22  ;;  %v429_v30 = vmax.f32 %v427_v19, %v428_v23  ;;  %v558_v31 = vsel %vm8592_vm1, %v5869_v24, -inf  ;;  %v5879_v33 = vadd.f32 %v549_v27, %v5858_v14 }
 0x111   : > { %v690_v32 = vsel %vm8592_vm1, %v5872_v25, -inf  ;;  %v5882_v34 = vadd.f32 %v681_v28, %v5858_v14 }
 0x112   : > { %v298_v35 = vrot.slane %v297_v29, 2  ;;  %v430_v36 = vrot.slane %v429_v30, 2  ;;  %v559_v38 = vmax.f32 %v5879_v33, %v558_v31 }
 0x113   : > { %v691_v39 = vmax.f32 %v5882_v34, %v690_v32 }
 0x114   : > { %v299_v40 = vmax.f32 %v297_v29, %v298_v35  ;;  %v431_v41 = vmax.f32 %v429_v30, %v430_v36  ;;  %v560_v42 = vrot.slane %v559_v38, 4 }
 0x115   : > { %v692_v43 = vrot.slane %v691_v39, 4 }
 0x116   : > { %v300_v44 = vrot.slane %v299_v40, 1  ;;  %v432_v45 = vrot.slane %v431_v41, 1  ;;  %v561_v48 = vmax.f32 %v559_v38, %v560_v42 }
 0x117   : > { %v693_v49 = vmax.f32 %v691_v39, %v692_v43  ;;  %v5160_v5 = vpop.f32.mrf.mxu0 }
 0x118   : > { %v5890_v50 = vmax.f32 %v299_v40, %v300_v44  ;;  %v5892_v51 = vmax.f32 %v431_v41, %v432_v45  ;;  %v562_v52 = vrot.slane %v561_v48, 2  ;;  %v5930_v10 = vadd.f32 %v5160_v5, %v5846_v7  ;;  %v5171_v13 = vpop.f32.mrf.mxu1 }
 0x119   : > { %v694_v55 = vrot.slane %v693_v49, 2  ;;  %v813_v17 = vpop.f32.mrf.mxu0  ;;  %v5943_v26 = vadd.f32 %v5171_v13, %v5846_v7 }
 0x11a   : > { %vm334_vm2 = vcmp.eq.f32.partialorder %v5861_v15, %v5890_v50  ;;  %vm335_vm3 = vcmp.eq.f32.partialorder %v5849_v8, %v5890_v50  ;;  %vm466_vm4 = vcmp.eq.f32.partialorder %v5864_v16, %v5892_v51  ;;  %vm467_vm5 = vcmp.eq.f32.partialorder %v5852_v9, %v5892_v51  ;;  %v945_v27 = vpop.f32.mrf.mxu1 }
 0x11b   : > { %v336_v53 = vsel %vm334_vm2, %v5886_v46, 10.0  ;;  %v337_v54 = vsel %vm335_vm3, %v5888_v47, 10.0  ;;  %v468_v58 = vsel %vm466_vm4, %v5886_v46, 10.0  ;;  %v469_v59 = vsel %vm467_vm5, %v5888_v47, 10.0 }
 0x11c   : > { %v338_v56 = vsel %vm8592_vm1, %v337_v54, inf  ;;  %v563_v60 = vmax.f32 %v561_v48, %v562_v52  ;;  %v470_v61 = vsel %vm8592_vm1, %v469_v59, inf  ;;  %v695_v62 = vmax.f32 %v693_v49, %v694_v55 }
 0x11d   : > { %v5903_v57 = vmin.f32 %v336_v53, %v338_v56  ;;  %v5910_v63 = vmin.f32 %v468_v58, %v470_v61  ;;  %v5936_v21 = vadd.f32 %v813_v17, %v5858_v14  ;;  %v822_v23 = vsel %vm8592_vm1, %v5930_v10, -inf }
 0x11e   : > { %v564_v0 = vrot.slane %v563_v60, 1  ;;  %v696_v1 = vrot.slane %v695_v62, 1  ;;  %v5947_v29 = vadd.f32 %v945_v27, %v5858_v14  ;;  %v954_v30 = vsel %vm8592_vm1, %v5943_v26, -inf }
 0x11f   : > { %v823_v28 = vmax.f32 %v5936_v21, %v822_v23 }
 0x120   : > { %v5912_v2 = vmax.f32 %v563_v60, %v564_v0  ;;  %v5916_v3 = vmax.f32 %v695_v62, %v696_v1  ;;  %v955_v32 = vmax.f32 %v5947_v29, %v954_v30 }
 0x121   : > { %v824_v31 = vrot.slane %v823_v28, 4  ;;  %v5182_v43 = vpop.f32.mrf.mxu0 }
 0x122   : > { %vm598_vm6 = vcmp.eq.f32.partialorder %v5879_v33, %v5912_v2  ;;  %vm599_vm7 = vcmp.eq.f32.partialorder %v5869_v24, %v5912_v2  ;;  %vm730_vm8 = vcmp.eq.f32.partialorder %v5882_v34, %v5916_v3  ;;  %vm731_vm9 = vcmp.eq.f32.partialorder %v5872_v25, %v5916_v3  ;;  %v5193_v59 = vpop.f32.mrf.mxu1 }
 0x123   : > { %v600_v4 = vsel %vm598_vm6, %v5886_v46, 10.0  ;;  %v601_v6 = vsel %vm599_vm7, %v5888_v47, 10.0  ;;  %v732_v18 = vsel %vm730_vm8, %v5886_v46, 10.0  ;;  %v733_v19 = vsel %vm731_vm9, %v5888_v47, 10.0  ;;  %v1077_v49 = vpop.f32.mrf.mxu0 }
 0x124   : > { %v602_v11 = vsel %vm8592_vm1, %v601_v6, inf  ;;  %v734_v20 = vsel %vm8592_vm1, %v733_v19, inf  ;;  %v825_v35 = vmax.f32 %v823_v28, %v824_v31  ;;  %v956_v36 = vrot.slane %v955_v32, 4  ;;  %v1209_v1 = vpop.f32.mrf.mxu1 }
 0x125   : > { %v5923_v12 = vmin.f32 %v600_v4, %v602_v11  ;;  %v5938_v22 = vmin.f32 %v732_v18, %v734_v20  ;;  %v5959_v48 = vadd.f32 %v5182_v43, %v5846_v7  ;;  %v5964_v54 = vadd.f32 %v1077_v49, %v5858_v14 }
 0x126   : > { %v826_v37 = vrot.slane %v825_v35, 2  ;;  %v957_v38 = vmax.f32 %v955_v32, %v956_v36  ;;  %v5974_v61 = vadd.f32 %v5193_v59, %v5846_v7  ;;  %v5989_v17 = vadd.f32 %v1209_v1, %v5858_v14 }
 0x127   : > { %v1086_v58 = vsel %vm8592_vm1, %v5959_v48, -inf }
 0x128   : > { %v827_v39 = vmax.f32 %v825_v35, %v826_v37  ;;  %v958_v40 = vrot.slane %v957_v38, 2  ;;  %v1087_v62 = vmax.f32 %v5964_v54, %v1086_v58  ;;  %v1218_v6 = vsel %vm8592_vm1, %v5974_v61, -inf }
 0x129   : > { %v1219_v20 = vmax.f32 %v5989_v17, %v1218_v6 }
 0x12a   : > { %v828_v41 = vrot.slane %v827_v39, 1  ;;  %v959_v42 = vmax.f32 %v957_v38, %v958_v40  ;;  %v1088_v11 = vrot.slane %v1087_v62, 4 }
 0x12b   : > { %v5204_v18 = vpop.f32.mrf.mxu0  ;;  %v1220_v27 = vrot.slane %v1219_v20, 4 }
 0x12c   : > { %v5952_v44 = vmax.f32 %v827_v39, %v828_v41  ;;  %v960_v45 = vrot.slane %v959_v42, 1  ;;  %v1089_v19 = vmax.f32 %v1087_v62, %v1088_v11  ;;  %v5993_v28 = vadd.f32 %v5204_v18, %v5846_v7 }
 0x12d   : > { %v1341_v30 = vpop.f32.mrf.mxu0  ;;  %v1221_v32 = vmax.f32 %v1219_v20, %v1220_v27 }
 0x12e   : > { %vm862_vm10 = vcmp.eq.f32.partialorder %v5936_v21, %v5952_v44  ;;  %vm863_vm11 = vcmp.eq.f32.partialorder %v5930_v10, %v5952_v44  ;;  %v5967_v56 = vmax.f32 %v959_v42, %v960_v45  ;;  %v1090_v23 = vrot.slane %v1089_v19, 2  ;;  %v5215_v45 = vpop.f32.mrf.mxu1 }
 0x12f   : > { %v864_v52 = vsel %vm862_vm10, %v5886_v46, 10.0  ;;  %v865_v53 = vsel %vm863_vm11, %v5888_v47, 10.0  ;;  %v5996_v36 = vadd.f32 %v1341_v30, %v5858_v14  ;;  %v1350_v37 = vsel %vm8592_vm1, %v5993_v28, -inf }
 0x130   : > { %v866_v55 = vsel %vm8592_vm1, %v865_v53, inf  ;;  %vm994_vm12 = vcmp.eq.f32.partialorder %v5947_v29, %v5967_v56  ;;  %vm995_vm13 = vcmp.eq.f32.partialorder %v5943_v26, %v5967_v56  ;;  %v1091_v31 = vmax.f32 %v1089_v19, %v1090_v23 }
 0x131   : > { %v5971_v60 = vmin.f32 %v864_v52, %v866_v55  ;;  %v996_v0 = vsel %vm994_vm12, %v5886_v46, 10.0  ;;  %v997_v4 = vsel %vm995_vm13, %v5888_v47, 10.0  ;;  %v1222_v38 = vrot.slane %v1221_v32, 2 }
 0x132   : > { %v998_v5 = vsel %vm8592_vm1, %v997_v4, inf  ;;  %v1092_v35 = vrot.slane %v1091_v31, 1  ;;  %v1351_v40 = vmax.f32 %v5996_v36, %v1350_v37  ;;  %v6015_v62 = vadd.f32 %v5215_v45, %v5846_v7 }
 0x133   : > { %v5986_v13 = vmin.f32 %v996_v0, %v998_v5  ;;  %v1223_v41 = vmax.f32 %v1221_v32, %v1222_v38  ;;  %v1473_v0 = vpop.f32.mrf.mxu1 }
 0x134   : > { %v6000_v39 = vmax.f32 %v1091_v31, %v1092_v35  ;;  %v1352_v42 = vrot.slane %v1351_v40, 4  ;;  %v6020_v4 = vadd.f32 %v1473_v0, %v5858_v14  ;;  %v1482_v6 = vsel %vm8592_vm1, %v6015_v62, -inf }
 0x135   : > { %v1224_v52 = vrot.slane %v1223_v41, 1 }
 0x136   : > { %vm1126_vm14 = vcmp.eq.f32.partialorder %v5964_v54, %v6000_v39  ;;  %vm1127_vm15 = vcmp.eq.f32.partialorder %v5959_v48, %v6000_v39  ;;  %v1353_v55 = vmax.f32 %v1351_v40, %v1352_v42  ;;  %8603 = vst [vmem:[#allocation11_spill] sm:$0xff] %v6020_v4  ;;  %v1483_v23 = vmax.f32 %v6020_v4, %v1482_v6 }
 0x137   : > { %v1128_v43 = vsel %vm1126_vm14, %v5886_v46, 10.0  ;;  %v1129_v49 = vsel %vm1127_vm15, %v5888_v47, 10.0  ;;  %v6012_v59 = vmax.f32 %v1223_v41, %v1224_v52 }
 0x138   : > { %v1130_v53 = vsel %vm8592_vm1, %v1129_v49, inf  ;;  %v1354_v1 = vrot.slane %v1353_v55, 2  ;;  %v1484_v30 = vrot.slane %v1483_v23, 4 }
 0x139   : > { %v6010_v58 = vmin.f32 %v1128_v43, %v1130_v53  ;;  %vm1258_vm0 = vcmp.eq.f32.partialorder %v5989_v17, %v6012_v59  ;;  %vm1259_vm2 = vcmp.eq.f32.partialorder %v5974_v61, %v6012_v59  ;;  %v5226_v43 = vpop.f32.mrf.mxu0  ;;  %v5237_v53 = vpop.f32.mrf.mxu1 }
 0x13a   : > { %v1260_v5 = vsel %vm1258_vm0, %v5886_v46, 10.0  ;;  %v1261_v11 = vsel %vm1259_vm2, %v5888_v47, 10.0  ;;  %v1355_v19 = vmax.f32 %v1353_v55, %v1354_v1  ;;  %v1485_v32 = vmax.f32 %v1483_v23, %v1484_v30 }
 0x13b   : > { %8602 = vst [vmem:[#allocation10_spill] sm:$0xff] %v6010_v58  ;;  %v1262_v18 = vsel %vm8592_vm1, %v1261_v11, inf  ;;  %v6046_v52 = vadd.f32 %v5226_v43, %v5846_v7  ;;  %v1605_v55 = vpop.f32.mrf.mxu0  ;;  %v6053_v0 = vadd.f32 %v5237_v53, %v5846_v7 }
 0x13c   : > { %v6029_v20 = vmin.f32 %v1260_v5, %v1262_v18  ;;  %v1356_v27 = vrot.slane %v1355_v19, 1  ;;  %v1486_v41 = vrot.slane %v1485_v32, 2  ;;  %v6056_v1 = vadd.f32 %v1605_v55, %v5858_v14  ;;  %v1737_v18 = vpop.f32.mrf.mxu1 }
 0x13d   : > { %8606 = vst [vmem:[#allocation14_spill] sm:$0xff] %v6046_v52  ;;  %8607 = vst [vmem:[#allocation15_spill] sm:$0xff] %v6053_v0  ;;  %v1614_v11 = vsel %vm8592_vm1, %v6046_v52, -inf  ;;  %v1746_v30 = vsel %vm8592_vm1, %v6053_v0, -inf }
 0x13e   : > { %8604 = vst [vmem:[#allocation12_spill] sm:$0xff] %v6029_v20  ;;  %v6032_v31 = vmax.f32 %v1355_v19, %v1356_v27  ;;  %v1487_v42 = vmax.f32 %v1485_v32, %v1486_v41  ;;  %8608 = vst [vmem:[#allocation16_spill] sm:$0xff] %v6056_v1  ;;  %v1615_v32 = vmax.f32 %v6056_v1, %v1614_v11 }
 0x13f   : > { %v5248_v19 = vpop.f32.mrf.mxu0 }
 0x140   : > { %vm1390_vm3 = vcmp.eq.f32.partialorder %v5996_v36, %v6032_v31  ;;  %vm1391_vm4 = vcmp.eq.f32.partialorder %v5993_v28, %v6032_v31  ;;  %v1488_v45 = vrot.slane %v1487_v42, 1 }
 0x141   : > { %v1392_v35 = vsel %vm1390_vm3, %v5886_v46, 10.0  ;;  %v1393_v37 = vsel %vm1391_vm4, %v5888_v47, 10.0 }
 0x142   : > { %v1394_v38 = vsel %vm8592_vm1, %v1393_v37, inf  ;;  %v6043_v49 = vmax.f32 %v1487_v42, %v1488_v45  ;;  %v1616_v37 = vrot.slane %v1615_v32, 4  ;;  %v6073_v42 = vadd.f32 %v5248_v19, %v5846_v7 }
 0x143   : > { %v6041_v40 = vmin.f32 %v1392_v35, %v1394_v38  ;;  %v6069_v35 = vadd.f32 %v1737_v18, %v5858_v14  ;;  %v1869_v38 = vpop.f32.mrf.mxu0 }
 0x144   : > { %vm1522_vm5 = vcmp.eq.f32.partialorder %v6020_v4, %v6043_v49  ;;  %vm1523_vm6 = vcmp.eq.f32.partialorder %v6015_v62, %v6043_v49  ;;  %8611 = vst [vmem:[#allocation19_spill] sm:$0xff] %v6073_v42  ;;  %v1617_v43 = vmax.f32 %v1615_v32, %v1616_v37  ;;  %v6076_v53 = vadd.f32 %v1869_v38, %v5858_v14 }
 0x145   : > { %8605 = vst [vmem:[#allocation13_spill] sm:$0xff] %v6041_v40  ;;  %v1524_v5 = vsel %vm1522_vm5, %v5886_v46, 10.0  ;;  %v1525_v6 = vsel %vm1523_vm6, %v5888_v47, 10.0  ;;  %8610 = vst [vmem:[#allocation18_spill] sm:$0xff] %v6069_v35  ;;  %v1747_v41 = vmax.f32 %v6069_v35, %v1746_v30 }
 0x146   : > { %v1526_v23 = vsel %vm8592_vm1, %v1525_v6, inf  ;;  %8612 = vst [vmem:[#allocation20_spill] sm:$0xff] %v6076_v53  ;;  %v1618_v55 = vrot.slane %v1617_v43, 2 }
 0x147   : > { %v6063_v27 = vmin.f32 %v1524_v5, %v1526_v23  ;;  %v1748_v45 = vrot.slane %v1747_v41, 4  ;;  %v1878_v5 = vsel %vm8592_vm1, %v6073_v42, -inf }
 0x148   : > { %v1619_v11 = vmax.f32 %v1617_v43, %v1618_v55  ;;  %v1879_v18 = vmax.f32 %v6076_v53, %v1878_v5  ;;  %v5259_v43 = vpop.f32.mrf.mxu1 }
 0x149   : > { %8609 = vst [vmem:[#allocation17_spill] sm:$0xff] %v6063_v27  ;;  %v1749_v6 = vmax.f32 %v1747_v41, %v1748_v45 }
 0x14a   : > { %v1620_v23 = vrot.slane %v1619_v11, 1  ;;  %v1880_v30 = vrot.slane %v1879_v18, 4 }
 0x14b   : > { %v1750_v27 = vrot.slane %v1749_v6, 2 }
 0x14c   : > { %v6081_v40 = vmax.f32 %v1619_v11, %v1620_v23  ;;  %v1881_v37 = vmax.f32 %v1879_v18, %v1880_v30  ;;  %v2001_v11 = vpop.f32.mrf.mxu1 }
 0x14d   : > { %v1751_v19 = vmax.f32 %v1749_v6, %v1750_v27  ;;  %v6095_v6 = vadd.f32 %v5259_v43, %v5846_v7  ;;  %v6113_v43 = vsub.f32 %v5849_v8, %v5890_v50 }
 0x14e   : > { %8613 = vst [vmem:[#allocation21_spill] sm:$0xff] %v6081_v40  ;;  %vm1654_vm7 = vcmp.eq.f32.partialorder %v6056_v1, %v6081_v40  ;;  %vm1655_vm8 = vcmp.eq.f32.partialorder %v6046_v52, %v6081_v40  ;;  %v1882_v27 = vrot.slane %v1881_v37, 2 }
 0x14f   : > { %v1656_v32 = vsel %vm1654_vm7, %v5886_v46, 10.0  ;;  %v1657_v38 = vsel %vm1655_vm8, %v5888_v47, 10.0  ;;  %v1752_v41 = vrot.slane %v1751_v19, 1  ;;  %8616 = vst [vmem:[#allocation24_spill] sm:$0xff] %v6095_v6 }
 0x150   : > { %v1658_v45 = vsel %vm8592_vm1, %v1657_v38, inf  ;;  %v1883_v30 = vmax.f32 %v1881_v37, %v1882_v27  ;;  %v2010_v38 = vsel %vm8592_vm1, %v6095_v6, -inf }
 0x151   : > { %v6090_v55 = vmin.f32 %v1656_v32, %v1658_v45  ;;  %v6092_v5 = vmax.f32 %v1751_v19, %v1752_v41  ;;  %v6104_v32 = vadd.f32 %v2001_v11, %v5858_v14  ;;  %v6124_v11 = vsub.f32 %v5861_v15, %v5890_v50 }
 0x152   : > { %v1884_v45 = vrot.slane %v1883_v30, 1 }
 0x153   : > { %8614 = vst [vmem:[#allocation22_spill] sm:$0xff] %v6090_v55  ;;  %8615 = vst [vmem:[#allocation23_spill] sm:$0xff] %v6092_v5  ;;  %vm1786_vm9 = vcmp.eq.f32.partialorder %v6069_v35, %v6092_v5  ;;  %vm1787_vm10 = vcmp.eq.f32.partialorder %v6053_v0, %v6092_v5  ;;  %v6117_v55 = vsub.f32 %v5852_v9, %v5892_v51  ;;  %v304_v9 = vmul.f32 1.442695, %v6124_v11 }
 0x154   : > { %v1788_v18 = vsel %vm1786_vm9, %v5886_v46, 10.0  ;;  %v1789_v23 = vsel %vm1787_vm10, %v5888_v47, 10.0  ;;  %8617 = vst [vmem:[#allocation25_spill] sm:$0xff] %v6104_v32  ;;  %v2011_v37 = vmax.f32 %v6104_v32, %v2010_v38  ;;  %v6120_v27 = vmax.f32 %v1883_v30, %v1884_v45  ;;  %v5270_v30 = vpop.f32.mrf.mxu0 }
 0x155   : > { %v1790_v19 = vsel %vm8592_vm1, %v1789_v23, inf  ;;  %v6129_v23 = vsub.f32 %v5864_v16, %v5892_v51  ;;  %v438_v8 = vmul.f32 1.442695, %v6117_v55  ;;  %v6144_v20 = vadd.f32 %v5270_v30, %v5846_v7 }
 0x156   : > { %v6109_v41 = vmin.f32 %v1788_v18, %v1790_v19  ;;  %8619 = vst [vmem:[#allocation27_spill] sm:$0xff] %v6120_v27  ;;  %v306_v18 = vmul.f32 1.442695, %v6113_v43  ;;  %v2012_v19 = vrot.slane %v2011_v37, 4  ;;  %vm1918_vm11 = vcmp.eq.f32.partialorder %v6076_v53, %v6120_v27 }
 0x157   : > { %vm1919_vm12 = vcmp.eq.f32.partialorder %v6073_v42, %v6120_v27  ;;  %v436_v15 = vmul.f32 1.442695, %v6129_v23  ;;  %v1920_v50 = vsel %vm1918_vm11, %v5886_v46, 10.0 }
 0x158   : > { %8618 = vst [vmem:[#allocation26_spill] sm:$0xff] %v6109_v41  ;;  %5337 = vpow2.f32 %v306_v18  ;;  %v1921_v16 = vsel %vm1919_vm12, %v5888_v47, 10.0  ;;  %v2013_v51 = vmax.f32 %v2011_v37, %v2012_v19  ;;  %v2133_v18 = vpop.f32.mrf.mxu0  ;;  %v2142_v19 = vsel %vm8592_vm1, %v6144_v20, -inf }
 0x159   : > { %5339 = vpow2.f32 %v438_v8  ;;  %v1922_v38 = vsel %vm8592_vm1, %v1921_v16, inf  ;;  %v6147_v42 = vadd.f32 %v2133_v18, %v5858_v14  ;;  %v6151_v8 = vsub.f32 %v5869_v24, %v5912_v2 }
 0x15a   : > { %5341 = vpow2.f32 %v304_v9  ;;  %v6141_v45 = vmin.f32 %v1920_v50, %v1922_v38  ;;  %v2014_v41 = vrot.slane %v2013_v51, 2  ;;  %v5281_v9 = vpop.f32.mrf.mxu1  ;;  %v6170_v38 = vsub.f32 %v5872_v25, %v5916_v3 }
 0x15b   : > { %5343 = vpow2.f32 %v436_v15  ;;  %8621 = vst [vmem:[#allocation29_spill] sm:$0xff] %v6147_v42  ;;  %v2143_v50 = vmax.f32 %v6147_v42, %v2142_v19  ;;  %v6158_v15 = vsub.f32 %v5879_v33, %v5912_v2  ;;  %v6164_v16 = vadd.f32 %v5281_v9, %v5846_v7 }
 0x15c   : > { %8620 = vst [vmem:[#allocation28_spill] sm:$0xff] %v6141_v45  ;;  %v2015_v53 = vmax.f32 %v2013_v51, %v2014_v41  ;;  %v570_v41 = vmul.f32 1.442695, %v6151_v8  ;;  %v2265_v24 = vpop.f32.mrf.mxu1  ;;  %v6176_v33 = vsub.f32 %v5882_v34, %v5916_v3  ;;  %v702_v3 = vmul.f32 1.442695, %v6170_v38 }
 0x15d   : > { %v2144_v2 = vrot.slane %v2143_v50, 4  ;;  %v568_v7 = vmul.f32 1.442695, %v6158_v15  ;;  %v2274_v25 = vsel %vm8592_vm1, %v6164_v16, -inf }
 0x15e   : > { %v2016_v37 = vrot.slane %v2015_v53, 1  ;;  %5345 = vpow2.f32 %v570_v41  ;;  %v700_v41 = vmul.f32 1.442695, %v6176_v33 }
 0x15f   : > { %v2145_v45 = vmax.f32 %v2143_v50, %v2144_v2  ;;  %5347 = vpow2.f32 %v568_v7 }
 0x160   : > { %v6161_v30 = vmax.f32 %v2015_v53, %v2016_v37  ;;  %v6179_v53 = vadd.f32 %v2265_v24, %v5858_v14  ;;  %5349 = vpow2.f32 %v702_v3 }
 0x161   : > { %5351 = vpow2.f32 %v700_v41 }
 0x162   : > { %8622 = vst [vmem:[#allocation30_spill] sm:$0xff] %v6161_v30  ;;  %vm2050_vm13 = vcmp.eq.f32.partialorder %v6104_v32, %v6161_v30  ;;  %vm2051_vm14 = vcmp.eq.f32.partialorder %v6095_v6, %v6161_v30  ;;  %v2275_v32 = vmax.f32 %v6179_v53, %v2274_v25  ;;  %v2146_v6 = vrot.slane %v2145_v45, 2 }
 0x163   : > { %v2052_v9 = vsel %vm2050_vm13, %v5886_v46, 10.0  ;;  %v2053_v24 = vsel %vm2051_vm14, %v5888_v47, 10.0 }
 0x164   : > { %v2054_v35 = vsel %vm8592_vm1, %v2053_v24, inf  ;;  %v2276_v30 = vrot.slane %v2275_v32, 4  ;;  %v2147_v0 = vmax.f32 %v2145_v45, %v2146_v6  ;;  %v6225_v24 = vsub.f32 %v5936_v21, %v5952_v44 }
 0x165   : > { %v6166_v51 = vpop.eup %5337  ;;  %v6204_v1 = vmin.f32 %v2052_v9, %v2054_v35 }
 0x166   : > { %v6172_v18 = vpop.eup %5339  ;;  %v308_v34 = vsel %vm8592_vm1, %v6166_v51, 0.0  ;;  %v2277_v40 = vmax.f32 %v2275_v32, %v2276_v30  ;;  %v2148_v50 = vrot.slane %v2147_v0, 1 }
 0x167   : > { %v6181_v37 = vpop.eup %5341  ;;  %v440_v14 = vsel %vm8592_vm1, %v6172_v18, 0.0  ;;  %8623 = vst [vmem:[#allocation31_spill] sm:$0xff] %v6204_v1 }
 0x168   : > { %v6188_v19 = vpop.eup %5343  ;;  %v309_v27 = vadd.f32 %v6181_v37, %v308_v34  ;;  %v6206_v2 = vmax.f32 %v2147_v0, %v2148_v50  ;;  %v2278_v25 = vrot.slane %v2277_v40, 2  ;;  %v6217_v0 = vsub.f32 %v5930_v10, %v5952_v44 }
 0x169   : > { %v441_v58 = vadd.f32 %v6188_v19, %v440_v14 }
 0x16a   : > { %v310_v5 = vrot.slane %v309_v27, 4  ;;  %vm2182_vm15 = vcmp.eq.f32.partialorder %v6147_v42, %v6206_v2  ;;  %v2279_v7 = vmax.f32 %v2277_v40, %v2278_v25  ;;  %vm2183_vm0 = vcmp.eq.f32.partialorder %v6144_v20, %v6206_v2 }
 0x16b   : > { %v442_v52 = vrot.slane %v441_v58, 4  ;;  %v5346_v14 = vpop.eup %5345  ;;  %v340_v25 = vrot.slane %v5903_v57, 4  ;;  %v834_v1 = vmul.f32 1.442695, %v6217_v0 }
 0x16c   : > { %v311_v34 = vadd.f32 %v310_v5, %v309_v27  ;;  %v6210_v9 = vpop.eup %5347  ;;  %v572_v6 = vsel %vm8592_vm1, %v5346_v14, 0.0  ;;  %v2280_v5 = vrot.slane %v2279_v7, 1 }
 0x16d   : > { %v443_v4 = vadd.f32 %v442_v52, %v441_v58  ;;  %v5350_v32 = vpop.eup %5349  ;;  %v2184_v58 = vsel %vm2182_vm15, %v5886_v46, 10.0  ;;  %v2185_v52 = vsel %vm2183_vm0, %v5888_v47, 10.0  ;;  %v573_v45 = vadd.f32 %v6210_v9, %v572_v6 }
 0x16e   : > { %v312_v35 = vrot.slane %v311_v34, 2  ;;  %v5352_v30 = vpop.eup %5351  ;;  %v704_v41 = vsel %vm8592_vm1, %v5350_v32, 0.0  ;;  %v2186_v50 = vsel %vm8592_vm1, %v2185_v52, inf  ;;  %v6228_v10 = vmax.f32 %v2279_v7, %v2280_v5 }
 0x16f   : > { %v444_v3 = vrot.slane %v443_v4, 2  ;;  %v6232_v42 = vmin.f32 %v2184_v58, %v2186_v50  ;;  %v574_v44 = vrot.slane %v573_v45, 4  ;;  %v341_v58 = vmin.f32 %v5903_v57, %v340_v25 }
 0x170   : > { %v313_v40 = vadd.f32 %v312_v35, %v311_v34  ;;  %vm2314_vm2 = vcmp.eq.f32.partialorder %v6179_v53, %v6228_v10  ;;  %vm2315_vm3 = vcmp.eq.f32.partialorder %v6164_v16, %v6228_v10  ;;  %v705_v34 = vadd.f32 %v5352_v30, %v704_v41 }
 0x171   : > { %v445_v27 = vadd.f32 %v444_v3, %v443_v4  ;;  %8624 = vst [vmem:[#allocation32_spill] sm:$0xff] %v6232_v42  ;;  %v6236_v4 = vsub.f32 %v5943_v26, %v5967_v56  ;;  %v472_v35 = vrot.slane %v5910_v63, 4  ;;  %v832_v3 = vmul.f32 1.442695, %v6225_v24 }
 0x172   : > { %v314_v21 = vrot.slane %v313_v40, 1  ;;  %v2317_v6 = vsel %vm2315_vm3, %v5888_v47, 10.0  ;;  %5353 = vpow2.f32 %v834_v1  ;;  %v6248_v26 = vsub.f32 %v5947_v29, %v5967_v56 }
 0x173   : > { %v446_v7 = vrot.slane %v445_v27, 1  ;;  %v2316_v52 = vsel %vm2314_vm2, %v5886_v46, 10.0  ;;  %v317_v5 = vmul.f32 %v6166_v51, %v6113_v43  ;;  %v449_v41 = vmul.f32 %v6172_v18, %v6117_v55 }
 0x174   : > { %v966_v50 = vmul.f32 1.442695, %v6236_v4  ;;  %v2318_v42 = vsel %vm8592_vm1, %v2317_v6, inf  ;;  %v6257_v47 = vadd.f32 %v314_v21, %v313_v40  ;;  %v575_v57 = vadd.f32 %v574_v44, %v573_v45 }
 0x175   : > { %v706_v1 = vrot.slane %v705_v34, 4  ;;  %v6259_v25 = vadd.f32 %v446_v7, %v445_v27  ;;  %v473_v29 = vmin.f32 %v5910_v63, %v472_v35  ;;  %5355 = vpow2.f32 %v832_v3 }
 0x176   : > { %v6262_v56 = vmin.f32 %v2316_v52, %v2318_v42  ;;  %v316_v43 = vmul.f32 %v6181_v37, %v6124_v11  ;;  %v342_v51 = vrot.slane %v341_v58, 2  ;;  %v448_v55 = vmul.f32 %v6188_v19, %v6129_v23 }
 0x177   : > { %v964_v18 = vmul.f32 1.442695, %v6248_v26  ;;  %v318_v40 = vsel %vm8592_vm1, %v317_v5, 0.0  ;;  %v450_v45 = vsel %vm8592_vm1, %v449_v41, 0.0  ;;  %5357 = vpow2.f32 %v966_v50 }
 0x178   : > { %8625 = vst [vmem:[#allocation33_spill] sm:$0xff] %v6262_v56  ;;  %v6273_v63 = vsub.f32 %v5959_v48, %v6000_v39  ;;  %5359 = vrcp.f32 %v6257_v47  ;;  %v576_v42 = vrot.slane %v575_v57, 2  ;;  %v581_v11 = vmul.f32 %v5346_v14, %v6151_v8 }
 0x179   : > { %v707_v37 = vadd.f32 %v706_v1, %v705_v34  ;;  %5361 = vrcp.f32 %v6259_v25  ;;  %v474_v23 = vrot.slane %v473_v29, 2  ;;  %v604_v19 = vrot.slane %v5923_v12, 4 }
 0x17a   : > { %v713_v27 = vmul.f32 %v5350_v32, %v6170_v38  ;;  %v319_v21 = vadd.f32 %v318_v40, %v316_v43  ;;  %v451_v44 = vadd.f32 %v450_v45, %v448_v55  ;;  %5363 = vpow2.f32 %v964_v18 }
 0x17b   : > { %v6282_v48 = vsub.f32 %v5964_v54, %v6000_v39  ;;  %v580_v7 = vmul.f32 %v6210_v9, %v6158_v15  ;;  %v1098_v8 = vmul.f32 1.442695, %v6273_v63  ;;  %v577_v14 = vadd.f32 %v576_v42, %v575_v57 }
 0x17c   : > { %v582_v34 = vsel %vm8592_vm1, %v581_v11, 0.0  ;;  %v708_v35 = vrot.slane %v707_v37, 2  ;;  %v712_v3 = vmul.f32 %v5352_v30, %v6176_v33  ;;  %v343_v6 = vmin.f32 %v341_v58, %v342_v51 }
 0x17d   : > { %v475_v38 = vmin.f32 %v473_v29, %v474_v23  ;;  %v605_v32 = vmin.f32 %v5923_v12, %v604_v19  ;;  %v714_v52 = vsel %vm8592_vm1, %v713_v27, 0.0  ;;  %v320_v5 = vrot.slane %v319_v21, 4 }
 0x17e   : > { %v452_v54 = vrot.slane %v451_v44, 4  ;;  %v1096_v39 = vmul.f32 1.442695, %v6282_v48  ;;  %v583_v15 = vadd.f32 %v582_v34, %v580_v7  ;;  %5365 = vpow2.f32 %v1098_v8 }
 0x17f   : > { %v6292_v41 = vpop.eup %5353  ;;  %v578_v9 = vrot.slane %v577_v14, 1  ;;  %v709_v50 = vadd.f32 %v708_v35, %v707_v37  ;;  %v715_v57 = vadd.f32 %v714_v52, %v712_v3  ;;  %v736_v1 = vrot.slane %v5938_v22, 4 }
 0x180   : > { %v344_v33 = vrot.slane %v343_v6, 1  ;;  %v476_v30 = vrot.slane %v475_v38, 1  ;;  %v606_v58 = vrot.slane %v605_v32, 2  ;;  %v321_v12 = vadd.f32 %v320_v5, %v319_v21 }
 0x181   : > { %v453_v43 = vadd.f32 %v452_v54, %v451_v44  ;;  %v836_v51 = vsel %vm8592_vm1, %v6292_v41, 0.0  ;;  %5367 = vpow2.f32 %v1096_v39  ;;  %v584_v55 = vrot.slane %v583_v15, 4 }
 0x182   : > { %v6295_v29 = vpop.eup %5355  ;;  %v6301_v18 = vsub.f32 %v5974_v61, %v6012_v59  ;;  %v6305_v45 = vadd.f32 %v578_v9, %v577_v14  ;;  %v710_v42 = vrot.slane %v709_v50, 1  ;;  %v716_v11 = vrot.slane %v715_v57, 4 }
 0x183   : > { %v737_v37 = vmin.f32 %v5938_v22, %v736_v1  ;;  %v6308_v19 = vmin.f32 %v343_v6, %v344_v33  ;;  %v6310_v27 = vmin.f32 %v475_v38, %v476_v30  ;;  %v607_v21 = vmin.f32 %v605_v32, %v606_v58 }
 0x184   : > { %v6303_v40 = vpop.eup %5357  ;;  %v837_v44 = vadd.f32 %v6295_v29, %v836_v51  ;;  %v322_v8 = vrot.slane %v321_v12, 2  ;;  %5369 = vlog2.f32 %v6257_v47  ;;  %v454_v61 = vrot.slane %v453_v43, 2 }
 0x185   : > { %v5360_v23 = vpop.eup %5359  ;;  %8626 = vst [vmem:[#allocation34_spill] sm:$0xff] %v6308_v19  ;;  %8627 = vst [vmem:[#allocation35_spill] sm:$0xff] %v6310_v27  ;;  %v6316_v14 = vsub.f32 %v5989_v17, %v6012_v59  ;;  %5371 = vlog2.f32 %v6259_v25  ;;  %v585_v22 = vadd.f32 %v584_v55, %v583_v15  ;;  %v968_v35 = vsel %vm8592_vm1, %v6303_v40, 0.0 }
 0x186   : > { %v5362_v7 = vpop.eup %5361  ;;  %v1230_v3 = vmul.f32 1.442695, %v6301_v18  ;;  %5373 = vrcp.f32 %v6305_v45  ;;  %v6325_v6 = vadd.f32 %v710_v42, %v709_v50  ;;  %v717_v38 = vadd.f32 %v716_v11, %v715_v57 }
 0x187   : > { %v6318_v34 = vpop.eup %5363  ;;  %v738_v32 = vrot.slane %v737_v37, 2  ;;  %v327_v52 = vmul.f32 %v5360_v23, %v6257_v47  ;;  %v459_v17 = vmul.f32 %v5362_v7, %v6259_v25  ;;  %v838_v59 = vrot.slane %v837_v44, 4 }
 0x188   : > { %v6331_v5 = vsub.f32 %v5993_v28, %v6032_v31  ;;  %5375 = vlog2.f32 %v6305_v45  ;;  %v868_v54 = vrot.slane %v5971_v60, 4  ;;  %v969_v39 = vadd.f32 %v6318_v34, %v968_v35 }
 0x189   : > { %v1228_v15 = vmul.f32 1.442695, %v6316_v14  ;;  %v323_v9 = vadd.f32 %v322_v8, %v321_v12  ;;  %v455_v50 = vadd.f32 %v454_v61, %v453_v43  ;;  %v586_v57 = vrot.slane %v585_v22, 2 }
 0x18a   : > { %5377 = vpow2.f32 %v1230_v3  ;;  %v718_v25 = vrot.slane %v717_v38, 2  ;;  %v739_v1 = vmin.f32 %v737_v37, %v738_v32  ;;  %v6342_v28 = vsub.f32 %v5996_v36, %v6032_v31 }
 0x18b   : > { %v6337_v47 = vpop.eup %5365  ;;  %5379 = vrcp.f32 %v6325_v6  ;;  %v328_v33 = vsub.f32 2.0, %v327_v52  ;;  %v460_v30 = vsub.f32 2.0, %v459_v17  ;;  %v839_v58 = vadd.f32 %v838_v59, %v837_v44 }
 0x18c   : > { %v1362_v51 = vmul.f32 1.442695, %v6331_v5  ;;  %v608_v55 = vrot.slane %v607_v21, 1  ;;  %v869_v12 = vmin.f32 %v5971_v60, %v868_v54  ;;  %v970_v43 = vrot.slane %v969_v39, 4 }
 0x18d   : > { %5381 = vpow2.f32 %v1228_v15  ;;  %v324_v11 = vrot.slane %v323_v9, 1  ;;  %v456_v8 = vrot.slane %v455_v50, 1  ;;  %v587_v61 = vadd.f32 %v586_v57, %v585_v22 }
 0x18e   : > { %v6346_v42 = vpop.eup %5367  ;;  %v1100_v37 = vsel %vm8592_vm1, %v6337_v47, 0.0  ;;  %v719_v36 = vadd.f32 %v718_v25, %v717_v38  ;;  %5383 = vlog2.f32 %v6325_v6  ;;  %v740_v31 = vrot.slane %v739_v1, 1 }
 0x18f   : > { %v1360_v44 = vmul.f32 1.442695, %v6342_v28  ;;  %v329_v35 = vmul.f32 %v5360_v23, %v328_v33  ;;  %v461_v3 = vmul.f32 %v5362_v7, %v460_v30  ;;  %v840_v32 = vrot.slane %v839_v58, 2 }
 0x190   : > { %5385 = vpow2.f32 %v1362_v51  ;;  %v845_v60 = vmul.f32 %v6292_v41, %v6217_v0  ;;  %v870_v52 = vrot.slane %v869_v12, 2  ;;  %v971_v17 = vadd.f32 %v970_v43, %v969_v39 }
 0x191   : > { %v1101_v22 = vadd.f32 %v6346_v42, %v1100_v37  ;;  %v5370_v59 = vpop.eup %5369  ;;  %v325_v54 = vadd.f32 %v324_v11, %v323_v9  ;;  %v457_v15 = vadd.f32 %v456_v8, %v455_v50  ;;  %v588_v38 = vrot.slane %v587_v61, 1 }
 0x192   : > { %v6355_v57 = vmin.f32 %v607_v21, %v608_v55  ;;  %v5372_v25 = vpop.eup %5371  ;;  %v720_v27 = vrot.slane %v719_v36, 1  ;;  %v6357_v19 = vmin.f32 %v739_v1, %v740_v31  ;;  %5387 = vpow2.f32 %v1360_v44 }
 0x193   : > { %v6361_v23 = vsub.f32 %v6015_v62, %v6043_v49  ;;  %v5374_v0 = vpop.eup %5373  ;;  %v332_v41 = vmul.f32 %v329_v35, %v325_v54  ;;  %v464_v7 = vmul.f32 %v461_v3, %v457_v15  ;;  %v841_v39 = vadd.f32 %v840_v32, %v839_v58  ;;  %v8630_v62 = vld [vmem:[#allocation11_spill] sm:$0xff] }
 0x194   : > { %8628 = vst [vmem:[#allocation36_spill] sm:$0xff] %v6355_v57  ;;  %8629 = vst [vmem:[#allocation37_spill] sm:$0xff] %v6357_v19  ;;  %v844_v9 = vmul.f32 %v6295_v29, %v6225_v24  ;;  %v846_v50 = vsel %vm8592_vm1, %v845_v60, 0.0  ;;  %v871_v21 = vmin.f32 %v869_v12, %v870_v52  ;;  %v972_v33 = vrot.slane %v971_v17, 2 }
 0x195   : > { %v1102_v30 = vrot.slane %v1101_v22, 4  ;;  %v5376_v51 = vpop.eup %5375  ;;  %v331_v1 = vmul.f32 0.6931472, %v5370_v59  ;;  %v589_v55 = vadd.f32 %v588_v38, %v587_v61  ;;  %v1000_v43 = vrot.slane %v5986_v13, 4 }
 0x196   : > { %v6369_v11 = vsub.f32 %v8630_v62, %v6043_v49  ;;  %v463_v58 = vmul.f32 0.6931472, %v5372_v25  ;;  %v591_v37 = vmul.f32 %v5374_v0, %v6305_v45  ;;  %v977_v24 = vmul.f32 %v6303_v40, %v6236_v4  ;;  %v8633_v25 = vld [vmem:[#allocation21_spill] sm:$0xff] }
 0x197   : > { %v6371_v8 = vpop.eup %5377  ;;  %v1494_v29 = vmul.f32 1.442695, %v6361_v23  ;;  %v6377_v31 = vsub.f32 %v331_v1, %v332_v41  ;;  %v6379_v61 = vadd.f32 %v720_v27, %v719_v36  ;;  %v842_v44 = vrot.slane %v841_v39, 1 }
 0x198   : > { %v5380_v12 = vpop.eup %5379  ;;  %v847_v35 = vadd.f32 %v846_v50, %v844_v9  ;;  %v6381_v3 = vsub.f32 %v463_v58, %v464_v7  ;;  %v872_v49 = vrot.slane %v871_v21, 1  ;;  %v973_v32 = vadd.f32 %v972_v33, %v971_v17  ;;  %v8638_v58 = vld [vmem:[#allocation16_spill] sm:$0xff] }
 0x199   : > { %8631 = vst [vmem:[#allocation11_spill] sm:$0xff] %v6377_v31  ;;  %v1103_v60 = vadd.f32 %v1102_v30, %v1101_v22  ;;  %v976_v45 = vmul.f32 %v6318_v34, %v6248_v26  ;;  %v1001_v4 = vmin.f32 %v5986_v13, %v1000_v43  ;;  %v1232_v40 = vsel %vm8592_vm1, %v6371_v8, 0.0  ;;  %v8634_v26 = vld [vmem:[#allocation14_spill] sm:$0xff]  ;;  %v8636_v30 = vld [vmem:[#allocation23_spill] sm:$0xff] }
 0x19a   : > { %8632 = vst [vmem:[#allocation38_spill] sm:$0xff] %v6381_v3  ;;  %v6383_v52 = vpop.eup %5381  ;;  %v1492_v27 = vmul.f32 1.442695, %v6369_v11  ;;  %v592_v36 = vsub.f32 2.0, %v591_v37  ;;  %v723_v59 = vmul.f32 %v5380_v12, %v6325_v6  ;;  %v978_v54 = vsel %vm8592_vm1, %v977_v24, 0.0 }
 0x19b   : > { %5389 = vpow2.f32 %v1494_v29  ;;  %v5384_v17 = vpop.eup %5383  ;;  %v595_v22 = vmul.f32 0.6931472, %v5376_v51  ;;  %v6393_v15 = vadd.f32 %v842_v44, %v841_v39  ;;  %v848_v38 = vrot.slane %v847_v35, 4  ;;  %v8637_v51 = vld [vmem:[#allocation15_spill] sm:$0xff] }
 0x19c   : > { %v6397_v34 = vsub.f32 %v8634_v26, %v8633_v25  ;;  %v6401_v41 = vmin.f32 %v871_v21, %v872_v49  ;;  %v974_v7 = vrot.slane %v973_v32, 1  ;;  %v1104_v9 = vrot.slane %v1103_v60, 2 }
 0x19d   : > { %v6399_v13 = vpop.eup %5385  ;;  %v1233_v6 = vadd.f32 %v6383_v52, %v1232_v40  ;;  %v979_v50 = vadd.f32 %v978_v54, %v976_v45  ;;  %v1002_v33 = vrot.slane %v1001_v4, 2  ;;  %5391 = vpow2.f32 %v1492_v27  ;;  %v8639_v40 = vld [vmem:[#allocation18_spill] sm:$0xff] }
 0x19e   : > { %8635 = vst [vmem:[#allocation21_spill] sm:$0xff] %v6401_v41  ;;  %v6406_v39 = vsub.f32 %v8637_v51, %v8636_v30  ;;  %v593_v1 = vmul.f32 %v5374_v0, %v592_v36  ;;  %v724_v43 = vsub.f32 2.0, %v723_v59  ;;  %v727_v62 = vmul.f32 0.6931472, %v5384_v17  ;;  %v8640_v54 = vld [vmem:[#allocation10_spill] sm:$0xff]  ;;  %v8641_v51 = vld [vmem:[#allocation27_spill] sm:$0xff] }
 0x19f   : > { %v6410_v37 = vsub.f32 %v8638_v58, %v8633_v25  ;;  %v6412_v21 = vpop.eup %5387  ;;  %v849_v24 = vadd.f32 %v848_v38, %v847_v35  ;;  %5393 = vrcp.f32 %v6393_v15  ;;  %v1364_v29 = vsel %vm8592_vm1, %v6399_v13, 0.0 }
 0x1a0   : > { %v1626_v44 = vmul.f32 1.442695, %v6397_v34  ;;  %v6418_v49 = vadd.f32 %v974_v7, %v973_v32  ;;  %v1105_v45 = vadd.f32 %v1104_v9, %v1103_v60  ;;  %v1234_v0 = vrot.slane %v1233_v6, 4  ;;  %v8642_v32 = vld [vmem:[#allocation19_spill] sm:$0xff] }
 0x1a1   : > { %v6422_v27 = vsub.f32 %v8639_v40, %v8636_v30  ;;  %v980_v36 = vrot.slane %v979_v50, 4  ;;  %v1003_v59 = vmin.f32 %v1001_v4, %v1002_v33  ;;  %v1132_v17 = vrot.slane %v8640_v54, 4 }
 0x1a2   : > { %v1758_v35 = vmul.f32 1.442695, %v6406_v39  ;;  %v596_v38 = vmul.f32 %v593_v1, %v589_v55  ;;  %v1365_v25 = vadd.f32 %v6412_v21, %v1364_v29  ;;  %v1624_v26 = vmul.f32 1.442695, %v6410_v37  ;;  %v8643_v29 = vld [vmem:[#allocation20_spill] sm:$0xff] }
 0x1a3   : > { %v6430_v7 = vsub.f32 %v8642_v32, %v8641_v51  ;;  %v725_v60 = vmul.f32 %v5380_v12, %v724_v43  ;;  %v850_v9 = vrot.slane %v849_v24, 2  ;;  %v1109_v30 = vmul.f32 %v6337_v47, %v6273_v63 }
 0x1a4   : > { %5395 = vpow2.f32 %v1626_v44  ;;  %v1106_v4 = vrot.slane %v1105_v45, 1  ;;  %v1235_v33 = vadd.f32 %v1234_v0, %v1233_v6  ;;  %v1756_v55 = vmul.f32 1.442695, %v6422_v27  ;;  %v8644_v0 = vld [vmem:[#allocation12_spill] sm:$0xff] }
 0x1a5   : > { %5397 = vrcp.f32 %v6418_v49  ;;  %v981_v1 = vadd.f32 %v980_v36, %v979_v50  ;;  %v1133_v58 = vmin.f32 %v8640_v54, %v1132_v17  ;;  %v6439_v40 = vsub.f32 %v8643_v29, %v8641_v51 }
 0x1a6   : > { %5399 = vpow2.f32 %v1758_v35  ;;  %v1108_v12 = vmul.f32 %v6346_v42, %v6282_v48  ;;  %v1366_v43 = vrot.slane %v1365_v25, 4  ;;  %v1890_v63 = vmul.f32 1.442695, %v6430_v7 }
 0x1a7   : > { %5401 = vpow2.f32 %v1624_v26  ;;  %v728_v6 = vmul.f32 %v725_v60, %v6379_v61  ;;  %v1004_v44 = vrot.slane %v1003_v59, 1  ;;  %v1110_v50 = vsel %vm8592_vm1, %v1109_v30, 0.0 }
 0x1a8   : > { %v6444_v47 = vpop.eup %5389  ;;  %v1264_v36 = vrot.slane %v8644_v0, 4  ;;  %v6449_v54 = vsub.f32 %v595_v22, %v596_v38  ;;  %v6451_v17 = vadd.f32 %v1106_v4, %v1105_v45  ;;  %v1236_v35 = vrot.slane %v1235_v33, 2  ;;  %v8649_v4 = vld [vmem:[#allocation24_spill] sm:$0xff] }
 0x1a9   : > { %5403 = vpow2.f32 %v1756_v55  ;;  %v851_v48 = vadd.f32 %v850_v9, %v849_v24  ;;  %v982_v42 = vrot.slane %v981_v1, 2  ;;  %v1134_v26 = vrot.slane %v1133_v58, 2 }
 0x1aa   : > { %8645 = vst [vmem:[#allocation14_spill] sm:$0xff] %v6449_v54  ;;  %v1888_v51 = vmul.f32 1.442695, %v6439_v40  ;;  %v6454_v32 = vpop.eup %5391  ;;  %v1111_v29 = vadd.f32 %v1110_v50, %v1108_v12  ;;  %v1367_v61 = vadd.f32 %v1366_v43, %v1365_v25  ;;  %v1496_v60 = vsel %vm8592_vm1, %v6444_v47, 0.0  ;;  %v8648_v25 = vld [vmem:[#allocation30_spill] sm:$0xff] }
 0x1ab   : > { %5405 = vpow2.f32 %v1890_v63  ;;  %v6458_v30 = vsub.f32 %v727_v62, %v728_v6  ;;  %v6461_v22 = vmin.f32 %v1003_v59, %v1004_v44  ;;  %v1265_v24 = vmin.f32 %v8644_v0, %v1264_v36 }
 0x1ac   : > { %5407 = vlog2.f32 %v6393_v15  ;;  %v5394_v45 = vpop.eup %5393  ;;  %v1237_v38 = vadd.f32 %v1236_v35, %v1235_v33  ;;  %v1241_v9 = vmul.f32 %v6371_v8, %v6301_v18  ;;  %v6469_v55 = vsub.f32 %v8649_v4, %v8648_v25  ;;  %v8651_v8 = vld [vmem:[#allocation25_spill] sm:$0xff] }
 0x1ad   : > { %8646 = vst [vmem:[#allocation23_spill] sm:$0xff] %v6458_v30  ;;  %8647 = vst [vmem:[#allocation15_spill] sm:$0xff] %v6461_v22  ;;  %5409 = vrcp.f32 %v6451_v17  ;;  %v852_v12 = vrot.slane %v851_v48, 1  ;;  %v983_v62 = vadd.f32 %v982_v42, %v981_v1  ;;  %v1497_v43 = vadd.f32 %v6454_v32, %v1496_v60 }
 0x1ae   : > { %8650 = vst [vmem:[#allocation16_spill] sm:$0xff] %v6469_v55  ;;  %5411 = vpow2.f32 %v1888_v51  ;;  %v1112_v59 = vrot.slane %v1111_v29, 4  ;;  %v1135_v63 = vmin.f32 %v1133_v58, %v1134_v26  ;;  %v1368_v6 = vrot.slane %v1367_v61, 2 }
 0x1af   : > { %5413 = vlog2.f32 %v6418_v49  ;;  %v1240_v33 = vmul.f32 %v6383_v52, %v6316_v14  ;;  %v1266_v44 = vrot.slane %v1265_v24, 2  ;;  %v1373_v18 = vmul.f32 %v6399_v13, %v6331_v5  ;;  %v8653_v52 = vld [vmem:[#allocation13_spill] sm:$0xff] }
 0x1b0   : > { %v6479_v50 = vsub.f32 %v8651_v8, %v8648_v25  ;;  %v855_v0 = vmul.f32 %v5394_v45, %v6393_v15  ;;  %v1238_v36 = vrot.slane %v1237_v38, 1  ;;  %v1242_v35 = vsel %vm8592_vm1, %v1241_v9, 0.0 }
 0x1b1   : > { %v6481_v1 = vpop.eup %5395  ;;  %v2022_v58 = vmul.f32 1.442695, %v6469_v55  ;;  %v853_v26 = vadd.f32 %v852_v12, %v851_v48  ;;  %v984_v14 = vrot.slane %v983_v62, 1  ;;  %v1396_v51 = vrot.slane %v8653_v52, 4 }
 0x1b2   : > { %8652 = vst [vmem:[#allocation18_spill] sm:$0xff] %v6479_v50  ;;  %v5398_v42 = vpop.eup %5397  ;;  %v1498_v60 = vrot.slane %v1497_v43, 4  ;;  %v1113_v13 = vadd.f32 %v1112_v59, %v1111_v29  ;;  %v1136_v25 = vrot.slane %v1135_v63, 1  ;;  %v1369_v4 = vadd.f32 %v1368_v6, %v1367_v61 }
 0x1b3   : > { %v6487_v5 = vpop.eup %5399  ;;  %v1372_v8 = vmul.f32 %v6412_v21, %v6342_v28  ;;  %v1243_v22 = vadd.f32 %v1242_v35, %v1240_v33  ;;  %v1374_v9 = vsel %vm8592_vm1, %v1373_v18, 0.0  ;;  %v1628_v48 = vsel %vm8592_vm1, %v6481_v1, 0.0 }
 0x1b4   : > { %v6491_v15 = vpop.eup %5401  ;;  %v2020_v12 = vmul.f32 1.442695, %v6479_v50  ;;  %v856_v41 = vsub.f32 2.0, %v855_v0  ;;  %v6497_v19 = vadd.f32 %v1238_v36, %v1237_v38  ;;  %v1267_v57 = vmin.f32 %v1265_v24, %v1266_v44  ;;  %v8654_v44 = vld [vmem:[#allocation17_spill] sm:$0xff] }
 0x1b5   : > { %5415 = vpow2.f32 %v2022_v58  ;;  %v987_v61 = vmul.f32 %v5398_v42, %v6418_v49  ;;  %v1397_v28 = vmin.f32 %v8653_v52, %v1396_v51  ;;  %v1499_v21 = vadd.f32 %v1498_v60, %v1497_v43 }
 0x1b6   : > { %v6499_v29 = vpop.eup %5403  ;;  %v1760_v59 = vsel %vm8592_vm1, %v6487_v5, 0.0  ;;  %v985_v6 = vadd.f32 %v984_v14, %v983_v62  ;;  %v1370_v33 = vrot.slane %v1369_v4, 1  ;;  %v1375_v18 = vadd.f32 %v1374_v9, %v1372_v8 }
 0x1b7   : > { %v1629_v35 = vadd.f32 %v6491_v15, %v1628_v48  ;;  %v1114_v38 = vrot.slane %v1113_v13, 2  ;;  %v1244_v24 = vrot.slane %v1243_v22, 4  ;;  %v1528_v36 = vrot.slane %v8654_v44, 4 }
 0x1b8   : > { %v6506_v0 = vpop.eup %5405  ;;  %5417 = vpow2.f32 %v2020_v12  ;;  %v857_v49 = vmul.f32 %v5394_v45, %v856_v41  ;;  %v1268_v43 = vrot.slane %v1267_v57, 1  ;;  %v1761_v52 = vadd.f32 %v6499_v29, %v1760_v59 }
 0x1b9   : > { %v5408_v58 = vpop.eup %5407  ;;  %5419 = vrcp.f32 %v6497_v19  ;;  %v988_v62 = vsub.f32 2.0, %v987_v61  ;;  %v6511_v14 = vmin.f32 %v1135_v63, %v1136_v25  ;;  %v1398_v60 = vrot.slane %v1397_v28, 2 }
 0x1ba   : > { %v5410_v51 = vpop.eup %5409  ;;  %v1500_v8 = vrot.slane %v1499_v21, 2  ;;  %v6515_v48 = vadd.f32 %v1370_v33, %v1369_v4  ;;  %v1376_v46 = vrot.slane %v1375_v18, 4  ;;  %v1630_v56 = vrot.slane %v1629_v35, 4 }
 0x1bb   : > { %8655 = vst [vmem:[#allocation10_spill] sm:$0xff] %v6511_v14  ;;  %v6513_v9 = vpop.eup %5411  ;;  %v1892_v41 = vsel %vm8592_vm1, %v6506_v0, 0.0  ;;  %v859_v12 = vmul.f32 0.6931472, %v5408_v58  ;;  %v1115_v30 = vadd.f32 %v1114_v38, %v1113_v13  ;;  %v1245_v3 = vadd.f32 %v1244_v24, %v1243_v22 }
 0x1bc   : > { %v5414_v45 = vpop.eup %5413  ;;  %v1529_v59 = vmin.f32 %v8654_v44, %v1528_v36  ;;  %v860_v61 = vmul.f32 %v857_v49, %v853_v26  ;;  %v1119_v63 = vmul.f32 %v5410_v51, %v6451_v17  ;;  %v6521_v25 = vmin.f32 %v1267_v57, %v1268_v43 }
 0x1bd   : > { %v1762_v14 = vrot.slane %v1761_v52, 4  ;;  %v1399_v54 = vmin.f32 %v1397_v28, %v1398_v60  ;;  %v1501_v4 = vadd.f32 %v1500_v8, %v1499_v21  ;;  %v1505_v33 = vmul.f32 %v6444_v47, %v6361_v23 }
 0x1be   : > { %v1893_v31 = vadd.f32 %v6513_v9, %v1892_v41  ;;  %v989_v50 = vmul.f32 %v5398_v42, %v988_v62  ;;  %v1377_v55 = vadd.f32 %v1376_v46, %v1375_v18  ;;  %5421 = vrcp.f32 %v6515_v48 }
 0x1bf   : > { %v1631_v22 = vadd.f32 %v1630_v56, %v1629_v35  ;;  %v991_v13 = vmul.f32 0.6931472, %v5414_v45  ;;  %v1116_v38 = vrot.slane %v1115_v30, 1  ;;  %v1246_v26 = vrot.slane %v1245_v3, 2 }
 0x1c0   : > { %v1530_v24 = vrot.slane %v1529_v59, 2  ;;  %v6527_v44 = vsub.f32 %v859_v12, %v860_v61  ;;  %v1120_v57 = vsub.f32 2.0, %v1119_v63  ;;  %v1504_v28 = vmul.f32 %v6454_v32, %v6369_v11 }
 0x1c1   : > { %v1763_v21 = vadd.f32 %v1762_v14, %v1761_v52  ;;  %v1400_v23 = vrot.slane %v1399_v54, 1  ;;  %v1502_v47 = vrot.slane %v1501_v4, 1  ;;  %v1506_v46 = vsel %vm8592_vm1, %v1505_v33, 0.0 }
 0x1c2   : > { %v6531_v36 = vpop.eup %5415  ;;  %v1894_v42 = vrot.slane %v1893_v31, 4  ;;  %v992_v18 = vmul.f32 %v989_v50, %v985_v6  ;;  %v1378_v56 = vrot.slane %v1377_v55, 2  ;;  %v1632_v35 = vrot.slane %v1631_v22, 2 }
 0x1c3   : > { %v6536_v58 = vsub.f32 %v6144_v20, %v6206_v2  ;;  %v1117_v49 = vadd.f32 %v1116_v38, %v1115_v30  ;;  %5423 = vlog2.f32 %v6451_v17  ;;  %v6539_v43 = vadd.f32 %v1246_v26, %v1245_v3  ;;  %v8656_v17 = vld [vmem:[#allocation29_spill] sm:$0xff]  ;;  %v8657_v38 = vld [vmem:[#allocation22_spill] sm:$0xff] }
 0x1c4   : > { %v6541_v11 = vmin.f32 %v1529_v59, %v1530_v24  ;;  %v1121_v52 = vmul.f32 %v5410_v51, %v1120_v57  ;;  %v1507_v62 = vadd.f32 %v1506_v46, %v1504_v28  ;;  %v1764_v14 = vrot.slane %v1763_v21, 2 }
 0x1c5   : > { %v6543_v32 = vpop.eup %5417  ;;  %v2024_v50 = vsel %vm8592_vm1, %v6531_v36, 0.0  ;;  %v6547_v60 = vmin.f32 %v1399_v54, %v1400_v23  ;;  %v6549_v20 = vadd.f32 %v1502_v47, %v1501_v4  ;;  %v1895_v30 = vadd.f32 %v1894_v42, %v1893_v31 }
 0x1c6   : > { %v5420_v6 = vpop.eup %5419  ;;  %v6553_v3 = vsub.f32 %v8656_v17, %v6206_v2  ;;  %v6555_v8 = vsub.f32 %v991_v13, %v992_v18  ;;  %v6557_v41 = vadd.f32 %v1378_v56, %v1377_v55  ;;  %v1633_v51 = vadd.f32 %v1632_v35, %v1631_v22 }
 0x1c7   : > { %v2154_v45 = vmul.f32 1.442695, %v6536_v58  ;;  %v1248_v12 = vrot.slane %v6539_v43, 1  ;;  %5425 = vlog2.f32 %v6497_v19  ;;  %v1532_v54 = vrot.slane %v6541_v11, 1 }
 0x1c8   : > { %v2025_v59 = vadd.f32 %v6543_v32, %v2024_v50  ;;  %v6564_v31 = vmul.f32 %v1121_v52, %v1117_v49  ;;  %v1251_v2 = vmul.f32 %v5420_v6, %v6497_v19  ;;  %v1508_v61 = vrot.slane %v1507_v62, 4  ;;  %v8658_v19 = vld [vmem:[#allocation26_spill] sm:$0xff] }
 0x1c9   : > { %v1765_v63 = vadd.f32 %v1764_v14, %v1763_v21  ;;  %5427 = vrcp.f32 %v6549_v20  ;;  %v1637_v55 = vmul.f32 %v6481_v1, %v6397_v34  ;;  %v1896_v4 = vrot.slane %v1895_v30, 2 }
 0x1ca   : > { %v2152_v33 = vmul.f32 1.442695, %v6553_v3  ;;  %v1380_v22 = vrot.slane %v6557_v41, 1  ;;  %v1634_v13 = vrot.slane %v1633_v51, 1  ;;  %v1660_v26 = vrot.slane %v8657_v38, 4 }
 0x1cb   : > { %5429 = vpow2.f32 %v2154_v45  ;;  %v5422_v24 = vpop.eup %5421  ;;  %v1792_v57 = vrot.slane %v8658_v19, 4  ;;  %v2026_v28 = vrot.slane %v2025_v59, 4  ;;  %v6577_v21 = vsub.f32 %v6164_v16, %v6228_v10 }
 0x1cc   : > { %5431 = vlog2.f32 %v6515_v48  ;;  %v1252_v34 = vsub.f32 2.0, %v1251_v2  ;;  %v1509_v1 = vadd.f32 %v1508_v61, %v1507_v62  ;;  %v1636_v23 = vmul.f32 %v6491_v15, %v6410_v37 }
 0x1cd   : > { %v1766_v47 = vrot.slane %v1765_v63, 1  ;;  %v1638_v46 = vsel %vm8592_vm1, %v1637_v55, 0.0  ;;  %v1769_v42 = vmul.f32 %v6487_v5, %v6406_v39  ;;  %v1897_v18 = vadd.f32 %v1896_v4, %v1895_v30 }
 0x1ce   : > { %5433 = vpow2.f32 %v2152_v33  ;;  %v1383_v56 = vmul.f32 %v5422_v24, %v6515_v48  ;;  %v6585_v35 = vadd.f32 %v1634_v13, %v1633_v51  ;;  %v1661_v16 = vmin.f32 %v8657_v38, %v1660_v26 }
 0x1cf   : > { %v6590_v49 = vsub.f32 %v6179_v53, %v6228_v10  ;;  %5435 = vlog2.f32 %v6549_v20  ;;  %v1793_v37 = vmin.f32 %v8658_v19, %v1792_v57  ;;  %v2027_v15 = vadd.f32 %v2026_v28, %v2025_v59 }
 0x1d0   : > { %v2286_v52 = vmul.f32 1.442695, %v6577_v21  ;;  %v5424_v39 = vpop.eup %5423  ;;  %v1639_v5 = vadd.f32 %v1638_v46, %v1636_v23  ;;  %v6595_v62 = vadd.f32 %v1766_v47, %v1765_v63  ;;  %v1768_v48 = vmul.f32 %v6499_v29, %v6422_v27  ;;  %v8660_v47 = vld [vmem:[#allocation16_spill] sm:$0xff] }
 0x1d1   : > { %v1901_v14 = vmul.f32 %v6506_v0, %v6430_v7  ;;  %v1253_v50 = vmul.f32 %v5420_v6, %v1252_v34  ;;  %v1510_v53 = vrot.slane %v1509_v1, 2  ;;  %v1770_v10 = vsel %vm8592_vm1, %v1769_v42, 0.0 }
 0x1d2   : > { %v1898_v30 = vrot.slane %v1897_v18, 1  ;;  %v1384_v17 = vsub.f32 2.0, %v1383_v56  ;;  %5437 = vrcp.f32 %v6585_v35  ;;  %v1662_v51 = vrot.slane %v1661_v16, 2 }
 0x1d3   : > { %v2284_v45 = vmul.f32 1.442695, %v6590_v49  ;;  %v1794_v59 = vrot.slane %v1793_v37, 2  ;;  %v1900_v2 = vmul.f32 %v6513_v9, %v6439_v40  ;;  %v2028_v61 = vrot.slane %v2027_v15, 2 }
 0x1d4   : > { %5439 = vpow2.f32 %v2286_v52  ;;  %v5426_v27 = vpop.eup %5425  ;;  %v1640_v29 = vrot.slane %v1639_v5, 4  ;;  %v1771_v7 = vadd.f32 %v1770_v10, %v1768_v48  ;;  %v1902_v0 = vsel %vm8592_vm1, %v1901_v14, 0.0  ;;  %v8661_v48 = vld [vmem:[#allocation18_spill] sm:$0xff] }
 0x1d5   : > { %5441 = vrcp.f32 %v6595_v62  ;;  %v1123_v6 = vmul.f32 0.6931472, %v5424_v39  ;;  %v1249_v63 = vadd.f32 %v1248_v12, %v6539_v43  ;;  %v6610_v55 = vmin.f32 %v6541_v11, %v1532_v54 }
 0x1d6   : > { %v6612_v4 = vadd.f32 %v1898_v30, %v1897_v18  ;;  %v5428_v33 = vpop.eup %5427  ;;  %v1385_v13 = vmul.f32 %v5422_v24, %v1384_v17  ;;  %v1511_v40 = vadd.f32 %v1510_v53, %v1509_v1  ;;  %v1663_v9 = vmin.f32 %v1661_v16, %v1662_v51  ;;  %v8659_v1 = vld [vmem:[#allocation28_spill] sm:$0xff] }
 0x1d7   : > { %5443 = vpow2.f32 %v2284_v45  ;;  %v6617_v26 = vsub.f32 %v1123_v6, %v6564_v31  ;;  %v1795_v19 = vmin.f32 %v1793_v37, %v1794_v59  ;;  %v1903_v57 = vadd.f32 %v1902_v0, %v1900_v2 }
 0x1d8   : > { %v6614_v38 = vpop.eup %5429  ;;  %v2029_v28 = vadd.f32 %v2028_v61, %v2027_v15  ;;  %v1256_v43 = vmul.f32 %v1253_v50, %v1249_v63  ;;  %v1381_v11 = vadd.f32 %v1380_v22, %v6557_v41  ;;  %v1641_v12 = vadd.f32 %v1640_v29, %v1639_v5 }
 0x1d9   : > { %v5432_v34 = vpop.eup %5431  ;;  %v1772_v54 = vrot.slane %v1771_v7, 4  ;;  %v1515_v24 = vmul.f32 %v5428_v33, %v6549_v20  ;;  %5445 = vrcp.f32 %v6612_v4  ;;  %v1924_v23 = vrot.slane %v8659_v1, 4 }
 0x1da   : > { %v2033_v31 = vmul.f32 %v6531_v36, %v8660_v47  ;;  %v1388_v42 = vmul.f32 %v1385_v13, %v1381_v11  ;;  %v1512_v18 = vrot.slane %v1511_v40, 1  ;;  %v1664_v56 = vrot.slane %v1663_v9, 1 }
 0x1db   : > { %v6627_v46 = vpop.eup %5433  ;;  %v2156_v16 = vsel %vm8592_vm1, %v6614_v38, 0.0  ;;  %v1255_v41 = vmul.f32 0.6931472, %v5426_v27  ;;  %v1796_v22 = vrot.slane %v1795_v19, 1  ;;  %v1904_v37 = vrot.slane %v1903_v57, 4 }
 0x1dc   : > { %v2030_v15 = vrot.slane %v2029_v28, 1  ;;  %v5436_v20 = vpop.eup %5435  ;;  %v1387_v52 = vmul.f32 0.6931472, %v5432_v34  ;;  %v1642_v39 = vrot.slane %v1641_v12, 2  ;;  %v1773_v5 = vadd.f32 %v1772_v54, %v1771_v7 }
 0x1dd   : > { %v2032_v14 = vmul.f32 %v6543_v32, %v8661_v48  ;;  %v1516_v36 = vsub.f32 2.0, %v1515_v24  ;;  %v1925_v50 = vmin.f32 %v8659_v1, %v1924_v23  ;;  %v2034_v53 = vsel %vm8592_vm1, %v2033_v31, 0.0 }
 0x1de   : > { %v2157_v10 = vadd.f32 %v6627_v46, %v2156_v16  ;;  %v6636_v30 = vsub.f32 %v1255_v41, %v1256_v43  ;;  %v6638_v17 = vsub.f32 %v1387_v52, %v1388_v42  ;;  %v1513_v51 = vadd.f32 %v1512_v18, %v1511_v40  ;;  %v8663_v43 = vld [vmem:[#allocation14_spill] sm:$0xff] }
 0x1df   : > { %v6640_v45 = vmin.f32 %v1663_v9, %v1664_v56  ;;  %v5438_v59 = vpop.eup %5437  ;;  %5447 = vlog2.f32 %v6585_v35  ;;  %v6643_v2 = vmin.f32 %v1795_v19, %v1796_v22  ;;  %v1905_v32 = vadd.f32 %v1904_v37, %v1903_v57  ;;  %v8662_v9 = vld [vmem:[#allocation11_spill] sm:$0xff]  ;;  %v8665_v57 = vld [vmem:[#allocation38_spill] sm:$0xff] }
 0x1e0   : > { %v6645_v61 = vadd.f32 %v2030_v15, %v2029_v28  ;;  %v1519_v29 = vmul.f32 0.6931472, %v5436_v20  ;;  %v1643_v7 = vadd.f32 %v1642_v39, %v1641_v12  ;;  %v1774_v0 = vrot.slane %v1773_v5, 2  ;;  %v8664_v19 = vld [vmem:[#allocation31_spill] sm:$0xff] }
 0x1e1   : > { %v6647_v27 = vpop.eup %5439  ;;  %v2035_v6 = vadd.f32 %v2034_v53, %v2032_v14  ;;  %v1517_v13 = vmul.f32 %v5428_v33, %v1516_v36  ;;  %v1926_v34 = vrot.slane %v1925_v50, 2  ;;  %v2158_v40 = vrot.slane %v2157_v10, 4 }
 0x1e2   : > { %v5442_v63 = vpop.eup %5441  ;;  %vm2330_vm4 = vcmp.lt.f32.partialorder %v8663_v43, %v8662_v9  ;;  %5449 = vlog2.f32 %v6595_v62  ;;  %v2056_v11 = vrot.slane %v8664_v19, 4  ;;  %vm2326_vm5 = vcmp.lt.f32.partialorder %v8665_v57, %v8662_v9 }
 0x1e3   : > { %v1647_v12 = vmul.f32 %v5438_v59, %v6585_v35  ;;  %v1906_v54 = vrot.slane %v1905_v32, 2  ;;  %5451 = vrcp.f32 %v6645_v61  ;;  %v2288_v33 = vsel %vm8592_vm1, %v6647_v27, 0.0 }
 0x1e4   : > { %v6655_v28 = vpop.eup %5443  ;;  %v1775_v24 = vadd.f32 %v1774_v0, %v1773_v5  ;;  %v1779_v1 = vmul.f32 %v5442_v63, %v6595_v62  ;;  %v2036_v23 = vrot.slane %v2035_v6, 4  ;;  %v5568_v47 = vmov 0.0   ;;  %v8666_v62 = vld [vmem:[#allocation23_spill] sm:$0xff] }
 0x1e5   : > { %v4687_v31 = vsel %vm2330_vm4, 1.0, %v5568_v47  ;;  %v1520_v42 = vmul.f32 %v1517_v13, %v1513_v51  ;;  %v1644_v18 = vrot.slane %v1643_v7, 1  ;;  %v6663_v56 = vmin.f32 %v1925_v50, %v1926_v34 }
 0x1e6   : > { %v2159_v16 = vadd.f32 %v2158_v40, %v2157_v10  ;;  %v5446_v41 = vpop.eup %5445  ;;  %v2057_v35 = vmin.f32 %v8664_v19, %v2056_v11  ;;  %v2289_v22 = vadd.f32 %v6655_v28, %v2288_v33  ;;  %v4686_v37 = vsel %vm2326_vm5, 1.0, %v5568_v47 }
 0x1e7   : > { %vm2334_vm6 = vcmp.lt.f32.partialorder %v8666_v62, %v8662_v9  ;;  %v1648_v15 = vsub.f32 2.0, %v1647_v12  ;;  %v1907_v20 = vadd.f32 %v1906_v54, %v1905_v32  ;;  %v2333_v52 = vadd.f32 %v4687_v31, %v4686_v37 }
 0x1e8   : > { %vm2338_vm7 = vcmp.lt.f32.partialorder %v6527_v44, %v8662_v9  ;;  %v1776_v39 = vrot.slane %v1775_v24, 1  ;;  %v1780_v5 = vsub.f32 2.0, %v1779_v1  ;;  %5453 = vlog2.f32 %v6612_v4 }
 0x1e9   : > { %v2037_v48 = vadd.f32 %v2036_v23, %v2035_v6  ;;  %v1645_v14 = vadd.f32 %v1644_v18, %v1643_v7  ;;  %v1911_v36 = vmul.f32 %v5446_v41, %v6612_v4  ;;  %v1928_v50 = vrot.slane %v6663_v56, 1 }
 0x1ea   : > { %v2160_v53 = vrot.slane %v2159_v16, 2  ;;  %v2165_v10 = vmul.f32 %v6614_v38, %v6536_v58  ;;  %v2290_v51 = vrot.slane %v2289_v22, 4  ;;  %v4688_v32 = vsel %vm2334_vm6, 1.0, %v5568_v47 }
 0x1eb   : > { %v4689_v0 = vsel %vm2338_vm7, 1.0, %v5568_v47  ;;  %v1649_v13 = vmul.f32 %v5438_v59, %v1648_v15  ;;  %v1908_v34 = vrot.slane %v1907_v20, 1  ;;  %v2058_v40 = vrot.slane %v2057_v35, 2 }
 0x1ec   : > { %v2337_v19 = vadd.f32 %v4688_v32, %v2333_v52  ;;  %v5448_v11 = vpop.eup %5447  ;;  %v6682_v6 = vsub.f32 %v1519_v29, %v1520_v42  ;;  %v1777_v7 = vadd.f32 %v1776_v39, %v1775_v24  ;;  %v1781_v4 = vmul.f32 %v5442_v63, %v1780_v5 }
 0x1ed   : > { %v2038_v12 = vrot.slane %v2037_v48, 2  ;;  %v1912_v54 = vsub.f32 2.0, %v1911_v36  ;;  %v2161_v33 = vadd.f32 %v2160_v53, %v2159_v16  ;;  %v2164_v58 = vmul.f32 %v6627_v46, %v6553_v3  ;;  %v8667_v3 = vld [vmem:[#allocation32_spill] sm:$0xff] }
 0x1ee   : > { %v2341_v38 = vadd.f32 %v4689_v0, %v2337_v19  ;;  %v2166_v1 = vsel %vm8592_vm1, %v2165_v10, 0.0  ;;  %v2291_v23 = vadd.f32 %v2290_v51, %v2289_v22  ;;  %vm2342_vm8 = vcmp.lt.f32.partialorder %v6555_v8, %v8662_v9 }
 0x1ef   : > { %vm2346_vm9 = vcmp.lt.f32.partialorder %v6617_v26, %v8662_v9  ;;  %v5450_v59 = vpop.eup %5449  ;;  %v1651_v29 = vmul.f32 0.6931472, %v5448_v11  ;;  %v1652_v24 = vmul.f32 %v1649_v13, %v1645_v14  ;;  %v1909_v63 = vadd.f32 %v1908_v34, %v1907_v20 }
 0x1f0   : > { %v6691_v31 = vmin.f32 %v2057_v35, %v2058_v40  ;;  %v5452_v42 = vpop.eup %5451  ;;  %v1784_v18 = vmul.f32 %v1781_v4, %v1777_v7  ;;  %5455 = vlog2.f32 %v6645_v61  ;;  %v2188_v46 = vrot.slane %v8667_v3, 4 }
 0x1f1   : > { %v2297_v16 = vmul.f32 %v6647_v27, %v6577_v21  ;;  %v2162_v22 = vrot.slane %v2161_v33, 1  ;;  %v2167_v37 = vadd.f32 %v2166_v1, %v2164_v58  ;;  %v4690_v15 = vsel %vm2342_vm8, 1.0, %v5568_v47 }
 0x1f2   : > { %v4691_v52 = vsel %vm2346_vm9, 1.0, %v5568_v47  ;;  %v1913_v39 = vmul.f32 %v5446_v41, %v1912_v54  ;;  %v2039_v5 = vadd.f32 %v2038_v12, %v2037_v48  ;;  %v2292_v20 = vrot.slane %v2291_v23, 2 }
 0x1f3   : > { %v2345_v35 = vadd.f32 %v4690_v15, %v2341_v38  ;;  %v1783_v14 = vmul.f32 0.6931472, %v5450_v59  ;;  %v2043_v36 = vmul.f32 %v5452_v42, %v6645_v61  ;;  %v2296_v53 = vmul.f32 %v6655_v28, %v6590_v49 }
 0x1f4   : > { %vm2350_vm10 = vcmp.lt.f32.partialorder %v6636_v30, %v8662_v9  ;;  %v2189_v21 = vmin.f32 %v8667_v3, %v2188_v46  ;;  %v2298_v27 = vsel %vm8592_vm1, %v2297_v16, 0.0  ;;  %vm2354_vm11 = vcmp.lt.f32.partialorder %v6638_v17, %v8662_v9 }
 0x1f5   : > { %v2349_v10 = vadd.f32 %v4691_v52, %v2345_v35  ;;  %v5454_v41 = vpop.eup %5453  ;;  %v6708_v48 = vsub.f32 %v1651_v29, %v1652_v24  ;;  %v6710_v51 = vsub.f32 %v1783_v14, %v1784_v18  ;;  %v6712_v61 = vadd.f32 %v2162_v22, %v2161_v33  ;;  %v8668_v29 = vld [vmem:[#allocation33_spill] sm:$0xff] }
 0x1f6   : > { %v2168_v32 = vrot.slane %v2167_v37, 4  ;;  %v1916_v49 = vmul.f32 %v1913_v39, %v1909_v63  ;;  %v2040_v28 = vrot.slane %v2039_v5, 1  ;;  %v2293_v0 = vadd.f32 %v2292_v20, %v2291_v23 }
 0x1f7   : > { %v4692_v13 = vsel %vm2350_vm10, 1.0, %v5568_v47  ;;  %v2044_v34 = vsub.f32 2.0, %v2043_v36  ;;  %v2299_v40 = vadd.f32 %v2298_v27, %v2296_v53  ;;  %v4693_v19 = vsel %vm2354_vm11, 1.0, %v5568_v47 }
 0x1f8   : > { %vm2390_vm12 = vcmp.lt.f32.partialorder %v8663_v43, %v8665_v57  ;;  %v1915_v11 = vmul.f32 0.6931472, %v5454_v41  ;;  %v2190_v7 = vrot.slane %v2189_v21, 2  ;;  %v2353_v4 = vadd.f32 %v4692_v13, %v2349_v10 }
 0x1f9   : > { %vm2358_vm13 = vcmp.lt.f32.partialorder %v6682_v6, %v8662_v9  ;;  %v2169_v12 = vadd.f32 %v2168_v32, %v2167_v37  ;;  %5457 = vrcp.f32 %v6712_v61  ;;  %vm2362_vm14 = vcmp.lt.f32.partialorder %v6708_v48, %v8662_v9 }
 0x1fa   : > { %vm2386_vm15 = vcmp.le.f32.partialorder %v8662_v9, %v8665_v57  ;;  %v6725_v54 = vsub.f32 %v1915_v11, %v1916_v49  ;;  %v2294_v33 = vrot.slane %v2293_v0, 1  ;;  %v2357_v58 = vadd.f32 %v4693_v19, %v2353_v4 }
 0x1fb   : > { %v4702_v38 = vsel %vm2390_vm12, 1.0, %v5568_v47  ;;  %v2041_v1 = vadd.f32 %v2040_v28, %v2039_v5  ;;  %v2045_v23 = vmul.f32 %v5452_v42, %v2044_v34  ;;  %v2300_v59 = vrot.slane %v2299_v40, 4 }
 0x1fc   : > { %v2320_v24 = vrot.slane %v8668_v29, 4  ;;  %v4694_v63 = vsel %vm2358_vm13, 1.0, %v5568_v47  ;;  %v4695_v18 = vsel %vm2362_vm14, 1.0, %v5568_v47  ;;  %vm2366_vm0 = vcmp.lt.f32.partialorder %v6710_v51, %v8662_v9 }
 0x1fd   : > { %v4701_v3 = vsel %vm2386_vm15, 1.0, %v5568_v47  ;;  %v5456_v46 = vpop.eup %5455  ;;  %v2170_v16 = vrot.slane %v2169_v12, 2  ;;  %vm2394_vm2 = vcmp.lt.f32.partialorder %v8666_v62, %v8665_v57  ;;  %vm2398_vm3 = vcmp.lt.f32.partialorder %v6527_v44, %v8665_v57 }
 0x1fe   : > { %v2393_v22 = vadd.f32 %v4702_v38, %v4701_v3  ;;  %v2060_v42 = vrot.slane %v6691_v31, 1  ;;  %v6739_v37 = vadd.f32 %v2294_v33, %v2293_v0  ;;  %v2361_v15 = vadd.f32 %v4694_v63, %v2357_v58 }
 0x1ff   : > { %vm2370_vm4 = vcmp.lt.f32.partialorder %v6725_v54, %v8662_v9  ;;  %v2048_v52 = vmul.f32 %v2045_v23, %v2041_v1  ;;  %v6743_v39 = vmin.f32 %v2189_v21, %v2190_v7  ;;  %v2301_v5 = vadd.f32 %v2300_v59, %v2299_v40 }
 0x200   : > { %v6746_v20 = vmin.f32 %v8668_v29, %v2320_v24  ;;  %v2365_v35 = vadd.f32 %v4695_v18, %v2361_v15  ;;  %v4696_v14 = vsel %vm2366_vm0, 1.0, %v5568_v47  ;;  %v4703_v36 = vsel %vm2394_vm2, 1.0, %v5568_v47 }
 0x201   : > { %v4704_v53 = vsel %vm2398_vm3, 1.0, %v5568_v47  ;;  %v2047_v27 = vmul.f32 0.6931472, %v5456_v46  ;;  %v2171_v10 = vadd.f32 %v2170_v16, %v2169_v12  ;;  %v4697_v41 = vsel %vm2370_vm4, 1.0, %v5568_v47 }
 0x202   : > { %v2397_v21 = vadd.f32 %v4703_v36, %v2393_v22  ;;  %5459 = vrcp.f32 %v6739_v37  ;;  %vm2402_vm5 = vcmp.lt.f32.partialorder %v6555_v8, %v8665_v57  ;;  %vm2446_vm6 = vcmp.le.f32.partialorder %v8662_v9, %v8663_v43 }
 0x203   : > { %vm2450_vm7 = vcmp.le.f32.partialorder %v8665_v57, %v8663_v43  ;;  %v6762_v32 = vsub.f32 %v2047_v27, %v2048_v52  ;;  %v2302_v49 = vrot.slane %v2301_v5, 2  ;;  %vm2406_vm8 = vcmp.lt.f32.partialorder %v6617_v26, %v8665_v57 }
 0x204   : > { %v2401_v28 = vadd.f32 %v4704_v53, %v2397_v21  ;;  %v6769_v0 = vmin.f32 %v6663_v56, %v1928_v50  ;;  %v6772_v13 = vmin.f32 %v6691_v31, %v2060_v42  ;;  %v2192_v34 = vrot.slane %v6743_v39, 1 }
 0x205   : > { %v2369_v40 = vadd.f32 %v4696_v14, %v2365_v35  ;;  %v2172_v19 = vrot.slane %v2171_v10, 1  ;;  %5461 = vlog2.f32 %v6712_v61  ;;  %v4716_v11 = vsel %vm2446_vm6, 1.0, %v5568_v47 }
 0x206   : > { %v4717_v7 = vsel %vm2450_vm7, 1.0, %v5568_v47  ;;  %v5458_v4 = vpop.eup %5457  ;;  %v2322_v12 = vrot.slane %v6746_v20, 2  ;;  %v4705_v56 = vsel %vm2402_vm5, 1.0, %v5568_v47  ;;  %v4706_v50 = vsel %vm2406_vm8, 1.0, %v5568_v47 }
 0x207   : > { %v2373_v33 = vadd.f32 %v4697_v41, %v2369_v40  ;;  %v2303_v31 = vadd.f32 %v2302_v49, %v2301_v5  ;;  %vm2374_vm9 = vcmp.lt.f32.partialorder %v6762_v32, %v8662_v9  ;;  %v2405_v58 = vadd.f32 %v4705_v56, %v2401_v28 }
 0x208   : > { %vm2410_vm10 = vcmp.lt.f32.partialorder %v6636_v30, %v8665_v57  ;;  %vm2414_vm11 = vcmp.lt.f32.partialorder %v6638_v17, %v8665_v57  ;;  %v2453_v38 = vadd.f32 %v4717_v7, %v4716_v11  ;;  %vm2454_vm12 = vcmp.lt.f32.partialorder %v8666_v62, %v8663_v43 }
 0x209   : > { %vm2458_vm13 = vcmp.lt.f32.partialorder %v6527_v44, %v8663_v43  ;;  %v2173_v1 = vadd.f32 %v2172_v19, %v2171_v10  ;;  %v2175_v23 = vmul.f32 %v5458_v4, %v6712_v61  ;;  %v2409_v59 = vadd.f32 %v4706_v50, %v2405_v58 }
 0x20a   : > { %vm2418_vm14 = vcmp.lt.f32.partialorder %v6682_v6, %v8665_v57  ;;  %v4698_v29 = vsel %vm2374_vm9, 1.0, %v5568_v47  ;;  %v4707_v24 = vsel %vm2410_vm10, 1.0, %v5568_v47  ;;  %vm2506_vm15 = vcmp.le.f32.partialorder %v8662_v9, %v8666_v62 }
 0x20b   : > { %vm2510_vm0 = vcmp.le.f32.partialorder %v8665_v57, %v8666_v62  ;;  %v2304_v63 = vrot.slane %v2303_v31, 1  ;;  %v4708_v18 = vsel %vm2414_vm11, 1.0, %v5568_v47  ;;  %v4718_v3 = vsel %vm2454_vm12, 1.0, %v5568_v47 }
 0x20c   : > { %v4719_v61 = vsel %vm2458_vm13, 1.0, %v5568_v47  ;;  %v6806_v46 = vadd.f32 %v4698_v29, %v2373_v33  ;;  %v4709_v16 = vsel %vm2418_vm14, 1.0, %v5568_v47  ;;  %vm2422_vm2 = vcmp.lt.f32.partialorder %v6708_v48, %v8665_v57 }
 0x20d   : > { %v2457_v22 = vadd.f32 %v4718_v3, %v2453_v38  ;;  %v2176_v42 = vsub.f32 2.0, %v2175_v23  ;;  %v2413_v15 = vadd.f32 %v4707_v24, %v2409_v59  ;;  %v4731_v52 = vsel %vm2506_vm15, 1.0, %v5568_v47 }
 0x20e   : > { %v4732_v5 = vsel %vm2510_vm0, 1.0, %v5568_v47  ;;  %vm2426_vm3 = vcmp.lt.f32.partialorder %v6710_v51, %v8665_v57  ;;  %vm2462_vm4 = vcmp.lt.f32.partialorder %v6555_v8, %v8663_v43  ;;  %vm2466_vm5 = vcmp.lt.f32.partialorder %v6617_v26, %v8663_v43 }
 0x20f   : > { %v2461_v35 = vadd.f32 %v4719_v61, %v2457_v22  ;;  %v5460_v14 = vpop.eup %5459  ;;  %v2305_v36 = vadd.f32 %v2304_v63, %v2303_v31  ;;  %5463 = vlog2.f32 %v6739_v37  ;;  %v2417_v53 = vadd.f32 %v4708_v18, %v2413_v15 }
 0x210   : > { %vm2430_vm6 = vcmp.lt.f32.partialorder %v6725_v54, %v8665_v57  ;;  %vm2434_vm7 = vcmp.lt.f32.partialorder %v6762_v32, %v8665_v57  ;;  %v2513_v27 = vadd.f32 %v4732_v5, %v4731_v52  ;;  %vm2514_vm8 = vcmp.le.f32.partialorder %v8663_v43, %v8666_v62 }
 0x211   : > { %vm2518_vm9 = vcmp.lt.f32.partialorder %v6527_v44, %v8666_v62  ;;  %v2177_v10 = vmul.f32 %v5458_v4, %v2176_v42  ;;  %v4710_v41 = vsel %vm2422_vm2, 1.0, %v5568_v47  ;;  %v4720_v21 = vsel %vm2462_vm4, 1.0, %v5568_v47 }
 0x212   : > { %v4721_v49 = vsel %vm2466_vm5, 1.0, %v5568_v47  ;;  %v5462_v28 = vpop.eup %5461  ;;  %v2307_v40 = vmul.f32 %v5460_v14, %v6739_v37  ;;  %v4711_v19 = vsel %vm2426_vm3, 1.0, %v5568_v47  ;;  %v4712_v11 = vsel %vm2430_vm6, 1.0, %v5568_v47 }
 0x213   : > { %v2465_v7 = vadd.f32 %v4720_v21, %v2461_v35  ;;  %v2421_v4 = vadd.f32 %v4709_v16, %v2417_v53  ;;  %v6841_v33 = vsel %vm2434_vm7, 1.0, %v5568_v47  ;;  %v4733_v56 = vsel %vm2514_vm8, 1.0, %v5568_v47 }
 0x214   : > { %v4734_v50 = vsel %vm2518_vm9, 1.0, %v5568_v47  ;;  %vm2470_vm10 = vcmp.lt.f32.partialorder %v6636_v30, %v8663_v43  ;;  %vm2474_vm11 = vcmp.lt.f32.partialorder %v6638_v17, %v8663_v43  ;;  %v2517_v37 = vadd.f32 %v4733_v56, %v2513_v27 }
 0x215   : > { %v2469_v31 = vadd.f32 %v4721_v49, %v2465_v7  ;;  %v2179_v58 = vmul.f32 0.6931472, %v5462_v28  ;;  %v2180_v38 = vmul.f32 %v2177_v10, %v2173_v1  ;;  %vm2566_vm12 = vcmp.le.f32.partialorder %v8662_v9, %v6527_v44 }
 0x216   : > { %vm2570_vm13 = vcmp.le.f32.partialorder %v8665_v57, %v6527_v44  ;;  %v2308_v23 = vsub.f32 2.0, %v2307_v40  ;;  %v2521_v59 = vadd.f32 %v4734_v50, %v2517_v37  ;;  %vm2522_vm14 = vcmp.lt.f32.partialorder %v6555_v8, %v8666_v62 }
 0x217   : > { %vm2526_vm15 = vcmp.lt.f32.partialorder %v6617_v26, %v8666_v62  ;;  %v2425_v29 = vadd.f32 %v4710_v41, %v2421_v4  ;;  %v4722_v24 = vsel %vm2470_vm10, 1.0, %v5568_v47  ;;  %v4723_v63 = vsel %vm2474_vm11, 1.0, %v5568_v47 }
 0x218   : > { %vm2478_vm0 = vcmp.lt.f32.partialorder %v6682_v6, %v8663_v43  ;;  %v2473_v1 = vadd.f32 %v4722_v24, %v2469_v31  ;;  %vm2482_vm2 = vcmp.lt.f32.partialorder %v6708_v48, %v8663_v43  ;;  %v4746_v18 = vsel %vm2566_vm12, 1.0, %v5568_v47 }
 0x219   : > { %v4747_v3 = vsel %vm2570_vm13, 1.0, %v5568_v47  ;;  %vm2486_vm3 = vcmp.lt.f32.partialorder %v6710_v51, %v8663_v43  ;;  %vm2490_vm4 = vcmp.lt.f32.partialorder %v6725_v54, %v8663_v43  ;;  %v4735_v61 = vsel %vm2522_vm14, 1.0, %v5568_v47 }
 0x21a   : > { %v4736_v16 = vsel %vm2526_vm15, 1.0, %v5568_v47  ;;  %v6871_v22 = vsub.f32 %v2179_v58, %v2180_v38  ;;  %v2309_v42 = vmul.f32 %v5460_v14, %v2308_v23  ;;  %v2477_v15 = vadd.f32 %v4723_v63, %v2473_v1 }
 0x21b   : > { %v2525_v52 = vadd.f32 %v4735_v61, %v2521_v59  ;;  %v2429_v5 = vadd.f32 %v4711_v19, %v2425_v29  ;;  %v4724_v35 = vsel %vm2478_vm0, 1.0, %v5568_v47  ;;  %v2573_v53 = vadd.f32 %v4747_v3, %v4746_v18 }
 0x21c   : > { %vm2574_vm5 = vcmp.le.f32.partialorder %v8663_v43, %v6527_v44  ;;  %v5464_v27 = vpop.eup %5463  ;;  %v4725_v10 = vsel %vm2482_vm2, 1.0, %v5568_v47  ;;  %vm2530_vm6 = vcmp.lt.f32.partialorder %v6636_v30, %v8666_v62  ;;  %vm2534_vm7 = vcmp.lt.f32.partialorder %v6638_v17, %v8666_v62 }
 0x21d   : > { %v2529_v41 = vadd.f32 %v4736_v16, %v2525_v52  ;;  %v2433_v14 = vadd.f32 %v4712_v11, %v2429_v5  ;;  %v4726_v21 = vsel %vm2486_vm3, 1.0, %v5568_v47  ;;  %v4727_v49 = vsel %vm2490_vm4, 1.0, %v5568_v47 }
 0x21e   : > { %vm2494_vm8 = vcmp.lt.f32.partialorder %v6762_v32, %v8663_v43  ;;  %v2312_v28 = vmul.f32 %v2309_v42, %v2305_v36  ;;  %vm2378_vm9 = vcmp.lt.f32.partialorder %v6871_v22, %v8662_v9  ;;  %v2481_v40 = vadd.f32 %v4724_v35, %v2477_v15 }
 0x21f   : > { %v4748_v19 = vsel %vm2574_vm5, 1.0, %v5568_v47  ;;  %v4737_v11 = vsel %vm2530_vm6, 1.0, %v5568_v47  ;;  %v4738_v7 = vsel %vm2534_vm7, 1.0, %v5568_v47  ;;  %vm2578_vm10 = vcmp.le.f32.partialorder %v8666_v62, %v6527_v44 }
 0x220   : > { %v2577_v4 = vadd.f32 %v4748_v19, %v2573_v53  ;;  %v2311_v56 = vmul.f32 0.6931472, %v5464_v27  ;;  %vm2438_vm11 = vcmp.lt.f32.partialorder %v6871_v22, %v8665_v57  ;;  %v4728_v36 = vsel %vm2494_vm8, 1.0, %v5568_v47 }
 0x221   : > { %v2533_v50 = vadd.f32 %v4737_v11, %v2529_v41  ;;  %v4699_v31 = vsel %vm2378_vm9, 1.0, %v5568_v47  ;;  %v2485_v37 = vadd.f32 %v4725_v10, %v2481_v40  ;;  %vm2538_vm12 = vcmp.lt.f32.partialorder %v6682_v6, %v8666_v62 }
 0x222   : > { %vm2542_vm13 = vcmp.lt.f32.partialorder %v6708_v48, %v8666_v62  ;;  %v4749_v38 = vsel %vm2578_vm10, 1.0, %v5568_v47  ;;  %vm2626_vm14 = vcmp.le.f32.partialorder %v8662_v9, %v6555_v8  ;;  %vm2630_vm15 = vcmp.le.f32.partialorder %v8665_v57, %v6555_v8 }
 0x223   : > { %v2537_v58 = vadd.f32 %v4738_v7, %v2533_v50  ;;  %v6914_v23 = vsub.f32 %v2311_v56, %v2312_v28  ;;  %v2437_v59 = vadd.f32 %v6841_v33, %v2433_v14  ;;  %v2581_v29 = vadd.f32 %v4749_v38, %v2577_v4 }
 0x224   : > { %vm2582_vm0 = vcmp.lt.f32.partialorder %v6555_v8, %v6527_v44  ;;  %v2381_v24 = vadd.f32 %v4699_v31, %v6806_v46  ;;  %v4714_v63 = vsel %vm2438_vm11, 1.0, %v5568_v47  ;;  %vm2498_vm2 = vcmp.lt.f32.partialorder %v6871_v22, %v8663_v43 }
 0x225   : > { %v4739_v1 = vsel %vm2538_vm12, 1.0, %v5568_v47  ;;  %v4740_v18 = vsel %vm2542_vm13, 1.0, %v5568_v47  ;;  %vm2586_vm3 = vcmp.lt.f32.partialorder %v6617_v26, %v6527_v44  ;;  %v4761_v33 = vsel %vm2626_vm14, 1.0, %v5568_v47 }
 0x226   : > { %v4762_v3 = vsel %vm2630_vm15, 1.0, %v5568_v47  ;;  %v2489_v46 = vadd.f32 %v4726_v21, %v2485_v37  ;;  %v2541_v61 = vadd.f32 %v4739_v1, %v2537_v58  ;;  %vm2546_vm4 = vcmp.lt.f32.partialorder %v6710_v51, %v8666_v62 }
 0x227   : > { %v4750_v16 = vsel %vm2582_vm0, 1.0, %v5568_v47  ;;  %vm2382_vm5 = vcmp.lt.f32.partialorder %v6914_v23, %v8662_v9  ;;  %vm2442_vm6 = vcmp.lt.f32.partialorder %v6914_v23, %v8665_v57  ;;  %vm2550_vm7 = vcmp.lt.f32.partialorder %v6725_v54, %v8666_v62 }
 0x228   : > { %v2585_v42 = vadd.f32 %v4750_v16, %v2581_v29  ;;  %v2545_v15 = vadd.f32 %v4740_v18, %v2541_v61  ;;  %v4751_v52 = vsel %vm2586_vm3, 1.0, %v5568_v47  ;;  %v2633_v5 = vadd.f32 %v4762_v3, %v4761_v33 }
 0x229   : > { %vm2634_vm8 = vcmp.le.f32.partialorder %v8663_v43, %v6555_v8  ;;  %v2441_v35 = vadd.f32 %v4714_v63, %v2437_v59  ;;  %v2493_v53 = vadd.f32 %v4727_v49, %v2489_v46  ;;  %v4729_v27 = vsel %vm2498_vm2, 1.0, %v5568_v47 }
 0x22a   : > { %vm2502_vm9 = vcmp.lt.f32.partialorder %v6914_v23, %v8663_v43  ;;  %v4700_v10 = vsel %vm2382_vm5, 1.0, %v5568_v47  ;;  %v4715_v41 = vsel %vm2442_vm6, 1.0, %v5568_v47  ;;  %v4741_v14 = vsel %vm2546_vm4, 1.0, %v5568_v47 }
 0x22b   : > { %v4742_v21 = vsel %vm2550_vm7, 1.0, %v5568_v47  ;;  %v2589_v49 = vadd.f32 %v4751_v52, %v2585_v42  ;;  %vm2590_vm10 = vcmp.lt.f32.partialorder %v6636_v30, %v6527_v44  ;;  %vm2594_vm11 = vcmp.lt.f32.partialorder %v6638_v17, %v6527_v44 }
 0x22c   : > { %v4763_v28 = vsel %vm2634_vm8, 1.0, %v5568_v47  ;;  %v4730_v40 = vsel %vm2502_vm9, 1.0, %v5568_v47  ;;  %v2549_v19 = vadd.f32 %v4741_v14, %v2545_v15  ;;  %vm2638_vm12 = vcmp.le.f32.partialorder %v8666_v62, %v6555_v8 }
 0x22d   : > { %v2637_v11 = vadd.f32 %v4763_v28, %v2633_v5  ;;  %v6965_v7 = vadd.f32 %v4700_v10, %v2381_v24  ;;  %v2497_v4 = vadd.f32 %v4728_v36, %v2493_v53  ;;  %vm2554_vm13 = vcmp.lt.f32.partialorder %v6762_v32, %v8666_v62 }
 0x22e   : > { %vm2558_vm14 = vcmp.lt.f32.partialorder %v6871_v22, %v8666_v62  ;;  %v2553_v56 = vadd.f32 %v4742_v21, %v2549_v19  ;;  %vm2562_vm15 = vcmp.lt.f32.partialorder %v6914_v23, %v8666_v62  ;;  %v4752_v50 = vsel %vm2590_vm10, 1.0, %v5568_v47 }
 0x22f   : > { %v4753_v31 = vsel %vm2594_vm11, 1.0, %v5568_v47  ;;  %v6975_v37 = vadd.f32 %v4715_v41, %v2441_v35  ;;  %v2501_v58 = vadd.f32 %v4729_v27, %v2497_v4  ;;  %v2593_v38 = vadd.f32 %v4752_v50, %v2589_v49 }
 0x230   : > { %v4764_v36 = vsel %vm2638_vm12, 1.0, %v5568_v47  ;;  %v4743_v59 = vsel %vm2554_vm13, 1.0, %v5568_v47  ;;  %vm2598_vm0 = vcmp.lt.f32.partialorder %v6682_v6, %v6527_v44  ;;  %vm2642_vm2 = vcmp.le.f32.partialorder %v6527_v44, %v6555_v8 }
 0x231   : > { %v2641_v29 = vadd.f32 %v4764_v36, %v2637_v11  ;;  %v4744_v24 = vsel %vm2558_vm14, 1.0, %v5568_v47  ;;  %v4745_v63 = vsel %vm2562_vm15, 1.0, %v5568_v47  ;;  %v2597_v1 = vadd.f32 %v4753_v31, %v2593_v38 }
 0x232   : > { %vm2602_vm3 = vcmp.lt.f32.partialorder %v6708_v48, %v6527_v44  ;;  %v2557_v18 = vadd.f32 %v4743_v59, %v2553_v56  ;;  %vm2646_vm4 = vcmp.lt.f32.partialorder %v6617_v26, %v6555_v8  ;;  %vm2686_vm5 = vcmp.le.f32.partialorder %v8662_v9, %v6617_v26 }
 0x233   : > { %vm2690_vm6 = vcmp.le.f32.partialorder %v8665_v57, %v6617_v26  ;;  %v6993_v33 = vadd.f32 %v4730_v40, %v2501_v58  ;;  %v4754_v3 = vsel %vm2598_vm0, 1.0, %v5568_v47  ;;  %vm2606_vm7 = vcmp.lt.f32.partialorder %v6710_v51, %v6527_v44 }
 0x234   : > { %v4765_v46 = vsel %vm2642_vm2, 1.0, %v5568_v47  ;;  %v2561_v61 = vadd.f32 %v4744_v24, %v2557_v18  ;;  %v4755_v16 = vsel %vm2602_vm3, 1.0, %v5568_v47  ;;  %vm2610_vm8 = vcmp.lt.f32.partialorder %v6725_v54, %v6527_v44 }
 0x235   : > { %v2645_v42 = vadd.f32 %v4765_v46, %v2641_v29  ;;  %v2601_v15 = vadd.f32 %v4754_v3, %v2597_v1  ;;  %v4766_v52 = vsel %vm2646_vm4, 1.0, %v5568_v47  ;;  %v4776_v5 = vsel %vm2686_vm5, 1.0, %v5568_v47 }
 0x236   : > { %v4777_v35 = vsel %vm2690_vm6, 1.0, %v5568_v47  ;;  %v4756_v53 = vsel %vm2606_vm7, 1.0, %v5568_v47  ;;  %vm2614_vm9 = vcmp.lt.f32.partialorder %v6762_v32, %v6527_v44  ;;  %vm2618_vm10 = vcmp.lt.f32.partialorder %v6871_v22, %v6527_v44 }
 0x237   : > { %vm2622_vm11 = vcmp.lt.f32.partialorder %v6914_v23, %v6527_v44  ;;  %v2605_v27 = vadd.f32 %v4755_v16, %v2601_v15  ;;  %v4757_v10 = vsel %vm2610_vm8, 1.0, %v5568_v47  ;;  %vm2650_vm12 = vcmp.lt.f32.partialorder %v6636_v30, %v6555_v8 }
 0x238   : > { %vm2654_vm13 = vcmp.lt.f32.partialorder %v6638_v17, %v6555_v8  ;;  %v2649_v41 = vadd.f32 %v4766_v52, %v2645_v42  ;;  %vm2658_vm14 = vcmp.lt.f32.partialorder %v6682_v6, %v6555_v8  ;;  %v2693_v14 = vadd.f32 %v4777_v35, %v4776_v5 }
 0x239   : > { %vm2694_vm15 = vcmp.le.f32.partialorder %v8663_v43, %v6617_v26  ;;  %v7021_v21 = vadd.f32 %v4745_v63, %v2561_v61  ;;  %v4758_v49 = vsel %vm2614_vm9, 1.0, %v5568_v47  ;;  %v4759_v28 = vsel %vm2618_vm10, 1.0, %v5568_v47 }
 0x23a   : > { %v4760_v40 = vsel %vm2622_vm11, 1.0, %v5568_v47  ;;  %v4767_v19 = vsel %vm2650_vm12, 1.0, %v5568_v47  ;;  %v4768_v11 = vsel %vm2654_vm13, 1.0, %v5568_v47  ;;  %vm2662_vm0 = vcmp.lt.f32.partialorder %v6708_v48, %v6555_v8 }
 0x23b   : > { %vm2666_vm2 = vcmp.lt.f32.partialorder %v6710_v51, %v6555_v8  ;;  %v2609_v4 = vadd.f32 %v4756_v53, %v2605_v27  ;;  %v4769_v56 = vsel %vm2658_vm14, 1.0, %v5568_v47  ;;  %vm2670_vm3 = vcmp.lt.f32.partialorder %v6725_v54, %v6555_v8 }
 0x23c   : > { %v4778_v50 = vsel %vm2694_vm15, 1.0, %v5568_v47  ;;  %v2653_v31 = vadd.f32 %v4767_v19, %v2649_v41  ;;  %vm2674_vm4 = vcmp.lt.f32.partialorder %v6762_v32, %v6555_v8  ;;  %vm2698_vm5 = vcmp.le.f32.partialorder %v8666_v62, %v6617_v26 }
 0x23d   : > { %v2697_v58 = vadd.f32 %v4778_v50, %v2693_v14  ;;  %v2613_v38 = vadd.f32 %v4757_v10, %v2609_v4  ;;  %v4770_v36 = vsel %vm2662_vm0, 1.0, %v5568_v47  ;;  %vm2678_vm6 = vcmp.lt.f32.partialorder %v6871_v22, %v6555_v8 }
 0x23e   : > { %vm2682_vm7 = vcmp.lt.f32.partialorder %v6914_v23, %v6555_v8  ;;  %v2657_v59 = vadd.f32 %v4768_v11, %v2653_v31  ;;  %v4771_v29 = vsel %vm2666_vm2, 1.0, %v5568_v47  ;;  %v4772_v24 = vsel %vm2670_vm3, 1.0, %v5568_v47 }
 0x23f   : > { %vm2702_vm8 = vcmp.le.f32.partialorder %v6527_v44, %v6617_v26  ;;  %v7050_v63 = vsel %vm2674_vm4, 1.0, %v5568_v47  ;;  %v4779_v1 = vsel %vm2698_vm5, 1.0, %v5568_v47  ;;  %vm2706_vm9 = vcmp.le.f32.partialorder %v6555_v8, %v6617_v26 }
 0x240   : > { %vm2710_vm10 = vcmp.lt.f32.partialorder %v6636_v30, %v6617_v26  ;;  %v7058_v18 = vsel %vm2678_vm6, 1.0, %v5568_v47  ;;  %v7061_v3 = vsel %vm2682_vm7, 1.0, %v5568_v47  ;;  %v2701_v46 = vadd.f32 %v4779_v1, %v2697_v58 }
 0x241   : > { %vm2714_vm11 = vcmp.lt.f32.partialorder %v6638_v17, %v6617_v26  ;;  %v2617_v61 = vadd.f32 %v4758_v49, %v2613_v38  ;;  %v4780_v16 = vsel %vm2702_vm8, 1.0, %v5568_v47  ;;  %vm2806_vm12 = vcmp.le.f32.partialorder %v8662_v9, %v6638_v17 }
 0x242   : > { %vm2810_vm13 = vcmp.le.f32.partialorder %v8665_v57, %v6638_v17  ;;  %v2661_v42 = vadd.f32 %v4769_v56, %v2657_v59  ;;  %v4781_v15 = vsel %vm2706_vm9, 1.0, %v5568_v47  ;;  %v4782_v52 = vsel %vm2710_vm10, 1.0, %v5568_v47 }
 0x243   : > { %vm2718_vm14 = vcmp.lt.f32.partialorder %v6682_v6, %v6617_v26  ;;  %v2621_v5 = vadd.f32 %v4759_v28, %v2617_v61  ;;  %v4783_v35 = vsel %vm2714_vm11, 1.0, %v5568_v47  ;;  %vm2746_vm15 = vcmp.le.f32.partialorder %v8662_v9, %v6636_v30 }
 0x244   : > { %vm2750_vm0 = vcmp.le.f32.partialorder %v8665_v57, %v6636_v30  ;;  %v2665_v53 = vadd.f32 %v4770_v36, %v2661_v42  ;;  %v2705_v27 = vadd.f32 %v4780_v16, %v2701_v46  ;;  %v4806_v10 = vsel %vm2806_vm12, 1.0, %v5568_v47 }
 0x245   : > { %v4807_v41 = vsel %vm2810_vm13, 1.0, %v5568_v47  ;;  %v7082_v14 = vsel %vm2718_vm14, 1.0, %v5568_v47  ;;  %vm2722_vm2 = vcmp.lt.f32.partialorder %v6708_v48, %v6617_v26  ;;  %vm2726_vm3 = vcmp.lt.f32.partialorder %v6710_v51, %v6617_v26 }
 0x246   : > { %vm2730_vm4 = vcmp.lt.f32.partialorder %v6725_v54, %v6617_v26  ;;  %v4791_v49 = vsel %vm2746_vm15, 1.0, %v5568_v47  ;;  %v4792_v28 = vsel %vm2750_vm0, 1.0, %v5568_v47  ;;  %vm2866_vm5 = vcmp.le.f32.partialorder %v8662_v9, %v6682_v6 }
 0x247   : > { %vm2870_vm6 = vcmp.le.f32.partialorder %v8665_v57, %v6682_v6  ;;  %v7096_v19 = vadd.f32 %v4760_v40, %v2621_v5  ;;  %vm2734_vm7 = vcmp.lt.f32.partialorder %v6762_v32, %v6617_v26  ;;  %v2813_v11 = vadd.f32 %v4807_v41, %v4806_v10 }
 0x248   : > { %vm2814_vm8 = vcmp.le.f32.partialorder %v8663_v43, %v6638_v17  ;;  %v2669_v4 = vadd.f32 %v4771_v29, %v2665_v53  ;;  %v2709_v56 = vadd.f32 %v4781_v15, %v2705_v27  ;;  %v7103_v50 = vsel %vm2722_vm2, 1.0, %v5568_v47 }
 0x249   : > { %v7106_v31 = vsel %vm2726_vm3, 1.0, %v5568_v47  ;;  %v2753_v58 = vadd.f32 %v4792_v28, %v4791_v49  ;;  %vm2754_vm9 = vcmp.le.f32.partialorder %v8663_v43, %v6636_v30  ;;  %v4821_v40 = vsel %vm2866_vm5, 1.0, %v5568_v47 }
 0x24a   : > { %v4822_v38 = vsel %vm2870_vm6, 1.0, %v5568_v47  ;;  %v7116_v36 = vsel %vm2730_vm4, 1.0, %v5568_v47  ;;  %v7119_v59 = vsel %vm2734_vm7, 1.0, %v5568_v47  ;;  %vm2738_vm10 = vcmp.lt.f32.partialorder %v6871_v22, %v6617_v26 }
 0x24b   : > { %v4808_v29 = vsel %vm2814_vm8, 1.0, %v5568_v47  ;;  %v2673_v1 = vadd.f32 %v4772_v24, %v2669_v4  ;;  %vm2742_vm11 = vcmp.lt.f32.partialorder %v6914_v23, %v6617_v26  ;;  %vm2818_vm12 = vcmp.le.f32.partialorder %v8666_v62, %v6638_v17 }
 0x24c   : > { %v2817_v46 = vadd.f32 %v4808_v29, %v2813_v11  ;;  %v4793_v61 = vsel %vm2754_vm9, 1.0, %v5568_v47  ;;  %vm2758_vm13 = vcmp.le.f32.partialorder %v8666_v62, %v6636_v30  ;;  %v2873_v16 = vadd.f32 %v4822_v38, %v4821_v40 }
 0x24d   : > { %vm2874_vm14 = vcmp.le.f32.partialorder %v8663_v43, %v6682_v6  ;;  %v2713_v42 = vadd.f32 %v4782_v52, %v2709_v56  ;;  %v2757_v15 = vadd.f32 %v4793_v61, %v2753_v58  ;;  %vm2926_vm15 = vcmp.le.f32.partialorder %v8662_v9, %v6708_v48 }
 0x24e   : > { %vm2930_vm0 = vcmp.le.f32.partialorder %v8665_v57, %v6708_v48  ;;  %v7138_v24 = vsel %vm2738_vm10, 1.0, %v5568_v47  ;;  %v7141_v5 = vsel %vm2742_vm11, 1.0, %v5568_v47  ;;  %vm2762_vm2 = vcmp.le.f32.partialorder %v6527_v44, %v6636_v30 }
 0x24f   : > { %v4809_v53 = vsel %vm2818_vm12, 1.0, %v5568_v47  ;;  %v4794_v52 = vsel %vm2758_vm13, 1.0, %v5568_v47  ;;  %vm2822_vm3 = vcmp.le.f32.partialorder %v6527_v44, %v6638_v17  ;;  %v4823_v10 = vsel %vm2874_vm14, 1.0, %v5568_v47 }
 0x250   : > { %v2821_v27 = vadd.f32 %v4809_v53, %v2817_v46  ;;  %v2877_v41 = vadd.f32 %v4823_v10, %v2873_v16  ;;  %vm2878_vm4 = vcmp.le.f32.partialorder %v8666_v62, %v6682_v6  ;;  %v4836_v49 = vsel %vm2926_vm15, 1.0, %v5568_v47 }
 0x251   : > { %v4837_v28 = vsel %vm2930_vm0, 1.0, %v5568_v47  ;;  %v2677_v11 = vadd.f32 %v7050_v63, %v2673_v1  ;;  %v2717_v4 = vadd.f32 %v4783_v35, %v2713_v42  ;;  %v2761_v56 = vadd.f32 %v4794_v52, %v2757_v15 }
 0x252   : > { %v4795_v58 = vsel %vm2762_vm2, 1.0, %v5568_v47  ;;  %vm2766_vm5 = vcmp.le.f32.partialorder %v6555_v8, %v6636_v30  ;;  %vm2770_vm6 = vcmp.le.f32.partialorder %v6617_v26, %v6636_v30  ;;  %vm2774_vm7 = vcmp.lt.f32.partialorder %v6638_v17, %v6636_v30 }
 0x253   : > { %vm2826_vm8 = vcmp.le.f32.partialorder %v6555_v8, %v6638_v17  ;;  %v4810_v40 = vsel %vm2822_vm3, 1.0, %v5568_v47  ;;  %v4824_v63 = vsel %vm2878_vm4, 1.0, %v5568_v47  ;;  %v2933_v35 = vadd.f32 %v4837_v28, %v4836_v49 }
 0x254   : > { %vm2934_vm9 = vcmp.le.f32.partialorder %v8663_v43, %v6708_v48  ;;  %v2681_v38 = vadd.f32 %v7058_v18, %v2677_v11  ;;  %v2825_v29 = vadd.f32 %v4810_v40, %v2821_v27  ;;  %v2881_v1 = vadd.f32 %v4824_v63, %v2877_v41 }
 0x255   : > { %vm2882_vm10 = vcmp.le.f32.partialorder %v6527_v44, %v6682_v6  ;;  %v2721_v46 = vadd.f32 %v7082_v14, %v2717_v4  ;;  %v2765_v61 = vadd.f32 %v4795_v58, %v2761_v56  ;;  %v4796_v16 = vsel %vm2766_vm5, 1.0, %v5568_v47 }
 0x256   : > { %vm2778_vm11 = vcmp.lt.f32.partialorder %v6682_v6, %v6636_v30  ;;  %vm2782_vm12 = vcmp.lt.f32.partialorder %v6708_v48, %v6636_v30  ;;  %v4811_v42 = vsel %vm2826_vm8, 1.0, %v5568_v47  ;;  %vm2830_vm13 = vcmp.le.f32.partialorder %v6617_v26, %v6638_v17 }
 0x257   : > { %v4838_v18 = vsel %vm2934_vm9, 1.0, %v5568_v47  ;;  %v4825_v15 = vsel %vm2882_vm10, 1.0, %v5568_v47  ;;  %vm2886_vm14 = vcmp.le.f32.partialorder %v6555_v8, %v6682_v6  ;;  %vm2938_vm15 = vcmp.le.f32.partialorder %v8666_v62, %v6708_v48 }
 0x258   : > { %v2937_v14 = vadd.f32 %v4838_v18, %v2933_v35  ;;  %v4797_v53 = vsel %vm2770_vm6, 1.0, %v5568_v47  ;;  %v4798_v52 = vsel %vm2774_vm7, 1.0, %v5568_v47  ;;  %v2829_v27 = vadd.f32 %v4811_v42, %v2825_v29 }
 0x259   : > { %v2885_v10 = vadd.f32 %v4825_v15, %v2881_v1  ;;  %v7195_v41 = vadd.f32 %v7061_v3, %v2681_v38  ;;  %v2725_v49 = vadd.f32 %v7103_v50, %v2721_v46  ;;  %v2769_v28 = vadd.f32 %v4796_v16, %v2765_v61 }
 0x25a   : > { %v4799_v11 = vsel %vm2778_vm11, 1.0, %v5568_v47  ;;  %v7206_v4 = vsel %vm2782_vm12, 1.0, %v5568_v47  ;;  %v4812_v56 = vsel %vm2830_vm13, 1.0, %v5568_v47  ;;  %v4826_v58 = vsel %vm2886_vm14, 1.0, %v5568_v47 }
 0x25b   : > { %v4839_v3 = vsel %vm2938_vm15, 1.0, %v5568_v47  ;;  %vm2942_vm0 = vcmp.le.f32.partialorder %v6527_v44, %v6708_v48  ;;  %vm2986_vm2 = vcmp.le.f32.partialorder %v8662_v9, %v6710_v51  ;;  %vm2990_vm3 = vcmp.le.f32.partialorder %v8665_v57, %v6710_v51 }
 0x25c   : > { %v2941_v40 = vadd.f32 %v4839_v3, %v2937_v14  ;;  %v2833_v50 = vadd.f32 %v4812_v56, %v2829_v27  ;;  %vm2834_vm4 = vcmp.le.f32.partialorder %v6636_v30, %v6638_v17  ;;  %v2889_v63 = vadd.f32 %v4826_v58, %v2885_v10 }
 0x25d   : > { %vm2890_vm5 = vcmp.le.f32.partialorder %v6617_v26, %v6682_v6  ;;  %v2773_v35 = vadd.f32 %v4797_v53, %v2769_v28  ;;  %vm2786_vm6 = vcmp.lt.f32.partialorder %v6710_v51, %v6636_v30  ;;  %vm2790_vm7 = vcmp.lt.f32.partialorder %v6725_v54, %v6636_v30 }
 0x25e   : > { %vm2794_vm8 = vcmp.lt.f32.partialorder %v6762_v32, %v6636_v30  ;;  %vm2838_vm9 = vcmp.lt.f32.partialorder %v6682_v6, %v6638_v17  ;;  %v4840_v38 = vsel %vm2942_vm0, 1.0, %v5568_v47  ;;  %v4851_v29 = vsel %vm2986_vm2, 1.0, %v5568_v47 }
 0x25f   : > { %v4852_v1 = vsel %vm2990_vm3, 1.0, %v5568_v47  ;;  %v4813_v46 = vsel %vm2834_vm4, 1.0, %v5568_v47  ;;  %v4827_v61 = vsel %vm2890_vm5, 1.0, %v5568_v47  ;;  %v2945_v16 = vadd.f32 %v4840_v38, %v2941_v40 }
 0x260   : > { %vm2946_vm10 = vcmp.le.f32.partialorder %v6555_v8, %v6708_v48  ;;  %v2729_v42 = vadd.f32 %v7106_v31, %v2725_v49  ;;  %v2837_v18 = vadd.f32 %v4813_v46, %v2833_v50  ;;  %v2893_v15 = vadd.f32 %v4827_v61, %v2889_v63 }
 0x261   : > { %vm2894_vm11 = vcmp.le.f32.partialorder %v6636_v30, %v6682_v6  ;;  %v4801_v14 = vsel %vm2786_vm6, 1.0, %v5568_v47  ;;  %v7241_v53 = vsel %vm2790_vm7, 1.0, %v5568_v47  ;;  %v2993_v27 = vadd.f32 %v4852_v1, %v4851_v29 }
 0x262   : > { %vm2994_vm12 = vcmp.le.f32.partialorder %v8663_v43, %v6710_v51  ;;  %v2733_v10 = vadd.f32 %v7116_v36, %v2729_v42  ;;  %v2777_v28 = vadd.f32 %v4798_v52, %v2773_v35  ;;  %v4814_v31 = vsel %vm2838_vm9, 1.0, %v5568_v47 }
 0x263   : > { %v4841_v49 = vsel %vm2946_vm10, 1.0, %v5568_v47  ;;  %vm2842_vm13 = vcmp.lt.f32.partialorder %v6708_v48, %v6638_v17  ;;  %v4828_v56 = vsel %vm2894_vm11, 1.0, %v5568_v47  ;;  %vm2950_vm14 = vcmp.le.f32.partialorder %v6617_v26, %v6708_v48 }
 0x264   : > { %v2949_v58 = vadd.f32 %v4841_v49, %v2945_v16  ;;  %v2841_v3 = vadd.f32 %v4814_v31, %v2837_v18  ;;  %v2897_v40 = vadd.f32 %v4828_v56, %v2893_v15  ;;  %vm2898_vm15 = vcmp.le.f32.partialorder %v6638_v17, %v6682_v6 }
 0x265   : > { %v4853_v36 = vsel %vm2994_vm12, 1.0, %v5568_v47  ;;  %v7263_v52 = vsel %vm2794_vm8, 1.0, %v5568_v47  ;;  %vm2798_vm0 = vcmp.lt.f32.partialorder %v6871_v22, %v6636_v30  ;;  %vm2998_vm2 = vcmp.le.f32.partialorder %v8666_v62, %v6710_v51 }
 0x266   : > { %v2997_v50 = vadd.f32 %v4853_v36, %v2993_v27  ;;  %v2737_v63 = vadd.f32 %v7119_v59, %v2733_v10  ;;  %v2781_v35 = vadd.f32 %v4799_v11, %v2777_v28  ;;  %vm2846_vm3 = vcmp.lt.f32.partialorder %v6710_v51, %v6638_v17 }
 0x267   : > { %v4842_v38 = vsel %vm2950_vm14, 1.0, %v5568_v47  ;;  %v4815_v29 = vsel %vm2842_vm13, 1.0, %v5568_v47  ;;  %v4829_v1 = vsel %vm2898_vm15, 1.0, %v5568_v47  ;;  %vm2954_vm4 = vcmp.le.f32.partialorder %v6636_v30, %v6708_v48 }
 0x268   : > { %v2953_v46 = vadd.f32 %v4842_v38, %v2949_v58  ;;  %v2845_v61 = vadd.f32 %v4815_v29, %v2841_v3  ;;  %v2901_v16 = vadd.f32 %v4829_v1, %v2897_v40  ;;  %vm2902_vm5 = vcmp.lt.f32.partialorder %v6708_v48, %v6682_v6 }
 0x269   : > { %v4854_v59 = vsel %vm2998_vm2, 1.0, %v5568_v47  ;;  %v2741_v11 = vadd.f32 %v7138_v24, %v2737_v63  ;;  %vm2802_vm6 = vcmp.lt.f32.partialorder %v6914_v23, %v6636_v30  ;;  %vm3002_vm7 = vcmp.le.f32.partialorder %v6527_v44, %v6710_v51 }
 0x26a   : > { %v3001_v42 = vadd.f32 %v4854_v59, %v2997_v50  ;;  %v2785_v18 = vadd.f32 %v7206_v4, %v2781_v35  ;;  %v4804_v15 = vsel %vm2798_vm0, 1.0, %v5568_v47  ;;  %v4816_v27 = vsel %vm2846_vm3, 1.0, %v5568_v47 }
 0x26b   : > { %v4843_v24 = vsel %vm2954_vm4, 1.0, %v5568_v47  ;;  %vm2850_vm8 = vcmp.lt.f32.partialorder %v6725_v54, %v6638_v17  ;;  %v4830_v10 = vsel %vm2902_vm5, 1.0, %v5568_v47  ;;  %vm2958_vm9 = vcmp.le.f32.partialorder %v6638_v17, %v6708_v48 }
 0x26c   : > { %v2957_v28 = vadd.f32 %v4843_v24, %v2953_v46  ;;  %v2849_v4 = vadd.f32 %v4816_v27, %v2845_v61  ;;  %v2905_v31 = vadd.f32 %v4830_v10, %v2901_v16  ;;  %vm2906_vm10 = vcmp.lt.f32.partialorder %v6710_v51, %v6682_v6 }
 0x26d   : > { %v4855_v49 = vsel %vm3002_vm7, 1.0, %v5568_v47  ;;  %v7307_v56 = vadd.f32 %v7141_v5, %v2741_v11  ;;  %v4805_v58 = vsel %vm2802_vm6, 1.0, %v5568_v47  ;;  %vm3006_vm11 = vcmp.le.f32.partialorder %v6555_v8, %v6710_v51 }
 0x26e   : > { %v3005_v3 = vadd.f32 %v4855_v49, %v3001_v42  ;;  %v4817_v40 = vsel %vm2850_vm8, 1.0, %v5568_v47  ;;  %vm2854_vm12 = vcmp.lt.f32.partialorder %v6762_v32, %v6638_v17  ;;  %vm2858_vm13 = vcmp.lt.f32.partialorder %v6871_v22, %v6638_v17 }
 0x26f   : > { %v4844_v5 = vsel %vm2958_vm9, 1.0, %v5568_v47  ;;  %v2789_v36 = vadd.f32 %v4801_v14, %v2785_v18  ;;  %v4831_v50 = vsel %vm2906_vm10, 1.0, %v5568_v47  ;;  %vm2962_vm14 = vcmp.le.f32.partialorder %v6682_v6, %v6708_v48 }
 0x270   : > { %v2961_v63 = vadd.f32 %v4844_v5, %v2957_v28  ;;  %v2853_v35 = vadd.f32 %v4817_v40, %v2849_v4  ;;  %v2909_v38 = vadd.f32 %v4831_v50, %v2905_v31  ;;  %vm2910_vm15 = vcmp.lt.f32.partialorder %v6725_v54, %v6682_v6 }
 0x271   : > { %v4856_v29 = vsel %vm3006_vm11, 1.0, %v5568_v47  ;;  %vm3010_vm0 = vcmp.le.f32.partialorder %v6617_v26, %v6710_v51  ;;  %vm3046_vm2 = vcmp.le.f32.partialorder %v8662_v9, %v6725_v54  ;;  %vm3050_vm3 = vcmp.le.f32.partialorder %v8665_v57, %v6725_v54 }
 0x272   : > { %v3009_v1 = vadd.f32 %v4856_v29, %v3005_v3  ;;  %v2793_v14 = vadd.f32 %v7241_v53, %v2789_v36  ;;  %v4818_v46 = vsel %vm2854_vm12, 1.0, %v5568_v47  ;;  %v4819_v61 = vsel %vm2858_vm13, 1.0, %v5568_v47 }
 0x273   : > { %v4845_v16 = vsel %vm2962_vm14, 1.0, %v5568_v47  ;;  %vm2862_vm4 = vcmp.lt.f32.partialorder %v6914_v23, %v6638_v17  ;;  %v4832_v59 = vsel %vm2910_vm15, 1.0, %v5568_v47  ;;  %vm2966_vm5 = vcmp.lt.f32.partialorder %v6710_v51, %v6708_v48 }
 0x274   : > { %v2965_v11 = vadd.f32 %v4845_v16, %v2961_v63  ;;  %v2857_v53 = vadd.f32 %v4818_v46, %v2853_v35  ;;  %v4857_v42 = vsel %vm3010_vm0, 1.0, %v5568_v47  ;;  %v4866_v18 = vsel %vm3046_vm2, 1.0, %v5568_v47 }
 0x275   : > { %v4867_v27 = vsel %vm3050_vm3, 1.0, %v5568_v47  ;;  %v2913_v24 = vadd.f32 %v4832_v59, %v2909_v38  ;;  %vm2914_vm6 = vcmp.lt.f32.partialorder %v6762_v32, %v6682_v6  ;;  %v3013_v10 = vadd.f32 %v4857_v42, %v3009_v1 }
 0x276   : > { %vm3014_vm7 = vcmp.le.f32.partialorder %v6636_v30, %v6710_v51  ;;  %v2797_v28 = vadd.f32 %v7263_v52, %v2793_v14  ;;  %v4820_v4 = vsel %vm2862_vm4, 1.0, %v5568_v47  ;;  %vm2918_vm8 = vcmp.lt.f32.partialorder %v6871_v22, %v6682_v6 }
 0x277   : > { %v4846_v31 = vsel %vm2966_vm5, 1.0, %v5568_v47  ;;  %vm2970_vm9 = vcmp.lt.f32.partialorder %v6725_v54, %v6708_v48  ;;  %v3053_v3 = vadd.f32 %v4867_v27, %v4866_v18  ;;  %vm3054_vm10 = vcmp.le.f32.partialorder %v8663_v43, %v6725_v54 }
 0x278   : > { %v2969_v49 = vadd.f32 %v4846_v31, %v2965_v11  ;;  %v2801_v40 = vadd.f32 %v4804_v15, %v2797_v28  ;;  %v2861_v5 = vadd.f32 %v4819_v61, %v2857_v53  ;;  %v4833_v36 = vsel %vm2914_vm6, 1.0, %v5568_v47 }
 0x279   : > { %v4858_v52 = vsel %vm3014_vm7, 1.0, %v5568_v47  ;;  %v2917_v50 = vadd.f32 %v4833_v36, %v2913_v24  ;;  %vm2922_vm11 = vcmp.lt.f32.partialorder %v6914_v23, %v6682_v6  ;;  %vm3018_vm12 = vcmp.le.f32.partialorder %v6638_v17, %v6710_v51 }
 0x27a   : > { %v3017_v63 = vadd.f32 %v4858_v52, %v3013_v10  ;;  %v4834_v35 = vsel %vm2918_vm8, 1.0, %v5568_v47  ;;  %v4847_v38 = vsel %vm2970_vm9, 1.0, %v5568_v47  ;;  %vm2974_vm13 = vcmp.lt.f32.partialorder %v6762_v32, %v6708_v48 }
 0x27b   : > { %v4868_v15 = vsel %vm3054_vm10, 1.0, %v5568_v47  ;;  %v2973_v29 = vadd.f32 %v4847_v38, %v2969_v49  ;;  %vm2978_vm14 = vcmp.lt.f32.partialorder %v6871_v22, %v6708_v48  ;;  %vm3058_vm15 = vcmp.le.f32.partialorder %v8666_v62, %v6725_v54 }
 0x27c   : > { %v3057_v1 = vadd.f32 %v4868_v15, %v3053_v3  ;;  %v7379_v14 = vadd.f32 %v4805_v58, %v2801_v40  ;;  %v7381_v46 = vadd.f32 %v4820_v4, %v2861_v5  ;;  %v4835_v61 = vsel %vm2922_vm11, 1.0, %v5568_v47 }
 0x27d   : > { %v4859_v16 = vsel %vm3018_vm12, 1.0, %v5568_v47  ;;  %v2921_v59 = vadd.f32 %v4834_v35, %v2917_v50  ;;  %vm2982_vm0 = vcmp.lt.f32.partialorder %v6914_v23, %v6708_v48  ;;  %vm3022_vm2 = vcmp.le.f32.partialorder %v6682_v6, %v6710_v51 }
 0x27e   : > { %v3021_v11 = vadd.f32 %v4859_v16, %v3017_v63  ;;  %v4848_v53 = vsel %vm2974_vm13, 1.0, %v5568_v47  ;;  %v4849_v42 = vsel %vm2978_vm14, 1.0, %v5568_v47  ;;  %vm3026_vm3 = vcmp.le.f32.partialorder %v6708_v48, %v6710_v51 }
 0x27f   : > { %v4869_v58 = vsel %vm3058_vm15, 1.0, %v5568_v47  ;;  %v2977_v18 = vadd.f32 %v4848_v53, %v2973_v29  ;;  %vm3030_vm4 = vcmp.lt.f32.partialorder %v6725_v54, %v6710_v51  ;;  %vm3062_vm5 = vcmp.le.f32.partialorder %v6527_v44, %v6725_v54  ;;  %v8669_v53 = vld [vmem:[#allocation8_spill] sm:$0xff] }
 0x280   : > { %v3061_v27 = vadd.f32 %v4869_v58, %v3057_v1  ;;  %v4850_v24 = vsel %vm2982_vm0, 1.0, %v5568_v47  ;;  %v4860_v10 = vsel %vm3022_vm2, 1.0, %v5568_v47  ;;  %vm3106_vm6 = vcmp.le.f32.partialorder %v8662_v9, %v6762_v32 }
 0x281   : > { %vm3110_vm7 = vcmp.le.f32.partialorder %v8665_v57, %v6762_v32  ;;  %v7404_v28 = vadd.f32 %v4835_v61, %v2921_v59  ;;  %v3025_v4 = vadd.f32 %v4860_v10, %v3021_v11  ;;  %vm3034_vm8 = vcmp.lt.f32.partialorder %v6762_v32, %v6710_v51  ;;  %v8671_v10 = vld [vmem:[#allocation9_spill] sm:$0xff] }
 0x282   : > { %vm3038_vm9 = vcmp.lt.f32.partialorder %v6871_v22, %v6710_v51  ;;  %v4861_v31 = vsel %vm3026_vm3, 1.0, %v5568_v47  ;;  %v4862_v49 = vsel %vm3030_vm4, 1.0, %v5568_v47  ;;  %v4870_v3 = vsel %vm3062_vm5, 1.0, %v5568_v47 }
 0x283   : > { %vm3066_vm10 = vcmp.le.f32.partialorder %v6555_v8, %v6725_v54  ;;  %v2981_v40 = vadd.f32 %v4849_v42, %v2977_v18  ;;  %v3065_v5 = vadd.f32 %v4870_v3, %v3061_v27  ;;  %v4881_v36 = vsel %vm3106_vm6, 1.0, %v5568_v47  ;;  %v8670_v42 = vld [vmem:[#allocation34_spill] sm:$0xff] }
 0x284   : > { %v4882_v52 = vsel %vm3110_vm7, 1.0, %v5568_v47  ;;  %v4863_v50 = vsel %vm3034_vm8, 1.0, %v5568_v47  ;;  %v4864_v63 = vsel %vm3038_vm9, 1.0, %v5568_v47  ;;  %vm3042_vm11 = vcmp.lt.f32.partialorder %v6914_v23, %v6710_v51 }
 0x285   : > { %vm3070_vm12 = vcmp.le.f32.partialorder %v6617_v26, %v6725_v54  ;;  %v3029_v35 = vadd.f32 %v4861_v31, %v3025_v4  ;;  %v4871_v38 = vsel %vm3066_vm10, 1.0, %v5568_v47  ;;  %vm3074_vm13 = vcmp.le.f32.partialorder %v6636_v30, %v6725_v54  ;;  %v8672_v31 = vld [vmem:[#allocation35_spill] sm:$0xff] }
 0x286   : > { %vm3078_vm14 = vcmp.le.f32.partialorder %v6638_v17, %v6725_v54  ;;  %v3113_v15 = vadd.f32 %v4882_v52, %v4881_v36  ;;  %vm3114_vm15 = vcmp.le.f32.partialorder %v8663_v43, %v6762_v32  ;;  %vm3166_vm0 = vcmp.le.f32.partialorder %v8662_v9, %v6871_v22 }
 0x287   : > { %vm3170_vm2 = vcmp.le.f32.partialorder %v8665_v57, %v6871_v22  ;;  %v7434_v29 = vadd.f32 %v4850_v24, %v2981_v40  ;;  %v7437_v1 = vsel %vm3042_vm11, 1.0, %v5568_v47  ;;  %v3069_v61 = vadd.f32 %v4871_v38, %v3065_v5 }
 0x288   : > { %v4872_v16 = vsel %vm3070_vm12, 1.0, %v5568_v47  ;;  %v4873_v59 = vsel %vm3074_vm13, 1.0, %v5568_v47  ;;  %v4874_v11 = vsel %vm3078_vm14, 1.0, %v5568_v47  ;;  %vm3082_vm3 = vcmp.le.f32.partialorder %v6682_v6, %v6725_v54 }
 0x289   : > { %vm3086_vm4 = vcmp.le.f32.partialorder %v6708_v48, %v6725_v54  ;;  %vm3287_vm5 = vcmp.eq.f32.partialorder %v8670_v42, %v8669_v53  ;;  %v3033_v58 = vadd.f32 %v4862_v49, %v3029_v35  ;;  %v4883_v18 = vsel %vm3114_vm15, 1.0, %v5568_v47 }
 0x28a   : > { %v4896_v27 = vsel %vm3166_vm0, 1.0, %v5568_v47  ;;  %v4897_v24 = vsel %vm3170_vm2, 1.0, %v5568_v47  ;;  %vm3288_vm6 = vcmp.eq.f32.partialorder %v8670_v42, %v8671_v10  ;;  %vm3090_vm7 = vcmp.le.f32.partialorder %v6710_v51, %v6725_v54 }
 0x28b   : > { %vm3094_vm8 = vcmp.lt.f32.partialorder %v6762_v32, %v6725_v54  ;;  %v3117_v4 = vadd.f32 %v4883_v18, %v3113_v15  ;;  %vm3118_vm9 = vcmp.le.f32.partialorder %v8666_v62, %v6762_v32  ;;  %vm3301_vm10 = vcmp.eq.f32.partialorder %v8672_v31, %v8671_v10  ;;  %v8673_v18 = vld [vmem:[#allocation36_spill] sm:$0xff] }
 0x28c   : > { %v3073_v49 = vadd.f32 %v4872_v16, %v3069_v61  ;;  %v4875_v3 = vsel %vm3082_vm3, 1.0, %v5568_v47  ;;  %v7463_v40 = vsel %vm3086_vm4, 1.0, %v5568_v47  ;;  %vm3098_vm11 = vcmp.lt.f32.partialorder %v6871_v22, %v6725_v54 }
 0x28d   : > { %vm3300_vm12 = vcmp.eq.f32.partialorder %v8672_v31, %v8669_v53  ;;  %v3173_v5 = vadd.f32 %v4897_v24, %v4896_v27  ;;  %vm3174_vm13 = vcmp.le.f32.partialorder %v8663_v43, %v6871_v22  ;;  %vm3226_vm14 = vcmp.le.f32.partialorder %v8662_v9, %v6914_v23 }
 0x28e   : > { %vm3230_vm15 = vcmp.le.f32.partialorder %v8665_v57, %v6914_v23  ;;  %v3037_v36 = vadd.f32 %v4863_v50, %v3033_v58  ;;  %v7476_v52 = vsel %vm3090_vm7, 1.0, %v5568_v47  ;;  %v7479_v35 = vsel %vm3094_vm8, 1.0, %v5568_v47 }
 0x28f   : > { %v4884_v38 = vsel %vm3118_vm9, 1.0, %v5568_v47  ;;  %v7483_v15 = vsel %vm3098_vm11, 1.0, %v5568_v47  ;;  %vm3102_vm0 = vcmp.lt.f32.partialorder %v6914_v23, %v6725_v54  ;;  %vm3122_vm2 = vcmp.le.f32.partialorder %v6527_v44, %v6762_v32 }
 0x290   : > { %v3121_v61 = vadd.f32 %v4884_v38, %v3117_v4  ;;  %v4898_v9 = vsel %vm3174_vm13, 1.0, %v5568_v47  ;;  %v4911_v57 = vsel %vm3226_vm14, 1.0, %v5568_v47  ;;  %v4912_v50 = vsel %vm3230_vm15, 1.0, %v5568_v47 }
 0x291   : > { %vm3286_vm3 = vcmp.lt.f32.partialorder %v6965_v7, 4.0  ;;  %v3077_v16 = vadd.f32 %v4873_v59, %v3073_v49  ;;  %vm3126_vm4 = vcmp.le.f32.partialorder %v6555_v8, %v6762_v32  ;;  %v3177_v58 = vadd.f32 %v4898_v9, %v3173_v5 }
 0x292   : > { %vm3178_vm7 = vcmp.le.f32.partialorder %v8666_v62, %v6871_v22  ;;  %vm3314_vm8 = vcmp.eq.f32.partialorder %v8673_v18, %v8671_v10  ;;  %v3041_v27 = vadd.f32 %v4864_v63, %v3037_v36  ;;  %v4885_v24 = vsel %vm3122_vm2, 1.0, %v5568_v47  ;;  %vm7514_vm2 = vmand %vm3286_vm3, %vm3287_vm5 }
 0x293   : > { %vm3130_vm9 = vcmp.le.f32.partialorder %v6617_v26, %v6762_v32  ;;  %vm3299_vm11 = vcmp.lt.f32.partialorder %v6975_v37, 4.0  ;;  %vm3313_vm13 = vcmp.eq.f32.partialorder %v8673_v18, %v8669_v53  ;;  %v3125_v59 = vadd.f32 %v4885_v24, %v3121_v61  ;;  %vm7533_vm5 = vmand %vm3286_vm3, %vm3288_vm6 }
 0x294   : > { %vm3134_vm14 = vcmp.le.f32.partialorder %v6636_v30, %v6762_v32  ;;  %v3233_v4 = vadd.f32 %v4912_v50, %v4911_v57  ;;  %vm3234_vm15 = vcmp.le.f32.partialorder %v8663_v43, %v6914_v23  ;;  %v7522_v49 = vsel %vm3102_vm0, 1.0, %v5568_v47  ;;  %vm3304_vm3 = vmand %vm3299_vm11, %vm3300_vm12 }
 0x295   : > { %v4886_v5 = vsel %vm3126_vm4, 1.0, %v5568_v47  ;;  %vm3138_vm1 = vcmp.le.f32.partialorder %v6638_v17, %v6762_v32  ;;  %v4899_v43 = vsel %vm3178_vm7, 1.0, %v5568_v47  ;;  %v3081_v38 = vadd.f32 %v4874_v11, %v3077_v16  ;;  %vm3305_vm4 = vmand %vm3299_vm11, %vm3301_vm10 }
 0x296   : > { %v4887_v61 = vsel %vm3130_vm9, 1.0, %v5568_v47  ;;  %v3181_v9 = vadd.f32 %v4899_v43, %v3177_v58  ;;  %vm3182_vm0 = vcmp.le.f32.partialorder %v6527_v44, %v6871_v22  ;;  %v7546_v57 = vadd.f32 %v7437_v1, %v3041_v27 }
 0x297   : > { %v4888_v50 = vsel %vm3134_vm14, 1.0, %v5568_v47  ;;  %vm3142_vm6 = vcmp.le.f32.partialorder %v6682_v6, %v6762_v32  ;;  %v4913_v11 = vsel %vm3234_vm15, 1.0, %v5568_v47  ;;  %v3129_v16 = vadd.f32 %v4886_v5, %v3125_v59 }
 0x298   : > { %vm3146_vm10 = vcmp.le.f32.partialorder %v6708_v48, %v6762_v32  ;;  %v3237_v58 = vadd.f32 %v4913_v11, %v3233_v4  ;;  %vm3238_vm7 = vcmp.le.f32.partialorder %v8666_v62, %v6914_v23  ;;  %v4900_v1 = vsel %vm3182_vm0, 1.0, %v5568_v47 }
 0x299   : > { %v4927_v27 = vsel %vm7533_vm5, 1.0, %v5568_v47  ;;  %v4929_v24 = vsel %vm3305_vm4, 1.0, %v5568_v47  ;;  %vm3312_vm9 = vcmp.lt.f32.partialorder %v6993_v33, 4.0  ;;  %v3185_v43 = vadd.f32 %v4900_v1, %v3181_v9 }
 0x29a   : > { %vm3186_vm12 = vcmp.le.f32.partialorder %v6555_v8, %v6871_v22  ;;  %v4926_v59 = vsel %vm7514_vm2, 1.0, %v5568_v47  ;;  %v4928_v62 = vsel %vm3304_vm3, 1.0, %v5568_v47  ;;  %v3085_v4 = vadd.f32 %v4875_v3, %v3081_v38  ;;  %vm3317_vm15 = vmand %vm3312_vm9, %vm3313_vm13 }
 0x29b   : > { %v4889_v5 = vsel %vm3138_vm1, 1.0, %v5568_v47  ;;  %v7581_v36 = vsel %vm3142_vm6, 1.0, %v5568_v47  ;;  %v4914_v9 = vsel %vm3238_vm7, 1.0, %v5568_v47  ;;  %v7585_v11 = vsel %vm3146_vm10, 1.0, %v5568_v47  ;;  %vm3318_vm1 = vmand %vm3312_vm9, %vm3314_vm8 }
 0x29c   : > { %v3241_v63 = vadd.f32 %v4914_v9, %v3237_v58  ;;  %vm3242_vm11 = vcmp.le.f32.partialorder %v6527_v44, %v6914_v23  ;;  %v3311_v3 = vadd.f32 %v4929_v24, %v4927_v27  ;;  %vm3150_vm14 = vcmp.le.f32.partialorder %v6710_v51, %v6762_v32 }
 0x29d   : > { %v4901_v38 = vsel %vm3186_vm12, 1.0, %v5568_v47  ;;  %v3310_v1 = vadd.f32 %v4928_v62, %v4926_v59  ;;  %vm3325_vm2 = vcmp.lt.f32.partialorder %v7021_v21, 4.0  ;;  %v3133_v44 = vadd.f32 %v4887_v61, %v3129_v16  ;;  %v8678_v59 = vld [vmem:[#allocation37_spill] sm:$0xff] }
 0x29e   : > { %vm3154_vm5 = vcmp.le.f32.partialorder %v6725_v54, %v6762_v32  ;;  %v3189_v58 = vadd.f32 %v4901_v38, %v3185_v43  ;;  %vm3190_vm8 = vcmp.le.f32.partialorder %v6617_v26, %v6871_v22  ;;  %vm3158_vm0 = vcmp.lt.f32.partialorder %v6871_v22, %v6762_v32 }
 0x29f   : > { %v4915_v27 = vsel %vm3242_vm11, 1.0, %v5568_v47  ;;  %vm3246_vm4 = vcmp.le.f32.partialorder %v6555_v8, %v6914_v23  ;;  %v4931_v24 = vsel %vm3318_vm1, 1.0, %v5568_v47  ;;  %vm3327_vm13 = vcmp.eq.f32.partialorder %v8678_v59, %v8671_v10 }
 0x2a0   : > { %v3245_v61 = vadd.f32 %v4915_v27, %v3241_v63  ;;  %v4930_v16 = vsel %vm3317_vm15, 1.0, %v5568_v47  ;;  %v3324_v43 = vadd.f32 %v4931_v24, %v3311_v3  ;;  %vm3326_vm6 = vcmp.eq.f32.partialorder %v8678_v59, %v8669_v53  ;;  %vm3331_vm3 = vmand %vm3325_vm2, %vm3327_vm13 }
 0x2a1   : > { %v3089_v62 = vadd.f32 %v7463_v40, %v3085_v4  ;;  %v4902_v9 = vsel %vm3190_vm8, 1.0, %v5568_v47  ;;  %v3323_v38 = vadd.f32 %v4930_v16, %v3310_v1  ;;  %vm3330_vm10 = vmand %vm3325_vm2, %vm3326_vm6  ;;  %vm3338_vm7 = vcmp.lt.f32.partialorder %v7096_v19, 4.0  ;;  %v8679_v4 = vld [vmem:[#allocation21_spill] sm:$0xff] }
 0x2a2   : > { %v3137_v63 = vadd.f32 %v4888_v50, %v3133_v44  ;;  %v7629_v3 = vsel %vm3150_vm14, 1.0, %v5568_v47  ;;  %vm3162_vm9 = vcmp.lt.f32.partialorder %v6914_v23, %v6762_v32  ;;  %v3193_v27 = vadd.f32 %v4902_v9, %v3189_v58 }
 0x2a3   : > { %vm3194_vm12 = vcmp.le.f32.partialorder %v6636_v30, %v6871_v22  ;;  %v4916_v40 = vsel %vm3246_vm4, 1.0, %v5568_v47  ;;  %vm3250_vm11 = vcmp.le.f32.partialorder %v6617_v26, %v6914_v23  ;;  %v4933_v50 = vsel %vm3331_vm3, 1.0, %v5568_v47 }
 0x2a4   : > { %vm3340_vm1 = vcmp.eq.f32.partialorder %v8679_v4, %v8671_v10  ;;  %v3249_v1 = vadd.f32 %v4916_v40, %v3245_v61  ;;  %v4932_v44 = vsel %vm3330_vm10, 1.0, %v5568_v47  ;;  %v3337_v58 = vadd.f32 %v4933_v50, %v3324_v43 }
 0x2a5   : > { %vm3339_vm14 = vcmp.eq.f32.partialorder %v8679_v4, %v8669_v53  ;;  %vm3344_vm15 = vmand %vm3338_vm7, %vm3340_vm1  ;;  %v3093_v8 = vadd.f32 %v7476_v52, %v3089_v62  ;;  %v4903_v24 = vsel %vm3194_vm12, 1.0, %v5568_v47  ;;  %v3336_v16 = vadd.f32 %v4932_v44, %v3323_v38  ;;  %v8680_v62 = vld [vmem:[#allocation15_spill] sm:$0xff] }
 0x2a6   : > { %vm3343_vm2 = vmand %vm3338_vm7, %vm3339_vm14  ;;  %vm3351_vm8 = vcmp.lt.f32.partialorder %v7195_v41, 4.0  ;;  %v3141_v61 = vadd.f32 %v4889_v5, %v3137_v63  ;;  %v7658_v43 = vsel %vm3154_vm5, 1.0, %v5568_v47  ;;  %v3197_v9 = vadd.f32 %v4903_v24, %v3193_v27 }
 0x2a7   : > { %vm3198_vm4 = vcmp.le.f32.partialorder %v6638_v17, %v6871_v22  ;;  %v4917_v52 = vsel %vm3250_vm11, 1.0, %v5568_v47  ;;  %vm3254_vm13 = vcmp.le.f32.partialorder %v6636_v30, %v6914_v23  ;;  %v4935_v5 = vsel %vm3344_vm15, 1.0, %v5568_v47 }
 0x2a8   : > { %vm3353_vm6 = vcmp.eq.f32.partialorder %v8680_v62, %v8671_v10  ;;  %v3253_v38 = vadd.f32 %v4917_v52, %v3249_v1  ;;  %v4934_v63 = vsel %vm3343_vm2, 1.0, %v5568_v47  ;;  %v3350_v27 = vadd.f32 %v4935_v5, %v3337_v58 }
 0x2a9   : > { %vm3352_vm5 = vcmp.eq.f32.partialorder %v8680_v62, %v8669_v53  ;;  %vm3357_vm3 = vmand %vm3351_vm8, %vm3353_vm6  ;;  %v3097_v26 = vadd.f32 %v7479_v35, %v3093_v8  ;;  %v4904_v40 = vsel %vm3198_vm4, 1.0, %v5568_v47  ;;  %v3349_v50 = vadd.f32 %v4934_v63, %v3336_v16  ;;  %v8681_v8 = vld [vmem:[#allocation10_spill] sm:$0xff] }
 0x2aa   : > { %vm3356_vm10 = vmand %vm3351_vm8, %vm3352_vm5  ;;  %vm3364_vm7 = vcmp.lt.f32.partialorder %v7307_v56, 4.0  ;;  %v3145_v1 = vadd.f32 %v7581_v36, %v3141_v61  ;;  %v7686_v44 = vsel %vm3158_vm0, 1.0, %v5568_v47  ;;  %v3201_v58 = vadd.f32 %v4904_v40, %v3197_v9 }
 0x2ab   : > { %vm3202_vm12 = vcmp.le.f32.partialorder %v6682_v6, %v6871_v22  ;;  %v4918_v35 = vsel %vm3254_vm13, 1.0, %v5568_v47  ;;  %vm3258_vm11 = vcmp.le.f32.partialorder %v6638_v17, %v6914_v23  ;;  %v4937_v36 = vsel %vm3357_vm3, 1.0, %v5568_v47 }
 0x2ac   : > { %vm3366_vm1 = vcmp.eq.f32.partialorder %v8681_v8, %v8671_v10  ;;  %v3257_v24 = vadd.f32 %v4918_v35, %v3253_v38  ;;  %v4936_v16 = vsel %vm3356_vm10, 1.0, %v5568_v47  ;;  %v3363_v61 = vadd.f32 %v4937_v36, %v3350_v27 }
 0x2ad   : > { %vm3365_vm0 = vcmp.eq.f32.partialorder %v8681_v8, %v8669_v53  ;;  %vm3370_vm14 = vmand %vm3364_vm7, %vm3366_vm1  ;;  %v3101_v30 = vadd.f32 %v7483_v15, %v3097_v26  ;;  %v7709_v9 = vsel %vm3162_vm9, 1.0, %v5568_v47  ;;  %v3362_v52 = vadd.f32 %v4936_v16, %v3349_v50 }
 0x2ae   : > { %vm3369_vm15 = vmand %vm3364_vm7, %vm3365_vm0  ;;  %vm3377_vm2 = vcmp.lt.f32.partialorder %v7379_v14, 4.0  ;;  %v3149_v5 = vadd.f32 %v7585_v11, %v3145_v1  ;;  %v4905_v38 = vsel %vm3202_vm12, 1.0, %v5568_v47  ;;  %vm3206_vm8 = vcmp.le.f32.partialorder %v6708_v48, %v6871_v22 }
 0x2af   : > { %vm3262_vm9 = vcmp.le.f32.partialorder %v6682_v6, %v6914_v23  ;;  %v3205_v15 = vadd.f32 %v4905_v38, %v3201_v58  ;;  %v4919_v63 = vsel %vm3258_vm11, 1.0, %v5568_v47  ;;  %v4939_v27 = vsel %vm3370_vm14, 1.0, %v5568_v47 }
 0x2b0   : > { %vm3379_vm4 = vcmp.eq.f32.partialorder %v6521_v25, %v8671_v10  ;;  %v3261_v11 = vadd.f32 %v4919_v63, %v3257_v24  ;;  %v4938_v26 = vsel %vm3369_vm15, 1.0, %v5568_v47  ;;  %v3376_v40 = vadd.f32 %v4939_v27, %v3363_v61 }
 0x2b1   : > { %vm3378_vm13 = vcmp.eq.f32.partialorder %v6521_v25, %v8669_v53  ;;  %vm3383_vm6 = vmand %vm3377_vm2, %vm3379_vm4  ;;  %v7736_v50 = vadd.f32 %v7522_v49, %v3101_v30  ;;  %vm3210_vm5 = vcmp.le.f32.partialorder %v6710_v51, %v6871_v22  ;;  %v3375_v17 = vadd.f32 %v4938_v26, %v3362_v52 }
 0x2b2   : > { %vm3382_vm3 = vmand %vm3377_vm2, %vm3378_vm13  ;;  %vm3390_vm10 = vcmp.lt.f32.partialorder %v7381_v46, 4.0  ;;  %v3153_v1 = vadd.f32 %v7629_v3, %v3149_v5  ;;  %v4906_v58 = vsel %vm3206_vm8, 1.0, %v5568_v47  ;;  %vm3214_vm7 = vcmp.le.f32.partialorder %v6725_v54, %v6871_v22 }
 0x2b3   : > { %v4920_v49 = vsel %vm3262_vm9, 1.0, %v5568_v47  ;;  %v3209_v35 = vadd.f32 %v4906_v58, %v3205_v15  ;;  %vm3266_vm12 = vcmp.le.f32.partialorder %v6708_v48, %v6914_v23  ;;  %v4941_v36 = vsel %vm3383_vm6, 1.0, %v5568_v47 }
 0x2b4   : > { %vm3392_vm11 = vcmp.eq.f32.partialorder %v6547_v60, %v8671_v10  ;;  %v3265_v3 = vadd.f32 %v4920_v49, %v3261_v11  ;;  %v4940_v24 = vsel %vm3382_vm3, 1.0, %v5568_v47  ;;  %v3389_v16 = vadd.f32 %v4941_v36, %v3376_v40 }
 0x2b5   : > { %vm3391_vm1 = vcmp.eq.f32.partialorder %v6547_v60, %v8669_v53  ;;  %vm3396_vm0 = vmand %vm3390_vm10, %vm3392_vm11  ;;  %v4907_v6 = vsel %vm3210_vm5, 1.0, %v5568_v47  ;;  %v4908_v61 = vsel %vm3214_vm7, 1.0, %v5568_v47  ;;  %v3388_v30 = vadd.f32 %v4940_v24, %v3375_v17 }
 0x2b6   : > { %vm3395_vm14 = vmand %vm3390_vm10, %vm3391_vm1  ;;  %vm3403_vm15 = vcmp.lt.f32.partialorder %v7404_v28, 4.0  ;;  %v3157_v52 = vadd.f32 %v7658_v43, %v3153_v1  ;;  %vm3270_vm2 = vcmp.le.f32.partialorder %v6710_v51, %v6914_v23  ;;  %vm3494_vm8 = vcmp.eq.f32.partialorder %v6965_v7, 4.0 }
 0x2b7   : > { %vm3497_vm9 = vcmp.eq.f32.partialorder %v6975_v37, 4.0  ;;  %v3213_v5 = vadd.f32 %v4907_v6, %v3209_v35  ;;  %v4921_v38 = vsel %vm3266_vm12, 1.0, %v5568_v47  ;;  %v4943_v15 = vsel %vm3396_vm0, 1.0, %v5568_v47 }
 0x2b8   : > { %vm3405_vm4 = vcmp.eq.f32.partialorder %v6610_v55, %v8671_v10  ;;  %v3269_v63 = vadd.f32 %v4921_v38, %v3265_v3  ;;  %v4942_v43 = vsel %vm3395_vm14, 1.0, %v5568_v47  ;;  %v3402_v27 = vadd.f32 %v4943_v15, %v3389_v16 }
 0x2b9   : > { %vm3404_vm13 = vcmp.eq.f32.partialorder %v6610_v55, %v8669_v53  ;;  %vm3409_vm6 = vmand %vm3403_vm15, %vm3405_vm4  ;;  %v3401_v11 = vadd.f32 %v4942_v43, %v3388_v30  ;;  %vm3416_vm3 = vcmp.lt.f32.partialorder %v7434_v29, 4.0  ;;  %v3495_v48 = vsel %vm3494_vm8, %v8670_v42, 0.0 }
 0x2ba   : > { %vm3408_vm5 = vmand %vm3403_vm15, %vm3404_vm13  ;;  %v3498_v26 = vsel %vm3497_vm9, %v8672_v31, 0.0  ;;  %v3161_v40 = vadd.f32 %v7686_v44, %v3157_v52  ;;  %vm3218_vm10 = vcmp.le.f32.partialorder %v6762_v32, %v6871_v22  ;;  %vm3222_vm7 = vcmp.lt.f32.partialorder %v6914_v23, %v6871_v22 }
 0x2bb   : > { %vm3274_vm12 = vcmp.le.f32.partialorder %v6725_v54, %v6914_v23  ;;  %v4922_v17 = vsel %vm3270_vm2, 1.0, %v5568_v47  ;;  %v4945_v1 = vsel %vm3409_vm6, 1.0, %v5568_v47  ;;  %vm3417_vm11 = vcmp.eq.f32.partialorder %v6640_v45, %v8669_v53 }
 0x2bc   : > { %vm3418_vm1 = vcmp.eq.f32.partialorder %v6640_v45, %v8671_v10  ;;  %v4944_v44 = vsel %vm3408_vm5, 1.0, %v5568_v47  ;;  %v3415_v58 = vadd.f32 %v4945_v1, %v3402_v27  ;;  %v3499_v49 = vadd.f32 %v3498_v26, %v3495_v48  ;;  %vm3421_vm15 = vmand %vm3416_vm3, %vm3417_vm11 }
 0x2bd   : > { %vm3422_vm0 = vmand %vm3416_vm3, %vm3418_vm1  ;;  %vm3500_vm14 = vcmp.eq.f32.partialorder %v6993_v33, 4.0  ;;  %v3217_v35 = vadd.f32 %v4908_v61, %v3213_v5  ;;  %v3273_v51 = vadd.f32 %v4922_v17, %v3269_v63  ;;  %v3414_v36 = vadd.f32 %v4944_v44, %v3401_v11 }
 0x2be   : > { %vm3429_vm2 = vcmp.lt.f32.partialorder %v7546_v57, 4.0  ;;  %v7818_v3 = vadd.f32 %v7709_v9, %v3161_v40  ;;  %v4909_v24 = vsel %vm3218_vm10, 1.0, %v5568_v47  ;;  %v4923_v16 = vsel %vm3274_vm12, 1.0, %v5568_v47 }
 0x2bf   : > { %vm3278_vm8 = vcmp.le.f32.partialorder %v6762_v32, %v6914_v23  ;;  %v4947_v6 = vsel %vm3422_vm0, 1.0, %v5568_v47  ;;  %vm3430_vm9 = vcmp.eq.f32.partialorder %v6643_v2, %v8669_v53  ;;  %vm3431_vm4 = vcmp.eq.f32.partialorder %v6643_v2, %v8671_v10 }
 0x2c0   : > { %v3501_v9 = vsel %vm3500_vm14, %v8673_v18, 0.0  ;;  %v4946_v61 = vsel %vm3421_vm15, 1.0, %v5568_v47  ;;  %v3428_v30 = vadd.f32 %v4947_v6, %v3415_v58  ;;  %vm3435_vm13 = vmand %vm3429_vm2, %vm3431_vm4  ;;  %vm3503_vm6 = vcmp.eq.f32.partialorder %v7021_v21, 4.0 }
 0x2c1   : > { %v3502_v54 = vadd.f32 %v3501_v9, %v3499_v49  ;;  %v3221_v52 = vadd.f32 %v4909_v24, %v3217_v35  ;;  %v3277_v5 = vadd.f32 %v4923_v16, %v3273_v51  ;;  %v3427_v38 = vadd.f32 %v4946_v61, %v3414_v36  ;;  %vm3434_vm5 = vmand %vm3429_vm2, %vm3430_vm9 }
 0x2c2   : > { %vm3442_vm3 = vcmp.lt.f32.partialorder %v7736_v50, 4.0  ;;  %v2323_v15 = vmin.f32 %v6746_v20, %v2322_v12  ;;  %v4910_v63 = vsel %vm3222_vm7, 1.0, %v5568_v47  ;;  %v4924_v43 = vsel %vm3278_vm8, 1.0, %v5568_v47 }
 0x2c3   : > { %vm3282_vm10 = vcmp.le.f32.partialorder %v6871_v22, %v6914_v23  ;;  %v4949_v27 = vsel %vm3435_vm13, 1.0, %v5568_v47  ;;  %vm3443_vm12 = vcmp.eq.f32.partialorder %v6769_v0, %v8669_v53  ;;  %vm3444_vm11 = vcmp.eq.f32.partialorder %v6769_v0, %v8671_v10 }
 0x2c4   : > { %v3504_v20 = vsel %vm3503_vm6, %v8678_v59, 0.0  ;;  %v4948_v12 = vsel %vm3434_vm5, 1.0, %v5568_v47  ;;  %v3441_v11 = vadd.f32 %v4949_v27, %v3428_v30  ;;  %vm3448_vm7 = vmand %vm3442_vm3, %vm3444_vm11  ;;  %vm3506_vm1 = vcmp.eq.f32.partialorder %v7096_v19, 4.0 }
 0x2c5   : > { %v3505_v32 = vadd.f32 %v3504_v20, %v3502_v54  ;;  %v7866_v48 = vadd.f32 %v4910_v63, %v3221_v52  ;;  %v3281_v26 = vadd.f32 %v4924_v43, %v3277_v5  ;;  %v3440_v40 = vadd.f32 %v4948_v12, %v3427_v38  ;;  %vm3447_vm0 = vmand %vm3442_vm3, %vm3443_vm12 }
 0x2c6   : > { %vm3455_vm14 = vcmp.lt.f32.partialorder %v7818_v3, 4.0  ;;  %v7874_v17 = vmin.f32 %v6743_v39, %v2192_v34  ;;  %v2324_v1 = vrot.slane %v2323_v15, 1  ;;  %v4925_v44 = vsel %vm3282_vm10, 1.0, %v5568_v47 }
 0x2c7   : > { %v4951_v58 = vsel %vm3448_vm7, 1.0, %v5568_v47  ;;  %vm3456_vm15 = vcmp.eq.f32.partialorder %v6772_v13, %v8669_v53  ;;  %vm3457_vm2 = vcmp.eq.f32.partialorder %v6772_v13, %v8671_v10  ;;  %v3507_v49 = vsel %vm3506_vm1, %v8679_v4, 0.0 }
 0x2c8   : > { %v4950_v35 = vsel %vm3447_vm0, 1.0, %v5568_v47  ;;  %v3454_v39 = vadd.f32 %v4951_v58, %v3441_v11  ;;  %vm3461_vm8 = vmand %vm3455_vm14, %vm3457_vm2  ;;  %v3508_v34 = vadd.f32 %v3507_v49, %v3505_v32  ;;  %vm3509_vm9 = vcmp.eq.f32.partialorder %v7195_v41, 4.0 }
 0x2c9   : > { %v7890_v22 = vadd.f32 %v4925_v44, %v3281_v26  ;;  %v3453_v23 = vadd.f32 %v4950_v35, %v3440_v40  ;;  %vm3460_vm4 = vmand %vm3455_vm14, %vm3456_vm15  ;;  %vm3468_vm13 = vcmp.lt.f32.partialorder %v7866_v48, 4.0  ;;  %v7895_v51 = vmin.f32 %v2323_v15, %v2324_v1 }
 0x2ca   : > { %v4953_v36 = vsel %vm3461_vm8, 1.0, %v5568_v47  ;;  %vm3469_vm6 = vcmp.eq.f32.partialorder %v7874_v17, %v8669_v53  ;;  %vm3470_vm5 = vcmp.eq.f32.partialorder %v7874_v17, %v8671_v10  ;;  %v3510_v24 = vsel %vm3509_vm9, %v8680_v62, 0.0 }
 0x2cb   : > { %v4952_v16 = vsel %vm3460_vm4, 1.0, %v5568_v47  ;;  %v3467_v6 = vadd.f32 %v4953_v36, %v3454_v39  ;;  %vm3474_vm3 = vmand %vm3468_vm13, %vm3470_vm5  ;;  %v3511_v9 = vadd.f32 %v3510_v24, %v3508_v34  ;;  %vm3512_vm10 = vcmp.eq.f32.partialorder %v7307_v56, 4.0 }
 0x2cc   : > { %v3466_v61 = vadd.f32 %v4952_v16, %v3453_v23  ;;  %vm3473_vm12 = vmand %vm3468_vm13, %vm3469_vm6  ;;  %vm3481_vm11 = vcmp.lt.f32.partialorder %v7890_v22, 4.0  ;;  %v4955_v30 = vsel %vm3474_vm3, 1.0, %v5568_v47  ;;  %vm3482_vm7 = vcmp.eq.f32.partialorder %v7895_v51, %v8669_v53 }
 0x2cd   : > { %vm3483_vm1 = vcmp.eq.f32.partialorder %v7895_v51, %v8671_v10  ;;  %v3513_v54 = vsel %vm3512_vm10, %v8681_v8, 0.0  ;;  %v4954_v52 = vsel %vm3473_vm12, 1.0, %v5568_v47  ;;  %v3480_v5 = vadd.f32 %v4955_v30, %v3467_v6  ;;  %vm3486_vm15 = vmand %vm3481_vm11, %vm3482_vm7 }
 0x2ce   : > { %vm3487_vm0 = vmand %vm3481_vm11, %vm3483_vm1  ;;  %v3514_v38 = vadd.f32 %v3513_v54, %v3511_v9  ;;  %vm3515_vm14 = vcmp.eq.f32.partialorder %v7379_v14, 4.0  ;;  %v3479_v15 = vadd.f32 %v4954_v52, %v3466_v61  ;;  %v4956_v27 = vsel %vm3486_vm15, 1.0, %v5568_v47 }
 0x2cf   : > { %v4957_v63 = vsel %vm3487_vm0, 1.0, %v5568_v47  ;;  %v3516_v43 = vsel %vm3515_vm14, %v6521_v25, 0.0  ;;  %vm3518_vm2 = vcmp.eq.f32.partialorder %v7381_v46, 4.0  ;;  %vm3521_vm8 = vcmp.eq.f32.partialorder %v7404_v28, 4.0 }
 0x2d0   : > { %v7917_v20 = vadd.f32 %v4957_v63, %v3480_v5  ;;  %v3517_v12 = vadd.f32 %v3516_v43, %v3514_v38  ;;  %v7920_v11 = vadd.f32 %v4956_v27, %v3479_v15  ;;  %v3519_v32 = vsel %vm3518_vm2, %v6547_v60, 0.0 }
 0x2d1   : > { %vm8682_vm9 = vcmask 1041408   ;;  %v3522_v44 = vsel %vm3521_vm8, %v6610_v55, 0.0  ;;  %vm3524_vm4 = vcmp.eq.f32.partialorder %v7434_v29, 4.0  ;;  %vm3542_vm13 = vcmp.eq.f32.partialorder %v6965_v7, 5.0 }
 0x2d2   : > { %v3520_v26 = vadd.f32 %v3519_v32, %v3517_v12  ;;  %v4070_v40 = vsel %vm8682_vm9, %v7917_v20, -inf  ;;  %vm3545_vm6 = vcmp.eq.f32.partialorder %v6975_v37, 5.0  ;;  %v3525_v39 = vsel %vm3524_vm4, %v6640_v45, 0.0  ;;  %vm8683_vm0 = vmmov %vm8682_vm9 }
 0x2d3   : > { %v4071_v1 = vmax.f32 %v7920_v11, %v4070_v40  ;;  %v3543_v34 = vsel %vm3542_vm13, %v8670_v42, 0.0  ;;  %v3546_v23 = vsel %vm3545_vm6, %v8672_v31, 0.0  ;;  %vm3527_vm5 = vcmp.eq.f32.partialorder %v7546_v57, 4.0 }
 0x2d4   : > { %v3523_v49 = vadd.f32 %v3522_v44, %v3520_v26  ;;  %v3547_v6 = vadd.f32 %v3546_v23, %v3543_v34  ;;  %vm3548_vm3 = vcmp.eq.f32.partialorder %v6993_v33, 5.0  ;;  %v3528_v9 = vsel %vm3527_vm5, %v6643_v2, 0.0 }
 0x2d5   : > { %v4072_v58 = vrot.slane %v4071_v1, 4  ;;  %vm3530_vm10 = vcmp.eq.f32.partialorder %v7736_v50, 4.0  ;;  %v3549_v54 = vsel %vm3548_vm3, %v8673_v18, 0.0  ;;  %vm3551_vm12 = vcmp.eq.f32.partialorder %v7021_v21, 5.0 }
 0x2d6   : > { %v3526_v24 = vadd.f32 %v3525_v39, %v3523_v49  ;;  %v3550_v5 = vadd.f32 %v3549_v54, %v3547_v6  ;;  %v3531_v38 = vsel %vm3530_vm10, %v6769_v0, 0.0  ;;  %vm3533_vm1 = vcmp.eq.f32.partialorder %v7818_v3, 4.0 }
 0x2d7   : > { %v4073_v35 = vmax.f32 %v4071_v1, %v4072_v58  ;;  %v3552_v27 = vsel %vm3551_vm12, %v8678_v59, 0.0  ;;  %vm3554_vm14 = vcmp.eq.f32.partialorder %v7096_v19, 5.0  ;;  %v3534_v40 = vsel %vm3533_vm1, %v6772_v13, 0.0 }
 0x2d8   : > { %v3529_v30 = vadd.f32 %v3528_v9, %v3526_v24  ;;  %v3553_v32 = vadd.f32 %v3552_v27, %v3550_v5  ;;  %vm3536_vm15 = vcmp.eq.f32.partialorder %v7866_v48, 4.0  ;;  %v3555_v58 = vsel %vm3554_vm14, %v8679_v4, 0.0 }
 0x2d9   : > { %v4074_v36 = vrot.slane %v4073_v35, 2  ;;  %vm3557_vm2 = vcmp.eq.f32.partialorder %v7195_v41, 5.0  ;;  %v3537_v39 = vsel %vm3536_vm15, %v7874_v17, 0.0  ;;  %vm3539_vm8 = vcmp.eq.f32.partialorder %v7890_v22, 4.0 }
 0x2da   : > { %v3532_v15 = vadd.f32 %v3531_v38, %v3529_v30  ;;  %v3556_v49 = vadd.f32 %v3555_v58, %v3553_v32  ;;  %vm3560_vm9 = vcmp.eq.f32.partialorder %v7307_v56, 5.0  ;;  %v3540_v6 = vsel %vm3539_vm8, %v7895_v51, 0.0 }
 0x2db   : > { %v4075_v16 = vmax.f32 %v4073_v35, %v4074_v36  ;;  %v3558_v36 = vsel %vm3557_vm2, %v8680_v62, 0.0  ;;  %v3561_v30 = vsel %vm3560_vm9, %v8681_v8, 0.0  ;;  %vm3563_vm4 = vcmp.eq.f32.partialorder %v7379_v14, 5.0 }
 0x2dc   : > { %v3535_v1 = vadd.f32 %v3534_v40, %v3532_v15  ;;  %v3559_v24 = vadd.f32 %v3558_v36, %v3556_v49  ;;  %v3564_v5 = vsel %vm3563_vm4, %v6521_v25, 0.0  ;;  %vm3566_vm10 = vcmp.eq.f32.partialorder %v7381_v46, 5.0 }
 0x2dd   : > { %v4076_v61 = vrot.slane %v4075_v16, 1  ;;  %vm3572_vm1 = vcmp.eq.f32.partialorder %v7434_v29, 5.0  ;;  %vm3593_vm14 = vcmp.eq.f32.partialorder %v6975_v37, 6.0  ;;  %vm3575_vm15 = vcmp.eq.f32.partialorder %v7546_v57, 5.0 }
 0x2de   : > { %v3538_v34 = vadd.f32 %v3537_v39, %v3535_v1  ;;  %v3562_v54 = vadd.f32 %v3561_v30, %v3559_v24  ;;  %vm3596_vm2 = vcmp.eq.f32.partialorder %v6993_v33, 6.0  ;;  %v3576_v24 = vsel %vm3575_vm15, %v6643_v2, 0.0 }
 0x2df   : > { %v4077_v52 = vmax.f32 %v4075_v16, %v4076_v61  ;;  %vm3578_vm8 = vcmp.eq.f32.partialorder %v7736_v50, 5.0  ;;  %vm3599_vm9 = vcmp.eq.f32.partialorder %v7021_v21, 6.0 }
 0x2e0   : > { %v3541_v9 = vadd.f32 %v3540_v6, %v3538_v34  ;;  %v3565_v38 = vadd.f32 %v3564_v5, %v3562_v54  ;;  %v3579_v54 = vsel %vm3578_vm8, %v6769_v0, 0.0  ;;  %vm3614_vm8 = vcmp.eq.f32.partialorder %v7381_v46, 6.0 }
 0x2e1   : > { %vm4078_vm11 = vcmp.eq.f32.partialorder %v7920_v11, %v4077_v52  ;;  %vm4079_vm7 = vcmp.eq.f32.partialorder %v7917_v20, %v4077_v52 }
 0x2e2   : > { %v4958_v63 = vsel %vm4078_vm11, 1.0, %v5568_v47  ;;  %v4959_v43 = vsel %vm4079_vm7, 1.0, %v5568_v47  ;;  %vm4093_vm6 = vcmp.eq.f32.partialorder %v8669_v53, %v3541_v9  ;;  %vm4094_vm5 = vcmp.eq.f32.partialorder %v8671_v10, %v3541_v9  ;;  %vm8684_vm7 = vmmov %vm8683_vm0 }
 0x2e3   : > { %v4084_v12 = vsel %vm8683_vm0, %v4959_v43, 0.0  ;;  %vm3569_vm11 = vcmp.eq.f32.partialorder %v7404_v28, 5.0  ;;  %vm3590_vm0 = vcmp.eq.f32.partialorder %v6965_v7, 6.0  ;;  %v3597_v9 = vsel %vm3596_vm2, %v8673_v18, 0.0 }
 0x2e4   : > { %v4085_v26 = vadd.f32 %v4958_v63, %v4084_v12  ;;  %v3567_v12 = vsel %vm3566_vm10, %v6547_v60, 0.0  ;;  %v3570_v1 = vsel %vm3569_vm11, %v6610_v55, 0.0  ;;  %v3591_v49 = vsel %vm3590_vm0, %v8670_v42, 0.0 }
 0x2e5   : > { %v3568_v32 = vadd.f32 %v3567_v12, %v3565_v38  ;;  %vm3584_vm10 = vcmp.eq.f32.partialorder %v7866_v48, 5.0  ;;  %vm3587_vm11 = vcmp.eq.f32.partialorder %v7890_v22, 5.0 }
 0x2e6   : > { %v4086_v44 = vrot.slane %v4085_v26, 4 }
 0x2e7   : > { %v3571_v58 = vadd.f32 %v3570_v1, %v3568_v32 }
 0x2e8   : > { %v4087_v35 = vadd.f32 %v4086_v44, %v4085_v26 }
 0x2ea   : > { %v4088_v23 = vrot.slane %v4087_v35, 2 }
 0x2ec   : > { %v4089_v16 = vadd.f32 %v4088_v23, %v4087_v35  ;;  %v3594_v35 = vsel %vm3593_vm14, %v8672_v31, 0.0 }
 0x2ed   : > { %v3595_v36 = vadd.f32 %v3594_v35, %v3591_v49 }
 0x2ee   : > { %v4090_v61 = vrot.slane %v4089_v16, 1 }
 0x2ef   : > { %v3598_v30 = vadd.f32 %v3597_v9, %v3595_v36  ;;  %v3588_v36 = vsel %vm3587_vm11, %v7895_v51, 0.0  ;;  %vm3626_vm11 = vcmp.eq.f32.partialorder %v7736_v50, 6.0 }
 0x2f0   : > { %v4091_v52 = vadd.f32 %v4090_v61, %v4089_v16 }
 0x2f2   : > { %vm4092_vm13 = vcmp.gt.f32.partialorder %v4091_v52, 1.0 }
 0x2f3   : > { %vm4097_vm3 = vmand %vm4092_vm13, %vm4093_vm6  ;;  %vm3581_vm6 = vcmp.eq.f32.partialorder %v7818_v3, 5.0 }
 0x2f4   : > { %vm4098_vm12 = vmand %vm4092_vm13, %vm4094_vm5  ;;  %v4960_v15 = vsel %vm4097_vm3, 1.0, %v5568_v47  ;;  %vm3602_vm3 = vcmp.eq.f32.partialorder %v7096_v19, 6.0 }
 0x2f5   : > { %v4961_v63 = vsel %vm4098_vm12, 1.0, %v5568_v47  ;;  %v7967_v43 = vadd.f32 %v4960_v15, %v7920_v11  ;;  %v3573_v11 = vsel %vm3572_vm1, %v6640_v45, 0.0  ;;  %v3600_v15 = vsel %vm3599_vm9, %v8678_v59, 0.0  ;;  %vm8685_vm5 = vmmov %vm8684_vm7 }
 0x2f6   : > { %v7970_v27 = vadd.f32 %v4961_v63, %v7917_v20  ;;  %v3574_v34 = vadd.f32 %v3573_v11, %v3571_v58  ;;  %v3601_v12 = vadd.f32 %v3600_v15, %v3598_v30  ;;  %vm3605_vm12 = vcmp.eq.f32.partialorder %v7195_v41, 6.0 }
 0x2f7   : > { %v3585_v11 = vsel %vm3584_vm10, %v7874_v17, 0.0  ;;  %vm3611_vm1 = vcmp.eq.f32.partialorder %v7379_v14, 6.0  ;;  %vm3623_vm10 = vcmp.eq.f32.partialorder %v7546_v57, 6.0 }
 0x2f8   : > { %v4105_v26 = vsel %vm8684_vm7, %v7970_v27, -inf  ;;  %v3577_v6 = vadd.f32 %v3576_v24, %v3574_v34  ;;  %vm3608_vm7 = vcmp.eq.f32.partialorder %v7307_v56, 6.0  ;;  %v3612_v30 = vsel %vm3611_vm1, %v6521_v25, 0.0 }
 0x2f9   : > { %v4106_v40 = vmax.f32 %v7967_v43, %v4105_v26  ;;  %v3582_v26 = vsel %vm3581_vm6, %v6772_v13, 0.0  ;;  %vm3620_vm6 = vcmp.eq.f32.partialorder %v7434_v29, 6.0 }
 0x2fa   : > { %v3580_v52 = vadd.f32 %v3579_v54, %v3577_v6  ;;  %v3609_v6 = vsel %vm3608_vm7, %v8681_v8, 0.0  ;;  %vm3647_vm7 = vcmp.eq.f32.partialorder %v7021_v21, 7.0 }
 0x2fb   : > { %v4107_v44 = vrot.slane %v4106_v40, 4 }
 0x2fd   : > { %v4108_v20 = vmax.f32 %v4106_v40, %v4107_v44  ;;  %v3583_v40 = vadd.f32 %v3582_v26, %v3580_v52  ;;  %v3603_v44 = vsel %vm3602_vm3, %v8679_v4, 0.0  ;;  %vm3641_vm3 = vcmp.eq.f32.partialorder %v6975_v37, 7.0 }
 0x2fe   : > { %v3604_v58 = vadd.f32 %v3603_v44, %v3601_v12 }
 0x2ff   : > { %v4109_v39 = vrot.slane %v4108_v20, 2  ;;  %v3586_v49 = vadd.f32 %v3585_v11, %v3583_v40 }
 0x301   : > { %v4110_v23 = vmax.f32 %v4108_v20, %v4109_v39  ;;  %v3606_v39 = vsel %vm3605_vm12, %v8680_v62, 0.0  ;;  %v3589_v24 = vadd.f32 %v3588_v36, %v3586_v49  ;;  %vm3644_vm12 = vcmp.eq.f32.partialorder %v6993_v33, 7.0 }
 0x302   : > { %v3607_v34 = vadd.f32 %v3606_v39, %v3604_v58 }
 0x303   : > { %v4111_v16 = vrot.slane %v4110_v23, 1  ;;  %vm4128_vm14 = vcmp.eq.f32.partialorder %v8669_v53, %v3589_v24  ;;  %vm4129_vm15 = vcmp.eq.f32.partialorder %v8671_v10, %v3589_v24  ;;  %v3645_v24 = vsel %vm3644_vm12, %v8673_v18, 0.0 }
 0x304   : > { %v3610_v9 = vadd.f32 %v3609_v6, %v3607_v34  ;;  %v3624_v34 = vsel %vm3623_vm10, %v6643_v2, 0.0 }
 0x305   : > { %v4112_v61 = vmax.f32 %v4110_v23, %v4111_v16 }
 0x306   : > { %v3613_v54 = vadd.f32 %v3612_v30, %v3610_v9  ;;  %v3627_v9 = vsel %vm3626_vm11, %v6769_v0, 0.0  ;;  %vm3662_vm11 = vcmp.eq.f32.partialorder %v7381_v46, 7.0 }
 0x307   : > { %vm4113_vm4 = vcmp.eq.f32.partialorder %v7967_v43, %v4112_v61  ;;  %vm4114_vm13 = vcmp.eq.f32.partialorder %v7970_v27, %v4112_v61 }
 0x308   : > { %v4962_v5 = vsel %vm4113_vm4, 1.0, %v5568_v47  ;;  %v4963_v38 = vsel %vm4114_vm13, 1.0, %v5568_v47  ;;  %vm3617_vm4 = vcmp.eq.f32.partialorder %v7404_v28, 6.0  ;;  %vm8686_vm13 = vmmov %vm8685_vm5 }
 0x309   : > { %v4119_v63 = vsel %vm8685_vm5, %v4963_v38, 0.0  ;;  %v3618_v40 = vsel %vm3617_vm4, %v6610_v55, 0.0  ;;  %vm3638_vm5 = vcmp.eq.f32.partialorder %v6965_v7, 7.0  ;;  %vm3635_vm4 = vcmp.eq.f32.partialorder %v7890_v22, 6.0 }
 0x30a   : > { %v4120_v32 = vadd.f32 %v4962_v5, %v4119_v63  ;;  %v3615_v63 = vsel %vm3614_vm8, %v6547_v60, 0.0  ;;  %v3639_v58 = vsel %vm3638_vm5, %v8670_v42, 0.0  ;;  %vm3632_vm8 = vcmp.eq.f32.partialorder %v7866_v48, 6.0 }
 0x30b   : > { %v3616_v12 = vadd.f32 %v3615_v63, %v3613_v54 }
 0x30c   : > { %v4121_v1 = vrot.slane %v4120_v32, 4 }
 0x30d   : > { %v3619_v44 = vadd.f32 %v3618_v40, %v3616_v12 }
 0x30e   : > { %v4122_v20 = vadd.f32 %v4121_v1, %v4120_v32 }
 0x310   : > { %v4123_v35 = vrot.slane %v4122_v20, 2 }
 0x312   : > { %v4124_v23 = vadd.f32 %v4123_v35, %v4122_v20  ;;  %v3642_v20 = vsel %vm3641_vm3, %v8672_v31, 0.0 }
 0x313   : > { %v3643_v39 = vadd.f32 %v3642_v20, %v3639_v58 }
 0x314   : > { %v4125_v16 = vrot.slane %v4124_v23, 1 }
 0x315   : > { %v3646_v6 = vadd.f32 %v3645_v24, %v3643_v39  ;;  %v3636_v39 = vsel %vm3635_vm4, %v7895_v51, 0.0  ;;  %vm3674_vm4 = vcmp.eq.f32.partialorder %v7736_v50, 7.0 }
 0x316   : > { %v4126_v61 = vadd.f32 %v4125_v16, %v4124_v23 }
 0x318   : > { %vm4127_vm0 = vcmp.gt.f32.partialorder %v4126_v61, 1.0 }
 0x319   : > { %vm4132_vm2 = vmand %vm4127_vm0, %vm4128_vm14  ;;  %vm3629_vm14 = vcmp.eq.f32.partialorder %v7818_v3, 6.0 }
 0x31a   : > { %vm4133_vm9 = vmand %vm4127_vm0, %vm4129_vm15  ;;  %v4964_v52 = vsel %vm4132_vm2, 1.0, %v5568_v47  ;;  %vm3650_vm2 = vcmp.eq.f32.partialorder %v7096_v19, 7.0 }
 0x31b   : > { %v4965_v5 = vsel %vm4133_vm9, 1.0, %v5568_v47  ;;  %v8017_v38 = vadd.f32 %v4964_v52, %v7967_v43  ;;  %v3648_v52 = vsel %vm3647_vm7, %v8678_v59, 0.0  ;;  %vm8687_vm15 = vmmov %vm8686_vm13  ;;  %vm3653_vm9 = vcmp.eq.f32.partialorder %v7195_v41, 7.0 }
 0x31c   : > { %v8020_v15 = vadd.f32 %v4965_v5, %v7970_v27  ;;  %v3621_v27 = vsel %vm3620_vm6, %v6640_v45, 0.0  ;;  %v3649_v63 = vadd.f32 %v3648_v52, %v3646_v6  ;;  %vm3659_vm6 = vcmp.eq.f32.partialorder %v7379_v14, 7.0 }
 0x31d   : > { %v3622_v49 = vadd.f32 %v3621_v27, %v3619_v44  ;;  %v3633_v27 = vsel %vm3632_vm8, %v7874_v17, 0.0  ;;  %v3660_v6 = vsel %vm3659_vm6, %v6521_v25, 0.0  ;;  %vm3671_vm8 = vcmp.eq.f32.partialorder %v7546_v57, 7.0 }
 0x31e   : > { %v4140_v32 = vsel %vm8686_vm13, %v8020_v15, -inf  ;;  %vm3656_vm13 = vcmp.eq.f32.partialorder %v7307_v56, 7.0 }
 0x31f   : > { %v4141_v26 = vmax.f32 %v8017_v38, %v4140_v32  ;;  %v3625_v36 = vadd.f32 %v3624_v34, %v3622_v49  ;;  %v3630_v32 = vsel %vm3629_vm14, %v6772_v13, 0.0  ;;  %vm3668_vm14 = vcmp.eq.f32.partialorder %v7434_v29, 7.0 }
 0x321   : > { %v4142_v1 = vrot.slane %v4141_v26, 4  ;;  %v3628_v61 = vadd.f32 %v3627_v9, %v3625_v36  ;;  %v3657_v36 = vsel %vm3656_vm13, %v8681_v8, 0.0  ;;  %vm3695_vm13 = vcmp.eq.f32.partialorder %v7021_v21, 8.0 }
 0x323   : > { %v4143_v43 = vmax.f32 %v4141_v26, %v4142_v1  ;;  %v3631_v26 = vadd.f32 %v3630_v32, %v3628_v61  ;;  %v3651_v1 = vsel %vm3650_vm2, %v8679_v4, 0.0  ;;  %vm3689_vm2 = vcmp.eq.f32.partialorder %v6975_v37, 8.0 }
 0x324   : > { %v3652_v44 = vadd.f32 %v3651_v1, %v3649_v63 }
 0x325   : > { %v4144_v11 = vrot.slane %v4143_v43, 2  ;;  %v3634_v58 = vadd.f32 %v3633_v27, %v3631_v26 }
 0x327   : > { %v4145_v35 = vmax.f32 %v4143_v43, %v4144_v11  ;;  %v3654_v11 = vsel %vm3653_vm9, %v8680_v62, 0.0  ;;  %v3637_v34 = vadd.f32 %v3636_v39, %v3634_v58  ;;  %vm3692_vm9 = vcmp.eq.f32.partialorder %v6993_v33, 8.0 }
 0x328   : > { %v3655_v49 = vadd.f32 %v3654_v11, %v3652_v44 }
 0x329   : > { %v4146_v23 = vrot.slane %v4145_v35, 1  ;;  %vm4163_vm3 = vcmp.eq.f32.partialorder %v8669_v53, %v3637_v34  ;;  %vm4164_vm10 = vcmp.eq.f32.partialorder %v8671_v10, %v3637_v34  ;;  %v3693_v34 = vsel %vm3692_vm9, %v8673_v18, 0.0 }
 0x32a   : > { %v3658_v24 = vadd.f32 %v3657_v36, %v3655_v49  ;;  %v3672_v49 = vsel %vm3671_vm8, %v6643_v2, 0.0 }
 0x32b   : > { %v4147_v16 = vmax.f32 %v4145_v35, %v4146_v23 }
 0x32c   : > { %v3661_v9 = vadd.f32 %v3660_v6, %v3658_v24  ;;  %v3675_v24 = vsel %vm3674_vm4, %v6769_v0, 0.0  ;;  %vm3710_vm4 = vcmp.eq.f32.partialorder %v7381_v46, 8.0 }
 0x32d   : > { %vm4148_vm1 = vcmp.eq.f32.partialorder %v8017_v38, %v4147_v16  ;;  %vm4149_vm0 = vcmp.eq.f32.partialorder %v8020_v15, %v4147_v16 }
 0x32e   : > { %v4966_v30 = vsel %vm4148_vm1, 1.0, %v5568_v47  ;;  %v4967_v54 = vsel %vm4149_vm0, 1.0, %v5568_v47  ;;  %vm3665_vm1 = vcmp.eq.f32.partialorder %v7404_v28, 7.0  ;;  %vm8688_vm0 = vmmov %vm8687_vm15 }
 0x32f   : > { %v4154_v5 = vsel %vm8687_vm15, %v4967_v54, 0.0  ;;  %v3666_v26 = vsel %vm3665_vm1, %v6610_v55, 0.0  ;;  %vm3686_vm15 = vcmp.eq.f32.partialorder %v6965_v7, 8.0  ;;  %vm3683_vm1 = vcmp.eq.f32.partialorder %v7890_v22, 7.0 }
 0x330   : > { %v4155_v12 = vadd.f32 %v4966_v30, %v4154_v5  ;;  %v3663_v5 = vsel %vm3662_vm11, %v6547_v60, 0.0  ;;  %v3687_v44 = vsel %vm3686_vm15, %v8670_v42, 0.0  ;;  %vm3680_vm11 = vcmp.eq.f32.partialorder %v7866_v48, 7.0 }
 0x331   : > { %v3664_v63 = vadd.f32 %v3663_v5, %v3661_v9 }
 0x332   : > { %v4156_v40 = vrot.slane %v4155_v12, 4 }
 0x333   : > { %v3667_v1 = vadd.f32 %v3666_v26, %v3664_v63 }
 0x334   : > { %v4157_v43 = vadd.f32 %v4156_v40, %v4155_v12 }
 0x336   : > { %v4158_v20 = vrot.slane %v4157_v43, 2 }
 0x338   : > { %v4159_v35 = vadd.f32 %v4158_v20, %v4157_v43  ;;  %v3690_v43 = vsel %vm3689_vm2, %v8672_v31, 0.0 }
 0x339   : > { %v3691_v11 = vadd.f32 %v3690_v43, %v3687_v44 }
 0x33a   : > { %v4160_v23 = vrot.slane %v4159_v35, 1 }
 0x33b   : > { %v3694_v36 = vadd.f32 %v3693_v34, %v3691_v11  ;;  %v3684_v11 = vsel %vm3683_vm1, %v7895_v51, 0.0  ;;  %vm3722_vm1 = vcmp.eq.f32.partialorder %v7736_v50, 8.0 }
 0x33c   : > { %v4161_v16 = vadd.f32 %v4160_v23, %v4159_v35 }
 0x33e   : > { %vm4162_vm5 = vcmp.gt.f32.partialorder %v4161_v16, 1.0 }
 0x33f   : > { %vm4167_vm12 = vmand %vm4162_vm5, %vm4163_vm3  ;;  %vm3677_vm3 = vcmp.eq.f32.partialorder %v7818_v3, 7.0 }
 0x340   : > { %vm4168_vm7 = vmand %vm4162_vm5, %vm4164_vm10  ;;  %v4968_v61 = vsel %vm4167_vm12, 1.0, %v5568_v47  ;;  %vm3698_vm12 = vcmp.eq.f32.partialorder %v7096_v19, 8.0 }
 0x341   : > { %v4969_v30 = vsel %vm4168_vm7, 1.0, %v5568_v47  ;;  %v8067_v54 = vadd.f32 %v4968_v61, %v8017_v38  ;;  %v3696_v61 = vsel %vm3695_vm13, %v8678_v59, 0.0  ;;  %vm8689_vm10 = vmmov %vm8688_vm0  ;;  %vm3701_vm7 = vcmp.eq.f32.partialorder %v7195_v41, 8.0 }
 0x342   : > { %v8070_v52 = vadd.f32 %v4969_v30, %v8020_v15  ;;  %v3669_v15 = vsel %vm3668_vm14, %v6640_v45, 0.0  ;;  %v3697_v5 = vadd.f32 %v3696_v61, %v3694_v36  ;;  %vm3707_vm14 = vcmp.eq.f32.partialorder %v7379_v14, 8.0 }
 0x343   : > { %v3670_v58 = vadd.f32 %v3669_v15, %v3667_v1  ;;  %v3681_v15 = vsel %vm3680_vm11, %v7874_v17, 0.0  ;;  %v3708_v36 = vsel %vm3707_vm14, %v6521_v25, 0.0  ;;  %vm3719_vm11 = vcmp.eq.f32.partialorder %v7546_v57, 8.0 }
 0x344   : > { %v4175_v12 = vsel %vm8688_vm0, %v8070_v52, -inf  ;;  %vm3704_vm0 = vcmp.eq.f32.partialorder %v7307_v56, 8.0 }
 0x345   : > { %v4176_v32 = vmax.f32 %v8067_v54, %v4175_v12  ;;  %v3673_v39 = vadd.f32 %v3672_v49, %v3670_v58  ;;  %v3678_v12 = vsel %vm3677_vm3, %v6772_v13, 0.0  ;;  %vm3716_vm3 = vcmp.eq.f32.partialorder %v7434_v29, 8.0 }
 0x347   : > { %v4177_v40 = vrot.slane %v4176_v32, 4  ;;  %v3676_v16 = vadd.f32 %v3675_v24, %v3673_v39  ;;  %v3705_v39 = vsel %vm3704_vm0, %v8681_v8, 0.0  ;;  %vm3743_vm0 = vcmp.eq.f32.partialorder %v7021_v21, 9.0 }
 0x349   : > { %v4178_v38 = vmax.f32 %v4176_v32, %v4177_v40  ;;  %v3679_v32 = vadd.f32 %v3678_v12, %v3676_v16  ;;  %v3699_v40 = vsel %vm3698_vm12, %v8679_v4, 0.0  ;;  %vm3737_vm12 = vcmp.eq.f32.partialorder %v6975_v37, 9.0 }
 0x34a   : > { %v3700_v1 = vadd.f32 %v3699_v40, %v3697_v5 }
 0x34b   : > { %v4179_v27 = vrot.slane %v4178_v38, 2  ;;  %v3682_v44 = vadd.f32 %v3681_v15, %v3679_v32 }
 0x34d   : > { %v4180_v20 = vmax.f32 %v4178_v38, %v4179_v27  ;;  %v3702_v27 = vsel %vm3701_vm7, %v8680_v62, 0.0  ;;  %v3685_v49 = vadd.f32 %v3684_v11, %v3682_v44  ;;  %vm3740_vm7 = vcmp.eq.f32.partialorder %v6993_v33, 9.0 }
 0x34e   : > { %v3703_v58 = vadd.f32 %v3702_v27, %v3700_v1 }
 0x34f   : > { %v4181_v35 = vrot.slane %v4180_v20, 1  ;;  %vm4198_vm2 = vcmp.eq.f32.partialorder %v8669_v53, %v3685_v49  ;;  %vm4199_vm8 = vcmp.eq.f32.partialorder %v8671_v10, %v3685_v49  ;;  %v3741_v49 = vsel %vm3740_vm7, %v8673_v18, 0.0 }
 0x350   : > { %v3706_v34 = vadd.f32 %v3705_v39, %v3703_v58  ;;  %v3720_v58 = vsel %vm3719_vm11, %v6643_v2, 0.0 }
 0x351   : > { %v4182_v23 = vmax.f32 %v4180_v20, %v4181_v35 }
 0x352   : > { %v3709_v24 = vadd.f32 %v3708_v36, %v3706_v34  ;;  %v3723_v34 = vsel %vm3722_vm1, %v6769_v0, 0.0  ;;  %vm3758_vm1 = vcmp.eq.f32.partialorder %v7381_v46, 9.0 }
 0x353   : > { %vm4183_vm6 = vcmp.eq.f32.partialorder %v8067_v54, %v4182_v23  ;;  %vm4184_vm5 = vcmp.eq.f32.partialorder %v8070_v52, %v4182_v23 }
 0x354   : > { %v4970_v6 = vsel %vm4183_vm6, 1.0, %v5568_v47  ;;  %v4971_v9 = vsel %vm4184_vm5, 1.0, %v5568_v47  ;;  %vm3713_vm6 = vcmp.eq.f32.partialorder %v7404_v28, 8.0  ;;  %vm8690_vm5 = vmmov %vm8689_vm10 }
 0x355   : > { %v4189_v30 = vsel %vm8689_vm10, %v4971_v9, 0.0  ;;  %v3714_v32 = vsel %vm3713_vm6, %v6610_v55, 0.0  ;;  %vm3734_vm10 = vcmp.eq.f32.partialorder %v6965_v7, 9.0  ;;  %vm3731_vm6 = vcmp.eq.f32.partialorder %v7890_v22, 8.0 }
 0x356   : > { %v4190_v63 = vadd.f32 %v4970_v6, %v4189_v30  ;;  %v3711_v30 = vsel %vm3710_vm4, %v6547_v60, 0.0  ;;  %v3735_v1 = vsel %vm3734_vm10, %v8670_v42, 0.0  ;;  %vm3728_vm4 = vcmp.eq.f32.partialorder %v7866_v48, 8.0 }
 0x357   : > { %v3712_v5 = vadd.f32 %v3711_v30, %v3709_v24 }
 0x358   : > { %v4191_v26 = vrot.slane %v4190_v63, 4 }
 0x359   : > { %v3715_v40 = vadd.f32 %v3714_v32, %v3712_v5 }
 0x35a   : > { %v4192_v38 = vadd.f32 %v4191_v26, %v4190_v63 }
 0x35c   : > { %v4193_v43 = vrot.slane %v4192_v38, 2 }
 0x35e   : > { %v4194_v20 = vadd.f32 %v4193_v43, %v4192_v38  ;;  %v3738_v38 = vsel %vm3737_vm12, %v8672_v31, 0.0 }
 0x35f   : > { %v3739_v27 = vadd.f32 %v3738_v38, %v3735_v1 }
 0x360   : > { %v4195_v35 = vrot.slane %v4194_v20, 1 }
 0x361   : > { %v3742_v39 = vadd.f32 %v3741_v49, %v3739_v27  ;;  %v3732_v27 = vsel %vm3731_vm6, %v7895_v51, 0.0  ;;  %vm3770_vm6 = vcmp.eq.f32.partialorder %v7736_v50, 9.0 }
 0x362   : > { %v4196_v23 = vadd.f32 %v4195_v35, %v4194_v20 }
 0x364   : > { %vm4197_vm15 = vcmp.gt.f32.partialorder %v4196_v23, 1.0 }
 0x365   : > { %vm4202_vm9 = vmand %vm4197_vm15, %vm4198_vm2  ;;  %vm3725_vm2 = vcmp.eq.f32.partialorder %v7818_v3, 8.0 }
 0x366   : > { %vm4203_vm13 = vmand %vm4197_vm15, %vm4199_vm8  ;;  %v4972_v16 = vsel %vm4202_vm9, 1.0, %v5568_v47  ;;  %vm3746_vm9 = vcmp.eq.f32.partialorder %v7096_v19, 9.0 }
 0x367   : > { %v4973_v6 = vsel %vm4203_vm13, 1.0, %v5568_v47  ;;  %v8117_v9 = vadd.f32 %v4972_v16, %v8067_v54  ;;  %v3744_v16 = vsel %vm3743_vm0, %v8678_v59, 0.0  ;;  %vm8691_vm8 = vmmov %vm8690_vm5  ;;  %vm3749_vm13 = vcmp.eq.f32.partialorder %v7195_v41, 9.0 }
 0x368   : > { %v8120_v61 = vadd.f32 %v4973_v6, %v8070_v52  ;;  %v3717_v52 = vsel %vm3716_vm3, %v6640_v45, 0.0  ;;  %v3745_v30 = vadd.f32 %v3744_v16, %v3742_v39  ;;  %vm3755_vm3 = vcmp.eq.f32.partialorder %v7379_v14, 9.0 }
 0x369   : > { %v3718_v44 = vadd.f32 %v3717_v52, %v3715_v40  ;;  %v3729_v52 = vsel %vm3728_vm4, %v7874_v17, 0.0  ;;  %v3756_v39 = vsel %vm3755_vm3, %v6521_v25, 0.0  ;;  %vm3767_vm4 = vcmp.eq.f32.partialorder %v7546_v57, 9.0 }
 0x36a   : > { %v4210_v63 = vsel %vm8690_vm5, %v8120_v61, -inf  ;;  %vm3752_vm5 = vcmp.eq.f32.partialorder %v7307_v56, 9.0 }
 0x36b   : > { %v4211_v12 = vmax.f32 %v8117_v9, %v4210_v63  ;;  %v3721_v11 = vadd.f32 %v3720_v58, %v3718_v44  ;;  %v3726_v63 = vsel %vm3725_vm2, %v6772_v13, 0.0  ;;  %vm3764_vm2 = vcmp.eq.f32.partialorder %v7434_v29, 9.0 }
 0x36d   : > { %v4212_v26 = vrot.slane %v4211_v12, 4  ;;  %v3724_v23 = vadd.f32 %v3723_v34, %v3721_v11  ;;  %v3753_v11 = vsel %vm3752_vm5, %v8681_v8, 0.0  ;;  %vm3791_vm5 = vcmp.eq.f32.partialorder %v7021_v21, 10.0 }
 0x36f   : > { %v4213_v54 = vmax.f32 %v4211_v12, %v4212_v26  ;;  %v3727_v12 = vadd.f32 %v3726_v63, %v3724_v23  ;;  %v3747_v26 = vsel %vm3746_vm9, %v8679_v4, 0.0  ;;  %vm3785_vm9 = vcmp.eq.f32.partialorder %v6975_v37, 10.0 }
 0x370   : > { %v3748_v40 = vadd.f32 %v3747_v26, %v3745_v30 }
 0x371   : > { %v4214_v15 = vrot.slane %v4213_v54, 2  ;;  %v3730_v1 = vadd.f32 %v3729_v52, %v3727_v12 }
 0x373   : > { %v4215_v43 = vmax.f32 %v4213_v54, %v4214_v15  ;;  %v3750_v15 = vsel %vm3749_vm13, %v8680_v62, 0.0  ;;  %v3733_v58 = vadd.f32 %v3732_v27, %v3730_v1  ;;  %vm3788_vm13 = vcmp.eq.f32.partialorder %v6993_v33, 10.0 }
 0x374   : > { %v3751_v44 = vadd.f32 %v3750_v15, %v3748_v40 }
 0x375   : > { %v4216_v20 = vrot.slane %v4215_v43, 1  ;;  %vm4233_vm12 = vcmp.eq.f32.partialorder %v8669_v53, %v3733_v58  ;;  %vm4234_vm11 = vcmp.eq.f32.partialorder %v8671_v10, %v3733_v58  ;;  %v3789_v58 = vsel %vm3788_vm13, %v8673_v18, 0.0 }
 0x376   : > { %v3754_v49 = vadd.f32 %v3753_v11, %v3751_v44  ;;  %v3768_v44 = vsel %vm3767_vm4, %v6643_v2, 0.0 }
 0x377   : > { %v4217_v35 = vmax.f32 %v4215_v43, %v4216_v20 }
 0x378   : > { %v3757_v34 = vadd.f32 %v3756_v39, %v3754_v49  ;;  %v3771_v49 = vsel %vm3770_vm6, %v6769_v0, 0.0  ;;  %vm3806_vm6 = vcmp.eq.f32.partialorder %v7381_v46, 10.0 }
 0x379   : > { %vm4218_vm14 = vcmp.eq.f32.partialorder %v8117_v9, %v4217_v35  ;;  %vm4219_vm15 = vcmp.eq.f32.partialorder %v8120_v61, %v4217_v35 }
 0x37a   : > { %v4974_v36 = vsel %vm4218_vm14, 1.0, %v5568_v47  ;;  %v4975_v24 = vsel %vm4219_vm15, 1.0, %v5568_v47  ;;  %vm3761_vm14 = vcmp.eq.f32.partialorder %v7404_v28, 9.0  ;;  %vm8692_vm15 = vmmov %vm8691_vm8 }
 0x37b   : > { %v4224_v6 = vsel %vm8691_vm8, %v4975_v24, 0.0  ;;  %v3762_v12 = vsel %vm3761_vm14, %v6610_v55, 0.0  ;;  %vm3782_vm8 = vcmp.eq.f32.partialorder %v6965_v7, 10.0  ;;  %vm3779_vm14 = vcmp.eq.f32.partialorder %v7890_v22, 9.0 }
 0x37c   : > { %v4225_v5 = vadd.f32 %v4974_v36, %v4224_v6  ;;  %v3759_v6 = vsel %vm3758_vm1, %v6547_v60, 0.0  ;;  %v3783_v40 = vsel %vm3782_vm8, %v8670_v42, 0.0  ;;  %vm3776_vm1 = vcmp.eq.f32.partialorder %v7866_v48, 9.0 }
 0x37d   : > { %v3760_v30 = vadd.f32 %v3759_v6, %v3757_v34 }
 0x37e   : > { %v4226_v32 = vrot.slane %v4225_v5, 4 }
 0x37f   : > { %v3763_v26 = vadd.f32 %v3762_v12, %v3760_v30 }
 0x380   : > { %v4227_v54 = vadd.f32 %v4226_v32, %v4225_v5 }
 0x382   : > { %v4228_v38 = vrot.slane %v4227_v54, 2 }
 0x384   : > { %v4229_v43 = vadd.f32 %v4228_v38, %v4227_v54  ;;  %v3786_v54 = vsel %vm3785_vm9, %v8672_v31, 0.0 }
 0x385   : > { %v3787_v15 = vadd.f32 %v3786_v54, %v3783_v40 }
 0x386   : > { %v4230_v20 = vrot.slane %v4229_v43, 1 }
 0x387   : > { %v3790_v11 = vadd.f32 %v3789_v58, %v3787_v15  ;;  %v3780_v15 = vsel %vm3779_vm14, %v7895_v51, 0.0  ;;  %vm3818_vm14 = vcmp.eq.f32.partialorder %v7736_v50, 10.0 }
 0x388   : > { %v4231_v35 = vadd.f32 %v4230_v20, %v4229_v43 }
 0x38a   : > { %vm4232_vm10 = vcmp.gt.f32.partialorder %v4231_v35, 1.0 }
 0x38b   : > { %vm4237_vm7 = vmand %vm4232_vm10, %vm4233_vm12  ;;  %vm3773_vm12 = vcmp.eq.f32.partialorder %v7818_v3, 9.0 }
 0x38c   : > { %vm4238_vm0 = vmand %vm4232_vm10, %vm4234_vm11  ;;  %v4976_v23 = vsel %vm4237_vm7, 1.0, %v5568_v47  ;;  %vm3794_vm7 = vcmp.eq.f32.partialorder %v7096_v19, 10.0 }
 0x38d   : > { %v4977_v36 = vsel %vm4238_vm0, 1.0, %v5568_v47  ;;  %v8167_v24 = vadd.f32 %v4976_v23, %v8117_v9  ;;  %v3792_v23 = vsel %vm3791_vm5, %v8678_v59, 0.0  ;;  %vm8693_vm11 = vmmov %vm8692_vm15  ;;  %vm3797_vm0 = vcmp.eq.f32.partialorder %v7195_v41, 10.0 }
 0x38e   : > { %v8170_v16 = vadd.f32 %v4977_v36, %v8120_v61  ;;  %v3765_v61 = vsel %vm3764_vm2, %v6640_v45, 0.0  ;;  %v3793_v6 = vadd.f32 %v3792_v23, %v3790_v11  ;;  %vm3803_vm2 = vcmp.eq.f32.partialorder %v7379_v14, 10.0 }
 0x38f   : > { %v3766_v1 = vadd.f32 %v3765_v61, %v3763_v26  ;;  %v3777_v61 = vsel %vm3776_vm1, %v7874_v17, 0.0  ;;  %v3804_v11 = vsel %vm3803_vm2, %v6521_v25, 0.0  ;;  %vm3815_vm1 = vcmp.eq.f32.partialorder %v7546_v57, 10.0 }
 0x390   : > { %v4245_v5 = vsel %vm8692_vm15, %v8170_v16, -inf  ;;  %vm3800_vm15 = vcmp.eq.f32.partialorder %v7307_v56, 10.0 }
 0x391   : > { %v4246_v63 = vmax.f32 %v8167_v24, %v4245_v5  ;;  %v3769_v27 = vadd.f32 %v3768_v44, %v3766_v1  ;;  %v3774_v5 = vsel %vm3773_vm12, %v6772_v13, 0.0  ;;  %vm3812_vm12 = vcmp.eq.f32.partialorder %v7434_v29, 10.0 }
 0x393   : > { %v4247_v32 = vrot.slane %v4246_v63, 4  ;;  %v3772_v35 = vadd.f32 %v3771_v49, %v3769_v27  ;;  %v3801_v27 = vsel %vm3800_vm15, %v8681_v8, 0.0  ;;  %vm3839_vm15 = vcmp.eq.f32.partialorder %v7021_v21, 11.0 }
 0x395   : > { %v4248_v9 = vmax.f32 %v4246_v63, %v4247_v32  ;;  %v3775_v63 = vadd.f32 %v3774_v5, %v3772_v35  ;;  %v3795_v32 = vsel %vm3794_vm7, %v8679_v4, 0.0  ;;  %vm3833_vm7 = vcmp.eq.f32.partialorder %v6975_v37, 11.0 }
 0x396   : > { %v3796_v26 = vadd.f32 %v3795_v32, %v3793_v6 }
 0x397   : > { %v4249_v52 = vrot.slane %v4248_v9, 2  ;;  %v3778_v40 = vadd.f32 %v3777_v61, %v3775_v63 }
 0x399   : > { %v4250_v38 = vmax.f32 %v4248_v9, %v4249_v52  ;;  %v3798_v52 = vsel %vm3797_vm0, %v8680_v62, 0.0  ;;  %v3781_v44 = vadd.f32 %v3780_v15, %v3778_v40  ;;  %vm3836_vm0 = vcmp.eq.f32.partialorder %v6993_v33, 11.0 }
 0x39a   : > { %v3799_v1 = vadd.f32 %v3798_v52, %v3796_v26 }
 0x39b   : > { %v4251_v43 = vrot.slane %v4250_v38, 1  ;;  %vm4268_vm9 = vcmp.eq.f32.partialorder %v8669_v53, %v3781_v44  ;;  %vm4269_vm4 = vcmp.eq.f32.partialorder %v8671_v10, %v3781_v44  ;;  %v3837_v44 = vsel %vm3836_vm0, %v8673_v18, 0.0 }
 0x39c   : > { %v3802_v58 = vadd.f32 %v3801_v27, %v3799_v1  ;;  %v3816_v1 = vsel %vm3815_vm1, %v6643_v2, 0.0 }
 0x39d   : > { %v4252_v20 = vmax.f32 %v4250_v38, %v4251_v43 }
 0x39e   : > { %v3805_v49 = vadd.f32 %v3804_v11, %v3802_v58  ;;  %v3819_v58 = vsel %vm3818_vm14, %v6769_v0, 0.0  ;;  %vm3854_vm14 = vcmp.eq.f32.partialorder %v7381_v46, 11.0 }
 0x39f   : > { %vm4253_vm3 = vcmp.eq.f32.partialorder %v8167_v24, %v4252_v20  ;;  %vm4254_vm10 = vcmp.eq.f32.partialorder %v8170_v16, %v4252_v20 }
 0x3a0   : > { %v4978_v39 = vsel %vm4253_vm3, 1.0, %v5568_v47  ;;  %v4979_v34 = vsel %vm4254_vm10, 1.0, %v5568_v47  ;;  %vm3809_vm3 = vcmp.eq.f32.partialorder %v7404_v28, 10.0  ;;  %vm8694_vm10 = vmmov %vm8693_vm11 }
 0x3a1   : > { %v4259_v36 = vsel %vm8693_vm11, %v4979_v34, 0.0  ;;  %v3810_v63 = vsel %vm3809_vm3, %v6610_v55, 0.0  ;;  %vm3830_vm11 = vcmp.eq.f32.partialorder %v6965_v7, 11.0  ;;  %vm3827_vm3 = vcmp.eq.f32.partialorder %v7890_v22, 10.0 }
 0x3a2   : > { %v4260_v30 = vadd.f32 %v4978_v39, %v4259_v36  ;;  %v3807_v36 = vsel %vm3806_vm6, %v6547_v60, 0.0  ;;  %v3831_v26 = vsel %vm3830_vm11, %v8670_v42, 0.0  ;;  %vm3824_vm6 = vcmp.eq.f32.partialorder %v7866_v48, 10.0 }
 0x3a3   : > { %v3808_v6 = vadd.f32 %v3807_v36, %v3805_v49 }
 0x3a4   : > { %v4261_v12 = vrot.slane %v4260_v30, 4 }
 0x3a5   : > { %v3811_v32 = vadd.f32 %v3810_v63, %v3808_v6 }
 0x3a6   : > { %v4262_v9 = vadd.f32 %v4261_v12, %v4260_v30 }
 0x3a8   : > { %v4263_v54 = vrot.slane %v4262_v9, 2 }
 0x3aa   : > { %v4264_v38 = vadd.f32 %v4263_v54, %v4262_v9  ;;  %v3834_v9 = vsel %vm3833_vm7, %v8672_v31, 0.0 }
 0x3ab   : > { %v3835_v52 = vadd.f32 %v3834_v9, %v3831_v26 }
 0x3ac   : > { %v4265_v43 = vrot.slane %v4264_v38, 1 }
 0x3ad   : > { %v3838_v27 = vadd.f32 %v3837_v44, %v3835_v52  ;;  %v3828_v52 = vsel %vm3827_vm3, %v7895_v51, 0.0  ;;  %vm3866_vm3 = vcmp.eq.f32.partialorder %v7736_v50, 11.0 }
 0x3ae   : > { %v4266_v20 = vadd.f32 %v4265_v43, %v4264_v38 }
 0x3b0   : > { %vm4267_vm8 = vcmp.gt.f32.partialorder %v4266_v20, 1.0 }
 0x3b1   : > { %vm4272_vm13 = vmand %vm4267_vm8, %vm4268_vm9  ;;  %vm3821_vm9 = vcmp.eq.f32.partialorder %v7818_v3, 10.0 }
 0x3b2   : > { %vm4273_vm5 = vmand %vm4267_vm8, %vm4269_vm4  ;;  %v4980_v35 = vsel %vm4272_vm13, 1.0, %v5568_v47  ;;  %vm3842_vm13 = vcmp.eq.f32.partialorder %v7096_v19, 11.0 }
 0x3b3   : > { %v4981_v39 = vsel %vm4273_vm5, 1.0, %v5568_v47  ;;  %v8217_v34 = vadd.f32 %v4980_v35, %v8167_v24  ;;  %v3840_v35 = vsel %vm3839_vm15, %v8678_v59, 0.0  ;;  %vm8695_vm4 = vmmov %vm8694_vm10  ;;  %vm3845_vm5 = vcmp.eq.f32.partialorder %v7195_v41, 11.0 }
 0x3b4   : > { %v8220_v23 = vadd.f32 %v4981_v39, %v8170_v16  ;;  %v3813_v16 = vsel %vm3812_vm12, %v6640_v45, 0.0  ;;  %v3841_v36 = vadd.f32 %v3840_v35, %v3838_v27  ;;  %vm3851_vm12 = vcmp.eq.f32.partialorder %v7379_v14, 11.0 }
 0x3b5   : > { %v3814_v40 = vadd.f32 %v3813_v16, %v3811_v32  ;;  %v3825_v16 = vsel %vm3824_vm6, %v7874_v17, 0.0  ;;  %v3852_v27 = vsel %vm3851_vm12, %v6521_v25, 0.0  ;;  %vm3863_vm6 = vcmp.eq.f32.partialorder %v7546_v57, 11.0 }
 0x3b6   : > { %v4280_v30 = vsel %vm8694_vm10, %v8220_v23, -inf  ;;  %vm3848_vm10 = vcmp.eq.f32.partialorder %v7307_v56, 11.0 }
 0x3b7   : > { %v4281_v5 = vmax.f32 %v8217_v34, %v4280_v30  ;;  %v3817_v15 = vadd.f32 %v3816_v1, %v3814_v40  ;;  %v3822_v30 = vsel %vm3821_vm9, %v6772_v13, 0.0  ;;  %vm3860_vm9 = vcmp.eq.f32.partialorder %v7434_v29, 11.0 }
 0x3b9   : > { %v4282_v12 = vrot.slane %v4281_v5, 4  ;;  %v3820_v20 = vadd.f32 %v3819_v58, %v3817_v15  ;;  %v3849_v15 = vsel %vm3848_vm10, %v8681_v8, 0.0  ;;  %vm3887_vm10 = vcmp.eq.f32.partialorder %v7021_v21, 12.0 }
 0x3bb   : > { %v4283_v24 = vmax.f32 %v4281_v5, %v4282_v12  ;;  %v3823_v5 = vadd.f32 %v3822_v30, %v3820_v20  ;;  %v3843_v12 = vsel %vm3842_vm13, %v8679_v4, 0.0  ;;  %vm3881_vm13 = vcmp.eq.f32.partialorder %v6975_v37, 12.0 }
 0x3bc   : > { %v3844_v32 = vadd.f32 %v3843_v12, %v3841_v36 }
 0x3bd   : > { %v4284_v61 = vrot.slane %v4283_v24, 2  ;;  %v3826_v26 = vadd.f32 %v3825_v16, %v3823_v5 }
 0x3bf   : > { %v4285_v54 = vmax.f32 %v4283_v24, %v4284_v61  ;;  %v3846_v61 = vsel %vm3845_vm5, %v8680_v62, 0.0  ;;  %v3829_v1 = vadd.f32 %v3828_v52, %v3826_v26  ;;  %vm3884_vm5 = vcmp.eq.f32.partialorder %v6993_v33, 12.0 }
 0x3c0   : > { %v3847_v40 = vadd.f32 %v3846_v61, %v3844_v32 }
 0x3c1   : > { %v4286_v38 = vrot.slane %v4285_v54, 1  ;;  %vm4303_vm7 = vcmp.eq.f32.partialorder %v8669_v53, %v3829_v1  ;;  %vm4304_vm1 = vcmp.eq.f32.partialorder %v8671_v10, %v3829_v1  ;;  %v3885_v1 = vsel %vm3884_vm5, %v8673_v18, 0.0 }
 0x3c2   : > { %v3850_v44 = vadd.f32 %v3849_v15, %v3847_v40  ;;  %v3864_v40 = vsel %vm3863_vm6, %v6643_v2, 0.0 }
 0x3c3   : > { %v4287_v43 = vmax.f32 %v4285_v54, %v4286_v38 }
 0x3c4   : > { %v3853_v58 = vadd.f32 %v3852_v27, %v3850_v44  ;;  %v3867_v44 = vsel %vm3866_vm3, %v6769_v0, 0.0  ;;  %vm3902_vm3 = vcmp.eq.f32.partialorder %v7381_v46, 12.0 }
 0x3c5   : > { %vm4288_vm2 = vcmp.eq.f32.partialorder %v8217_v34, %v4287_v43  ;;  %vm4289_vm8 = vcmp.eq.f32.partialorder %v8220_v23, %v4287_v43 }
 0x3c6   : > { %v4982_v11 = vsel %vm4288_vm2, 1.0, %v5568_v47  ;;  %v4983_v49 = vsel %vm4289_vm8, 1.0, %v5568_v47  ;;  %vm3857_vm2 = vcmp.eq.f32.partialorder %v7404_v28, 11.0  ;;  %vm8696_vm8 = vmmov %vm8695_vm4 }
 0x3c7   : > { %v4294_v39 = vsel %vm8695_vm4, %v4983_v49, 0.0  ;;  %v3858_v5 = vsel %vm3857_vm2, %v6610_v55, 0.0  ;;  %vm3878_vm4 = vcmp.eq.f32.partialorder %v6965_v7, 12.0  ;;  %vm3875_vm2 = vcmp.eq.f32.partialorder %v7890_v22, 11.0 }
 0x3c8   : > { %v4295_v6 = vadd.f32 %v4982_v11, %v4294_v39  ;;  %v3855_v39 = vsel %vm3854_vm14, %v6547_v60, 0.0  ;;  %v3879_v32 = vsel %vm3878_vm4, %v8670_v42, 0.0  ;;  %vm3872_vm14 = vcmp.eq.f32.partialorder %v7866_v48, 11.0 }
 0x3c9   : > { %v3856_v36 = vadd.f32 %v3855_v39, %v3853_v58 }
 0x3ca   : > { %v4296_v63 = vrot.slane %v4295_v6, 4 }
 0x3cb   : > { %v3859_v12 = vadd.f32 %v3858_v5, %v3856_v36 }
 0x3cc   : > { %v4297_v24 = vadd.f32 %v4296_v63, %v4295_v6 }
 0x3ce   : > { %v4298_v9 = vrot.slane %v4297_v24, 2 }
 0x3d0   : > { %v4299_v54 = vadd.f32 %v4298_v9, %v4297_v24  ;;  %v3882_v24 = vsel %vm3881_vm13, %v8672_v31, 0.0 }
 0x3d1   : > { %v3883_v61 = vadd.f32 %v3882_v24, %v3879_v32 }
 0x3d2   : > { %v4300_v38 = vrot.slane %v4299_v54, 1 }
 0x3d3   : > { %v3886_v15 = vadd.f32 %v3885_v1, %v3883_v61  ;;  %v3876_v61 = vsel %vm3875_vm2, %v7895_v51, 0.0  ;;  %vm3914_vm2 = vcmp.eq.f32.partialorder %v7736_v50, 12.0 }
 0x3d4   : > { %v4301_v43 = vadd.f32 %v4300_v38, %v4299_v54 }
 0x3d6   : > { %vm4302_vm11 = vcmp.gt.f32.partialorder %v4301_v43, 1.0 }
 0x3d7   : > { %vm4307_vm0 = vmand %vm4302_vm11, %vm4303_vm7  ;;  %vm3869_vm7 = vcmp.eq.f32.partialorder %v7818_v3, 11.0 }
 0x3d8   : > { %vm4308_vm15 = vmand %vm4302_vm11, %vm4304_vm1  ;;  %v4984_v20 = vsel %vm4307_vm0, 1.0, %v5568_v47  ;;  %vm3890_vm0 = vcmp.eq.f32.partialorder %v7096_v19, 12.0 }
 0x3d9   : > { %v4985_v11 = vsel %vm4308_vm15, 1.0, %v5568_v47  ;;  %v8267_v49 = vadd.f32 %v4984_v20, %v8217_v34  ;;  %v3888_v20 = vsel %vm3887_vm10, %v8678_v59, 0.0  ;;  %vm8697_vm1 = vmmov %vm8696_vm8  ;;  %vm3893_vm15 = vcmp.eq.f32.partialorder %v7195_v41, 12.0 }
 0x3da   : > { %v8270_v35 = vadd.f32 %v4985_v11, %v8220_v23  ;;  %v3861_v23 = vsel %vm3860_vm9, %v6640_v45, 0.0  ;;  %v3889_v39 = vadd.f32 %v3888_v20, %v3886_v15  ;;  %vm3899_vm9 = vcmp.eq.f32.partialorder %v7379_v14, 12.0 }
 0x3db   : > { %v3862_v26 = vadd.f32 %v3861_v23, %v3859_v12  ;;  %v3873_v23 = vsel %vm3872_vm14, %v7874_v17, 0.0  ;;  %v3900_v15 = vsel %vm3899_vm9, %v6521_v25, 0.0  ;;  %vm3911_vm14 = vcmp.eq.f32.partialorder %v7546_v57, 12.0 }
 0x3dc   : > { %v4315_v6 = vsel %vm8696_vm8, %v8270_v35, -inf  ;;  %vm3896_vm8 = vcmp.eq.f32.partialorder %v7307_v56, 12.0 }
 0x3dd   : > { %v4316_v30 = vmax.f32 %v8267_v49, %v4315_v6  ;;  %v3865_v52 = vadd.f32 %v3864_v40, %v3862_v26  ;;  %v3870_v6 = vsel %vm3869_vm7, %v6772_v13, 0.0  ;;  %vm3908_vm7 = vcmp.eq.f32.partialorder %v7434_v29, 12.0 }
 0x3df   : > { %v4317_v63 = vrot.slane %v4316_v30, 4  ;;  %v3868_v43 = vadd.f32 %v3867_v44, %v3865_v52  ;;  %v3897_v52 = vsel %vm3896_vm8, %v8681_v8, 0.0  ;;  %vm3935_vm8 = vcmp.eq.f32.partialorder %v7021_v21, 13.0 }
 0x3e1   : > { %v4318_v34 = vmax.f32 %v4316_v30, %v4317_v63  ;;  %v3871_v30 = vadd.f32 %v3870_v6, %v3868_v43  ;;  %v3891_v63 = vsel %vm3890_vm0, %v8679_v4, 0.0  ;;  %vm3929_vm0 = vcmp.eq.f32.partialorder %v6975_v37, 13.0 }
 0x3e2   : > { %v3892_v12 = vadd.f32 %v3891_v63, %v3889_v39 }
 0x3e3   : > { %v4319_v16 = vrot.slane %v4318_v34, 2  ;;  %v3874_v32 = vadd.f32 %v3873_v23, %v3871_v30 }
 0x3e5   : > { %v4320_v9 = vmax.f32 %v4318_v34, %v4319_v16  ;;  %v3894_v16 = vsel %vm3893_vm15, %v8680_v62, 0.0  ;;  %v3877_v40 = vadd.f32 %v3876_v61, %v3874_v32  ;;  %vm3932_vm15 = vcmp.eq.f32.partialorder %v6993_v33, 13.0 }
 0x3e6   : > { %v3895_v26 = vadd.f32 %v3894_v16, %v3892_v12 }
 0x3e7   : > { %v4321_v54 = vrot.slane %v4320_v9, 1  ;;  %vm4338_vm13 = vcmp.eq.f32.partialorder %v8669_v53, %v3877_v40  ;;  %vm4339_vm6 = vcmp.eq.f32.partialorder %v8671_v10, %v3877_v40  ;;  %v3933_v40 = vsel %vm3932_vm15, %v8673_v18, 0.0 }
 0x3e8   : > { %v3898_v1 = vadd.f32 %v3897_v52, %v3895_v26  ;;  %v3912_v26 = vsel %vm3911_vm14, %v6643_v2, 0.0 }
 0x3e9   : > { %v4322_v38 = vmax.f32 %v4320_v9, %v4321_v54 }
 0x3ea   : > { %v3901_v44 = vadd.f32 %v3900_v15, %v3898_v1  ;;  %v3915_v1 = vsel %vm3914_vm2, %v6769_v0, 0.0  ;;  %vm3950_vm2 = vcmp.eq.f32.partialorder %v7381_v46, 13.0 }
 0x3eb   : > { %vm4323_vm12 = vcmp.eq.f32.partialorder %v8267_v49, %v4322_v38  ;;  %vm4324_vm11 = vcmp.eq.f32.partialorder %v8270_v35, %v4322_v38 }
 0x3ec   : > { %v4986_v27 = vsel %vm4323_vm12, 1.0, %v5568_v47  ;;  %v4987_v58 = vsel %vm4324_vm11, 1.0, %v5568_v47  ;;  %vm3905_vm12 = vcmp.eq.f32.partialorder %v7404_v28, 12.0  ;;  %vm8698_vm11 = vmmov %vm8697_vm1 }
 0x3ed   : > { %v4329_v11 = vsel %vm8697_vm1, %v4987_v58, 0.0  ;;  %v3906_v30 = vsel %vm3905_vm12, %v6610_v55, 0.0  ;;  %vm3926_vm1 = vcmp.eq.f32.partialorder %v6965_v7, 13.0  ;;  %vm3923_vm12 = vcmp.eq.f32.partialorder %v7890_v22, 12.0 }
 0x3ee   : > { %v4330_v36 = vadd.f32 %v4986_v27, %v4329_v11  ;;  %v3903_v11 = vsel %vm3902_vm3, %v6547_v60, 0.0  ;;  %v3927_v12 = vsel %vm3926_vm1, %v8670_v42, 0.0  ;;  %vm3920_vm3 = vcmp.eq.f32.partialorder %v7866_v48, 12.0 }
 0x3ef   : > { %v3904_v39 = vadd.f32 %v3903_v11, %v3901_v44 }
 0x3f0   : > { %v4331_v5 = vrot.slane %v4330_v36, 4 }
 0x3f1   : > { %v3907_v63 = vadd.f32 %v3906_v30, %v3904_v39 }
 0x3f2   : > { %v4332_v34 = vadd.f32 %v4331_v5, %v4330_v36 }
 0x3f4   : > { %v4333_v24 = vrot.slane %v4332_v34, 2 }
 0x3f6   : > { %v4334_v9 = vadd.f32 %v4333_v24, %v4332_v34  ;;  %v3930_v34 = vsel %vm3929_vm0, %v8672_v31, 0.0 }
 0x3f7   : > { %v3931_v16 = vadd.f32 %v3930_v34, %v3927_v12 }
 0x3f8   : > { %v4335_v54 = vrot.slane %v4334_v9, 1 }
 0x3f9   : > { %v3934_v52 = vadd.f32 %v3933_v40, %v3931_v16  ;;  %v3924_v16 = vsel %vm3923_vm12, %v7895_v51, 0.0  ;;  %vm3962_vm12 = vcmp.eq.f32.partialorder %v7736_v50, 13.0 }
 0x3fa   : > { %v4336_v38 = vadd.f32 %v4335_v54, %v4334_v9 }
 0x3fc   : > { %vm4337_vm4 = vcmp.gt.f32.partialorder %v4336_v38, 1.0 }
 0x3fd   : > { %vm4342_vm5 = vmand %vm4337_vm4, %vm4338_vm13  ;;  %vm3917_vm13 = vcmp.eq.f32.partialorder %v7818_v3, 12.0 }
 0x3fe   : > { %vm4343_vm10 = vmand %vm4337_vm4, %vm4339_vm6  ;;  %v4988_v43 = vsel %vm4342_vm5, 1.0, %v5568_v47  ;;  %vm3938_vm5 = vcmp.eq.f32.partialorder %v7096_v19, 13.0 }
 0x3ff   : > { %v4989_v27 = vsel %vm4343_vm10, 1.0, %v5568_v47  ;;  %v8317_v58 = vadd.f32 %v4988_v43, %v8267_v49  ;;  %v3936_v43 = vsel %vm3935_vm8, %v8678_v59, 0.0  ;;  %vm8699_vm6 = vmmov %vm8698_vm11  ;;  %vm3941_vm10 = vcmp.eq.f32.partialorder %v7195_v41, 13.0 }
 0x400   : > { %v8320_v20 = vadd.f32 %v4989_v27, %v8270_v35  ;;  %v3909_v35 = vsel %vm3908_vm7, %v6640_v45, 0.0  ;;  %v3937_v11 = vadd.f32 %v3936_v43, %v3934_v52  ;;  %vm3947_vm7 = vcmp.eq.f32.partialorder %v7379_v14, 13.0 }
 0x401   : > { %v3910_v32 = vadd.f32 %v3909_v35, %v3907_v63  ;;  %v3921_v35 = vsel %vm3920_vm3, %v7874_v17, 0.0  ;;  %v3948_v52 = vsel %vm3947_vm7, %v6521_v25, 0.0  ;;  %vm3959_vm3 = vcmp.eq.f32.partialorder %v7546_v57, 13.0 }
 0x402   : > { %v4350_v36 = vsel %vm8698_vm11, %v8320_v20, -inf  ;;  %vm3944_vm11 = vcmp.eq.f32.partialorder %v7307_v56, 13.0 }
 0x403   : > { %v4351_v6 = vmax.f32 %v8317_v58, %v4350_v36  ;;  %v3913_v61 = vadd.f32 %v3912_v26, %v3910_v32  ;;  %v3918_v36 = vsel %vm3917_vm13, %v6772_v13, 0.0  ;;  %vm3956_vm13 = vcmp.eq.f32.partialorder %v7434_v29, 13.0 }
 0x405   : > { %v4352_v5 = vrot.slane %v4351_v6, 4  ;;  %v3916_v38 = vadd.f32 %v3915_v1, %v3913_v61  ;;  %v3945_v61 = vsel %vm3944_vm11, %v8681_v8, 0.0  ;;  %vm3983_vm11 = vcmp.eq.f32.partialorder %v7021_v21, 14.0 }
 0x407   : > { %v4353_v49 = vmax.f32 %v4351_v6, %v4352_v5  ;;  %v3919_v6 = vadd.f32 %v3918_v36, %v3916_v38  ;;  %v3939_v5 = vsel %vm3938_vm5, %v8679_v4, 0.0  ;;  %vm3977_vm5 = vcmp.eq.f32.partialorder %v6975_v37, 14.0 }
 0x408   : > { %v3940_v63 = vadd.f32 %v3939_v5, %v3937_v11 }
 0x409   : > { %v4354_v23 = vrot.slane %v4353_v49, 2  ;;  %v3922_v12 = vadd.f32 %v3921_v35, %v3919_v6 }
 0x40b   : > { %v4355_v24 = vmax.f32 %v4353_v49, %v4354_v23  ;;  %v3942_v23 = vsel %vm3941_vm10, %v8680_v62, 0.0  ;;  %v3925_v26 = vadd.f32 %v3924_v16, %v3922_v12  ;;  %vm3980_vm10 = vcmp.eq.f32.partialorder %v6993_v33, 14.0 }
 0x40c   : > { %v3943_v32 = vadd.f32 %v3942_v23, %v3940_v63 }
 0x40d   : > { %v4356_v9 = vrot.slane %v4355_v24, 1  ;;  %vm4373_vm0 = vcmp.eq.f32.partialorder %v8669_v53, %v3925_v26  ;;  %vm4374_vm14 = vcmp.eq.f32.partialorder %v8671_v10, %v3925_v26  ;;  %v3981_v26 = vsel %vm3980_vm10, %v8673_v18, 0.0 }
 0x40e   : > { %v3946_v40 = vadd.f32 %v3945_v61, %v3943_v32  ;;  %v3960_v32 = vsel %vm3959_vm3, %v6643_v2, 0.0 }
 0x40f   : > { %v4357_v54 = vmax.f32 %v4355_v24, %v4356_v9 }
 0x410   : > { %v3949_v1 = vadd.f32 %v3948_v52, %v3946_v40  ;;  %v3963_v40 = vsel %vm3962_vm12, %v6769_v0, 0.0  ;;  %vm3998_vm12 = vcmp.eq.f32.partialorder %v7381_v46, 14.0 }
 0x411   : > { %vm4358_vm9 = vcmp.eq.f32.partialorder %v8317_v58, %v4357_v54  ;;  %vm4359_vm4 = vcmp.eq.f32.partialorder %v8320_v20, %v4357_v54 }
 0x412   : > { %v4990_v15 = vsel %vm4358_vm9, 1.0, %v5568_v47  ;;  %v4991_v44 = vsel %vm4359_vm4, 1.0, %v5568_v47  ;;  %vm3953_vm9 = vcmp.eq.f32.partialorder %v7404_v28, 13.0  ;;  %vm8700_vm4 = vmmov %vm8699_vm6 }
 0x413   : > { %v4364_v27 = vsel %vm8699_vm6, %v4991_v44, 0.0  ;;  %v3954_v6 = vsel %vm3953_vm9, %v6610_v55, 0.0  ;;  %vm3974_vm6 = vcmp.eq.f32.partialorder %v6965_v7, 14.0  ;;  %vm3971_vm9 = vcmp.eq.f32.partialorder %v7890_v22, 13.0 }
 0x414   : > { %v4365_v39 = vadd.f32 %v4990_v15, %v4364_v27  ;;  %v3951_v27 = vsel %vm3950_vm2, %v6547_v60, 0.0  ;;  %v3975_v63 = vsel %vm3974_vm6, %v8670_v42, 0.0  ;;  %vm3968_vm2 = vcmp.eq.f32.partialorder %v7866_v48, 13.0 }
 0x415   : > { %v3952_v11 = vadd.f32 %v3951_v27, %v3949_v1 }
 0x416   : > { %v4366_v30 = vrot.slane %v4365_v39, 4 }
 0x417   : > { %v3955_v5 = vadd.f32 %v3954_v6, %v3952_v11 }
 0x418   : > { %v4367_v49 = vadd.f32 %v4366_v30, %v4365_v39 }
 0x41a   : > { %v4368_v34 = vrot.slane %v4367_v49, 2 }
 0x41c   : > { %v4369_v24 = vadd.f32 %v4368_v34, %v4367_v49  ;;  %v3978_v49 = vsel %vm3977_vm5, %v8672_v31, 0.0 }
 0x41d   : > { %v3979_v23 = vadd.f32 %v3978_v49, %v3975_v63 }
 0x41e   : > { %v4370_v9 = vrot.slane %v4369_v24, 1 }
 0x41f   : > { %v3982_v61 = vadd.f32 %v3981_v26, %v3979_v23  ;;  %v3972_v23 = vsel %vm3971_vm9, %v7895_v51, 0.0  ;;  %vm4010_vm9 = vcmp.eq.f32.partialorder %v7736_v50, 14.0 }
 0x420   : > { %v4371_v54 = vadd.f32 %v4370_v9, %v4369_v24 }
 0x422   : > { %vm4372_vm1 = vcmp.gt.f32.partialorder %v4371_v54, 1.0 }
 0x423   : > { %vm4377_vm15 = vmand %vm4372_vm1, %vm4373_vm0  ;;  %vm3965_vm0 = vcmp.eq.f32.partialorder %v7818_v3, 13.0 }
 0x424   : > { %vm4378_vm8 = vmand %vm4372_vm1, %vm4374_vm14  ;;  %v4992_v38 = vsel %vm4377_vm15, 1.0, %v5568_v47  ;;  %vm3986_vm15 = vcmp.eq.f32.partialorder %v7096_v19, 14.0 }
 0x425   : > { %v4993_v15 = vsel %vm4378_vm8, 1.0, %v5568_v47  ;;  %v8367_v44 = vadd.f32 %v4992_v38, %v8317_v58  ;;  %v3984_v38 = vsel %vm3983_vm11, %v8678_v59, 0.0  ;;  %vm8701_vm14 = vmmov %vm8700_vm4  ;;  %vm3989_vm8 = vcmp.eq.f32.partialorder %v7195_v41, 14.0 }
 0x426   : > { %v8370_v43 = vadd.f32 %v4993_v15, %v8320_v20  ;;  %v3957_v20 = vsel %vm3956_vm13, %v6640_v45, 0.0  ;;  %v3985_v27 = vadd.f32 %v3984_v38, %v3982_v61  ;;  %vm3995_vm13 = vcmp.eq.f32.partialorder %v7379_v14, 14.0 }
 0x427   : > { %v3958_v12 = vadd.f32 %v3957_v20, %v3955_v5  ;;  %v3969_v20 = vsel %vm3968_vm2, %v7874_v17, 0.0  ;;  %v3996_v61 = vsel %vm3995_vm13, %v6521_v25, 0.0  ;;  %vm4007_vm2 = vcmp.eq.f32.partialorder %v7546_v57, 14.0 }
 0x428   : > { %v4385_v39 = vsel %vm8700_vm4, %v8370_v43, -inf  ;;  %vm3992_vm4 = vcmp.eq.f32.partialorder %v7307_v56, 14.0 }
 0x429   : > { %v4386_v36 = vmax.f32 %v8367_v44, %v4385_v39  ;;  %v3961_v16 = vadd.f32 %v3960_v32, %v3958_v12  ;;  %v3966_v39 = vsel %vm3965_vm0, %v6772_v13, 0.0  ;;  %vm4004_vm0 = vcmp.eq.f32.partialorder %v7434_v29, 14.0 }
 0x42b   : > { %v4387_v30 = vrot.slane %v4386_v36, 4  ;;  %v3964_v54 = vadd.f32 %v3963_v40, %v3961_v16  ;;  %v3993_v16 = vsel %vm3992_vm4, %v8681_v8, 0.0  ;;  %vm4031_vm4 = vcmp.eq.f32.partialorder %v7021_v21, 15.0 }
 0x42d   : > { %v4388_v58 = vmax.f32 %v4386_v36, %v4387_v30  ;;  %v3967_v36 = vadd.f32 %v3966_v39, %v3964_v54  ;;  %v3987_v30 = vsel %vm3986_vm15, %v8679_v4, 0.0  ;;  %vm4025_vm15 = vcmp.eq.f32.partialorder %v6975_v37, 15.0 }
 0x42e   : > { %v3988_v5 = vadd.f32 %v3987_v30, %v3985_v27 }
 0x42f   : > { %v4389_v35 = vrot.slane %v4388_v58, 2  ;;  %v3970_v63 = vadd.f32 %v3969_v20, %v3967_v36 }
 0x431   : > { %v4390_v34 = vmax.f32 %v4388_v58, %v4389_v35  ;;  %v3990_v35 = vsel %vm3989_vm8, %v8680_v62, 0.0  ;;  %v3973_v32 = vadd.f32 %v3972_v23, %v3970_v63  ;;  %vm4028_vm8 = vcmp.eq.f32.partialorder %v6993_v33, 15.0 }
 0x432   : > { %v3991_v12 = vadd.f32 %v3990_v35, %v3988_v5  ;;  %v4029_v37 = vsel %vm4028_vm8, %v8673_v18, 0.0 }
 0x433   : > { %v4391_v24 = vrot.slane %v4390_v34, 1  ;;  %vm4408_vm5 = vcmp.eq.f32.partialorder %v8669_v53, %v3973_v32  ;;  %vm4409_vm3 = vcmp.eq.f32.partialorder %v8671_v10, %v3973_v32 }
 0x434   : > { %v3994_v26 = vadd.f32 %v3993_v16, %v3991_v12  ;;  %v4008_v12 = vsel %vm4007_vm2, %v6643_v2, 0.0  ;;  %v4032_v16 = vsel %vm4031_vm4, %v8678_v59, 0.0 }
 0x435   : > { %v4392_v9 = vmax.f32 %v4390_v34, %v4391_v24 }
 0x436   : > { %v3997_v40 = vadd.f32 %v3996_v61, %v3994_v26 }
 0x437   : > { %vm4393_vm7 = vcmp.eq.f32.partialorder %v8367_v44, %v4392_v9  ;;  %vm4394_vm1 = vcmp.eq.f32.partialorder %v8370_v43, %v4392_v9 }
 0x438   : > { %v4994_v52 = vsel %vm4393_vm7, 1.0, %v5568_v47  ;;  %v4995_v1 = vsel %vm4394_vm1, 1.0, %v5568_v47  ;;  %vm4001_vm7 = vcmp.eq.f32.partialorder %v7404_v28, 14.0  ;;  %vm8702_vm1 = vmmov %vm8701_vm14 }
 0x439   : > { %v4399_v15 = vsel %vm8701_vm14, %v4995_v1, 0.0  ;;  %v4002_v36 = vsel %vm4001_vm7, %v6610_v55, 0.0  ;;  %vm4022_vm14 = vcmp.eq.f32.partialorder %v6965_v7, 15.0  ;;  %vm4019_vm7 = vcmp.eq.f32.partialorder %v7890_v22, 14.0 }
 0x43a   : > { %v4400_v11 = vadd.f32 %v4994_v52, %v4399_v15  ;;  %v3999_v15 = vsel %vm3998_vm12, %v6547_v60, 0.0  ;;  %v4023_v5 = vsel %vm4022_vm14, %v8670_v42, 0.0  ;;  %vm4016_vm12 = vcmp.eq.f32.partialorder %v7866_v48, 14.0 }
 0x43b   : > { %v4000_v27 = vadd.f32 %v3999_v15, %v3997_v40  ;;  %v4017_v59 = vsel %vm4016_vm12, %v7874_v17, 0.0 }
 0x43c   : > { %v4401_v6 = vrot.slane %v4400_v11, 4 }
 0x43d   : > { %v4003_v30 = vadd.f32 %v4002_v36, %v4000_v27 }
 0x43e   : > { %v4402_v58 = vadd.f32 %v4401_v6, %v4400_v11 }
 0x440   : > { %v4403_v49 = vrot.slane %v4402_v58, 2 }
 0x442   : > { %v4404_v34 = vadd.f32 %v4403_v49, %v4402_v58  ;;  %v4026_v58 = vsel %vm4025_vm15, %v8672_v31, 0.0  ;;  %v4011_v31 = vsel %vm4010_vm9, %v6769_v0, 0.0  ;;  %vm4046_vm9 = vcmp.eq.f32.partialorder %v7381_v46, 15.0 }
 0x443   : > { %v4027_v35 = vadd.f32 %v4026_v58, %v4023_v5 }
 0x444   : > { %v4405_v24 = vrot.slane %v4404_v34, 1 }
 0x445   : > { %v4030_v42 = vadd.f32 %v4029_v37, %v4027_v35 }
 0x446   : > { %v4406_v9 = vadd.f32 %v4405_v24, %v4404_v34 }
 0x447   : > { %v4033_v26 = vadd.f32 %v4032_v16, %v4030_v42 }
 0x448   : > { %vm4407_vm6 = vcmp.gt.f32.partialorder %v4406_v9, 1.0 }
 0x449   : > { %vm4412_vm10 = vmand %vm4407_vm6, %vm4408_vm5  ;;  %vm4013_vm5 = vcmp.eq.f32.partialorder %v7818_v3, 14.0 }
 0x44a   : > { %vm4413_vm11 = vmand %vm4407_vm6, %vm4409_vm3  ;;  %v4996_v54 = vsel %vm4412_vm10, 1.0, %v5568_v47  ;;  %vm4034_vm10 = vcmp.eq.f32.partialorder %v7096_v19, 15.0  ;;  %v4014_v9 = vsel %vm4013_vm5, %v6772_v13, 0.0  ;;  %vm4052_vm5 = vcmp.eq.f32.partialorder %v7434_v29, 15.0 }
 0x44b   : > { %v4997_v52 = vsel %vm4413_vm11, 1.0, %v5568_v47  ;;  %v8417_v1 = vadd.f32 %v4996_v54, %v8367_v44  ;;  %vm8703_vm3 = vmmov %vm8702_vm1  ;;  %v4035_v54 = vsel %vm4034_vm10, %v8679_v4, 0.0  ;;  %vm4037_vm11 = vcmp.eq.f32.partialorder %v7195_v41, 15.0 }
 0x44c   : > { %v8420_v38 = vadd.f32 %v4997_v52, %v8370_v43  ;;  %v4005_v43 = vsel %vm4004_vm0, %v6640_v45, 0.0  ;;  %v4036_v52 = vadd.f32 %v4035_v54, %v4033_v26  ;;  %v4038_v19 = vsel %vm4037_vm11, %v8680_v62, 0.0 }
 0x44d   : > { %v4006_v63 = vadd.f32 %v4005_v43, %v4003_v30  ;;  %vm4043_vm0 = vcmp.eq.f32.partialorder %v7379_v14, 15.0  ;;  %vm4058_vm10 = vcmp.eq.f32.partialorder %v7736_v50, 15.0 }
 0x44e   : > { %v4420_v11 = vsel %vm8702_vm1, %v8420_v38, -inf  ;;  %vm4040_vm1 = vcmp.eq.f32.partialorder %v7307_v56, 15.0  ;;  %v4044_v5 = vsel %vm4043_vm0, %v6521_v25, 0.0  ;;  %vm4064_vm0 = vcmp.eq.f32.partialorder %v7866_v48, 15.0 }
 0x44f   : > { %v4421_v39 = vmax.f32 %v8417_v1, %v4420_v11  ;;  %v4009_v34 = vadd.f32 %v4008_v12, %v4006_v63 }
 0x451   : > { %v4422_v6 = vrot.slane %v4421_v39, 4  ;;  %v4012_v32 = vadd.f32 %v4011_v31, %v4009_v34  ;;  %v4053_v34 = vsel %vm4052_vm5, %v6640_v45, 0.0 }
 0x453   : > { %v4423_v44 = vmax.f32 %v4421_v39, %v4422_v6  ;;  %v4015_v61 = vadd.f32 %v4014_v9, %v4012_v32  ;;  %v4039_v39 = vadd.f32 %v4038_v19, %v4036_v52  ;;  %v4020_v6 = vsel %vm4019_vm7, %v7895_v51, 0.0 }
 0x454   : > { %vm4061_vm7 = vcmp.eq.f32.partialorder %v7818_v3, 15.0 }
 0x455   : > { %v4424_v20 = vrot.slane %v4423_v44, 2  ;;  %v4018_v27 = vadd.f32 %v4017_v59, %v4015_v61 }
 0x457   : > { %v4425_v49 = vmax.f32 %v4423_v44, %v4424_v20  ;;  %v4021_v30 = vadd.f32 %v4020_v6, %v4018_v27  ;;  %v4041_v44 = vsel %vm4040_vm1, %v8681_v8, 0.0  ;;  %v4047_v20 = vsel %vm4046_vm9, %v6547_v60, 0.0 }
 0x458   : > { %v4042_v41 = vadd.f32 %v4041_v44, %v4039_v39 }
 0x459   : > { %v4426_v7 = vrot.slane %v4425_v49, 1  ;;  %vm4443_vm15 = vcmp.eq.f32.partialorder %v8669_v53, %v4021_v30  ;;  %vm4444_vm2 = vcmp.eq.f32.partialorder %v8671_v10, %v4021_v30 }
 0x45a   : > { %v4045_v56 = vadd.f32 %v4044_v5, %v4042_v41 }
 0x45b   : > { %v4427_v23 = vmax.f32 %v4425_v49, %v4426_v7 }
 0x45c   : > { %v4048_v63 = vadd.f32 %v4047_v20, %v4045_v56 }
 0x45d   : > { %vm4428_vm13 = vcmp.eq.f32.partialorder %v8417_v1, %v4427_v23  ;;  %vm4429_vm6 = vcmp.eq.f32.partialorder %v8420_v38, %v4427_v23 }
 0x45e   : > { %v4998_v33 = vsel %vm4428_vm13, 1.0, %v5568_v47  ;;  %v4999_v24 = vsel %vm4429_vm6, 1.0, %v5568_v47  ;;  %vm4049_vm13 = vcmp.eq.f32.partialorder %v7404_v28, 15.0  ;;  %vm8704_vm6 = vmmov %vm8703_vm3 }
 0x45f   : > { %v4434_v18 = vsel %vm8703_vm3, %v4999_v24, 0.0  ;;  %v4050_v35 = vsel %vm4049_vm13, %v6610_v55, 0.0  ;;  %vm4055_vm3 = vcmp.eq.f32.partialorder %v7546_v57, 15.0  ;;  %v4059_v55 = vsel %vm4058_vm10, %v6769_v0, 0.0  ;;  %vm8705_vm1 = vmmov %vm8704_vm6 }
 0x460   : > { %v4435_v21 = vadd.f32 %v4998_v33, %v4434_v18  ;;  %v4051_v12 = vadd.f32 %v4050_v35, %v4048_v63  ;;  %v4065_v0 = vsel %vm4064_vm0, %v7874_v17, 0.0 }
 0x462   : > { %v4436_v40 = vrot.slane %v4435_v21, 4  ;;  %v4054_v37 = vadd.f32 %v4053_v34, %v4051_v12 }
 0x464   : > { %v4437_v15 = vadd.f32 %v4436_v40, %v4435_v21 }
 0x466   : > { %v4438_v11 = vrot.slane %v4437_v15, 2 }
 0x468   : > { %v4439_v36 = vadd.f32 %v4438_v11, %v4437_v15 }
 0x46a   : > { %v4440_v4 = vrot.slane %v4439_v36, 1 }
 0x46c   : > { %v4441_v43 = vadd.f32 %v4440_v4, %v4439_v36 }
 0x46e   : > { %vm4442_vm14 = vcmp.gt.f32.partialorder %v4441_v43, 1.0 }
 0x46f   : > { %vm4447_vm8 = vmand %vm4442_vm14, %vm4443_vm15 }
 0x470   : > { %vm4448_vm4 = vmand %vm4442_vm14, %vm4444_vm2  ;;  %v5000_v62 = vsel %vm4447_vm8, 1.0, %v5568_v47  ;;  %vm4067_vm14 = vcmp.eq.f32.partialorder %v7890_v22, 15.0 }
 0x471   : > { %v5001_v8 = vsel %vm4448_vm4, 1.0, %v5568_v47  ;;  %v4453_v58 = vadd.f32 %v5000_v62, %v8417_v1  ;;  %v4068_v26 = vsel %vm4067_vm14, %v7895_v51, 0.0 }
 0x472   : > { %v4454_v14 = vadd.f32 %v5001_v8, %v8420_v38  ;;  %v4056_v38 = vsel %vm4055_vm3, %v6643_v2, 0.0  ;;  %v4062_v2 = vsel %vm4061_vm7, %v6772_v13, 0.0 }
 0x473   : > { %v4057_v23 = vadd.f32 %v4056_v38, %v4054_v37 }
 0x474   : > { %v4455_v25 = vsel %vm8704_vm6, %v4454_v14, -inf }
 0x475   : > { %v4456_v49 = vmax.f32 %v4453_v58, %v4455_v25  ;;  %v4060_v29 = vadd.f32 %v4059_v55, %v4057_v23 }
 0x477   : > { %v4457_v46 = vrot.slane %v4456_v49, 4  ;;  %v4063_v33 = vadd.f32 %v4062_v2, %v4060_v29 }
 0x479   : > { %v4458_v7 = vmax.f32 %v4456_v49, %v4457_v46  ;;  %v4066_v16 = vadd.f32 %v4065_v0, %v4063_v33 }
 0x47b   : > { %v4459_v1 = vrot.slane %v4458_v7, 2  ;;  %v4069_v21 = vadd.f32 %v4068_v26, %v4066_v16 }
 0x47d   : > { %v4460_v60 = vmax.f32 %v4458_v7, %v4459_v1  ;;  %vm4478_vm2 = vcmp.eq.f32.partialorder %v8669_v53, %v4069_v21  ;;  %vm4479_vm8 = vcmp.eq.f32.partialorder %v8671_v10, %v4069_v21 }
 0x47f   : > { %v4461_v28 = vrot.slane %v4460_v60, 1 }
 0x481   : > { %v4462_v42 = vmax.f32 %v4460_v60, %v4461_v28 }
 0x483   : > { %vm4463_vm12 = vcmp.eq.f32.partialorder %v4453_v58, %v4462_v42  ;;  %vm4464_vm11 = vcmp.eq.f32.partialorder %v4454_v14, %v4462_v42 }
 0x484   : > { %v5002_v45 = vsel %vm4463_vm12, 1.0, %v5568_v47  ;;  %v5003_v31 = vsel %vm4464_vm11, 1.0, %v5568_v47 }
 0x485   : > { %v4469_v57 = vsel %vm8705_vm1, %v5003_v31, 0.0 }
 0x486   : > { %v4470_v32 = vadd.f32 %v5002_v45, %v4469_v57 }
 0x488   : > { %v4471_v50 = vrot.slane %v4470_v32, 4 }
 0x48a   : > { %v4472_v24 = vadd.f32 %v4471_v50, %v4470_v32 }
 0x48c   : > { %v4473_v3 = vrot.slane %v4472_v24, 2 }
 0x48e   : > { %v4474_v18 = vadd.f32 %v4473_v3, %v4472_v24 }
 0x490   : > { %v4475_v9 = vrot.slane %v4474_v18, 1 }
 0x492   : > { %v4476_v61 = vadd.f32 %v4475_v9, %v4474_v18 }
 0x494   : > { %vm4477_vm15 = vcmp.gt.f32.partialorder %v4476_v61, 1.0 }
 0x495   : > { %vm4482_vm9 = vmand %vm4477_vm15, %vm4478_vm2 }
 0x496   : > { %vm4483_vm4 = vmand %vm4477_vm15, %vm4479_vm8  ;;  %v5004_v13 = vsel %vm4482_vm9, 1.0, %v5568_v47 }
 0x497   : > { %v5005_v48 = vsel %vm4483_vm4, 1.0, %v5568_v47  ;;  %v4488_v17 = vadd.f32 %v5004_v13, %v4453_v58 }
 0x498   : > { %v4489_v22 = vadd.f32 %v5005_v48, %v4454_v14 }
 0x499   : > { %v4490_v40 = vmul.f32 0.0625, %v4488_v17 }
 0x49a   : > { %v4491_v51 = vmul.f32 0.0625, %v4489_v22 }
 0x49b   : > { %v4492_v54 = vadd.f32 1e-08, %v4490_v40 }
 0x49c   : > { %v4493_v52 = vadd.f32 1e-08, %v4491_v51 }
 0x49d   : > { %5465 = vlog2.f32 %v4492_v54 }
 0x49e   : > { %5467 = vlog2.f32 %v4493_v52 }
 0x4aa   : > { %v5466_v53 = vpop.eup %5465 }
 0x4ab   : > { %v5468_v47 = vpop.eup %5467  ;;  %v4495_v10 = vmul.f32 0.6931472, %v5466_v53 }
 0x4ac   : > { %v4497_v15 = vmul.f32 0.6931472, %v5468_v47 }
 0x4ad   : > { %4498 = vst [vmem:[%s187_s28] sm:$0xff] %v4495_v10 }
 0x4ae   : > { %4499 = vst [vmem:[%s187_s28 + $0x8] sm:$0x3] %v4497_v15 }
 0x4af   : > { %5510 = shalt.err (!%p5507_p10)
}
 0x4b0   : > { %s5511_s6 = scalar_lea.hbm %s8496_s10, 256  ;;  %s5515_s19 = scalar_lea.hbm %s8544_s3, 512 }
 0x4b1   : > { %p5512_p1 = scmp.ne.s32.totalorder %s8496_s10, %s5511_s6  ;;  %p5516_p0 = scmp.lt.s32.totalorder %s8496_s10, %s8544_s3 }
 0x4b2   : > { %p5517_p2 = scmp.lt.s32.totalorder %s5515_s19, %s5511_s6 }
 0x4b3   : > { %p5513_p3 = pnand %p5512_p1, %p8706_p12 }
 0x4b4   : > { %p5518_p6 = por %p5517_p2, %p5516_p0 }
 0x4b5   : > { %p5514_p9 = pneg %p5513_p3 }
 0x4b7   : > { %p5519_p11 = pnand %p5518_p6, %p5514_p9 }
 0x4b9   : > { %5522 = shalt.err (!%p5519_p11)
}
 0x4ba   : > { %s5570_s26 = smov 128   ;;  %s5571_s27 = smov 256  }
 0x4bb   : > { %s5572_s28 = smov 8  }
 0x4bc   : > { %5284 = dma.vmem_to_hbm [thread:$0]  (%p8706_p12), %s8498_s29, 256, %s8496_s10, %s4501_s11, %s5570_s26, %s5571_s27, %s5572_s28  }
 0x4bd PF: > { %s4528_s30 = sand.u32 1, %s5549_s12   ;;  %p8707_p13 = scmp.ne.s32.totalorder %s8596_s25, 0 }
 0x4be   : > { %p8708_p4 = scmp.ge.s32.totalorder %s5561_s15, 2  ;;  %s4529_s5 = scalar_lea.sflag [#allocation4], %s4528_s30 }
 0x4c0   : > { %p5291_p5 = pnand %p8708_p4, %p8707_p13 }
 0x4c2   : > { %p5292_p7 = pneg %p5291_p5 }
 0x4c4   : > { %5544 = dma.done.wait (%p5292_p7), %s4529_s5, 256  }
 0x4c5   : > { %5546 = vsyncadd (%p5292_p7), %s4529_s5, 4294967040  ;;  %p16_p8 = scmp.ge.s32.totalorder %s5618_s18, 4   ;;  %s8709_s12 = smov %s5553_s13 }
 0x4c6   : > { %s8710_s13 = smov %s5557_s14  ;;  %s8711_s14 = smov %s5630_s21 }
 0x4c7   : > { %s8712_s15 = smov %s5618_s18  ;;  %18 = sbr.rel (!%p16_p8) target bundleno = 5 (0x5), region = 92 }
 0x4cc   :  { %4534 = vsyncpa [#allocation3], 1 }
 0x4cd   :  { %4536 = vsyncpa [#allocation3 + $0x1], 1 }
 0x4ce   :  { %4537 = vsyncpa [#allocation4], 1 }
 0x4cf   :  { %4539 = vsyncpa [#allocation4 + $0x1], 1 }

</bundles_post_ra>
